<compile_context>
chip_gen: v5e
topology: v5e:2x2
jax: 0.10.0
libtpu: 0.0.40
codegen_flags: <defaults>
</compile_context>

<pallas_src>
import functools
import math

import numpy as np

import jax
import jax.numpy as jnp
from jax.experimental import pallas as pl
from jax.experimental.pallas import tpu as pltpu

_HALF_LOG_2PI = 0.5 * math.log(2.0 * math.pi)
_LANES = 128
_VMEM_LIMIT = 32 * 1024 * 1024

_CONV_CFG = (("conv1", 8, 4), ("conv2", 4, 2), ("conv3", 3, 1))  # (name, k, stride)


# ---------------------------------------------------------------------------
# Fully fused kernel: conv1 -> conv2 -> conv3 -> fc -> heads, per batch block.
# All activations are kept in the "row" representation  [H, W*C]  (lane-dense).
# Fixed NatureCNN/screen=64 geometry:
#   s2d input [16, 256*C] -> conv1 [15, 480] -> conv2 [6, 384] -> conv3 [4, 256]
#   -> fc [1, F] -> packed head [1, 128].
# ---------------------------------------------------------------------------
def _agent_fused_kernel(xs_ref, w1_ref, b1_ref, w2_ref, b2_ref, w3_ref, b3_ref,
                        fcw_ref, fcb_ref, hw_ref, hb_ref, eps_ref, out_ref,
                        *, action_dim):
    f32 = jnp.float32
    bf16 = jnp.bfloat16
    a = action_dim
    nb = xs_ref.shape[0]

    # iota helpers (hoisted out of the per-image loop)
    sel_oh = jax.lax.broadcasted_iota(jnp.int32, (6, 15), 0)
    sel_hh = jax.lax.broadcasted_iota(jnp.int32, (6, 15), 1)
    col = jax.lax.broadcasted_iota(jnp.int32, (1, _LANES), 1)

    for i in range(nb):
        x = xs_ref[i]                                              # [16, 256*C] bf16

        # conv1: space-to-depth form, kernel 2 (rows) x banded cols, stride 1
        acc1 = jnp.dot(x[0:15, :], w1_ref[0], preferred_element_type=f32)
        acc1 = acc1 + jnp.dot(x[1:16, :], w1_ref[1], preferred_element_type=f32)
        a1 = jnp.maximum(acc1 + b1_ref[...], 0.0).astype(bf16)     # [15, 480]

        # conv2: kernel 4 rows, stride 2 -> pick rows {2*oh + kh} via selection matmul
        acc2 = jnp.zeros((6, 384), f32)
        for kh in range(4):
            sel = jnp.where(sel_hh == 2 * sel_oh + kh, 1.0, 0.0).astype(bf16)  # [6,15]
            rows = jnp.dot(sel, a1, preferred_element_type=f32).astype(bf16)   # [6,480]
            acc2 = acc2 + jnp.dot(rows, w2_ref[kh], preferred_element_type=f32)
        a2 = jnp.maximum(acc2 + b2_ref[...], 0.0).astype(bf16)     # [6, 384]

        # conv3: kernel 3 rows, stride 1
        acc3 = jnp.dot(a2[0:4, :], w3_ref[0], preferred_element_type=f32)
        acc3 = acc3 + jnp.dot(a2[1:5, :], w3_ref[1], preferred_element_type=f32)
        acc3 = acc3 + jnp.dot(a2[2:6, :], w3_ref[2], preferred_element_type=f32)
        a3 = jnp.maximum(acc3 + b3_ref[...], 0.0).astype(bf16)     # [4, 256]

        # fc: flatten in (h, w, c) row order == sum over the 4 output rows
        feat = jnp.dot(a3[0:1, :], fcw_ref[0], preferred_element_type=f32)
        for h in range(1, 4):
            feat = feat + jnp.dot(a3[h:h + 1, :], fcw_ref[h],
                                  preferred_element_type=f32)
        feat = jnp.maximum(feat + fcb_ref[...], 0.0)               # [1, F] f32

        # fused policy/value heads: one [F, 256] matmul
        #   slab0 = hd[:, :128]  lanes: [mean | logstd | logstd | value | 0...]
        #   slab1 = hd[:, 128:]  lanes: [logstd (aligned with mean) | 0...]
        hd = jnp.dot(feat.astype(bf16), hw_ref[...],
                     preferred_element_type=f32) + hb_ref[...]     # [1, 256]
        h0 = hd[:, :_LANES]
        h1 = hd[:, _LANES:]
        eps = eps_ref[i]                                           # [1, 128]: eps|eps|0

        std = jnp.exp(h1)
        action = h0 + std * eps                                    # valid lanes [0, A)
        logp = -0.5 * eps * eps - h0 - _HALF_LOG_2PI               # valid lanes [A, 2A)
        ent = (0.5 + _HALF_LOG_2PI) + h0                           # valid lanes [2A, 3A)

        packed = jnp.where(col < a, action,
                 jnp.where(col < 2 * a, logp,
                 jnp.where(col < 3 * a, ent,
                 jnp.where(col == 3 * a, h0, 0.0))))               # lane 3A = value
        out_ref[i] = packed


def _pick_batch_block(batch):
    """Largest block of images per grid step that divides B and keeps >=2 steps."""
    for nb in (8, 4, 2, 1):
        if batch % nb == 0 and batch // nb >= 2:
            return nb
    return batch


# ---------------------------------------------------------------------------
# One-time parameter packing (run OUTSIDE the jitted forward).
# ---------------------------------------------------------------------------
def _band_matrix(w_kh, in_w, out_w, stride):
    """w_kh: [kW, Cin, Cout] -> banded [in_w*Cin, out_w*Cout] row->row conv matrix."""
    kW, cin, cout = w_kh.shape
    m = np.zeros((in_w * cin, out_w * cout), np.float32)
    for ow in range(out_w):
        for kw in range(kW):
            iw = stride * ow + kw
            m[iw * cin:(iw + 1) * cin, ow * cout:(ow + 1) * cout] = w_kh[kw]
    return m


def prepare_params(params, action_dim):
    a = action_dim
    assert 3 * a + 1 <= _LANES, "action_dim too large for packed head layout"

    w1 = np.asarray(params["conv1_w"], np.float32)        # [8, 8, C, 32]
    w2 = np.asarray(params["conv2_w"], np.float32)        # [4, 4, 32, 64]
    w3 = np.asarray(params["conv3_w"], np.float32)        # [3, 3, 64, 64]
    c_in = w1.shape[2]

    # conv1 in space-to-depth(4) form: kernel 2x2, stride 1, Cin' = 16*C
    w1s = (w1.reshape(2, 4, 2, 4, c_in, 32)
             .transpose(0, 2, 1, 3, 4, 5)
             .reshape(2, 2, 16 * c_in, 32))
    w1b = np.stack([_band_matrix(w1s[bi], 16, 15, 1) for bi in range(2)])  # [2,256C,480]
    w2b = np.stack([_band_matrix(w2[kh], 15, 6, 2) for kh in range(4)])    # [4,480,384]
    w3b = np.stack([_band_matrix(w3[kh], 6, 4, 1) for kh in range(3)])     # [3,384,256]

    b1r = np.tile(np.asarray(params["conv1_b"], np.float32), 15)[None]     # [1, 480]
    b2r = np.tile(np.asarray(params["conv2_b"], np.float32), 6)[None]      # [1, 384]
    b3r = np.tile(np.asarray(params["conv3_b"], np.float32), 4)[None]      # [1, 256]

    fcw = np.asarray(params["fc_w"], np.float32)                           # [1024, F]
    feat_dim = fcw.shape[1]
    fcw4 = fcw.reshape(4, 256, feat_dim)
    fcb = np.asarray(params["fc_b"], np.float32)[None]                     # [1, F]

    hw = np.zeros((feat_dim, 2 * _LANES), np.float32)
    hb = np.zeros((2 * _LANES,), np.float32)
    mw = np.asarray(params["mean_w"], np.float32)
    mb = np.asarray(params["mean_b"], np.float32)
    lw = np.asarray(params["logstd_w"], np.float32)
    lb = np.asarray(params["logstd_b"], np.float32)
    vw = np.asarray(params["v_w"], np.float32)
    vb = np.asarray(params["v_b"], np.float32)
    hw[:, 0:a] = mw;               hb[0:a] = mb
    hw[:, a:2 * a] = lw;           hb[a:2 * a] = lb
    hw[:, 2 * a:3 * a] = lw;       hb[2 * a:3 * a] = lb
    hw[:, 3 * a:3 * a + 1] = vw;   hb[3 * a:3 * a + 1] = vb
    hw[:, _LANES:_LANES + a] = lw; hb[_LANES:_LANES + a] = lb

    bf = jnp.bfloat16
    return {
        "w1": jnp.asarray(w1b, bf), "b1": jnp.asarray(b1r, jnp.float32),
        "w2": jnp.asarray(w2b, bf), "b2": jnp.asarray(b2r, jnp.float32),
        "w3": jnp.asarray(w3b, bf), "b3": jnp.asarray(b3r, jnp.float32),
        "fcw": jnp.asarray(fcw4, bf), "fcb": jnp.asarray(fcb, jnp.float32),
        "headw": jnp.asarray(hw, bf), "headb": jnp.asarray(hb[None], jnp.float32),
    }


# ---------------------------------------------------------------------------
# Forward pass == PPOPixelContinuousAgent.forward(obs, action=None)
# (eps is the standard-normal noise that Normal.sample() would draw internally)
# ---------------------------------------------------------------------------
def ppo_pixel_continuous_forward(prep, obs_nchw, eps):
    B, C, H, W = obs_nchw.shape
    assert H == 64 and W == 64, "NatureCNN geometry derived for screen_size=64"
    A = eps.shape[1]
    assert 3 * A + 1 <= _LANES

    # bf16 BEFORE the layout transform; space-to-depth(4) + NCHW->row-rep in one pass
    x = obs_nchw.astype(jnp.bfloat16)
    x = x.reshape(B, C, 16, 4, 16, 4).transpose(0, 2, 4, 3, 5, 1)  # [B,R,Wb,ri,rj,c]
    xs = x.reshape(B, 16, 256 * C)

    # lane-dense eps carrier: [eps | eps | 0...]  (no scatters)
    eps_pad = jnp.concatenate(
        [eps, eps, jnp.zeros((B, _LANES - 2 * A), eps.dtype)], axis=-1)
    eps_pad = eps_pad.astype(jnp.float32)[:, None, :]              # [B, 1, 128]

    nb = _pick_batch_block(B)
    grid = (B // nb,)

    packed = pl.pallas_call(
        functools.partial(_agent_fused_kernel, action_dim=A),
        out_shape=jax.ShapeDtypeStruct((B, 1, _LANES), jnp.float32),
        grid=grid,
        in_specs=[
            pl.BlockSpec((nb, 16, 256 * C), lambda b: (b, 0, 0)),
            pl.BlockSpec(prep["w1"].shape, lambda b: (0, 0, 0)),
            pl.BlockSpec(prep["b1"].shape, lambda b: (0, 0)),
            pl.BlockSpec(prep["w2"].shape, lambda b: (0, 0, 0)),
            pl.BlockSpec(prep["b2"].shape, lambda b: (0, 0)),
            pl.BlockSpec(prep["w3"].shape, lambda b: (0, 0, 0)),
            pl.BlockSpec(prep["b3"].shape, lambda b: (0, 0)),
            pl.BlockSpec(prep["fcw"].shape, lambda b: (0, 0, 0)),
            pl.BlockSpec(prep["fcb"].shape, lambda b: (0, 0)),
            pl.BlockSpec(prep["headw"].shape, lambda b: (0, 0)),
            pl.BlockSpec(prep["headb"].shape, lambda b: (0, 0)),
            pl.BlockSpec((nb, 1, _LANES), lambda b: (b, 0, 0)),
        ],
        out_specs=pl.BlockSpec((nb, 1, _LANES), lambda b: (b, 0, 0)),
        compiler_params=pltpu.CompilerParams(
            dimension_semantics=("parallel",),
            vmem_limit_bytes=_VMEM_LIMIT),
    )(xs, prep["w1"], prep["b1"], prep["w2"], prep["b2"], prep["w3"],
      prep["b3"], prep["fcw"], prep["fcb"], prep["headw"], prep["headb"],
      eps_pad)

    out = packed[:, 0, :]
    action = out[:, 0:A]
    log_prob = out[:, A:2 * A]
    entropy = out[:, 2 * A:3 * A]
    value = out[:, 3 * A:3 * A + 1]
    return action, log_prob, entropy, value


# ---------------------------------------------------------------------------
# Parameters (deterministic init, PyTorch-like uniform(-1/sqrt(fan_in), ...)).
# Conv weights stored [kh, kw, cin, cout]; flatten order is NHWC (self-consistent).
# ---------------------------------------------------------------------------
def init_params(key, in_channels, features_dim, action_dim, screen_size=64):
    assert screen_size == 64, "NatureCNN flatten size derived for screen_size=64"

    def uni(k, shape, fan_in):
        bound = 1.0 / math.sqrt(fan_in)
        return jax.random.uniform(k, shape, jnp.float32, -bound, bound)

    keys = jax.random.split(key, 14)
    C = in_channels
    flat_dim = 64 * 4 * 4
    p = {}
    p["conv1_w"] = uni(keys[0], (8, 8, C, 32), 8 * 8 * C)
    p["conv1_b"] = uni(keys[1], (32,), 8 * 8 * C)
    p["conv2_w"] = uni(keys[2], (4, 4, 32, 64), 4 * 4 * 32)
    p["conv2_b"] = uni(keys[3], (64,), 4 * 4 * 32)
    p["conv3_w"] = uni(keys[4], (3, 3, 64, 64), 3 * 3 * 64)
    p["conv3_b"] = uni(keys[5], (64,), 3 * 3 * 64)
    p["fc_w"] = uni(keys[6], (flat_dim, features_dim), flat_dim)
    p["fc_b"] = uni(keys[7], (features_dim,), flat_dim)
    p["mean_w"] = uni(keys[8], (features_dim, action_dim), features_dim)
    p["mean_b"] = uni(keys[9], (action_dim,), features_dim)
    p["logstd_w"] = uni(keys[10], (features_dim, action_dim), features_dim)
    p["logstd_b"] = uni(keys[11], (action_dim,), features_dim)
    p["v_w"] = uni(keys[12], (features_dim, 1), features_dim)
    p["v_b"] = uni(keys[13], (1,), features_dim)
    return p


# ---------------------------------------------------------------------------
# Pure-JAX reference (same bf16 casting discipline) for correctness validation.
# ---------------------------------------------------------------------------
def _im2col(x, k, stride):
    B, H, W, C = x.shape
    oh = (H - k) // stride + 1
    ow = (W - k) // stride + 1
    cols = []
    for i in range(k):
        for j in range(k):
            cols.append(x[:, i:i + stride * oh:stride, j:j + stride * ow:stride, :])
    patches = jnp.stack(cols, axis=3)                      # [B, oh, ow, k*k, C]
    return patches.reshape(B * oh * ow, k * k * C), oh, ow


def reference_forward(params, obs_nchw, eps):
    x = jnp.transpose(obs_nchw, (0, 2, 3, 1)).astype(jnp.bfloat16)
    B = x.shape[0]
    for name, k, s in _CONV_CFG:
        cols, oh, ow = _im2col(x, k, s)
        w = params[name + "_w"]
        w2d = w.reshape(-1, w.shape[-1]).astype(jnp.bfloat16)
        y = jnp.dot(cols, w2d, preferred_element_type=jnp.float32) + params[name + "_b"]
        y = jnp.maximum(y, 0.0).astype(jnp.bfloat16)
        x = y.reshape(B, oh, ow, w.shape[-1])
    flat = x.reshape(B, -1)
    feat = jnp.maximum(
        jnp.dot(flat, params["fc_w"].astype(jnp.bfloat16),
                preferred_element_type=jnp.float32) + params["fc_b"], 0.0)
    featb = feat.astype(jnp.bfloat16)

    def head(wname, bname):
        return (jnp.dot(featb, params[wname].astype(jnp.bfloat16),
                        preferred_element_type=jnp.float32) + params[bname])

    mean = head("mean_w", "mean_b")
    log_std = head("logstd_w", "logstd_b")
    value = head("v_w", "v_b")
    std = jnp.exp(log_std)
    action = mean + std * eps
    log_prob = -0.5 * eps * eps - log_std - _HALF_LOG_2PI
    entropy = 0.5 + _HALF_LOG_2PI + log_std
    return action, log_prob, entropy, value


if __name__ == "__main__":
    batch, in_channels, screen_size = 2, 4, 64
    features_dim, action_dim = 128, 4

    root = jax.random.PRNGKey(0)
    k_obs, k_eps, k_par = jax.random.split(root, 3)

    obs = jax.random.normal(k_obs, (batch, in_channels, screen_size, screen_size),
                            jnp.float32)
    eps = jax.random.normal(k_eps, (batch, action_dim), jnp.float32)
    params = init_params(k_par, in_channels, features_dim, action_dim, screen_size)

    # one-time weight packing / bf16 casts, hoisted out of the jitted forward
    prep = prepare_params(params, action_dim)

    fwd = jax.jit(ppo_pixel_continuous_forward)
    action, log_prob, entropy, value = fwd(prep, obs, eps)
    jax.block_until_ready((action, log_prob, entropy, value))

    assert action.shape == (batch, action_dim)
    assert log_prob.shape == (batch, action_dim)
    assert entropy.shape == (batch, action_dim)
    assert value.shape == (batch, 1)

    ra, rl, re, rv = jax.jit(reference_forward)(params, obs, eps)
    jax.block_until_ready((ra, rl, re, rv))
    for got, ref in ((action, ra), (log_prob, rl), (entropy, re), (value, rv)):
        assert bool(jnp.all(jnp.isfinite(got)))
        assert bool(jnp.allclose(got, ref, rtol=1e-1, atol=1e-1)), (got, ref)

    print("KERNEL_OK")
</pallas_src>

<mosaic_0001>
module attributes {stable_mosaic.version = 11 : i64} {
  func.func @_agent_fused_kernel(%arg0: i32, %arg1: memref<1x16x1024xbf16, #tpu.memory_space<vmem>>, %arg2: memref<2x1024x480xbf16, #tpu.memory_space<vmem>>, %arg3: memref<1x480xf32, #tpu.memory_space<vmem>>, %arg4: memref<4x480x384xbf16, #tpu.memory_space<vmem>>, %arg5: memref<1x384xf32, #tpu.memory_space<vmem>>, %arg6: memref<3x384x256xbf16, #tpu.memory_space<vmem>>, %arg7: memref<1x256xf32, #tpu.memory_space<vmem>>, %arg8: memref<4x256x128xbf16, #tpu.memory_space<vmem>>, %arg9: memref<1x128xf32, #tpu.memory_space<vmem>>, %arg10: memref<128x256xbf16, #tpu.memory_space<vmem>>, %arg11: memref<1x256xf32, #tpu.memory_space<vmem>>, %arg12: memref<1x1x128xf32, #tpu.memory_space<vmem>>, %arg13: memref<1x1x128xf32, #tpu.memory_space<vmem>>) attributes {dimension_semantics = [#tpu.dimension_semantics<parallel>], iteration_bounds = array<i64: 2>, scalar_prefetch = 0 : i64, scratch_operands = 0 : i64, tpu.core_type = #tpu.core_type<tc>, window_params = [{transform_indices = @transform_0, window_bounds = array<i64: 1, 16, 1024>}, {pipeline_mode = #tpu.pipeline_mode<synchronous>, transform_indices = @transform_1, window_bounds = array<i64: 2, 1024, 480>}, {pipeline_mode = #tpu.pipeline_mode<synchronous>, transform_indices = @transform_2, window_bounds = array<i64: 1, 480>}, {pipeline_mode = #tpu.pipeline_mode<synchronous>, transform_indices = @transform_3, window_bounds = array<i64: 4, 480, 384>}, {pipeline_mode = #tpu.pipeline_mode<synchronous>, transform_indices = @transform_4, window_bounds = array<i64: 1, 384>}, {pipeline_mode = #tpu.pipeline_mode<synchronous>, transform_indices = @transform_5, window_bounds = array<i64: 3, 384, 256>}, {pipeline_mode = #tpu.pipeline_mode<synchronous>, transform_indices = @transform_6, window_bounds = array<i64: 1, 256>}, {pipeline_mode = #tpu.pipeline_mode<synchronous>, transform_indices = @transform_7, window_bounds = array<i64: 4, 256, 128>}, {pipeline_mode = #tpu.pipeline_mode<synchronous>, transform_indices = @transform_8, window_bounds = array<i64: 1, 128>}, {pipeline_mode = #tpu.pipeline_mode<synchronous>, transform_indices = @transform_9, window_bounds = array<i64: 128, 256>}, {pipeline_mode = #tpu.pipeline_mode<synchronous>, transform_indices = @transform_10, window_bounds = array<i64: 1, 256>}, {transform_indices = @transform_11, window_bounds = array<i64: 1, 1, 128>}, {transform_indices = @transform_12, window_bounds = array<i64: 1, 1, 128>}]} {
    %0 = tpu.iota {dimensions = array<i32: 0>} : vector<6x15xi32>
    %1 = tpu.iota {dimensions = array<i32: 1>} : vector<6x15xi32>
    %2 = tpu.iota {dimensions = array<i32: 1>} : vector<1x128xi32>
    %c0 = arith.constant 0 : index
    %c0_0 = arith.constant 0 : index
    %c0_1 = arith.constant 0 : index
    %3 = vector.load %arg1[%c0, %c0_0, %c0_1] : memref<1x16x1024xbf16, #tpu.memory_space<vmem>>, vector<1x16x1024xbf16>
    %4 = vector.shape_cast %3 : vector<1x16x1024xbf16> to vector<16x1024xbf16>
    %5 = vector.extract_strided_slice %4 {offsets = [0, 0], sizes = [15, 1024], strides = [1, 1]} : vector<16x1024xbf16> to vector<15x1024xbf16>
    %c0_2 = arith.constant 0 : index
    %c0_3 = arith.constant 0 : index
    %c0_4 = arith.constant 0 : index
    %6 = vector.load %arg2[%c0_2, %c0_3, %c0_4] : memref<2x1024x480xbf16, #tpu.memory_space<vmem>>, vector<1x1024x480xbf16>
    %7 = vector.shape_cast %6 : vector<1x1024x480xbf16> to vector<1024x480xbf16>
    %cst = arith.constant dense<0.000000e+00> : vector<15x480xf32>
    %8 = tpu.matmul %5, %7, %cst {dimension_numbers = #tpu.dot_dimension_numbers<[1], [0], [0], [1], [0, 0, 1, 1], [], []>} : vector<15x1024xbf16>, vector<1024x480xbf16>, vector<15x480xf32> -> vector<15x480xf32>
    %9 = vector.extract_strided_slice %4 {offsets = [1, 0], sizes = [15, 1024], strides = [1, 1]} : vector<16x1024xbf16> to vector<15x1024xbf16>
    %c1 = arith.constant 1 : index
    %c0_5 = arith.constant 0 : index
    %c0_6 = arith.constant 0 : index
    %10 = vector.load %arg2[%c1, %c0_5, %c0_6] : memref<2x1024x480xbf16, #tpu.memory_space<vmem>>, vector<1x1024x480xbf16>
    %11 = vector.shape_cast %10 : vector<1x1024x480xbf16> to vector<1024x480xbf16>
    %cst_7 = arith.constant dense<0.000000e+00> : vector<15x480xf32>
    %12 = tpu.matmul %9, %11, %cst_7 {dimension_numbers = #tpu.dot_dimension_numbers<[1], [0], [0], [1], [0, 0, 1, 1], [], []>} : vector<15x1024xbf16>, vector<1024x480xbf16>, vector<15x480xf32> -> vector<15x480xf32>
    %13 = arith.addf %8, %12 : vector<15x480xf32>
    %c0_8 = arith.constant 0 : index
    %c0_9 = arith.constant 0 : index
    %14 = vector.load %arg3[%c0_8, %c0_9] : memref<1x480xf32, #tpu.memory_space<vmem>>, vector<1x480xf32>
    %15 = vector.broadcast %14 : vector<1x480xf32> to vector<15x480xf32>
    %16 = arith.addf %13, %15 : vector<15x480xf32>
    %cst_10 = arith.constant 0.000000e+00 : f32
    %17 = vector.broadcast %cst_10 : f32 to vector<15x480xf32>
    %18 = arith.maximumf %16, %17 : vector<15x480xf32>
    %19 = arith.truncf %18 : vector<15x480xf32> to vector<15x480xbf16>
    %cst_11 = arith.constant 0.000000e+00 : f32
    %20 = vector.broadcast %cst_11 : f32 to vector<6x384xf32>
    %c2_i32 = arith.constant 2 : i32
    %21 = vector.broadcast %c2_i32 : i32 to vector<6x15xi32>
    %22 = arith.muli %21, %0 : vector<6x15xi32>
    %c0_i32 = arith.constant 0 : i32
    %23 = vector.broadcast %c0_i32 : i32 to vector<6x15xi32>
    %24 = arith.addi %22, %23 : vector<6x15xi32>
    %25 = arith.cmpi eq, %1, %24 : vector<6x15xi32>
    %cst_12 = arith.constant 1.000000e+00 : f32
    %cst_13 = arith.constant 0.000000e+00 : f32
    %26 = vector.broadcast %cst_12 : f32 to vector<6x15xf32>
    %27 = vector.broadcast %cst_13 : f32 to vector<6x15xf32>
    %28 = arith.select %25, %26, %27 : vector<6x15xi1>, vector<6x15xf32>
    %29 = arith.truncf %28 : vector<6x15xf32> to vector<6x15xbf16>
    %cst_14 = arith.constant dense<0.000000e+00> : vector<6x480xf32>
    %30 = tpu.matmul %29, %19, %cst_14 {dimension_numbers = #tpu.dot_dimension_numbers<[1], [0], [0], [1], [0, 0, 1, 1], [], []>} : vector<6x15xbf16>, vector<15x480xbf16>, vector<6x480xf32> -> vector<6x480xf32>
    %31 = arith.truncf %30 : vector<6x480xf32> to vector<6x480xbf16>
    %c0_15 = arith.constant 0 : index
    %c0_16 = arith.constant 0 : index
    %c0_17 = arith.constant 0 : index
    %32 = vector.load %arg4[%c0_15, %c0_16, %c0_17] : memref<4x480x384xbf16, #tpu.memory_space<vmem>>, vector<1x480x384xbf16>
    %33 = vector.shape_cast %32 : vector<1x480x384xbf16> to vector<480x384xbf16>
    %cst_18 = arith.constant dense<0.000000e+00> : vector<6x384xf32>
    %34 = tpu.matmul %31, %33, %cst_18 {dimension_numbers = #tpu.dot_dimension_numbers<[1], [0], [0], [1], [0, 0, 1, 1], [], []>} : vector<6x480xbf16>, vector<480x384xbf16>, vector<6x384xf32> -> vector<6x384xf32>
    %35 = arith.addf %20, %34 : vector<6x384xf32>
    %c2_i32_19 = arith.constant 2 : i32
    %36 = vector.broadcast %c2_i32_19 : i32 to vector<6x15xi32>
    %37 = arith.muli %36, %0 : vector<6x15xi32>
    %c1_i32 = arith.constant 1 : i32
    %38 = vector.broadcast %c1_i32 : i32 to vector<6x15xi32>
    %39 = arith.addi %37, %38 : vector<6x15xi32>
    %40 = arith.cmpi eq, %1, %39 : vector<6x15xi32>
    %cst_20 = arith.constant 1.000000e+00 : f32
    %cst_21 = arith.constant 0.000000e+00 : f32
    %41 = vector.broadcast %cst_20 : f32 to vector<6x15xf32>
    %42 = vector.broadcast %cst_21 : f32 to vector<6x15xf32>
    %43 = arith.select %40, %41, %42 : vector<6x15xi1>, vector<6x15xf32>
    %44 = arith.truncf %43 : vector<6x15xf32> to vector<6x15xbf16>
    %cst_22 = arith.constant dense<0.000000e+00> : vector<6x480xf32>
    %45 = tpu.matmul %44, %19, %cst_22 {dimension_numbers = #tpu.dot_dimension_numbers<[1], [0], [0], [1], [0, 0, 1, 1], [], []>} : vector<6x15xbf16>, vector<15x480xbf16>, vector<6x480xf32> -> vector<6x480xf32>
    %46 = arith.truncf %45 : vector<6x480xf32> to vector<6x480xbf16>
    %c1_23 = arith.constant 1 : index
    %c0_24 = arith.constant 0 : index
    %c0_25 = arith.constant 0 : index
    %47 = vector.load %arg4[%c1_23, %c0_24, %c0_25] : memref<4x480x384xbf16, #tpu.memory_space<vmem>>, vector<1x480x384xbf16>
    %48 = vector.shape_cast %47 : vector<1x480x384xbf16> to vector<480x384xbf16>
    %cst_26 = arith.constant dense<0.000000e+00> : vector<6x384xf32>
    %49 = tpu.matmul %46, %48, %cst_26 {dimension_numbers = #tpu.dot_dimension_numbers<[1], [0], [0], [1], [0, 0, 1, 1], [], []>} : vector<6x480xbf16>, vector<480x384xbf16>, vector<6x384xf32> -> vector<6x384xf32>
    %50 = arith.addf %35, %49 : vector<6x384xf32>
    %c2_i32_27 = arith.constant 2 : i32
    %51 = vector.broadcast %c2_i32_27 : i32 to vector<6x15xi32>
    %52 = arith.muli %51, %0 : vector<6x15xi32>
    %c2_i32_28 = arith.constant 2 : i32
    %53 = vector.broadcast %c2_i32_28 : i32 to vector<6x15xi32>
    %54 = arith.addi %52, %53 : vector<6x15xi32>
    %55 = arith.cmpi eq, %1, %54 : vector<6x15xi32>
    %cst_29 = arith.constant 1.000000e+00 : f32
    %cst_30 = arith.constant 0.000000e+00 : f32
    %56 = vector.broadcast %cst_29 : f32 to vector<6x15xf32>
    %57 = vector.broadcast %cst_30 : f32 to vector<6x15xf32>
    %58 = arith.select %55, %56, %57 : vector<6x15xi1>, vector<6x15xf32>
    %59 = arith.truncf %58 : vector<6x15xf32> to vector<6x15xbf16>
    %cst_31 = arith.constant dense<0.000000e+00> : vector<6x480xf32>
    %60 = tpu.matmul %59, %19, %cst_31 {dimension_numbers = #tpu.dot_dimension_numbers<[1], [0], [0], [1], [0, 0, 1, 1], [], []>} : vector<6x15xbf16>, vector<15x480xbf16>, vector<6x480xf32> -> vector<6x480xf32>
    %61 = arith.truncf %60 : vector<6x480xf32> to vector<6x480xbf16>
    %c2 = arith.constant 2 : index
    %c0_32 = arith.constant 0 : index
    %c0_33 = arith.constant 0 : index
    %62 = vector.load %arg4[%c2, %c0_32, %c0_33] : memref<4x480x384xbf16, #tpu.memory_space<vmem>>, vector<1x480x384xbf16>
    %63 = vector.shape_cast %62 : vector<1x480x384xbf16> to vector<480x384xbf16>
    %cst_34 = arith.constant dense<0.000000e+00> : vector<6x384xf32>
    %64 = tpu.matmul %61, %63, %cst_34 {dimension_numbers = #tpu.dot_dimension_numbers<[1], [0], [0], [1], [0, 0, 1, 1], [], []>} : vector<6x480xbf16>, vector<480x384xbf16>, vector<6x384xf32> -> vector<6x384xf32>
    %65 = arith.addf %50, %64 : vector<6x384xf32>
    %c2_i32_35 = arith.constant 2 : i32
    %66 = vector.broadcast %c2_i32_35 : i32 to vector<6x15xi32>
    %67 = arith.muli %66, %0 : vector<6x15xi32>
    %c3_i32 = arith.constant 3 : i32
    %68 = vector.broadcast %c3_i32 : i32 to vector<6x15xi32>
    %69 = arith.addi %67, %68 : vector<6x15xi32>
    %70 = arith.cmpi eq, %1, %69 : vector<6x15xi32>
    %cst_36 = arith.constant 1.000000e+00 : f32
    %cst_37 = arith.constant 0.000000e+00 : f32
    %71 = vector.broadcast %cst_36 : f32 to vector<6x15xf32>
    %72 = vector.broadcast %cst_37 : f32 to vector<6x15xf32>
    %73 = arith.select %70, %71, %72 : vector<6x15xi1>, vector<6x15xf32>
    %74 = arith.truncf %73 : vector<6x15xf32> to vector<6x15xbf16>
    %cst_38 = arith.constant dense<0.000000e+00> : vector<6x480xf32>
    %75 = tpu.matmul %74, %19, %cst_38 {dimension_numbers = #tpu.dot_dimension_numbers<[1], [0], [0], [1], [0, 0, 1, 1], [], []>} : vector<6x15xbf16>, vector<15x480xbf16>, vector<6x480xf32> -> vector<6x480xf32>
    %76 = arith.truncf %75 : vector<6x480xf32> to vector<6x480xbf16>
    %c3 = arith.constant 3 : index
    %c0_39 = arith.constant 0 : index
    %c0_40 = arith.constant 0 : index
    %77 = vector.load %arg4[%c3, %c0_39, %c0_40] : memref<4x480x384xbf16, #tpu.memory_space<vmem>>, vector<1x480x384xbf16>
    %78 = vector.shape_cast %77 : vector<1x480x384xbf16> to vector<480x384xbf16>
    %cst_41 = arith.constant dense<0.000000e+00> : vector<6x384xf32>
    %79 = tpu.matmul %76, %78, %cst_41 {dimension_numbers = #tpu.dot_dimension_numbers<[1], [0], [0], [1], [0, 0, 1, 1], [], []>} : vector<6x480xbf16>, vector<480x384xbf16>, vector<6x384xf32> -> vector<6x384xf32>
    %80 = arith.addf %65, %79 : vector<6x384xf32>
    %c0_42 = arith.constant 0 : index
    %c0_43 = arith.constant 0 : index
    %81 = vector.load %arg5[%c0_42, %c0_43] : memref<1x384xf32, #tpu.memory_space<vmem>>, vector<1x384xf32>
    %82 = vector.broadcast %81 : vector<1x384xf32> to vector<6x384xf32>
    %83 = arith.addf %80, %82 : vector<6x384xf32>
    %cst_44 = arith.constant 0.000000e+00 : f32
    %84 = vector.broadcast %cst_44 : f32 to vector<6x384xf32>
    %85 = arith.maximumf %83, %84 : vector<6x384xf32>
    %86 = arith.truncf %85 : vector<6x384xf32> to vector<6x384xbf16>
    %87 = vector.extract_strided_slice %86 {offsets = [0, 0], sizes = [4, 384], strides = [1, 1]} : vector<6x384xbf16> to vector<4x384xbf16>
    %c0_45 = arith.constant 0 : index
    %c0_46 = arith.constant 0 : index
    %c0_47 = arith.constant 0 : index
    %88 = vector.load %arg6[%c0_45, %c0_46, %c0_47] : memref<3x384x256xbf16, #tpu.memory_space<vmem>>, vector<1x384x256xbf16>
    %89 = vector.shape_cast %88 : vector<1x384x256xbf16> to vector<384x256xbf16>
    %cst_48 = arith.constant dense<0.000000e+00> : vector<4x256xf32>
    %90 = tpu.matmul %87, %89, %cst_48 {dimension_numbers = #tpu.dot_dimension_numbers<[1], [0], [0], [1], [0, 0, 1, 1], [], []>} : vector<4x384xbf16>, vector<384x256xbf16>, vector<4x256xf32> -> vector<4x256xf32>
    %91 = vector.extract_strided_slice %86 {offsets = [1, 0], sizes = [4, 384], strides = [1, 1]} : vector<6x384xbf16> to vector<4x384xbf16>
    %c1_49 = arith.constant 1 : index
    %c0_50 = arith.constant 0 : index
    %c0_51 = arith.constant 0 : index
    %92 = vector.load %arg6[%c1_49, %c0_50, %c0_51] : memref<3x384x256xbf16, #tpu.memory_space<vmem>>, vector<1x384x256xbf16>
    %93 = vector.shape_cast %92 : vector<1x384x256xbf16> to vector<384x256xbf16>
    %cst_52 = arith.constant dense<0.000000e+00> : vector<4x256xf32>
    %94 = tpu.matmul %91, %93, %cst_52 {dimension_numbers = #tpu.dot_dimension_numbers<[1], [0], [0], [1], [0, 0, 1, 1], [], []>} : vector<4x384xbf16>, vector<384x256xbf16>, vector<4x256xf32> -> vector<4x256xf32>
    %95 = arith.addf %90, %94 : vector<4x256xf32>
    %96 = vector.extract_strided_slice %86 {offsets = [2, 0], sizes = [4, 384], strides = [1, 1]} : vector<6x384xbf16> to vector<4x384xbf16>
    %c2_53 = arith.constant 2 : index
    %c0_54 = arith.constant 0 : index
    %c0_55 = arith.constant 0 : index
    %97 = vector.load %arg6[%c2_53, %c0_54, %c0_55] : memref<3x384x256xbf16, #tpu.memory_space<vmem>>, vector<1x384x256xbf16>
    %98 = vector.shape_cast %97 : vector<1x384x256xbf16> to vector<384x256xbf16>
    %cst_56 = arith.constant dense<0.000000e+00> : vector<4x256xf32>
    %99 = tpu.matmul %96, %98, %cst_56 {dimension_numbers = #tpu.dot_dimension_numbers<[1], [0], [0], [1], [0, 0, 1, 1], [], []>} : vector<4x384xbf16>, vector<384x256xbf16>, vector<4x256xf32> -> vector<4x256xf32>
    %100 = arith.addf %95, %99 : vector<4x256xf32>
    %c0_57 = arith.constant 0 : index
    %c0_58 = arith.constant 0 : index
    %101 = vector.load %arg7[%c0_57, %c0_58] : memref<1x256xf32, #tpu.memory_space<vmem>>, vector<1x256xf32>
    %102 = vector.broadcast %101 : vector<1x256xf32> to vector<4x256xf32>
    %103 = arith.addf %100, %102 : vector<4x256xf32>
    %cst_59 = arith.constant 0.000000e+00 : f32
    %104 = vector.broadcast %cst_59 : f32 to vector<4x256xf32>
    %105 = arith.maximumf %103, %104 : vector<4x256xf32>
    %106 = arith.truncf %105 : vector<4x256xf32> to vector<4x256xbf16>
    %107 = vector.extract_strided_slice %106 {offsets = [0, 0], sizes = [1, 256], strides = [1, 1]} : vector<4x256xbf16> to vector<1x256xbf16>
    %c0_60 = arith.constant 0 : index
    %c0_61 = arith.constant 0 : index
    %c0_62 = arith.constant 0 : index
    %108 = vector.load %arg8[%c0_60, %c0_61, %c0_62] : memref<4x256x128xbf16, #tpu.memory_space<vmem>>, vector<1x256x128xbf16>
    %109 = vector.shape_cast %108 : vector<1x256x128xbf16> to vector<256x128xbf16>
    %cst_63 = arith.constant dense<0.000000e+00> : vector<1x128xf32>
    %110 = tpu.matmul %107, %109, %cst_63 {dimension_numbers = #tpu.dot_dimension_numbers<[1], [0], [0], [1], [0, 0, 1, 1], [], []>} : vector<1x256xbf16>, vector<256x128xbf16>, vector<1x128xf32> -> vector<1x128xf32>
    %111 = vector.extract_strided_slice %106 {offsets = [1, 0], sizes = [1, 256], strides = [1, 1]} : vector<4x256xbf16> to vector<1x256xbf16>
    %c1_64 = arith.constant 1 : index
    %c0_65 = arith.constant 0 : index
    %c0_66 = arith.constant 0 : index
    %112 = vector.load %arg8[%c1_64, %c0_65, %c0_66] : memref<4x256x128xbf16, #tpu.memory_space<vmem>>, vector<1x256x128xbf16>
    %113 = vector.shape_cast %112 : vector<1x256x128xbf16> to vector<256x128xbf16>
    %cst_67 = arith.constant dense<0.000000e+00> : vector<1x128xf32>
    %114 = tpu.matmul %111, %113, %cst_67 {dimension_numbers = #tpu.dot_dimension_numbers<[1], [0], [0], [1], [0, 0, 1, 1], [], []>} : vector<1x256xbf16>, vector<256x128xbf16>, vector<1x128xf32> -> vector<1x128xf32>
    %115 = arith.addf %110, %114 : vector<1x128xf32>
    %116 = vector.extract_strided_slice %106 {offsets = [2, 0], sizes = [1, 256], strides = [1, 1]} : vector<4x256xbf16> to vector<1x256xbf16>
    %c2_68 = arith.constant 2 : index
    %c0_69 = arith.constant 0 : index
    %c0_70 = arith.constant 0 : index
    %117 = vector.load %arg8[%c2_68, %c0_69, %c0_70] : memref<4x256x128xbf16, #tpu.memory_space<vmem>>, vector<1x256x128xbf16>
    %118 = vector.shape_cast %117 : vector<1x256x128xbf16> to vector<256x128xbf16>
    %cst_71 = arith.constant dense<0.000000e+00> : vector<1x128xf32>
    %119 = tpu.matmul %116, %118, %cst_71 {dimension_numbers = #tpu.dot_dimension_numbers<[1], [0], [0], [1], [0, 0, 1, 1], [], []>} : vector<1x256xbf16>, vector<256x128xbf16>, vector<1x128xf32> -> vector<1x128xf32>
    %120 = arith.addf %115, %119 : vector<1x128xf32>
    %121 = vector.extract_strided_slice %106 {offsets = [3, 0], sizes = [1, 256], strides = [1, 1]} : vector<4x256xbf16> to vector<1x256xbf16>
    %c3_72 = arith.constant 3 : index
    %c0_73 = arith.constant 0 : index
    %c0_74 = arith.constant 0 : index
    %122 = vector.load %arg8[%c3_72, %c0_73, %c0_74] : memref<4x256x128xbf16, #tpu.memory_space<vmem>>, vector<1x256x128xbf16>
    %123 = vector.shape_cast %122 : vector<1x256x128xbf16> to vector<256x128xbf16>
    %cst_75 = arith.constant dense<0.000000e+00> : vector<1x128xf32>
    %124 = tpu.matmul %121, %123, %cst_75 {dimension_numbers = #tpu.dot_dimension_numbers<[1], [0], [0], [1], [0, 0, 1, 1], [], []>} : vector<1x256xbf16>, vector<256x128xbf16>, vector<1x128xf32> -> vector<1x128xf32>
    %125 = arith.addf %120, %124 : vector<1x128xf32>
    %c0_76 = arith.constant 0 : index
    %c0_77 = arith.constant 0 : index
    %126 = vector.load %arg9[%c0_76, %c0_77] : memref<1x128xf32, #tpu.memory_space<vmem>>, vector<1x128xf32>
    %127 = arith.addf %125, %126 : vector<1x128xf32>
    %cst_78 = arith.constant 0.000000e+00 : f32
    %128 = vector.broadcast %cst_78 : f32 to vector<1x128xf32>
    %129 = arith.maximumf %127, %128 : vector<1x128xf32>
    %130 = arith.truncf %129 : vector<1x128xf32> to vector<1x128xbf16>
    %c0_79 = arith.constant 0 : index
    %c0_80 = arith.constant 0 : index
    %131 = vector.load %arg10[%c0_79, %c0_80] : memref<128x256xbf16, #tpu.memory_space<vmem>>, vector<128x256xbf16>
    %cst_81 = arith.constant dense<0.000000e+00> : vector<1x256xf32>
    %132 = tpu.matmul %130, %131, %cst_81 {dimension_numbers = #tpu.dot_dimension_numbers<[1], [0], [0], [1], [0, 0, 1, 1], [], []>} : vector<1x128xbf16>, vector<128x256xbf16>, vector<1x256xf32> -> vector<1x256xf32>
    %c0_82 = arith.constant 0 : index
    %c0_83 = arith.constant 0 : index
    %133 = vector.load %arg11[%c0_82, %c0_83] : memref<1x256xf32, #tpu.memory_space<vmem>>, vector<1x256xf32>
    %134 = arith.addf %132, %133 : vector<1x256xf32>
    %135 = vector.extract_strided_slice %134 {offsets = [0, 0], sizes = [1, 128], strides = [1, 1]} : vector<1x256xf32> to vector<1x128xf32>
    %136 = vector.extract_strided_slice %134 {offsets = [0, 128], sizes = [1, 128], strides = [1, 1]} : vector<1x256xf32> to vector<1x128xf32>
    %c0_84 = arith.constant 0 : index
    %c0_85 = arith.constant 0 : index
    %c0_86 = arith.constant 0 : index
    %137 = vector.load %arg12[%c0_84, %c0_85, %c0_86] : memref<1x1x128xf32, #tpu.memory_space<vmem>>, vector<1x1x128xf32>
    %138 = vector.shape_cast %137 : vector<1x1x128xf32> to vector<1x128xf32>
    %139 = math.exp %136 : vector<1x128xf32>
    %140 = arith.mulf %139, %138 : vector<1x128xf32>
    %141 = arith.addf %135, %140 : vector<1x128xf32>
    %cst_87 = arith.constant -5.000000e-01 : f32
    %142 = vector.broadcast %cst_87 : f32 to vector<1x128xf32>
    %143 = arith.mulf %142, %138 : vector<1x128xf32>
    %144 = arith.mulf %143, %138 : vector<1x128xf32>
    %145 = arith.subf %144, %135 : vector<1x128xf32>
    %cst_88 = arith.constant 0.918938517 : f32
    %146 = vector.broadcast %cst_88 : f32 to vector<1x128xf32>
    %147 = arith.subf %145, %146 : vector<1x128xf32>
    %cst_89 = arith.constant 1.41893852 : f32
    %148 = vector.broadcast %cst_89 : f32 to vector<1x128xf32>
    %149 = arith.addf %148, %135 : vector<1x128xf32>
    %c4_i32 = arith.constant 4 : i32
    %150 = vector.broadcast %c4_i32 : i32 to vector<1x128xi32>
    %151 = arith.cmpi slt, %2, %150 : vector<1x128xi32>
    %c8_i32 = arith.constant 8 : i32
    %152 = vector.broadcast %c8_i32 : i32 to vector<1x128xi32>
    %153 = arith.cmpi slt, %2, %152 : vector<1x128xi32>
    %c12_i32 = arith.constant 12 : i32
    %154 = vector.broadcast %c12_i32 : i32 to vector<1x128xi32>
    %155 = arith.cmpi slt, %2, %154 : vector<1x128xi32>
    %c12_i32_90 = arith.constant 12 : i32
    %156 = vector.broadcast %c12_i32_90 : i32 to vector<1x128xi32>
    %157 = arith.cmpi eq, %2, %156 : vector<1x128xi32>
    %cst_91 = arith.constant 0.000000e+00 : f32
    %158 = vector.broadcast %cst_91 : f32 to vector<1x128xf32>
    %159 = arith.select %157, %135, %158 : vector<1x128xi1>, vector<1x128xf32>
    %160 = arith.select %155, %149, %159 : vector<1x128xi1>, vector<1x128xf32>
    %161 = arith.select %153, %147, %160 : vector<1x128xi1>, vector<1x128xf32>
    %162 = arith.select %151, %141, %161 : vector<1x128xi1>, vector<1x128xf32>
    %c0_92 = arith.constant 0 : index
    %c0_93 = arith.constant 0 : index
    %c0_94 = arith.constant 0 : index
    %163 = vector.load %arg13[%c0_92, %c0_93, %c0_94] : memref<1x1x128xf32, #tpu.memory_space<vmem>>, vector<1x1x128xf32>
    %164 = vector.shape_cast %163 : vector<1x1x128xf32> to vector<1x128xf32>
    %165 = vector.shape_cast %162 : vector<1x128xf32> to vector<1x1x128xf32>
    tpu.vector_store %arg13[%c0_92, %c0_93, %c0_94], %165 {strides = array<i32>} : memref<1x1x128xf32, #tpu.memory_space<vmem>>, vector<1x1x128xf32>,
    return
  }
  func.func @transform_0(%arg0: i32) -> (i32, i32, i32) {
    %c0_i32 = arith.constant 0 : i32
    %c0_i32_0 = arith.constant 0 : i32
    %c0_i32_1 = arith.constant 0 : i32
    return %arg0, %c0_i32, %c0_i32_0 : i32, i32, i32
  }
  func.func @transform_1(%arg0: i32) -> (i32, i32, i32) {
    %c0_i32 = arith.constant 0 : i32
    %c0_i32_0 = arith.constant 0 : i32
    %c0_i32_1 = arith.constant 0 : i32
    %c0_i32_2 = arith.constant 0 : i32
    return %c0_i32, %c0_i32_0, %c0_i32_1 : i32, i32, i32
  }
  func.func @transform_2(%arg0: i32) -> (i32, i32) {
    %c0_i32 = arith.constant 0 : i32
    %c0_i32_0 = arith.constant 0 : i32
    %c0_i32_1 = arith.constant 0 : i32
    return %c0_i32, %c0_i32_0 : i32, i32
  }
  func.func @transform_3(%arg0: i32) -> (i32, i32, i32) {
    %c0_i32 = arith.constant 0 : i32
    %c0_i32_0 = arith.constant 0 : i32
    %c0_i32_1 = arith.constant 0 : i32
    %c0_i32_2 = arith.constant 0 : i32
    return %c0_i32, %c0_i32_0, %c0_i32_1 : i32, i32, i32
  }
  func.func @transform_4(%arg0: i32) -> (i32, i32) {
    %c0_i32 = arith.constant 0 : i32
    %c0_i32_0 = arith.constant 0 : i32
    %c0_i32_1 = arith.constant 0 : i32
    return %c0_i32, %c0_i32_0 : i32, i32
  }
  func.func @transform_5(%arg0: i32) -> (i32, i32, i32) {
    %c0_i32 = arith.constant 0 : i32
    %c0_i32_0 = arith.constant 0 : i32
    %c0_i32_1 = arith.constant 0 : i32
    %c0_i32_2 = arith.constant 0 : i32
    return %c0_i32, %c0_i32_0, %c0_i32_1 : i32, i32, i32
  }
  func.func @transform_6(%arg0: i32) -> (i32, i32) {
    %c0_i32 = arith.constant 0 : i32
    %c0_i32_0 = arith.constant 0 : i32
    %c0_i32_1 = arith.constant 0 : i32
    return %c0_i32, %c0_i32_0 : i32, i32
  }
  func.func @transform_7(%arg0: i32) -> (i32, i32, i32) {
    %c0_i32 = arith.constant 0 : i32
    %c0_i32_0 = arith.constant 0 : i32
    %c0_i32_1 = arith.constant 0 : i32
    %c0_i32_2 = arith.constant 0 : i32
    return %c0_i32, %c0_i32_0, %c0_i32_1 : i32, i32, i32
  }
  func.func @transform_8(%arg0: i32) -> (i32, i32) {
    %c0_i32 = arith.constant 0 : i32
    %c0_i32_0 = arith.constant 0 : i32
    %c0_i32_1 = arith.constant 0 : i32
    return %c0_i32, %c0_i32_0 : i32, i32
  }
  func.func @transform_9(%arg0: i32) -> (i32, i32) {
    %c0_i32 = arith.constant 0 : i32
    %c0_i32_0 = arith.constant 0 : i32
    %c0_i32_1 = arith.constant 0 : i32
    return %c0_i32, %c0_i32_0 : i32, i32
  }
  func.func @transform_10(%arg0: i32) -> (i32, i32) {
    %c0_i32 = arith.constant 0 : i32
    %c0_i32_0 = arith.constant 0 : i32
    %c0_i32_1 = arith.constant 0 : i32
    return %c0_i32, %c0_i32_0 : i32, i32
  }
  func.func @transform_11(%arg0: i32) -> (i32, i32, i32) {
    %c0_i32 = arith.constant 0 : i32
    %c0_i32_0 = arith.constant 0 : i32
    %c0_i32_1 = arith.constant 0 : i32
    return %arg0, %c0_i32, %c0_i32_0 : i32, i32, i32
  }
  func.func @transform_12(%arg0: i32) -> (i32, i32, i32) {
    %c0_i32 = arith.constant 0 : i32
    %c0_i32_0 = arith.constant 0 : i32
    %c0_i32_1 = arith.constant 0 : i32
    return %arg0, %c0_i32, %c0_i32_0 : i32, i32, i32
  }
}

</mosaic_0001>

<bundles_post_ra>
// kernel: ppo_pixel_continuous_forward.1
= control target key start
LH: loop header
LB: loop body
LE: loop exit
PB: predicated region body
PF: predicated region fallthrough
CT: control target
= control target key end

     0   :  { %s16330_s21 = smov 0   ;;  %s23372_s0 = inlined_call_operand.vmem [shape: bf16[2,16,1024], index: 0, kind: input, shape index: {}]   ;;  %s23373_s1 = inlined_call_operand.vmem [shape: bf16[2,1024,480], index: 1, kind: input, shape index: {}]   ;;  %s23374_s2 = inlined_call_operand.vmem [shape: f32[1,480], index: 2, kind: input, shape index: {}]   ;;  %s23375_s3 = inlined_call_operand.vmem [shape: bf16[4,480,384], index: 3, kind: input, shape index: {}]   ;;  %s23376_s4 = inlined_call_operand.vmem [shape: f32[1,384], index: 4, kind: input, shape index: {}]   ;;  %s23377_s5 = inlined_call_operand.vmem [shape: bf16[3,384,256], index: 5, kind: input, shape index: {}]   ;;  %s23378_s6 = inlined_call_operand.vmem [shape: f32[1,256], index: 6, kind: input, shape index: {}]   ;;  %s23379_s7 = inlined_call_operand.vmem [shape: bf16[4,256,128], index: 7, kind: input, shape index: {}]   ;;  %s23380_s8 = inlined_call_operand.vmem [shape: f32[1,128], index: 8, kind: input, shape index: {}]   ;;  %s23381_s9 = inlined_call_operand.vmem [shape: bf16[128,256], index: 9, kind: input, shape index: {}]   ;;  %s23382_s10 = inlined_call_operand.vmem [shape: f32[1,256], index: 10, kind: input, shape index: {}]   ;;  %s23383_s11 = inlined_call_operand.vmem [shape: f32[2,1,128], index: 11, kind: input, shape index: {}]   ;;  %s23384_s12 = inlined_call_operand.vmem [shape: f32[2,1,128], index: 12, kind: output, shape index: {}]  }
   0x1 LB: > { %s9876_s22 = sadd.s32 4294967295, %s16261_s21   ;;  %p9880_p0 = scmp.ge.s32.totalorder %s16261_s21, 1  ;;  %s16261_s21 = sphi %s16330_s21, %s22_s21  }
   0x2   : > { %p370_p1 = scmp.lt.s32.totalorder %s16261_s21, 3 }
   0x4   : > { %p371_p2 = pnand %p9880_p0, %p370_p1 }
   0x6   : > { %374 = sbr.rel (%p371_p2) target bundleno = 2008 (0x7d8), region = 68 }
   0xb   : > { %v10285_v0 = vld [vmem:[%s23373_s1 + $0x8e0] sm:$0xf]  ;;  %v15433_v1 = vld [vmem:[%s23373_s1 + $0x8ec] sm:$0xf0]  ;;  %p413_p3 = scmp.lt.s32.totalorder %s9876_s22, 1  ;;  %vm4548_vm0 = vcmask 1046528  }
   0xc   : > { %v10413_v2 = vld [vmem:[%s23373_s1 + $0x9e0] sm:$0xf]  ;;  %v10286_v3 = vor.u32 %v15433_v1, %v10285_v0  ;;  %v15465_v4 = vld [vmem:[%s23373_s1 + $0x9ec] sm:$0xf0]  ;;  %vm4549_vm1 = vcmask 1047552   ;;  %vm4544_vm3 = vcmask 121856  }
   0xd   : > { %v10541_v5 = vld [vmem:[%s23373_s1 + $0xae0] sm:$0xf]  ;;  %v15497_v6 = vld [vmem:[%s23373_s1 + $0xaec] sm:$0xf0]  ;;  %v10414_v7 = vor.u32 %v15465_v4, %v10413_v2  ;;  %s23398_s22 = smov (!%p413_p3, %s9876_s22), 1  ;;  %vm5404_vm5 = vcmask 785408  }
   0xe   : > { %v10542_v8 = vor.u32 %v15497_v6, %v10541_v5  ;;  %v10669_v9 = vld [vmem:[%s23373_s1 + $0xbe0] sm:$0xf]  ;;  %v15529_v10 = vld [vmem:[%s23373_s1 + $0xbec] sm:$0xf0]  ;;  %2326 = vmatpush.bf16.msra.mxu0 %v10286_v3  ;;  %s15138_s29 = sshll.u32 %s23398_s22, 6  ;;  %s420_s25 = scalar_lea.vmem %s23383_s11, %s23398_s22 }
   0xf   : > { %v10269_v11 = vld [vmem:[%s23373_s1 + $0x8c0] sm:$0xf]  ;;  %v10670_v12 = vor.u32 %v15529_v10, %v10669_v9  ;;  %v15429_v13 = vld [vmem:[%s23373_s1 + $0x8cc] sm:$0xf0]  ;;  %2340 = vmatpush.bf16.msra.mxu1 %v10414_v7  ;;  %s16630_s20 = scalar_lea.vmem %s23372_s0, %s15138_s29  ;;  %s423_s30 = scalar_lea.vmem %s23384_s12, %s23398_s22 }
  0x10   : > { %v10397_v14 = vld [vmem:[%s23373_s1 + $0x9c0] sm:$0xf]  ;;  %v15461_v15 = vld [vmem:[%s23373_s1 + $0x9cc] sm:$0xf0]  ;;  %2354 = vmatpush.bf16.msra.mxu2 %v10542_v8  ;;  %v10270_v16 = vor.u32 %v15429_v13, %v10269_v11 }
  0x11   : > { %v10398_v17 = vor.u32 %v15461_v15, %v10397_v14  ;;  %v10525_v18 = vld [vmem:[%s23373_s1 + $0xac0] sm:$0xf]  ;;  %v15493_v19 = vld [vmem:[%s23373_s1 + $0xacc] sm:$0xf0]  ;;  %2368 = vmatpush.bf16.msra.mxu3 %v10670_v12 }
  0x12   : > { %v10653_v20 = vld [vmem:[%s23373_s1 + $0xbc0] sm:$0xf]  ;;  %v10526_v21 = vor.u32 %v15493_v19, %v10525_v18  ;;  %v15525_v22 = vld [vmem:[%s23373_s1 + $0xbcc] sm:$0xf0]  ;;  %2327 = vmatpush.bf16.msra.mxu0 %v10270_v16 }
  0x13   : > { %v10253_v23 = vld [vmem:[%s23373_s1 + $0x8a0] sm:$0xf]  ;;  %v15425_v24 = vld [vmem:[%s23373_s1 + $0x8ac] sm:$0xf0]  ;;  %v10654_v25 = vor.u32 %v15525_v22, %v10653_v20  ;;  %2341 = vmatpush.bf16.msra.mxu1 %v10398_v17 }
  0x14   : > { %v10381_v26 = vld [vmem:[%s23373_s1 + $0x9a0] sm:$0xf]  ;;  %v15457_v27 = vld [vmem:[%s23373_s1 + $0x9ac] sm:$0xf0]  ;;  %v10254_v29 = vor.u32 %v15425_v24, %v10253_v23  ;;  %2355 = vmatpush.bf16.msra.mxu2 %v10526_v21 }
  0x15   : > { %v10509_v28 = vld [vmem:[%s23373_s1 + $0xaa0] sm:$0xf]  ;;  %v15489_v30 = vld [vmem:[%s23373_s1 + $0xaac] sm:$0xf0]  ;;  %v10382_v33 = vor.u32 %v15457_v27, %v10381_v26  ;;  %2369 = vmatpush.bf16.msra.mxu3 %v10654_v25 }
  0x16   : > { %v10637_v31 = vld [vmem:[%s23373_s1 + $0xba0] sm:$0xf]  ;;  %v15521_v32 = vld [vmem:[%s23373_s1 + $0xbac] sm:$0xf0]  ;;  %v10510_v34 = vor.u32 %v15489_v30, %v10509_v28  ;;  %2328 = vmatpush.bf16.msra.mxu0 %v10254_v29 }
  0x17   : > { %v10237_v35 = vld [vmem:[%s23373_s1 + $0x880] sm:$0xf]  ;;  %v15421_v36 = vld [vmem:[%s23373_s1 + $0x88c] sm:$0xf0]  ;;  %v10638_v38 = vor.u32 %v15521_v32, %v10637_v31  ;;  %2342 = vmatpush.bf16.msra.mxu1 %v10382_v33 }
  0x18   : > { %v10365_v37 = vld [vmem:[%s23373_s1 + $0x980] sm:$0xf]  ;;  %v15453_v39 = vld [vmem:[%s23373_s1 + $0x98c] sm:$0xf0]  ;;  %v10238_v44 = vor.u32 %v15421_v36, %v10237_v35  ;;  %2356 = vmatpush.bf16.msra.mxu2 %v10510_v34 }
  0x19   : > { %v10493_v40 = vld [vmem:[%s23373_s1 + $0xa80] sm:$0xf]  ;;  %v15485_v41 = vld [vmem:[%s23373_s1 + $0xa8c] sm:$0xf0]  ;;  %v10366_v45 = vor.u32 %v15453_v39, %v10365_v37  ;;  %2370 = vmatpush.bf16.msra.mxu3 %v10638_v38 }
  0x1a   : > { %v10621_v42 = vld [vmem:[%s23373_s1 + $0xb80] sm:$0xf]  ;;  %v15517_v43 = vld [vmem:[%s23373_s1 + $0xb8c] sm:$0xf0]  ;;  %v10494_v46 = vor.u32 %v15485_v41, %v10493_v40  ;;  %2329 = vmatpush.bf16.msra.mxu0 %v10238_v44 }
  0x1b   : > { %v10221_v47 = vld [vmem:[%s23373_s1 + $0x860] sm:$0xf]  ;;  %v15417_v48 = vld [vmem:[%s23373_s1 + $0x86c] sm:$0xf0]  ;;  %v10622_v50 = vor.u32 %v15517_v43, %v10621_v42  ;;  %2343 = vmatpush.bf16.msra.mxu1 %v10366_v45 }
  0x1c   : > { %v10349_v49 = vld [vmem:[%s23373_s1 + $0x960] sm:$0xf]  ;;  %v15449_v51 = vld [vmem:[%s23373_s1 + $0x96c] sm:$0xf0]  ;;  %v10222_v56 = vor.u32 %v15417_v48, %v10221_v47  ;;  %2357 = vmatpush.bf16.msra.mxu2 %v10494_v46 }
  0x1d   : > { %v10477_v52 = vld [vmem:[%s23373_s1 + $0xa60] sm:$0xf]  ;;  %v15481_v53 = vld [vmem:[%s23373_s1 + $0xa6c] sm:$0xf0]  ;;  %v10350_v57 = vor.u32 %v15449_v51, %v10349_v49  ;;  %2371 = vmatpush.bf16.msra.mxu3 %v10622_v50 }
  0x1e   : > { %v10605_v54 = vld [vmem:[%s23373_s1 + $0xb60] sm:$0xf]  ;;  %v15513_v55 = vld [vmem:[%s23373_s1 + $0xb6c] sm:$0xf0]  ;;  %v10478_v58 = vor.u32 %v15481_v53, %v10477_v52  ;;  %2330 = vmatpush.bf16.msra.mxu0 %v10222_v56 }
  0x1f   : > { %v10205_v59 = vld [vmem:[%s23373_s1 + $0x840] sm:$0xf]  ;;  %v15413_v60 = vld [vmem:[%s23373_s1 + $0x84c] sm:$0xf0]  ;;  %v10606_v62 = vor.u32 %v15513_v55, %v10605_v54  ;;  %2344 = vmatpush.bf16.msra.mxu1 %v10350_v57 }
  0x20   : > { %v10333_v61 = vld [vmem:[%s23373_s1 + $0x940] sm:$0xf]  ;;  %v15445_v63 = vld [vmem:[%s23373_s1 + $0x94c] sm:$0xf0]  ;;  %v10206_v4 = vor.u32 %v15413_v60, %v10205_v59  ;;  %2358 = vmatpush.bf16.msra.mxu2 %v10478_v58 }
  0x21   : > { %v10461_v0 = vld [vmem:[%s23373_s1 + $0xa40] sm:$0xf]  ;;  %v15477_v1 = vld [vmem:[%s23373_s1 + $0xa4c] sm:$0xf0]  ;;  %v10334_v5 = vor.u32 %v15445_v63, %v10333_v61  ;;  %2372 = vmatpush.bf16.msra.mxu3 %v10606_v62 }
  0x22   : > { %v10589_v2 = vld [vmem:[%s23373_s1 + $0xb40] sm:$0xf]  ;;  %v15509_v3 = vld [vmem:[%s23373_s1 + $0xb4c] sm:$0xf0]  ;;  %v10462_v6 = vor.u32 %v15477_v1, %v10461_v0  ;;  %2331 = vmatpush.bf16.msra.mxu0 %v10206_v4 }
  0x23   : > { %v10189_v7 = vld [vmem:[%s23373_s1 + $0x820] sm:$0xf]  ;;  %v15409_v8 = vld [vmem:[%s23373_s1 + $0x82c] sm:$0xf0]  ;;  %v10590_v10 = vor.u32 %v15509_v3, %v10589_v2  ;;  %2345 = vmatpush.bf16.msra.mxu1 %v10334_v5 }
  0x24   : > { %v10317_v9 = vld [vmem:[%s23373_s1 + $0x920] sm:$0xf]  ;;  %v15441_v11 = vld [vmem:[%s23373_s1 + $0x92c] sm:$0xf0]  ;;  %v10190_v16 = vor.u32 %v15409_v8, %v10189_v7  ;;  %2359 = vmatpush.bf16.msra.mxu2 %v10462_v6 }
  0x25   : > { %v10445_v12 = vld [vmem:[%s23373_s1 + $0xa20] sm:$0xf]  ;;  %v15473_v13 = vld [vmem:[%s23373_s1 + $0xa2c] sm:$0xf0]  ;;  %v10318_v19 = vor.u32 %v15441_v11, %v10317_v9  ;;  %2373 = vmatpush.bf16.msra.mxu3 %v10590_v10 }
  0x26   : > { %v10573_v14 = vld [vmem:[%s23373_s1 + $0xb20] sm:$0xf]  ;;  %v15505_v15 = vld [vmem:[%s23373_s1 + $0xb2c] sm:$0xf0]  ;;  %v10446_v20 = vor.u32 %v15473_v13, %v10445_v12  ;;  %2332 = vmatpush.bf16.msra.mxu0 %v10190_v16  ;;  %v10149_v13 = vld [vmem:[%s16630_s20 + $0x8] sm:$0xf] }
  0x27   : > { %v10173_v17 = vld [vmem:[%s23373_s1 + $0x800] sm:$0xf]  ;;  %v15405_v18 = vld [vmem:[%s23373_s1 + $0x80c] sm:$0xf0]  ;;  %v10574_v24 = vor.u32 %v15505_v15, %v10573_v14  ;;  %2346 = vmatpush.bf16.msra.mxu1 %v10318_v19  ;;  %v15144_v16 = vld [vmem:[%s16630_s20 + $0x24] sm:$0xf0] }
  0x28   : > { %v10301_v21 = vld [vmem:[%s23373_s1 + $0x900] sm:$0xf]  ;;  %v15437_v22 = vld [vmem:[%s23373_s1 + $0x90c] sm:$0xf0]  ;;  %v10174_v31 = vor.u32 %v15405_v18, %v10173_v17  ;;  %2360 = vmatpush.bf16.msra.mxu2 %v10446_v20  ;;  %v15139_v17 = vld [vmem:[%s16630_s20 + $0x4] sm:$0xf] }
  0x29   : > { %v10429_v23 = vld [vmem:[%s23373_s1 + $0xa00] sm:$0xf]  ;;  %v15469_v25 = vld [vmem:[%s23373_s1 + $0xa0c] sm:$0xf0]  ;;  %v10302_v35 = vor.u32 %v15437_v22, %v10301_v21  ;;  %2374 = vmatpush.bf16.msra.mxu3 %v10574_v24  ;;  %v10143_v18 = vld [vmem:[%s16630_s20 + $0x20] sm:$0xf0]  ;;  %v16646_v21 = vor.u32 %v15144_v16, %v10149_v13 }
  0x2a   : > { %v10557_v26 = vld [vmem:[%s23373_s1 + $0xb00] sm:$0xf]  ;;  %v15501_v27 = vld [vmem:[%s23373_s1 + $0xb0c] sm:$0xf0]  ;;  %v10430_v36 = vor.u32 %v15469_v25, %v10429_v23  ;;  %2333 = vmatpush.bf16.msra.mxu0 %v10174_v31  ;;  %v16654_v24 = vor.u32 %v15139_v17, %v10143_v18  ;;  %v15140_v25 = vld [vmem:[%s16630_s20 + $0xc] sm:$0xf] }
  0x2b   : > { %v10797_v28 = vld [vmem:[%s23373_s1 + $0xce0] sm:$0xf]  ;;  %v15561_v29 = vld [vmem:[%s23373_s1 + $0xcec] sm:$0xf0]  ;;  %v10558_v39 = vor.u32 %v15501_v27, %v10557_v26  ;;  %2347 = vmatpush.bf16.msra.mxu1 %v10302_v35  ;;  %v10151_v26 = vld [vmem:[%s16630_s20 + $0x28] sm:$0xf0] }
  0x2c   : > { %v10925_v30 = vld [vmem:[%s23373_s1 + $0xde0] sm:$0xf]  ;;  %v15593_v32 = vld [vmem:[%s23373_s1 + $0xdec] sm:$0xf0]  ;;  %v10798_v40 = vor.u32 %v15561_v29, %v10797_v28  ;;  %2361 = vmatpush.bf16.msra.mxu2 %v10430_v36  ;;  %v990_v36 = vshrl.u32 %v16654_v24, 16 }
  0x2d   : > { %v11053_v33 = vld [vmem:[%s23373_s1 + $0xee0] sm:$0xf]  ;;  %v15625_v34 = vld [vmem:[%s23373_s1 + $0xeec] sm:$0xf0]  ;;  %v10926_v42 = vor.u32 %v15593_v32, %v10925_v30  ;;  %2375 = vmatpush.bf16.msra.mxu3 %v10558_v39  ;;  %v16666_v32 = vor.u32 %v15140_v25, %v10151_v26  ;;  %v15146_v25 = vld [vmem:[%s16630_s20 + $0x34] sm:$0xf0] }
  0x2e   : > { %v11181_v37 = vld [vmem:[%s23373_s1 + $0xfe0] sm:$0xf]  ;;  %v15657_v38 = vld [vmem:[%s23373_s1 + $0xfec] sm:$0xf0]  ;;  %v11054_v43 = vor.u32 %v15625_v34, %v11053_v33  ;;  %2382 = vmatpush.bf16.msrb.mxu0 %v10798_v40  ;;  %v997_v33 = vshrl.u32 %v16646_v21, 16  ;;  %v999_v34 = vshll.u32 %v16646_v21, 16 }
  0x2f   : > { %v10781_v41 = vld [vmem:[%s23373_s1 + $0xcc0] sm:$0xf]  ;;  %v15557_v44 = vld [vmem:[%s23373_s1 + $0xccc] sm:$0xf0]  ;;  %v11182_v47 = vor.u32 %v15657_v38, %v11181_v37  ;;  %2396 = vmatpush.bf16.msrb.mxu1 %v10926_v42  ;;  %v992_v37 = vshll.u32 %v16654_v24, 16  ;;  %v1006_v42 = vshll.u32 %v16666_v32, 16 }
  0x30   : > { %v10909_v45 = vld [vmem:[%s23373_s1 + $0xdc0] sm:$0xf]  ;;  %v15589_v46 = vld [vmem:[%s23373_s1 + $0xdcc] sm:$0xf0]  ;;  %v10782_v53 = vor.u32 %v15557_v44, %v10781_v41  ;;  %2410 = vmatpush.bf16.msrb.mxu2 %v11054_v43  ;;  %v1004_v41 = vshrl.u32 %v16666_v32, 16  ;;  %v1001_v43 = vrot.slane %v999_v34, 1 }
  0x31   : > { %v11037_v48 = vld [vmem:[%s23373_s1 + $0xec0] sm:$0xf]  ;;  %v15621_v49 = vld [vmem:[%s23373_s1 + $0xecc] sm:$0xf0]  ;;  %v10910_v57 = vor.u32 %v15589_v46, %v10909_v45  ;;  %2424 = vmatpush.bf16.msrb.mxu3 %v11182_v47  ;;  %v994_v46 = vrot.slane %v992_v37, 1 }
  0x32   : > { %v11165_v50 = vld [vmem:[%s23373_s1 + $0xfc0] sm:$0xf]  ;;  %v15653_v51 = vld [vmem:[%s23373_s1 + $0xfcc] sm:$0xf0]  ;;  %v11038_v58 = vor.u32 %v15621_v49, %v11037_v48  ;;  %2383 = vmatpush.bf16.msrb.mxu0 %v10782_v53  ;;  %v15141_v26 = vld [vmem:[%s16630_s20 + $0x14] sm:$0xf] }
  0x33   : > { %v10765_v52 = vld [vmem:[%s23373_s1 + $0xca0] sm:$0xf]  ;;  %v15553_v54 = vld [vmem:[%s23373_s1 + $0xcac] sm:$0xf0]  ;;  %v11166_v61 = vor.u32 %v15653_v51, %v11165_v50  ;;  %2397 = vmatpush.bf16.msrb.mxu1 %v10910_v57  ;;  %v1008_v50 = vrot.slane %v1006_v42, 1 }
  0x34   : > { %v10893_v55 = vld [vmem:[%s23373_s1 + $0xda0] sm:$0xf]  ;;  %v15585_v56 = vld [vmem:[%s23373_s1 + $0xdac] sm:$0xf0]  ;;  %v10766_v3 = vor.u32 %v15553_v54, %v10765_v52  ;;  %2411 = vmatpush.bf16.msrb.mxu2 %v11038_v58  ;;  %v16691_v52 = vor.u32 %v1001_v43, %v997_v33  ;;  %v16693_v54 = vor.u32 %v994_v46, %v990_v36  ;;  %v10167_v33 = vld [vmem:[%s16630_s20 + $0x38] sm:$0xf0] }
  0x35   : > { %v11021_v59 = vld [vmem:[%s23373_s1 + $0xea0] sm:$0xf]  ;;  %v15617_v60 = vld [vmem:[%s23373_s1 + $0xeac] sm:$0xf0]  ;;  %v10894_v7 = vor.u32 %v15585_v56, %v10893_v55  ;;  %2425 = vmatpush.bf16.msrb.mxu3 %v11166_v61  ;;  %v15431_v37 = vld [vmem:[%s23373_s1 + $0x8e4] sm:$0xf] }
  0x36   : > { %v11149_v62 = vld [vmem:[%s23373_s1 + $0xfa0] sm:$0xf]  ;;  %v15649_v63 = vld [vmem:[%s23373_s1 + $0xfac] sm:$0xf0]  ;;  %v11022_v8 = vor.u32 %v15617_v60, %v11021_v59  ;;  %2384 = vmatpush.bf16.msrb.mxu0 %v10766_v3  ;;  %v16705_v59 = vor.u32 %v1008_v50, %v1004_v41  ;;  %2362 = vmatmul.bf16.vlgmr.msra.gmra.mxu2 %v16691_v52  ;;  %v15463_v43 = vld [vmem:[%s23373_s1 + $0x9e4] sm:$0xf] }
  0x37   : > { %v10749_v0 = vld [vmem:[%s23373_s1 + $0xc80] sm:$0xf]  ;;  %v15549_v1 = vld [vmem:[%s23373_s1 + $0xc8c] sm:$0xf0]  ;;  %v11150_v14 = vor.u32 %v15649_v63, %v11149_v62  ;;  %2398 = vmatpush.bf16.msrb.mxu1 %v10894_v7  ;;  %v10543_v50 = vld [vmem:[%s23373_s1 + $0xaf0] sm:$0xf0] }
  0x38   : > { %v10877_v2 = vld [vmem:[%s23373_s1 + $0xd80] sm:$0xf]  ;;  %v15581_v4 = vld [vmem:[%s23373_s1 + $0xd8c] sm:$0xf0]  ;;  %v10750_v19 = vor.u32 %v15549_v1, %v10749_v0  ;;  %2412 = vmatpush.bf16.msrb.mxu2 %v11022_v8  ;;  %2348 = vmatmul.bf16.vlgmr.msra.gmra.mxu1 %v16693_v54 }
  0x39   : > { %v11005_v5 = vld [vmem:[%s23373_s1 + $0xe80] sm:$0xf]  ;;  %v15613_v6 = vld [vmem:[%s23373_s1 + $0xe8c] sm:$0xf0]  ;;  %v10878_v20 = vor.u32 %v15581_v4, %v10877_v2  ;;  %2426 = vmatpush.bf16.msrb.mxu3 %v11150_v14 }
  0x3a   : > { %v11133_v9 = vld [vmem:[%s23373_s1 + $0xf80] sm:$0xf]  ;;  %v15645_v10 = vld [vmem:[%s23373_s1 + $0xf8c] sm:$0xf0]  ;;  %v11006_v27 = vor.u32 %v15613_v6, %v11005_v5  ;;  %2385 = vmatpush.bf16.msrb.mxu0 %v10750_v19  ;;  %2376 = vmatmul.bf16.vlgmr.msra.gmra.mxu3 %v16705_v59 }
  0x3b   : > { %v10141_v11 = vld [vmem:[%s16630_s20] sm:$0xf]  ;;  %v15545_v23 = vld [vmem:[%s23373_s1 + $0xc6c] sm:$0xf0]  ;;  %v11134_v38 = vor.u32 %v15645_v10, %v11133_v9  ;;  %2399 = vmatpush.bf16.msrb.mxu1 %v10878_v20 }
  0x3c   : > { %v15143_v12 = vld [vmem:[%s16630_s20 + $0x1c] sm:$0xf0]  ;;  %v15577_v31 = vld [vmem:[%s23373_s1 + $0xd6c] sm:$0xf0]  ;;  %2413 = vmatpush.bf16.msrb.mxu2 %v11006_v27 }
  0x3d   : > { %v16641_v15 = vor.u32 %v15143_v12, %v10141_v11  ;;  %v10733_v22 = vld [vmem:[%s23373_s1 + $0xc60] sm:$0xf]  ;;  %v15609_v40 = vld [vmem:[%s23373_s1 + $0xe6c] sm:$0xf0]  ;;  %2427 = vmatpush.bf16.msrb.mxu3 %v11134_v38  ;;  %v10287_v38 = vld [vmem:[%s23373_s1 + $0x8f0] sm:$0xf0] }
  0x3e   : > { %v10861_v30 = vld [vmem:[%s23373_s1 + $0xd60] sm:$0xf]  ;;  %v15641_v45 = vld [vmem:[%s23373_s1 + $0xf6c] sm:$0xf0]  ;;  %v10734_v48 = vor.u32 %v15545_v23, %v10733_v22  ;;  %v10165_v23 = vld [vmem:[%s16630_s20 + $0x18] sm:$0xf] }
  0x3f   : > { %v983_v28 = vshrl.u32 %v16641_v15, 16  ;;  %v985_v29 = vshll.u32 %v16641_v15, 16  ;;  %v10989_v35 = vld [vmem:[%s23373_s1 + $0xe60] sm:$0xf]  ;;  %v10862_v49 = vor.u32 %v15577_v31, %v10861_v30  ;;  %v15541_v55 = vld [vmem:[%s23373_s1 + $0xc4c] sm:$0xf0] }
  0x40   : > { %v11117_v44 = vld [vmem:[%s23373_s1 + $0xf60] sm:$0xf]  ;;  %v10990_v53 = vor.u32 %v15609_v40, %v10989_v35  ;;  %v15573_v57 = vld [vmem:[%s23373_s1 + $0xd4c] sm:$0xf0]  ;;  %2386 = vmatpush.bf16.msrb.mxu0 %v10734_v48  ;;  %v10159_v30 = vld [vmem:[%s16630_s20 + $0x30] sm:$0xf0] }
  0x41   : > { %v987_v39 = vrot.slane %v985_v29, 1  ;;  %v10717_v51 = vld [vmem:[%s23373_s1 + $0xc40] sm:$0xf]  ;;  %v11118_v58 = vor.u32 %v15641_v45, %v11117_v44  ;;  %v15605_v61 = vld [vmem:[%s23373_s1 + $0xe4c] sm:$0xf0]  ;;  %2400 = vmatpush.bf16.msrb.mxu1 %v10862_v49  ;;  %v16777_v29 = vor.u32 %v15146_v25, %v10165_v23  ;;  %v16795_v40 = vor.u32 %v15141_v26, %v10159_v30 }
  0x42   : > { %v10845_v56 = vld [vmem:[%s23373_s1 + $0xd40] sm:$0xf]  ;;  %v15637_v63 = vld [vmem:[%s23373_s1 + $0xf4c] sm:$0xf0]  ;;  %v10718_v2 = vor.u32 %v15541_v55, %v10717_v51  ;;  %2414 = vmatpush.bf16.msrb.mxu2 %v10990_v53  ;;  %v15142_v31 = vld [vmem:[%s16630_s20 + $0x1c] sm:$0xf] }
  0x43   : > { %v16686_v47 = vor.u32 %v987_v39, %v983_v28  ;;  %v10973_v60 = vld [vmem:[%s23373_s1 + $0xe40] sm:$0xf]  ;;  %v15537_v1 = vld [vmem:[%s23373_s1 + $0xc2c] sm:$0xf0]  ;;  %v10846_v6 = vor.u32 %v15573_v57, %v10845_v56  ;;  %2428 = vmatpush.bf16.msrb.mxu3 %v11118_v58  ;;  %v16797_v41 = vor.u32 %v15142_v31, %v10167_v33  ;;  %v10415_v44 = vld [vmem:[%s23373_s1 + $0x9f0] sm:$0xf0] }
  0x44   : > { %v11101_v62 = vld [vmem:[%s23373_s1 + $0xf40] sm:$0xf]  ;;  %v15569_v4 = vld [vmem:[%s23373_s1 + $0xd2c] sm:$0xf0]  ;;  %v10974_v7 = vor.u32 %v15605_v61, %v10973_v60  ;;  %2387 = vmatpush.bf16.msrb.mxu0 %v10718_v2  ;;  %v1027_v45 = vshll.u32 %v16777_v29, 16  ;;  %v1020_v51 = vshll.u32 %v16795_v40, 16  ;;  %v10290_v2 = vor.u32 %v15431_v37, %v10287_v38 }
  0x45   : > { %2334 = vmatmul.bf16.vlgmr.msra.gmra.mxu0 %v16686_v47  ;;  %v10701_v0 = vld [vmem:[%s23373_s1 + $0xc20] sm:$0xf]  ;;  %v15601_v8 = vld [vmem:[%s23373_s1 + $0xe2c] sm:$0xf0]  ;;  %v11102_v11 = vor.u32 %v15637_v63, %v11101_v62  ;;  %2401 = vmatpush.bf16.msrb.mxu1 %v10846_v6  ;;  %v15495_v49 = vld [vmem:[%s23373_s1 + $0xae4] sm:$0xf] }
  0x46   : > { %v10829_v3 = vld [vmem:[%s23373_s1 + $0xd20] sm:$0xf]  ;;  %v15633_v10 = vld [vmem:[%s23373_s1 + $0xf2c] sm:$0xf0]  ;;  %v10702_v27 = vor.u32 %v15537_v1, %v10701_v0  ;;  %2415 = vmatpush.bf16.msrb.mxu2 %v10974_v7  ;;  %v15527_v55 = vld [vmem:[%s23373_s1 + $0xbe4] sm:$0xf]  ;;  %v10546_v6 = vor.u32 %v15495_v49, %v10543_v50 }
  0x47   : > { %v10957_v5 = vld [vmem:[%s23373_s1 + $0xe20] sm:$0xf]  ;;  %v15533_v13 = vld [vmem:[%s23373_s1 + $0xc0c] sm:$0xf0]  ;;  %v10830_v28 = vor.u32 %v15569_v4, %v10829_v3  ;;  %2429 = vmatpush.bf16.msrb.mxu3 %v11102_v11  ;;  %v1034_v58 = vshll.u32 %v16797_v41, 16  ;;  %v1025_v61 = vshrl.u32 %v16777_v29, 16 }
  0x48   : > { %v11085_v9 = vld [vmem:[%s23373_s1 + $0xf20] sm:$0xf]  ;;  %v16760_v16 = vld [vmem:[%s23373_s1 + $0xd0c] sm:$0xf0]  ;;  %v10958_v34 = vor.u32 %v15601_v8, %v10957_v5  ;;  %2388 = vmatpush.bf16.msrb.mxu0 %v10702_v27  ;;  %v10671_v60 = vld [vmem:[%s23373_s1 + $0xbf0] sm:$0xf0]  ;;  %v10418_v5 = vor.u32 %v15463_v43, %v10415_v44 }
  0x49   : > { %v10685_v12 = vld [vmem:[%s23373_s1 + $0xc00] sm:$0xf]  ;;  %v10157_v17 = vld [vmem:[%s16630_s20 + $0x10] sm:$0xf]  ;;  %v11086_v42 = vor.u32 %v15633_v10, %v11085_v9  ;;  %2402 = vmatpush.bf16.msrb.mxu1 %v10830_v28  ;;  %v1029_v62 = vrot.slane %v1027_v45, 1  ;;  %v1018_v63 = vshrl.u32 %v16795_v40, 16  ;;  %v10674_v10 = vor.u32 %v15527_v55, %v10671_v60 }
  0x4a   : > { %v16755_v14 = vld [vmem:[%s23373_s1 + $0xd00] sm:$0xf]  ;;  %v15145_v18 = vld [vmem:[%s16630_s20 + $0x2c] sm:$0xf0]  ;;  %v10686_v46 = vor.u32 %v15533_v13, %v10685_v12  ;;  %2416 = vmatpush.bf16.msrb.mxu2 %v10958_v34  ;;  %v1022_v0 = vrot.slane %v1020_v51, 1  ;;  %v1032_v3 = vshrl.u32 %v16797_v41, 16 }
  0x4b   : > { %v16767_v19 = vld [vmem:[%s23373_s1 + $0xe00] sm:$0xf]  ;;  %v15597_v20 = vld [vmem:[%s23373_s1 + $0xe0c] sm:$0xf0]  ;;  %v16772_v22 = vor.u32 %v15145_v18, %v10157_v17  ;;  %v10814_v48 = vor.u32 %v16760_v16, %v16755_v14  ;;  %2430 = vmatpush.bf16.msrb.mxu3 %v11086_v42  ;;  %v1036_v4 = vrot.slane %v1034_v58, 1  ;;  %v16847_v16 = vor.u32 %v1029_v62, %v1025_v61 }
  0x4c   : > { %v11069_v35 = vld [vmem:[%s23373_s1 + $0xf00] sm:$0xf]  ;;  %v15629_v36 = vld [vmem:[%s23373_s1 + $0xf0c] sm:$0xf0]  ;;  %v10942_v53 = vor.u32 %v15597_v20, %v16767_v19  ;;  %v15427_v7 = vld [vmem:[%s23373_s1 + $0x8c4] sm:$0xf]  ;;  %2389 = vmatpush.bf16.msrb.mxu0 %v10686_v46  ;;  %v16849_v17 = vor.u32 %v1022_v0, %v1018_v63 }
  0x4d   : > { %v1013_v39 = vshll.u32 %v16772_v22, 16  ;;  %v1011_v56 = vshrl.u32 %v16772_v22, 16  ;;  %v11070_v1 = vor.u32 %v15629_v36, %v11069_v35  ;;  %v10271_v8 = vld [vmem:[%s23373_s1 + $0x8d0] sm:$0xf0]  ;;  %v15459_v9 = vld [vmem:[%s23373_s1 + $0x9c4] sm:$0xf]  ;;  %2403 = vmatpush.bf16.msrb.mxu1 %v10814_v48  ;;  %v16857_v20 = vor.u32 %v1036_v4, %v1032_v3 }
  0x4e   : > { %v10399_v12 = vld [vmem:[%s23373_s1 + $0x9d0] sm:$0xf0]  ;;  %v15491_v13 = vld [vmem:[%s23373_s1 + $0xac4] sm:$0xf]  ;;  %2417 = vmatpush.bf16.msrb.mxu2 %v10942_v53  ;;  %v10274_v23 = vor.u32 %v15427_v7, %v10271_v8 }
  0x4f   : > { %v1015_v57 = vrot.slane %v1013_v39, 1  ;;  %v10527_v14 = vld [vmem:[%s23373_s1 + $0xad0] sm:$0xf0]  ;;  %v15523_v18 = vld [vmem:[%s23373_s1 + $0xbc4] sm:$0xf]  ;;  %2431 = vmatpush.bf16.msrb.mxu3 %v11070_v1  ;;  %v10402_v25 = vor.u32 %v15459_v9, %v10399_v12 }
  0x50   : > { %v10655_v19 = vld [vmem:[%s23373_s1 + $0xbd0] sm:$0xf0]  ;;  %2438 = vmatpush.bf16.msra.mxu0 %v10290_v2  ;;  %v10530_v26 = vor.u32 %v15491_v13, %v10527_v14  ;;  %v15423_v27 = vld [vmem:[%s23373_s1 + $0x8a4] sm:$0xf]  ;;  %2404 = vmatmul.bf16.vlgmr.msrb.gmra.mxu1 %v16849_v17 }
  0x51   : > { %v16836_v11 = vor.u32 %v1015_v57, %v1011_v56  ;;  %2452 = vmatpush.bf16.msra.mxu1 %v10418_v5  ;;  %v10255_v28 = vld [vmem:[%s23373_s1 + $0x8b0] sm:$0xf0]  ;;  %v15455_v30 = vld [vmem:[%s23373_s1 + $0x9a4] sm:$0xf]  ;;  %v10658_v31 = vor.u32 %v15523_v18, %v10655_v19  ;;  %2418 = vmatmul.bf16.vlgmr.msrb.gmra.mxu2 %v16847_v16 }
  0x52   : > { %2466 = vmatpush.bf16.msra.mxu2 %v10546_v6  ;;  %v10383_v33 = vld [vmem:[%s23373_s1 + $0x9b0] sm:$0xf0]  ;;  %v15487_v34 = vld [vmem:[%s23373_s1 + $0xaa4] sm:$0xf]  ;;  %2432 = vmatmul.bf16.vlgmr.msrb.gmra.mxu3 %v16857_v20  ;;  %v10258_v38 = vor.u32 %v15423_v27, %v10255_v28 }
  0x53   : > { %2480 = vmatpush.bf16.msra.mxu3 %v10674_v10  ;;  %v10511_v35 = vld [vmem:[%s23373_s1 + $0xab0] sm:$0xf0]  ;;  %v15519_v36 = vld [vmem:[%s23373_s1 + $0xba4] sm:$0xf]  ;;  %v10386_v39 = vor.u32 %v15455_v30, %v10383_v33 }
  0x54   : > { %v10639_v37 = vld [vmem:[%s23373_s1 + $0xbb0] sm:$0xf0]  ;;  %2439 = vmatpush.bf16.msra.mxu0 %v10274_v23  ;;  %v10514_v42 = vor.u32 %v15487_v34, %v10511_v35  ;;  %v15419_v43 = vld [vmem:[%s23373_s1 + $0x884] sm:$0xf] }
  0x55   : > { %2390 = vmatmul.bf16.vlgmr.msrb.gmra.mxu0 %v16836_v11  ;;  %2453 = vmatpush.bf16.msra.mxu1 %v10402_v25  ;;  %v10239_v44 = vld [vmem:[%s23373_s1 + $0x890] sm:$0xf0]  ;;  %v15451_v45 = vld [vmem:[%s23373_s1 + $0x984] sm:$0xf]  ;;  %v10642_v46 = vor.u32 %v15519_v36, %v10639_v37 }
  0x56   : > { %2467 = vmatpush.bf16.msra.mxu2 %v10530_v26  ;;  %v10367_v48 = vld [vmem:[%s23373_s1 + $0x990] sm:$0xf0]  ;;  %v15483_v49 = vld [vmem:[%s23373_s1 + $0xa84] sm:$0xf]  ;;  %v10242_v55 = vor.u32 %v15419_v43, %v10239_v44 }
  0x57   : > { %2481 = vmatpush.bf16.msra.mxu3 %v10658_v31  ;;  %v10495_v50 = vld [vmem:[%s23373_s1 + $0xa90] sm:$0xf0]  ;;  %v15515_v51 = vld [vmem:[%s23373_s1 + $0xb84] sm:$0xf]  ;;  %v10370_v56 = vor.u32 %v15451_v45, %v10367_v48 }
  0x58   : > { %v10623_v53 = vld [vmem:[%s23373_s1 + $0xb90] sm:$0xf0]  ;;  %2440 = vmatpush.bf16.msra.mxu0 %v10258_v38  ;;  %v10498_v57 = vor.u32 %v15483_v49, %v10495_v50  ;;  %v15415_v58 = vld [vmem:[%s23373_s1 + $0x864] sm:$0xf] }
  0x59   : > { %2454 = vmatpush.bf16.msra.mxu1 %v10386_v39  ;;  %v10223_v60 = vld [vmem:[%s23373_s1 + $0x870] sm:$0xf0]  ;;  %v15447_v61 = vld [vmem:[%s23373_s1 + $0x964] sm:$0xf]  ;;  %v10626_v62 = vor.u32 %v15515_v51, %v10623_v53 }
  0x5a   : > { %2468 = vmatpush.bf16.msra.mxu2 %v10514_v42  ;;  %v10351_v63 = vld [vmem:[%s23373_s1 + $0x970] sm:$0xf0]  ;;  %v15479_v0 = vld [vmem:[%s23373_s1 + $0xa64] sm:$0xf]  ;;  %v10226_v4 = vor.u32 %v15415_v58, %v10223_v60 }
  0x5b   : > { %2482 = vmatpush.bf16.msra.mxu3 %v10642_v46  ;;  %v10479_v1 = vld [vmem:[%s23373_s1 + $0xa70] sm:$0xf0]  ;;  %v15511_v2 = vld [vmem:[%s23373_s1 + $0xb64] sm:$0xf]  ;;  %v10354_v5 = vor.u32 %v15447_v61, %v10351_v63 }
  0x5c   : > { %v10607_v3 = vld [vmem:[%s23373_s1 + $0xb70] sm:$0xf0]  ;;  %2441 = vmatpush.bf16.msra.mxu0 %v10242_v55  ;;  %v10482_v6 = vor.u32 %v15479_v0, %v10479_v1  ;;  %v15411_v7 = vld [vmem:[%s23373_s1 + $0x844] sm:$0xf] }
  0x5d   : > { %2455 = vmatpush.bf16.msra.mxu1 %v10370_v56  ;;  %v10207_v8 = vld [vmem:[%s23373_s1 + $0x850] sm:$0xf0]  ;;  %v15443_v9 = vld [vmem:[%s23373_s1 + $0x944] sm:$0xf]  ;;  %v10610_v10 = vor.u32 %v15511_v2, %v10607_v3 }
  0x5e   : > { %2469 = vmatpush.bf16.msra.mxu2 %v10498_v57  ;;  %v10335_v12 = vld [vmem:[%s23373_s1 + $0x950] sm:$0xf0]  ;;  %v15475_v13 = vld [vmem:[%s23373_s1 + $0xa44] sm:$0xf]  ;;  %v10210_v23 = vor.u32 %v15411_v7, %v10207_v8 }
  0x5f   : > { %2483 = vmatpush.bf16.msra.mxu3 %v10626_v62  ;;  %v10463_v14 = vld [vmem:[%s23373_s1 + $0xa50] sm:$0xf0]  ;;  %v15507_v18 = vld [vmem:[%s23373_s1 + $0xb44] sm:$0xf]  ;;  %v10338_v25 = vor.u32 %v15443_v9, %v10335_v12 }
  0x60   : > { %v10591_v19 = vld [vmem:[%s23373_s1 + $0xb50] sm:$0xf0]  ;;  %2442 = vmatpush.bf16.msra.mxu0 %v10226_v4  ;;  %v10466_v26 = vor.u32 %v15475_v13, %v10463_v14  ;;  %v15407_v27 = vld [vmem:[%s23373_s1 + $0x824] sm:$0xf] }
  0x61   : > { %2456 = vmatpush.bf16.msra.mxu1 %v10354_v5  ;;  %v10191_v28 = vld [vmem:[%s23373_s1 + $0x830] sm:$0xf0]  ;;  %v15439_v30 = vld [vmem:[%s23373_s1 + $0x924] sm:$0xf]  ;;  %v10594_v31 = vor.u32 %v15507_v18, %v10591_v19 }
  0x62   : > { %2470 = vmatpush.bf16.msra.mxu2 %v10482_v6  ;;  %v10319_v33 = vld [vmem:[%s23373_s1 + $0x930] sm:$0xf0]  ;;  %v15471_v34 = vld [vmem:[%s23373_s1 + $0xa24] sm:$0xf]  ;;  %v10194_v38 = vor.u32 %v15407_v27, %v10191_v28 }
  0x63   : > { %2484 = vmatpush.bf16.msra.mxu3 %v10610_v10  ;;  %v10447_v35 = vld [vmem:[%s23373_s1 + $0xa30] sm:$0xf0]  ;;  %v15503_v36 = vld [vmem:[%s23373_s1 + $0xb24] sm:$0xf]  ;;  %v10322_v43 = vor.u32 %v15439_v30, %v10319_v33 }
  0x64   : > { %v10575_v37 = vld [vmem:[%s23373_s1 + $0xb30] sm:$0xf0]  ;;  %2443 = vmatpush.bf16.msra.mxu0 %v10210_v23  ;;  %v15403_v39 = vld [vmem:[%s23373_s1 + $0x804] sm:$0xf]  ;;  %v10450_v44 = vor.u32 %v15471_v34, %v10447_v35 }
  0x65   : > { %v10175_v42 = vld [vmem:[%s23373_s1 + $0x810] sm:$0xf0]  ;;  %2457 = vmatpush.bf16.msra.mxu1 %v10338_v25  ;;  %v15435_v45 = vld [vmem:[%s23373_s1 + $0x904] sm:$0xf]  ;;  %v10578_v49 = vor.u32 %v15503_v36, %v10575_v37 }
  0x66   : > { %2471 = vmatpush.bf16.msra.mxu2 %v10466_v26  ;;  %v10303_v46 = vld [vmem:[%s23373_s1 + $0x910] sm:$0xf0]  ;;  %v15467_v48 = vld [vmem:[%s23373_s1 + $0xa04] sm:$0xf]  ;;  %v10178_v58 = vor.u32 %v15403_v39, %v10175_v42 }
  0x67   : > { %2485 = vmatpush.bf16.msra.mxu3 %v10594_v31  ;;  %v10431_v50 = vld [vmem:[%s23373_s1 + $0xa10] sm:$0xf0]  ;;  %v15499_v51 = vld [vmem:[%s23373_s1 + $0xb04] sm:$0xf]  ;;  %v10306_v63 = vor.u32 %v15435_v45, %v10303_v46 }
  0x68   : > { %v10559_v53 = vld [vmem:[%s23373_s1 + $0xb10] sm:$0xf0]  ;;  %v15559_v55 = vld [vmem:[%s23373_s1 + $0xce4] sm:$0xf]  ;;  %2444 = vmatpush.bf16.msra.mxu0 %v10194_v38  ;;  %v10434_v0 = vor.u32 %v15467_v48, %v10431_v50 }
  0x69   : > { %v10799_v56 = vld [vmem:[%s23373_s1 + $0xcf0] sm:$0xf0]  ;;  %v15591_v57 = vld [vmem:[%s23373_s1 + $0xde4] sm:$0xf]  ;;  %2458 = vmatpush.bf16.msra.mxu1 %v10322_v43  ;;  %v10562_v3 = vor.u32 %v15499_v51, %v10559_v53 }
  0x6a   : > { %v10927_v60 = vld [vmem:[%s23373_s1 + $0xdf0] sm:$0xf0]  ;;  %v15623_v61 = vld [vmem:[%s23373_s1 + $0xee4] sm:$0xf]  ;;  %2472 = vmatpush.bf16.msra.mxu2 %v10450_v44  ;;  %v10802_v4 = vor.u32 %v15559_v55, %v10799_v56 }
  0x6b   : > { %v11055_v62 = vld [vmem:[%s23373_s1 + $0xef0] sm:$0xf0]  ;;  %v15655_v1 = vld [vmem:[%s23373_s1 + $0xfe4] sm:$0xf]  ;;  %2486 = vmatpush.bf16.msra.mxu3 %v10578_v49  ;;  %v10930_v5 = vor.u32 %v15591_v57, %v10927_v60 }
  0x6c   : > { %v11183_v2 = vld [vmem:[%s23373_s1 + $0xff0] sm:$0xf0]  ;;  %v11058_v6 = vor.u32 %v15623_v61, %v11055_v62  ;;  %v15555_v7 = vld [vmem:[%s23373_s1 + $0xcc4] sm:$0xf]  ;;  %2445 = vmatpush.bf16.msra.mxu0 %v10178_v58 }
  0x6d   : > { %v10783_v8 = vld [vmem:[%s23373_s1 + $0xcd0] sm:$0xf0]  ;;  %v15587_v9 = vld [vmem:[%s23373_s1 + $0xdc4] sm:$0xf]  ;;  %v11186_v10 = vor.u32 %v15655_v1, %v11183_v2  ;;  %2459 = vmatpush.bf16.msra.mxu1 %v10306_v63 }
  0x6e   : > { %v10911_v12 = vld [vmem:[%s23373_s1 + $0xdd0] sm:$0xf0]  ;;  %v15619_v13 = vld [vmem:[%s23373_s1 + $0xec4] sm:$0xf]  ;;  %2473 = vmatpush.bf16.msra.mxu2 %v10434_v0  ;;  %v10786_v23 = vor.u32 %v15555_v7, %v10783_v8 }
  0x6f   : > { %v11039_v14 = vld [vmem:[%s23373_s1 + $0xed0] sm:$0xf0]  ;;  %v15651_v18 = vld [vmem:[%s23373_s1 + $0xfc4] sm:$0xf]  ;;  %2487 = vmatpush.bf16.msra.mxu3 %v10562_v3  ;;  %v10914_v25 = vor.u32 %v15587_v9, %v10911_v12  ;;  %2446 = vmatmul.bf16.vlgmr.msra.gmra.mxu0 %v16686_v47 }
  0x70   : > { %v11167_v19 = vld [vmem:[%s23373_s1 + $0xfd0] sm:$0xf0]  ;;  %2494 = vmatpush.bf16.msrb.mxu0 %v10802_v4  ;;  %v11042_v26 = vor.u32 %v15619_v13, %v11039_v14  ;;  %v15551_v27 = vld [vmem:[%s23373_s1 + $0xca4] sm:$0xf]  ;;  %2460 = vmatmul.bf16.vlgmr.msra.gmra.mxu1 %v16693_v54 }
  0x71   : > { %2508 = vmatpush.bf16.msrb.mxu1 %v10930_v5  ;;  %v10767_v28 = vld [vmem:[%s23373_s1 + $0xcb0] sm:$0xf0]  ;;  %v15583_v30 = vld [vmem:[%s23373_s1 + $0xda4] sm:$0xf]  ;;  %v11170_v31 = vor.u32 %v15651_v18, %v11167_v19  ;;  %2474 = vmatmul.bf16.vlgmr.msra.gmra.mxu2 %v16691_v52 }
  0x72   : > { %2522 = vmatpush.bf16.msrb.mxu2 %v11058_v6  ;;  %v10895_v33 = vld [vmem:[%s23373_s1 + $0xdb0] sm:$0xf0]  ;;  %v15615_v34 = vld [vmem:[%s23373_s1 + $0xea4] sm:$0xf]  ;;  %v10770_v38 = vor.u32 %v15551_v27, %v10767_v28  ;;  %2488 = vmatmul.bf16.vlgmr.msra.gmra.mxu3 %v16705_v59 }
  0x73   : > { %2536 = vmatpush.bf16.msrb.mxu3 %v11186_v10  ;;  %v11023_v35 = vld [vmem:[%s23373_s1 + $0xeb0] sm:$0xf0]  ;;  %v15647_v36 = vld [vmem:[%s23373_s1 + $0xfa4] sm:$0xf]  ;;  %v10898_v39 = vor.u32 %v15583_v30, %v10895_v33 }
  0x74   : > { %v11151_v37 = vld [vmem:[%s23373_s1 + $0xfb0] sm:$0xf0]  ;;  %2495 = vmatpush.bf16.msrb.mxu0 %v10786_v23  ;;  %v11026_v42 = vor.u32 %v15615_v34, %v11023_v35  ;;  %v15547_v43 = vld [vmem:[%s23373_s1 + $0xc84] sm:$0xf] }
  0x75   : > { %2509 = vmatpush.bf16.msrb.mxu1 %v10914_v25  ;;  %v10751_v44 = vld [vmem:[%s23373_s1 + $0xc90] sm:$0xf0]  ;;  %v15579_v45 = vld [vmem:[%s23373_s1 + $0xd84] sm:$0xf]  ;;  %v11154_v46 = vor.u32 %v15647_v36, %v11151_v37 }
  0x76   : > { %2523 = vmatpush.bf16.msrb.mxu2 %v11042_v26  ;;  %v10879_v48 = vld [vmem:[%s23373_s1 + $0xd90] sm:$0xf0]  ;;  %v15611_v49 = vld [vmem:[%s23373_s1 + $0xe84] sm:$0xf]  ;;  %v10754_v55 = vor.u32 %v15547_v43, %v10751_v44 }
  0x77   : > { %2537 = vmatpush.bf16.msrb.mxu3 %v11170_v31  ;;  %v11007_v50 = vld [vmem:[%s23373_s1 + $0xe90] sm:$0xf0]  ;;  %v15643_v51 = vld [vmem:[%s23373_s1 + $0xf84] sm:$0xf]  ;;  %v10882_v56 = vor.u32 %v15579_v45, %v10879_v48 }
  0x78   : > { %v11135_v53 = vld [vmem:[%s23373_s1 + $0xf90] sm:$0xf0]  ;;  %2496 = vmatpush.bf16.msrb.mxu0 %v10770_v38  ;;  %v11010_v57 = vor.u32 %v15611_v49, %v11007_v50  ;;  %v15543_v58 = vld [vmem:[%s23373_s1 + $0xc64] sm:$0xf] }
  0x79   : > { %2510 = vmatpush.bf16.msrb.mxu1 %v10898_v39  ;;  %v10735_v60 = vld [vmem:[%s23373_s1 + $0xc70] sm:$0xf0]  ;;  %v15575_v61 = vld [vmem:[%s23373_s1 + $0xd64] sm:$0xf]  ;;  %v11138_v62 = vor.u32 %v15643_v51, %v11135_v53 }
  0x7a   : > { %2524 = vmatpush.bf16.msrb.mxu2 %v11026_v42  ;;  %v10863_v63 = vld [vmem:[%s23373_s1 + $0xd70] sm:$0xf0]  ;;  %v15607_v0 = vld [vmem:[%s23373_s1 + $0xe64] sm:$0xf]  ;;  %v10738_v4 = vor.u32 %v15543_v58, %v10735_v60  ;;  %v15466_v60 = vld [vmem:[%s23373_s1 + $0x9f4] sm:$0xf0] }
  0x7b   : > { %2538 = vmatpush.bf16.msrb.mxu3 %v11154_v46  ;;  %v10991_v1 = vld [vmem:[%s23373_s1 + $0xe70] sm:$0xf0]  ;;  %v15639_v2 = vld [vmem:[%s23373_s1 + $0xf64] sm:$0xf]  ;;  %v10866_v5 = vor.u32 %v15575_v61, %v10863_v63  ;;  %v10549_v61 = vld [vmem:[%s23373_s1 + $0xae8] sm:$0xf] }
  0x7c   : > { %v11119_v3 = vld [vmem:[%s23373_s1 + $0xf70] sm:$0xf0]  ;;  %2497 = vmatpush.bf16.msrb.mxu0 %v10754_v55  ;;  %v10994_v6 = vor.u32 %v15607_v0, %v10991_v1  ;;  %v15539_v7 = vld [vmem:[%s23373_s1 + $0xc44] sm:$0xf]  ;;  %v10293_v55 = vld [vmem:[%s23373_s1 + $0x8e8] sm:$0xf] }
  0x7d   : > { %2511 = vmatpush.bf16.msrb.mxu1 %v10882_v56  ;;  %v10719_v8 = vld [vmem:[%s23373_s1 + $0xc50] sm:$0xf0]  ;;  %v15571_v9 = vld [vmem:[%s23373_s1 + $0xd44] sm:$0xf]  ;;  %v11122_v10 = vor.u32 %v15639_v2, %v11119_v3  ;;  %v15434_v56 = vld [vmem:[%s23373_s1 + $0x8f4] sm:$0xf0] }
  0x7e   : > { %2525 = vmatpush.bf16.msrb.mxu2 %v11010_v57  ;;  %v10847_v12 = vld [vmem:[%s23373_s1 + $0xd50] sm:$0xf0]  ;;  %v15603_v13 = vld [vmem:[%s23373_s1 + $0xe44] sm:$0xf]  ;;  %v10722_v23 = vor.u32 %v15539_v7, %v10719_v8  ;;  %v10421_v57 = vld [vmem:[%s23373_s1 + $0x9e8] sm:$0xf] }
  0x7f   : > { %2539 = vmatpush.bf16.msrb.mxu3 %v11138_v62  ;;  %v10975_v14 = vld [vmem:[%s23373_s1 + $0xe50] sm:$0xf0]  ;;  %v15635_v18 = vld [vmem:[%s23373_s1 + $0xf44] sm:$0xf]  ;;  %v10850_v25 = vor.u32 %v15571_v9, %v10847_v12  ;;  %v15498_v62 = vld [vmem:[%s23373_s1 + $0xaf4] sm:$0xf0] }
  0x80   : > { %v11103_v19 = vld [vmem:[%s23373_s1 + $0xf50] sm:$0xf0]  ;;  %2498 = vmatpush.bf16.msrb.mxu0 %v10738_v4  ;;  %v10978_v26 = vor.u32 %v15603_v13, %v10975_v14  ;;  %v15535_v27 = vld [vmem:[%s23373_s1 + $0xc24] sm:$0xf]  ;;  %v10677_v1 = vld [vmem:[%s23373_s1 + $0xbe8] sm:$0xf]  ;;  %v10294_v4 = vor.u32 %v15434_v56, %v10293_v55 }
  0x81   : > { %2512 = vmatpush.bf16.msrb.mxu1 %v10866_v5  ;;  %v10703_v28 = vld [vmem:[%s23373_s1 + $0xc30] sm:$0xf0]  ;;  %v15567_v30 = vld [vmem:[%s23373_s1 + $0xd24] sm:$0xf]  ;;  %v11106_v31 = vor.u32 %v15635_v18, %v11103_v19  ;;  %v15530_v2 = vld [vmem:[%s23373_s1 + $0xbf4] sm:$0xf0]  ;;  %v10422_v5 = vor.u32 %v15466_v60, %v10421_v57 }
  0x82   : > { %2526 = vmatpush.bf16.msrb.mxu2 %v10994_v6  ;;  %v10831_v33 = vld [vmem:[%s23373_s1 + $0xd30] sm:$0xf0]  ;;  %v15599_v34 = vld [vmem:[%s23373_s1 + $0xe24] sm:$0xf]  ;;  %v10706_v38 = vor.u32 %v15535_v27, %v10703_v28  ;;  %v10550_v6 = vor.u32 %v15498_v62, %v10549_v61  ;;  %v10277_v7 = vld [vmem:[%s23373_s1 + $0x8c8] sm:$0xf] }
  0x83   : > { %2540 = vmatpush.bf16.msrb.mxu3 %v11122_v10  ;;  %v10959_v35 = vld [vmem:[%s23373_s1 + $0xe30] sm:$0xf0]  ;;  %v15631_v36 = vld [vmem:[%s23373_s1 + $0xf24] sm:$0xf]  ;;  %v10834_v43 = vor.u32 %v15567_v30, %v10831_v33  ;;  %v15430_v8 = vld [vmem:[%s23373_s1 + $0x8d4] sm:$0xf0]  ;;  %v10678_v10 = vor.u32 %v15530_v2, %v10677_v1 }
  0x84   : > { %v11087_v37 = vld [vmem:[%s23373_s1 + $0xf30] sm:$0xf0]  ;;  %2499 = vmatpush.bf16.msrb.mxu0 %v10722_v23  ;;  %v15531_v39 = vld [vmem:[%s23373_s1 + $0xc04] sm:$0xf]  ;;  %v10962_v44 = vor.u32 %v15599_v34, %v10959_v35  ;;  %v10405_v9 = vld [vmem:[%s23373_s1 + $0x9c8] sm:$0xf]  ;;  %v10278_v23 = vor.u32 %v15430_v8, %v10277_v7 }
  0x85   : > { %v10687_v42 = vld [vmem:[%s23373_s1 + $0xc10] sm:$0xf0]  ;;  %2513 = vmatpush.bf16.msrb.mxu1 %v10850_v25  ;;  %v15563_v45 = vld [vmem:[%s23373_s1 + $0xd04] sm:$0xf]  ;;  %v11090_v49 = vor.u32 %v15631_v36, %v11087_v37  ;;  %v15462_v12 = vld [vmem:[%s23373_s1 + $0x9d4] sm:$0xf0] }
  0x86   : > { %2527 = vmatpush.bf16.msrb.mxu2 %v10978_v26  ;;  %v10815_v46 = vld [vmem:[%s23373_s1 + $0xd10] sm:$0xf0]  ;;  %v15595_v48 = vld [vmem:[%s23373_s1 + $0xe04] sm:$0xf]  ;;  %v10690_v58 = vor.u32 %v15531_v39, %v10687_v42  ;;  %v10533_v13 = vld [vmem:[%s23373_s1 + $0xac8] sm:$0xf]  ;;  %v10406_v25 = vor.u32 %v15462_v12, %v10405_v9 }
  0x87   : > { %2541 = vmatpush.bf16.msrb.mxu3 %v11106_v31  ;;  %v10943_v50 = vld [vmem:[%s23373_s1 + $0xe10] sm:$0xf0]  ;;  %v15627_v51 = vld [vmem:[%s23373_s1 + $0xf04] sm:$0xf]  ;;  %v10818_v63 = vor.u32 %v15563_v45, %v10815_v46  ;;  %v15494_v14 = vld [vmem:[%s23373_s1 + $0xad4] sm:$0xf0] }
  0x88   : > { %v11071_v53 = vld [vmem:[%s23373_s1 + $0xf10] sm:$0xf0]  ;;  %2500 = vmatpush.bf16.msrb.mxu0 %v10706_v38  ;;  %v10946_v0 = vor.u32 %v15595_v48, %v10943_v50  ;;  %v10661_v18 = vld [vmem:[%s23373_s1 + $0xbc8] sm:$0xf]  ;;  %v15526_v19 = vld [vmem:[%s23373_s1 + $0xbd4] sm:$0xf0]  ;;  %v10534_v26 = vor.u32 %v15494_v14, %v10533_v13 }
  0x89   : > { %2514 = vmatpush.bf16.msrb.mxu1 %v10834_v43  ;;  %v11074_v3 = vor.u32 %v15627_v51, %v11071_v53  ;;  %v10261_v27 = vld [vmem:[%s23373_s1 + $0x8a8] sm:$0xf]  ;;  %v15426_v28 = vld [vmem:[%s23373_s1 + $0x8b4] sm:$0xf0]  ;;  %v10662_v31 = vor.u32 %v15526_v19, %v10661_v18 }
  0x8a   : > { %2528 = vmatpush.bf16.msrb.mxu2 %v10962_v44  ;;  %v10389_v30 = vld [vmem:[%s23373_s1 + $0x9a8] sm:$0xf]  ;;  %v15458_v33 = vld [vmem:[%s23373_s1 + $0x9b4] sm:$0xf0]  ;;  %v10262_v38 = vor.u32 %v15426_v28, %v10261_v27 }
  0x8b   : > { %2542 = vmatpush.bf16.msrb.mxu3 %v11090_v49  ;;  %v10517_v34 = vld [vmem:[%s23373_s1 + $0xaa8] sm:$0xf]  ;;  %v15490_v35 = vld [vmem:[%s23373_s1 + $0xab4] sm:$0xf0]  ;;  %v10390_v39 = vor.u32 %v15458_v33, %v10389_v30 }
  0x8c   : > { %2501 = vmatpush.bf16.msrb.mxu0 %v10690_v58  ;;  %v10645_v36 = vld [vmem:[%s23373_s1 + $0xba8] sm:$0xf]  ;;  %v15522_v37 = vld [vmem:[%s23373_s1 + $0xbb4] sm:$0xf0]  ;;  %v10518_v42 = vor.u32 %v15490_v35, %v10517_v34 }
  0x8d   : > { %2515 = vmatpush.bf16.msrb.mxu1 %v10818_v63  ;;  %v10245_v43 = vld [vmem:[%s23373_s1 + $0x888] sm:$0xf]  ;;  %v15422_v44 = vld [vmem:[%s23373_s1 + $0x894] sm:$0xf0]  ;;  %v10646_v46 = vor.u32 %v15522_v37, %v10645_v36 }
  0x8e   : > { %2529 = vmatpush.bf16.msrb.mxu2 %v10946_v0  ;;  %v10373_v45 = vld [vmem:[%s23373_s1 + $0x988] sm:$0xf]  ;;  %v15454_v48 = vld [vmem:[%s23373_s1 + $0x994] sm:$0xf0]  ;;  %v10246_v55 = vor.u32 %v15422_v44, %v10245_v43 }
  0x8f   : > { %2543 = vmatpush.bf16.msrb.mxu3 %v11074_v3  ;;  %2502 = vmatmul.bf16.vlgmr.msrb.gmra.mxu0 %v16836_v11  ;;  %v10501_v49 = vld [vmem:[%s23373_s1 + $0xa88] sm:$0xf]  ;;  %v15486_v50 = vld [vmem:[%s23373_s1 + $0xa94] sm:$0xf0]  ;;  %v10374_v56 = vor.u32 %v15454_v48, %v10373_v45 }
  0x90   : > { %2550 = vmatpush.bf16.msra.mxu0 %v10294_v4  ;;  %2516 = vmatmul.bf16.vlgmr.msrb.gmra.mxu1 %v16849_v17  ;;  %v10629_v51 = vld [vmem:[%s23373_s1 + $0xb88] sm:$0xf]  ;;  %v15518_v53 = vld [vmem:[%s23373_s1 + $0xb94] sm:$0xf0]  ;;  %v10502_v57 = vor.u32 %v15486_v50, %v10501_v49 }
  0x91   : > { %2564 = vmatpush.bf16.msra.mxu1 %v10422_v5  ;;  %2530 = vmatmul.bf16.vlgmr.msrb.gmra.mxu2 %v16847_v16  ;;  %v10229_v58 = vld [vmem:[%s23373_s1 + $0x868] sm:$0xf]  ;;  %v15418_v60 = vld [vmem:[%s23373_s1 + $0x874] sm:$0xf0]  ;;  %v10630_v62 = vor.u32 %v15518_v53, %v10629_v51 }
  0x92   : > { %2578 = vmatpush.bf16.msra.mxu2 %v10550_v6  ;;  %2544 = vmatmul.bf16.vlgmr.msrb.gmra.mxu3 %v16857_v20  ;;  %v10357_v61 = vld [vmem:[%s23373_s1 + $0x968] sm:$0xf]  ;;  %v15450_v63 = vld [vmem:[%s23373_s1 + $0x974] sm:$0xf0]  ;;  %v10230_v4 = vor.u32 %v15418_v60, %v10229_v58 }
  0x93   : > { %2592 = vmatpush.bf16.msra.mxu3 %v10678_v10  ;;  %v10485_v0 = vld [vmem:[%s23373_s1 + $0xa68] sm:$0xf]  ;;  %v15482_v1 = vld [vmem:[%s23373_s1 + $0xa74] sm:$0xf0]  ;;  %v10358_v5 = vor.u32 %v15450_v63, %v10357_v61 }
  0x94   : > { %2551 = vmatpush.bf16.msra.mxu0 %v10278_v23  ;;  %v10613_v2 = vld [vmem:[%s23373_s1 + $0xb68] sm:$0xf]  ;;  %v15514_v3 = vld [vmem:[%s23373_s1 + $0xb74] sm:$0xf0]  ;;  %v10486_v6 = vor.u32 %v15482_v1, %v10485_v0 }
  0x95   : > { %2565 = vmatpush.bf16.msra.mxu1 %v10406_v25  ;;  %v10213_v7 = vld [vmem:[%s23373_s1 + $0x848] sm:$0xf]  ;;  %v15414_v8 = vld [vmem:[%s23373_s1 + $0x854] sm:$0xf0]  ;;  %v10614_v10 = vor.u32 %v15514_v3, %v10613_v2 }
  0x96   : > { %2579 = vmatpush.bf16.msra.mxu2 %v10534_v26  ;;  %v10341_v9 = vld [vmem:[%s23373_s1 + $0x948] sm:$0xf]  ;;  %v15446_v12 = vld [vmem:[%s23373_s1 + $0x954] sm:$0xf0]  ;;  %v10214_v23 = vor.u32 %v15414_v8, %v10213_v7 }
  0x97   : > { %2593 = vmatpush.bf16.msra.mxu3 %v10662_v31  ;;  %v10469_v13 = vld [vmem:[%s23373_s1 + $0xa48] sm:$0xf]  ;;  %v15478_v14 = vld [vmem:[%s23373_s1 + $0xa54] sm:$0xf0]  ;;  %v10342_v25 = vor.u32 %v15446_v12, %v10341_v9 }
  0x98   : > { %2552 = vmatpush.bf16.msra.mxu0 %v10262_v38  ;;  %v10597_v18 = vld [vmem:[%s23373_s1 + $0xb48] sm:$0xf]  ;;  %v15510_v19 = vld [vmem:[%s23373_s1 + $0xb54] sm:$0xf0]  ;;  %v10470_v26 = vor.u32 %v15478_v14, %v10469_v13 }
  0x99   : > { %2566 = vmatpush.bf16.msra.mxu1 %v10390_v39  ;;  %v10197_v27 = vld [vmem:[%s23373_s1 + $0x828] sm:$0xf]  ;;  %v15410_v28 = vld [vmem:[%s23373_s1 + $0x834] sm:$0xf0]  ;;  %v10598_v31 = vor.u32 %v15510_v19, %v10597_v18 }
  0x9a   : > { %2580 = vmatpush.bf16.msra.mxu2 %v10518_v42  ;;  %v10325_v30 = vld [vmem:[%s23373_s1 + $0x928] sm:$0xf]  ;;  %v15442_v33 = vld [vmem:[%s23373_s1 + $0x934] sm:$0xf0]  ;;  %v10198_v38 = vor.u32 %v15410_v28, %v10197_v27 }
  0x9b   : > { %2594 = vmatpush.bf16.msra.mxu3 %v10646_v46  ;;  %v10453_v34 = vld [vmem:[%s23373_s1 + $0xa28] sm:$0xf]  ;;  %v15474_v35 = vld [vmem:[%s23373_s1 + $0xa34] sm:$0xf0]  ;;  %v10326_v43 = vor.u32 %v15442_v33, %v10325_v30 }
  0x9c   : > { %2553 = vmatpush.bf16.msra.mxu0 %v10246_v55  ;;  %v10581_v36 = vld [vmem:[%s23373_s1 + $0xb28] sm:$0xf]  ;;  %v15506_v37 = vld [vmem:[%s23373_s1 + $0xb34] sm:$0xf0]  ;;  %v10454_v44 = vor.u32 %v15474_v35, %v10453_v34 }
  0x9d   : > { %2567 = vmatpush.bf16.msra.mxu1 %v10374_v56  ;;  %v10181_v39 = vld [vmem:[%s23373_s1 + $0x808] sm:$0xf]  ;;  %v15406_v42 = vld [vmem:[%s23373_s1 + $0x814] sm:$0xf0]  ;;  %v10582_v49 = vor.u32 %v15506_v37, %v10581_v36 }
  0x9e   : > { %2581 = vmatpush.bf16.msra.mxu2 %v10502_v57  ;;  %v10309_v45 = vld [vmem:[%s23373_s1 + $0x908] sm:$0xf]  ;;  %v15438_v46 = vld [vmem:[%s23373_s1 + $0x914] sm:$0xf0]  ;;  %v10182_v58 = vor.u32 %v15406_v42, %v10181_v39 }
  0x9f   : > { %2595 = vmatpush.bf16.msra.mxu3 %v10630_v62  ;;  %v10437_v48 = vld [vmem:[%s23373_s1 + $0xa08] sm:$0xf]  ;;  %v15470_v50 = vld [vmem:[%s23373_s1 + $0xa14] sm:$0xf0]  ;;  %v10310_v63 = vor.u32 %v15438_v46, %v10309_v45 }
  0xa0   : > { %2554 = vmatpush.bf16.msra.mxu0 %v10230_v4  ;;  %v10565_v51 = vld [vmem:[%s23373_s1 + $0xb08] sm:$0xf]  ;;  %v15502_v53 = vld [vmem:[%s23373_s1 + $0xb14] sm:$0xf0]  ;;  %v10438_v0 = vor.u32 %v15470_v50, %v10437_v48 }
  0xa1   : > { %2568 = vmatpush.bf16.msra.mxu1 %v10358_v5  ;;  %v10805_v55 = vld [vmem:[%s23373_s1 + $0xce8] sm:$0xf]  ;;  %v15562_v56 = vld [vmem:[%s23373_s1 + $0xcf4] sm:$0xf0]  ;;  %v10566_v3 = vor.u32 %v15502_v53, %v10565_v51 }
  0xa2   : > { %2582 = vmatpush.bf16.msra.mxu2 %v10486_v6  ;;  %v10933_v57 = vld [vmem:[%s23373_s1 + $0xde8] sm:$0xf]  ;;  %v15594_v60 = vld [vmem:[%s23373_s1 + $0xdf4] sm:$0xf0]  ;;  %v10806_v4 = vor.u32 %v15562_v56, %v10805_v55 }
  0xa3   : > { %2596 = vmatpush.bf16.msra.mxu3 %v10614_v10  ;;  %v11061_v61 = vld [vmem:[%s23373_s1 + $0xee8] sm:$0xf]  ;;  %v15626_v62 = vld [vmem:[%s23373_s1 + $0xef4] sm:$0xf0]  ;;  %v10934_v5 = vor.u32 %v15594_v60, %v10933_v57 }
  0xa4   : > { %2555 = vmatpush.bf16.msra.mxu0 %v10214_v23  ;;  %v11189_v1 = vld [vmem:[%s23373_s1 + $0xfe8] sm:$0xf]  ;;  %v15658_v2 = vld [vmem:[%s23373_s1 + $0xff4] sm:$0xf0]  ;;  %v11062_v6 = vor.u32 %v15626_v62, %v11061_v61 }
  0xa5   : > { %2569 = vmatpush.bf16.msra.mxu1 %v10342_v25  ;;  %v10789_v7 = vld [vmem:[%s23373_s1 + $0xcc8] sm:$0xf]  ;;  %v15558_v8 = vld [vmem:[%s23373_s1 + $0xcd4] sm:$0xf0]  ;;  %v11190_v10 = vor.u32 %v15658_v2, %v11189_v1 }
  0xa6   : > { %2583 = vmatpush.bf16.msra.mxu2 %v10470_v26  ;;  %v10917_v9 = vld [vmem:[%s23373_s1 + $0xdc8] sm:$0xf]  ;;  %v15590_v12 = vld [vmem:[%s23373_s1 + $0xdd4] sm:$0xf0]  ;;  %v10790_v23 = vor.u32 %v15558_v8, %v10789_v7 }
  0xa7   : > { %2597 = vmatpush.bf16.msra.mxu3 %v10598_v31  ;;  %v11045_v13 = vld [vmem:[%s23373_s1 + $0xec8] sm:$0xf]  ;;  %v15622_v14 = vld [vmem:[%s23373_s1 + $0xed4] sm:$0xf0]  ;;  %v10918_v25 = vor.u32 %v15590_v12, %v10917_v9 }
  0xa8   : > { %2556 = vmatpush.bf16.msra.mxu0 %v10198_v38  ;;  %v11173_v18 = vld [vmem:[%s23373_s1 + $0xfc8] sm:$0xf]  ;;  %v15654_v19 = vld [vmem:[%s23373_s1 + $0xfd4] sm:$0xf0]  ;;  %v11046_v26 = vor.u32 %v15622_v14, %v11045_v13 }
  0xa9   : > { %2570 = vmatpush.bf16.msra.mxu1 %v10326_v43  ;;  %v10773_v27 = vld [vmem:[%s23373_s1 + $0xca8] sm:$0xf]  ;;  %v15554_v28 = vld [vmem:[%s23373_s1 + $0xcb4] sm:$0xf0]  ;;  %v11174_v31 = vor.u32 %v15654_v19, %v11173_v18 }
  0xaa   : > { %2584 = vmatpush.bf16.msra.mxu2 %v10454_v44  ;;  %v10901_v30 = vld [vmem:[%s23373_s1 + $0xda8] sm:$0xf]  ;;  %v15586_v33 = vld [vmem:[%s23373_s1 + $0xdb4] sm:$0xf0]  ;;  %v10774_v38 = vor.u32 %v15554_v28, %v10773_v27 }
  0xab   : > { %2598 = vmatpush.bf16.msra.mxu3 %v10582_v49  ;;  %v11029_v34 = vld [vmem:[%s23373_s1 + $0xea8] sm:$0xf]  ;;  %v15618_v35 = vld [vmem:[%s23373_s1 + $0xeb4] sm:$0xf0]  ;;  %v10902_v39 = vor.u32 %v15586_v33, %v10901_v30 }
  0xac   : > { %2557 = vmatpush.bf16.msra.mxu0 %v10182_v58  ;;  %v11157_v36 = vld [vmem:[%s23373_s1 + $0xfa8] sm:$0xf]  ;;  %v15650_v37 = vld [vmem:[%s23373_s1 + $0xfb4] sm:$0xf0]  ;;  %v11030_v42 = vor.u32 %v15618_v35, %v11029_v34 }
  0xad   : > { %2571 = vmatpush.bf16.msra.mxu1 %v10310_v63  ;;  %v10757_v43 = vld [vmem:[%s23373_s1 + $0xc88] sm:$0xf]  ;;  %v15550_v44 = vld [vmem:[%s23373_s1 + $0xc94] sm:$0xf0]  ;;  %v11158_v46 = vor.u32 %v15650_v37, %v11157_v36 }
  0xae   : > { %2585 = vmatpush.bf16.msra.mxu2 %v10438_v0  ;;  %v10885_v45 = vld [vmem:[%s23373_s1 + $0xd88] sm:$0xf]  ;;  %v15582_v48 = vld [vmem:[%s23373_s1 + $0xd94] sm:$0xf0]  ;;  %v10758_v55 = vor.u32 %v15550_v44, %v10757_v43 }
  0xaf   : > { %2599 = vmatpush.bf16.msra.mxu3 %v10566_v3  ;;  %2558 = vmatmul.bf16.vlgmr.msra.gmra.mxu0 %v16686_v47  ;;  %v11013_v49 = vld [vmem:[%s23373_s1 + $0xe88] sm:$0xf]  ;;  %v15614_v50 = vld [vmem:[%s23373_s1 + $0xe94] sm:$0xf0]  ;;  %v10886_v56 = vor.u32 %v15582_v48, %v10885_v45 }
  0xb0   : > { %2606 = vmatpush.bf16.msrb.mxu0 %v10806_v4  ;;  %2572 = vmatmul.bf16.vlgmr.msra.gmra.mxu1 %v16693_v54  ;;  %v11141_v51 = vld [vmem:[%s23373_s1 + $0xf88] sm:$0xf]  ;;  %v15646_v53 = vld [vmem:[%s23373_s1 + $0xf94] sm:$0xf0]  ;;  %v11014_v57 = vor.u32 %v15614_v50, %v11013_v49 }
  0xb1   : > { %2620 = vmatpush.bf16.msrb.mxu1 %v10934_v5  ;;  %2586 = vmatmul.bf16.vlgmr.msra.gmra.mxu2 %v16691_v52  ;;  %v10741_v58 = vld [vmem:[%s23373_s1 + $0xc68] sm:$0xf]  ;;  %v15546_v60 = vld [vmem:[%s23373_s1 + $0xc74] sm:$0xf0]  ;;  %v11142_v62 = vor.u32 %v15646_v53, %v11141_v51 }
  0xb2   : > { %2634 = vmatpush.bf16.msrb.mxu2 %v11062_v6  ;;  %2600 = vmatmul.bf16.vlgmr.msra.gmra.mxu3 %v16705_v59  ;;  %v10869_v61 = vld [vmem:[%s23373_s1 + $0xd68] sm:$0xf]  ;;  %v15578_v63 = vld [vmem:[%s23373_s1 + $0xd74] sm:$0xf0]  ;;  %v10742_v4 = vor.u32 %v15546_v60, %v10741_v58  ;;  %v15432_v58 = vld [vmem:[%s23373_s1 + $0x8ec] sm:$0xf] }
  0xb3   : > { %2648 = vmatpush.bf16.msrb.mxu3 %v11190_v10  ;;  %v10997_v0 = vld [vmem:[%s23373_s1 + $0xe68] sm:$0xf]  ;;  %v15610_v1 = vld [vmem:[%s23373_s1 + $0xe74] sm:$0xf0]  ;;  %v10870_v5 = vor.u32 %v15578_v63, %v10869_v61  ;;  %v10295_v60 = vld [vmem:[%s23373_s1 + $0x8f8] sm:$0xf0] }
  0xb4   : > { %2607 = vmatpush.bf16.msrb.mxu0 %v10790_v23  ;;  %v11125_v2 = vld [vmem:[%s23373_s1 + $0xf68] sm:$0xf]  ;;  %v15642_v3 = vld [vmem:[%s23373_s1 + $0xf74] sm:$0xf0]  ;;  %v10998_v6 = vor.u32 %v15610_v1, %v10997_v0  ;;  %v15464_v61 = vld [vmem:[%s23373_s1 + $0x9ec] sm:$0xf] }
  0xb5   : > { %2621 = vmatpush.bf16.msrb.mxu1 %v10918_v25  ;;  %v10725_v7 = vld [vmem:[%s23373_s1 + $0xc48] sm:$0xf]  ;;  %v15542_v8 = vld [vmem:[%s23373_s1 + $0xc54] sm:$0xf0]  ;;  %v11126_v10 = vor.u32 %v15642_v3, %v11125_v2  ;;  %v10423_v63 = vld [vmem:[%s23373_s1 + $0x9f8] sm:$0xf0] }
  0xb6   : > { %2635 = vmatpush.bf16.msrb.mxu2 %v11046_v26  ;;  %v10853_v9 = vld [vmem:[%s23373_s1 + $0xd48] sm:$0xf]  ;;  %v15574_v12 = vld [vmem:[%s23373_s1 + $0xd54] sm:$0xf0]  ;;  %v10726_v23 = vor.u32 %v15542_v8, %v10725_v7  ;;  %v15496_v0 = vld [vmem:[%s23373_s1 + $0xaec] sm:$0xf]  ;;  %v10298_v7 = vor.u32 %v15432_v58, %v10295_v60 }
  0xb7   : > { %2649 = vmatpush.bf16.msrb.mxu3 %v11174_v31  ;;  %v10981_v13 = vld [vmem:[%s23373_s1 + $0xe48] sm:$0xf]  ;;  %v15606_v14 = vld [vmem:[%s23373_s1 + $0xe54] sm:$0xf0]  ;;  %v10854_v25 = vor.u32 %v15574_v12, %v10853_v9  ;;  %v10551_v1 = vld [vmem:[%s23373_s1 + $0xaf8] sm:$0xf0]  ;;  %v10426_v9 = vor.u32 %v15464_v61, %v10423_v63 }
  0xb8   : > { %2608 = vmatpush.bf16.msrb.mxu0 %v10774_v38  ;;  %v11109_v18 = vld [vmem:[%s23373_s1 + $0xf48] sm:$0xf]  ;;  %v15638_v19 = vld [vmem:[%s23373_s1 + $0xf54] sm:$0xf0]  ;;  %v10982_v26 = vor.u32 %v15606_v14, %v10981_v13  ;;  %v15452_v58 = vld [vmem:[%s23373_s1 + $0x98c] sm:$0xf] }
  0xb9   : > { %2622 = vmatpush.bf16.msrb.mxu1 %v10902_v39  ;;  %v10709_v27 = vld [vmem:[%s23373_s1 + $0xc28] sm:$0xf]  ;;  %v15538_v28 = vld [vmem:[%s23373_s1 + $0xc34] sm:$0xf0]  ;;  %v11110_v31 = vor.u32 %v15638_v19, %v11109_v18  ;;  %v2363_v8 = vpop.f32.mrf.mxu2  ;;  %v15428_v18 = vld [vmem:[%s23373_s1 + $0x8cc] sm:$0xf] }
  0xba   : > { %2636 = vmatpush.bf16.msrb.mxu2 %v11030_v42  ;;  %v10837_v30 = vld [vmem:[%s23373_s1 + $0xd28] sm:$0xf]  ;;  %v15570_v33 = vld [vmem:[%s23373_s1 + $0xd34] sm:$0xf0]  ;;  %v10710_v39 = vor.u32 %v15538_v28, %v10709_v27  ;;  %v2349_v42 = vpop.f32.mrf.mxu1  ;;  %v10279_v19 = vld [vmem:[%s23373_s1 + $0x8d8] sm:$0xf0] }
  0xbb   : > { %2650 = vmatpush.bf16.msrb.mxu3 %v11158_v46  ;;  %v10965_v34 = vld [vmem:[%s23373_s1 + $0xe28] sm:$0xf]  ;;  %v15602_v35 = vld [vmem:[%s23373_s1 + $0xe34] sm:$0xf0]  ;;  %v10838_v45 = vor.u32 %v15570_v33, %v10837_v30  ;;  %v15492_v27 = vld [vmem:[%s23373_s1 + $0xacc] sm:$0xf] }
  0xbc   : > { %2609 = vmatpush.bf16.msrb.mxu0 %v10758_v55  ;;  %v11093_v37 = vld [vmem:[%s23373_s1 + $0xf28] sm:$0xf]  ;;  %v15634_v38 = vld [vmem:[%s23373_s1 + $0xf34] sm:$0xf0]  ;;  %v10966_v46 = vor.u32 %v15602_v35, %v10965_v34  ;;  %v10535_v28 = vld [vmem:[%s23373_s1 + $0xad8] sm:$0xf0]  ;;  %v10282_v35 = vor.u32 %v15428_v18, %v10279_v19 }
  0xbd   : > { %2623 = vmatpush.bf16.msrb.mxu1 %v10886_v56  ;;  %v10693_v43 = vld [vmem:[%s23373_s1 + $0xc08] sm:$0xf]  ;;  %v15534_v44 = vld [vmem:[%s23373_s1 + $0xc14] sm:$0xf0]  ;;  %v11094_v53 = vor.u32 %v15634_v38, %v11093_v37  ;;  %v2377_v14 = vpop.f32.mrf.mxu3  ;;  %v10663_v33 = vld [vmem:[%s23373_s1 + $0xbd8] sm:$0xf0]  ;;  %v10538_v37 = vor.u32 %v15492_v27, %v10535_v28 }
  0xbe   : > { %2637 = vmatpush.bf16.msrb.mxu2 %v11014_v57  ;;  %v10821_v49 = vld [vmem:[%s23373_s1 + $0xd08] sm:$0xf]  ;;  %v15566_v50 = vld [vmem:[%s23373_s1 + $0xd14] sm:$0xf0]  ;;  %v15424_v38 = vld [vmem:[%s23373_s1 + $0x8ac] sm:$0xf] }
  0xbf   : > { %2651 = vmatpush.bf16.msrb.mxu3 %v11142_v62  ;;  %v10949_v51 = vld [vmem:[%s23373_s1 + $0xe08] sm:$0xf]  ;;  %v15598_v55 = vld [vmem:[%s23373_s1 + $0xe14] sm:$0xf0]  ;;  %v10694_v62 = vor.u32 %v15534_v44, %v10693_v43  ;;  %v10822_v2 = vor.u32 %v15566_v50, %v10821_v49  ;;  %v10391_v44 = vld [vmem:[%s23373_s1 + $0x9b8] sm:$0xf0] }
  0xc0   : > { %2610 = vmatpush.bf16.msrb.mxu0 %v10742_v4  ;;  %v11077_v56 = vld [vmem:[%s23373_s1 + $0xf08] sm:$0xf]  ;;  %v15630_v57 = vld [vmem:[%s23373_s1 + $0xf14] sm:$0xf0]  ;;  %v10950_v3 = vor.u32 %v15598_v55, %v10949_v51  ;;  %v15528_v4 = vld [vmem:[%s23373_s1 + $0xbec] sm:$0xf] }
  0xc1   : > { %2624 = vmatpush.bf16.msrb.mxu1 %v10870_v5  ;;  %v10679_v5 = vld [vmem:[%s23373_s1 + $0xbf8] sm:$0xf0]  ;;  %v17675_v51 = vpop.f32.mrf.mxu2  ;;  %v15484_v63 = vld [vmem:[%s23373_s1 + $0xa8c] sm:$0xf] }
  0xc2   : > { %2638 = vmatpush.bf16.msrb.mxu2 %v10998_v6  ;;  %v2335_v36 = vpop.f32.mrf.mxu0  ;;  %v11078_v6 = vor.u32 %v15630_v57, %v11077_v56  ;;  %v17645_v34 = vpop.f32.mrf.mxu1  ;;  %v10647_v49 = vld [vmem:[%s23373_s1 + $0xbb8] sm:$0xf0]  ;;  %v15420_v56 = vld [vmem:[%s23373_s1 + $0x88c] sm:$0xf] }
  0xc3   : > { %2652 = vmatpush.bf16.msrb.mxu3 %v11126_v10  ;;  %v2350_v48 = vadd.f32 %v2349_v42, %v2335_v36  ;;  %v10554_v10 = vor.u32 %v15496_v0, %v10551_v1  ;;  %v15456_v42 = vld [vmem:[%s23373_s1 + $0x9ac] sm:$0xf]  ;;  %v10247_v57 = vld [vmem:[%s23373_s1 + $0x898] sm:$0xf0] }
  0xc4   : > { %2611 = vmatpush.bf16.msrb.mxu0 %v10726_v23  ;;  %v15460_v23 = vld [vmem:[%s23373_s1 + $0x9cc] sm:$0xf]  ;;  %v10503_v0 = vld [vmem:[%s23373_s1 + $0xa98] sm:$0xf0] }
  0xc5   : > { %2625 = vmatpush.bf16.msrb.mxu1 %v10854_v25  ;;  %v2364_v12 = vadd.f32 %v2363_v8, %v2350_v48  ;;  %v10682_v25 = vor.u32 %v15528_v4, %v10679_v5  ;;  %v15520_v48 = vld [vmem:[%s23373_s1 + $0xbac] sm:$0xf]  ;;  %v17686_v61 = vpop.f32.mrf.mxu3  ;;  %v10250_v5 = vor.u32 %v15420_v56, %v10247_v57  ;;  %v10359_v19 = vld [vmem:[%s23373_s1 + $0x978] sm:$0xf0] }
  0xc6   : > { %2639 = vmatpush.bf16.msrb.mxu2 %v10982_v26  ;;  %v10407_v26 = vld [vmem:[%s23373_s1 + $0x9d8] sm:$0xf0]  ;;  %v10650_v60 = vor.u32 %v15520_v48, %v10647_v49  ;;  %v15408_v56 = vld [vmem:[%s23373_s1 + $0x82c] sm:$0xf] }
  0xc7   : > { %2653 = vmatpush.bf16.msrb.mxu3 %v11110_v31  ;;  %v2378_v30 = vadd.f32 %v2377_v14, %v2364_v12  ;;  %v15524_v31 = vld [vmem:[%s23373_s1 + $0xbcc] sm:$0xf]  ;;  %v10410_v36 = vor.u32 %v15460_v23, %v10407_v26  ;;  %v10615_v27 = vld [vmem:[%s23373_s1 + $0xb78] sm:$0xf0] }
  0xc8   : > { %2612 = vmatpush.bf16.msrb.mxu0 %v10710_v39  ;;  %v10263_v39 = vld [vmem:[%s23373_s1 + $0x8b8] sm:$0xf0]  ;;  %v10666_v43 = vor.u32 %v15524_v31, %v10663_v33  ;;  %v15448_v12 = vld [vmem:[%s23373_s1 + $0x96c] sm:$0xf] }
  0xc9   : > { %2626 = vmatpush.bf16.msrb.mxu1 %v10838_v45  ;;  %v15488_v45 = vld [vmem:[%s23373_s1 + $0xaac] sm:$0xf]  ;;  %v10266_v50 = vor.u32 %v15424_v38, %v10263_v39  ;;  %v10343_v39 = vld [vmem:[%s23373_s1 + $0x958] sm:$0xf0] }
  0xca   : > { %2640 = vmatpush.bf16.msrb.mxu2 %v10966_v46  ;;  %v17619_v13 = vpop.f32.mrf.mxu0  ;;  %v10519_v46 = vld [vmem:[%s23373_s1 + $0xab8] sm:$0xf0]  ;;  %v15480_v23 = vld [vmem:[%s23373_s1 + $0xa6c] sm:$0xf] }
  0xcb   : > { %2654 = vmatpush.bf16.msrb.mxu3 %v11094_v53  ;;  %v10394_v53 = vor.u32 %v15456_v42, %v10391_v44  ;;  %v10522_v55 = vor.u32 %v15488_v45, %v10519_v46  ;;  %v15512_v26 = vld [vmem:[%s23373_s1 + $0xb6c] sm:$0xf]  ;;  %v10599_v46 = vld [vmem:[%s23373_s1 + $0xb58] sm:$0xf0] }
  0xcc   : > { %2613 = vmatpush.bf16.msrb.mxu0 %v10694_v62  ;;  %v10375_v62 = vld [vmem:[%s23373_s1 + $0x998] sm:$0xf0]  ;;  %v15412_v33 = vld [vmem:[%s23373_s1 + $0x84c] sm:$0xf] }
  0xcd   : > { %2627 = vmatpush.bf16.msrb.mxu1 %v10822_v2  ;;  %v15516_v2 = vld [vmem:[%s23373_s1 + $0xb8c] sm:$0xf]  ;;  %v2405_v8 = vpop.f32.mrf.mxu1  ;;  %v10199_v57 = vld [vmem:[%s23373_s1 + $0x838] sm:$0xf0] }
  0xce   : > { %2641 = vmatpush.bf16.msrb.mxu2 %v10950_v3  ;;  %v10631_v3 = vld [vmem:[%s23373_s1 + $0xb98] sm:$0xf0]  ;;  %v15476_v42 = vld [vmem:[%s23373_s1 + $0xa4c] sm:$0xf] }
  0xcf   : > { %2655 = vmatpush.bf16.msrb.mxu3 %v11078_v6  ;;  %2614 = vmatmul.bf16.vlgmr.msrb.gmra.mxu0 %v16836_v11  ;;  %v10378_v6 = vor.u32 %v15452_v58, %v10375_v62  ;;  %v10634_v14 = vor.u32 %v15516_v2, %v10631_v3  ;;  %v15508_v45 = vld [vmem:[%s23373_s1 + $0xb4c] sm:$0xf]  ;;  %v10327_v62 = vld [vmem:[%s23373_s1 + $0x938] sm:$0xf0]  ;;  %v10202_v3 = vor.u32 %v15408_v56, %v10199_v57 }
  0xd0   : > { %2662 = vmatpush.bf16.msra.mxu0 %v10298_v7  ;;  %2628 = vmatmul.bf16.vlgmr.msrb.gmra.mxu1 %v16849_v17  ;;  %v10506_v7 = vor.u32 %v15484_v63, %v10503_v0  ;;  %v15440_v58 = vld [vmem:[%s23373_s1 + $0x92c] sm:$0xf]  ;;  %v10455_v0 = vld [vmem:[%s23373_s1 + $0xa38] sm:$0xf0] }
  0xd1   : > { %2676 = vmatpush.bf16.msra.mxu1 %v10426_v9  ;;  %2642 = vmatmul.bf16.vlgmr.msrb.gmra.mxu2 %v16847_v16  ;;  %v15416_v9 = vld [vmem:[%s23373_s1 + $0x86c] sm:$0xf]  ;;  %v10583_v2 = vld [vmem:[%s23373_s1 + $0xb38] sm:$0xf0] }
  0xd2   : > { %2690 = vmatpush.bf16.msra.mxu2 %v10554_v10  ;;  %2656 = vmatmul.bf16.vlgmr.msrb.gmra.mxu3 %v16857_v20  ;;  %v2391_v1 = vpop.f32.mrf.mxu0  ;;  %v10231_v10 = vld [vmem:[%s23373_s1 + $0x878] sm:$0xf0]  ;;  %v15472_v63 = vld [vmem:[%s23373_s1 + $0xa2c] sm:$0xf] }
  0xd3   : > { %2704 = vmatpush.bf16.msra.mxu3 %v10682_v25  ;;  %v2392_v4 = vadd.f32 %v2391_v1, %v2378_v30  ;;  %v10487_v25 = vld [vmem:[%s23373_s1 + $0xa78] sm:$0xf0]  ;;  %v10234_v28 = vor.u32 %v15416_v9, %v10231_v10  ;;  %v10362_v30 = vor.u32 %v15448_v12, %v10359_v19  ;;  %v15504_v1 = vld [vmem:[%s23373_s1 + $0xb2c] sm:$0xf] }
  0xd4   : > { %2663 = vmatpush.bf16.msra.mxu0 %v10282_v35  ;;  %v10490_v31 = vor.u32 %v15480_v23, %v10487_v25  ;;  %v10215_v35 = vld [vmem:[%s23373_s1 + $0x858] sm:$0xf0]  ;;  %v2419_v38 = vpop.f32.mrf.mxu2  ;;  %v15468_v10 = vld [vmem:[%s23373_s1 + $0xa0c] sm:$0xf]  ;;  %v10586_v12 = vor.u32 %v15504_v1, %v10583_v2 }
  0xd5   : > { %2677 = vmatpush.bf16.msra.mxu1 %v10410_v36  ;;  %v2406_v18 = vadd.f32 %v2405_v8, %v2392_v4  ;;  %v15444_v36 = vld [vmem:[%s23373_s1 + $0x94c] sm:$0xf]  ;;  %v2433_v48 = vpop.f32.mrf.mxu3  ;;  %v10218_v49 = vor.u32 %v15412_v33, %v10215_v35  ;;  %v10311_v9 = vld [vmem:[%s23373_s1 + $0x918] sm:$0xf0] }
  0xd6   : > { %2691 = vmatpush.bf16.msra.mxu2 %v10538_v37  ;;  %v10618_v37 = vor.u32 %v15512_v26, %v10615_v27  ;;  %v15404_v4 = vld [vmem:[%s23373_s1 + $0x80c] sm:$0xf]  ;;  %v10567_v19 = vld [vmem:[%s23373_s1 + $0xb18] sm:$0xf0] }
  0xd7   : > { %2705 = vmatpush.bf16.msra.mxu3 %v10666_v43  ;;  %v10471_v43 = vld [vmem:[%s23373_s1 + $0xa58] sm:$0xf0]  ;;  %v2420_v44 = vadd.f32 %v2419_v38, %v2406_v18  ;;  %v15436_v8 = vld [vmem:[%s23373_s1 + $0x90c] sm:$0xf] }
  0xd8   : > { %2664 = vmatpush.bf16.msra.mxu0 %v10266_v50  ;;  %v15500_v18 = vld [vmem:[%s23373_s1 + $0xb0c] sm:$0xf]  ;;  %v10807_v25 = vld [vmem:[%s23373_s1 + $0xcf8] sm:$0xf0]  ;;  %v10314_v33 = vor.u32 %v15436_v8, %v10311_v9 }
  0xd9   : > { %2678 = vmatpush.bf16.msra.mxu1 %v10394_v53  ;;  %v17751_v50 = vadd.f32 %v2433_v48, %v2420_v44  ;;  %v10346_v53 = vor.u32 %v15444_v36, %v10343_v39  ;;  %v15560_v23 = vld [vmem:[%s23373_s1 + $0xcec] sm:$0xf]  ;;  %v10570_v38 = vor.u32 %v15500_v18, %v10567_v19  ;;  %v11175_v57 = vld [vmem:[%s23373_s1 + $0xfd8] sm:$0xf0] }
  0xda   : > { %2692 = vmatpush.bf16.msra.mxu2 %v10522_v55  ;;  %v10474_v55 = vor.u32 %v15476_v42, %v10471_v43  ;;  %v15592_v26 = vld [vmem:[%s23373_s1 + $0xdec] sm:$0xf]  ;;  %v10810_v39 = vor.u32 %v15560_v23, %v10807_v25  ;;  %v10775_v2 = vld [vmem:[%s23373_s1 + $0xcb8] sm:$0xf0] }
  0xdb   : > { %2706 = vmatpush.bf16.msra.mxu3 %v10650_v60  ;;  %v10602_v60 = vor.u32 %v15508_v45, %v10599_v46  ;;  %v15656_v36 = vld [vmem:[%s23373_s1 + $0xfec] sm:$0xf]  ;;  %v10791_v45 = vld [vmem:[%s23373_s1 + $0xcd8] sm:$0xf0] }
  0xdc   : > { %2665 = vmatpush.bf16.msra.mxu0 %v10250_v5  ;;  %v10183_v5 = vld [vmem:[%s23373_s1 + $0x818] sm:$0xf0]  ;;  %v15556_v44 = vld [vmem:[%s23373_s1 + $0xccc] sm:$0xf] }
  0xdd   : > { %2679 = vmatpush.bf16.msra.mxu1 %v10378_v6  ;;  %v10330_v6 = vor.u32 %v15440_v58, %v10327_v62  ;;  %v10186_v27 = vor.u32 %v15404_v4, %v10183_v5  ;;  %v15588_v46 = vld [vmem:[%s23373_s1 + $0xdcc] sm:$0xf]  ;;  %v17849_v58 = vpop.f32.mrf.mxu0  ;;  %v10794_v62 = vor.u32 %v15556_v44, %v10791_v45  ;;  %v10903_v5 = vld [vmem:[%s23373_s1 + $0xdb8] sm:$0xf0] }
  0xde   : > { %2693 = vmatpush.bf16.msra.mxu2 %v10506_v7  ;;  %v10458_v7 = vor.u32 %v15472_v63, %v10455_v0  ;;  %v15652_v56 = vld [vmem:[%s23373_s1 + $0xfcc] sm:$0xf]  ;;  %v11159_v9 = vld [vmem:[%s23373_s1 + $0xfb8] sm:$0xf0] }
  0xdf   : > { %2707 = vmatpush.bf16.msra.mxu3 %v10634_v14  ;;  %v10439_v14 = vld [vmem:[%s23373_s1 + $0xa18] sm:$0xf0]  ;;  %v15552_v1 = vld [vmem:[%s23373_s1 + $0xcac] sm:$0xf]  ;;  %v11178_v4 = vor.u32 %v15652_v56, %v11175_v57 }
  0xe0   : > { %2666 = vmatpush.bf16.msra.mxu0 %v10234_v28  ;;  %v10935_v28 = vld [vmem:[%s23373_s1 + $0xdf8] sm:$0xf0]  ;;  %v10442_v35 = vor.u32 %v15468_v10, %v10439_v14  ;;  %v15648_v8 = vld [vmem:[%s23373_s1 + $0xfac] sm:$0xf]  ;;  %v10778_v10 = vor.u32 %v15552_v1, %v10775_v2 }
  0xe1   : > { %2680 = vmatpush.bf16.msra.mxu1 %v10362_v30  ;;  %v15624_v30 = vld [vmem:[%s23373_s1 + $0xeec] sm:$0xf]  ;;  %v10938_v42 = vor.u32 %v15592_v26, %v10935_v28  ;;  %v10759_v18 = vld [vmem:[%s23373_s1 + $0xc98] sm:$0xf0]  ;;  %v17901_v26 = vpop.f32.mrf.mxu3 }
  0xe2   : > { %2694 = vmatpush.bf16.msra.mxu2 %v10490_v31  ;;  %v11063_v31 = vld [vmem:[%s23373_s1 + $0xef8] sm:$0xf0]  ;;  %v15548_v14 = vld [vmem:[%s23373_s1 + $0xc8c] sm:$0xf] }
  0xe3   : > { %2708 = vmatpush.bf16.msra.mxu3 %v10618_v37  ;;  %v11191_v37 = vld [vmem:[%s23373_s1 + $0xff8] sm:$0xf0]  ;;  %v11066_v43 = vor.u32 %v15624_v30, %v11063_v31  ;;  %v15612_v23 = vld [vmem:[%s23373_s1 + $0xe8c] sm:$0xf]  ;;  %v10762_v30 = vor.u32 %v15548_v14, %v10759_v18 }
  0xe4   : > { %2667 = vmatpush.bf16.msra.mxu0 %v10218_v49  ;;  %v11194_v48 = vor.u32 %v15656_v36, %v11191_v37  ;;  %v10919_v49 = vld [vmem:[%s23373_s1 + $0xdd8] sm:$0xf0]  ;;  %v15544_v37 = vld [vmem:[%s23373_s1 + $0xc6c] sm:$0xf] }
  0xe5   : > { %2681 = vmatpush.bf16.msra.mxu1 %v10346_v53  ;;  %v15620_v53 = vld [vmem:[%s23373_s1 + $0xecc] sm:$0xf]  ;;  %v10922_v63 = vor.u32 %v15588_v46, %v10919_v49  ;;  %v10887_v19 = vld [vmem:[%s23373_s1 + $0xd98] sm:$0xf0] }
  0xe6   : > { %2695 = vmatpush.bf16.msra.mxu2 %v10474_v55  ;;  %v11047_v55 = vld [vmem:[%s23373_s1 + $0xed8] sm:$0xf0]  ;;  %v15608_v45 = vld [vmem:[%s23373_s1 + $0xe6c] sm:$0xf] }
  0xe7   : > { %2709 = vmatpush.bf16.msra.mxu3 %v10602_v60  ;;  %v17851_v60 = vpop.f32.mrf.mxu1  ;;  %v11050_v0 = vor.u32 %v15620_v53, %v11047_v55  ;;  %v11015_v25 = vld [vmem:[%s23373_s1 + $0xe98] sm:$0xf0]  ;;  %v15540_v57 = vld [vmem:[%s23373_s1 + $0xc4c] sm:$0xf] }
  0xe8   : > { %2668 = vmatpush.bf16.msra.mxu0 %v10202_v3  ;;  %v15584_v3 = vld [vmem:[%s23373_s1 + $0xdac] sm:$0xf]  ;;  %v11143_v28 = vld [vmem:[%s23373_s1 + $0xf98] sm:$0xf0]  ;;  %v11018_v36 = vor.u32 %v15612_v23, %v11015_v25 }
  0xe9   : > { %2682 = vmatpush.bf16.msra.mxu1 %v10330_v6  ;;  %v15616_v6 = vld [vmem:[%s23373_s1 + $0xeac] sm:$0xf]  ;;  %v10871_v44 = vld [vmem:[%s23373_s1 + $0xd78] sm:$0xf0] }
  0xea   : > { %2696 = vmatpush.bf16.msra.mxu2 %v10458_v7  ;;  %v11031_v7 = vld [vmem:[%s23373_s1 + $0xeb8] sm:$0xf0]  ;;  %v15604_v2 = vld [vmem:[%s23373_s1 + $0xe4c] sm:$0xf] }
  0xeb   : > { %2710 = vmatpush.bf16.msra.mxu3 %v10586_v12  ;;  %v10906_v12 = vor.u32 %v15584_v3, %v10903_v5  ;;  %v10999_v46 = vld [vmem:[%s23373_s1 + $0xe78] sm:$0xf0]  ;;  %v15636_v5 = vld [vmem:[%s23373_s1 + $0xf4c] sm:$0xf] }
  0xec   : > { %2669 = vmatpush.bf16.msra.mxu0 %v10186_v27  ;;  %v15644_v27 = vld [vmem:[%s23373_s1 + $0xf8c] sm:$0xf]  ;;  %v2447_v31 = vpop.f32.mrf.mxu0  ;;  %v11127_v49 = vld [vmem:[%s23373_s1 + $0xf78] sm:$0xf0]  ;;  %v11002_v56 = vor.u32 %v15608_v45, %v10999_v46  ;;  %v11309_v46 = vld [vmem:[%s23373_s1 + $0xe0] sm:$0xf] }
  0xed   : > { %2683 = vmatpush.bf16.msra.mxu1 %v10314_v33  ;;  %v10855_v1 = vld [vmem:[%s23373_s1 + $0xd58] sm:$0xf0]  ;;  %v15568_v18 = vld [vmem:[%s23373_s1 + $0xd2c] sm:$0xf] }
  0xee   : > { %2697 = vmatpush.bf16.msra.mxu2 %v10442_v35  ;;  %v10983_v3 = vld [vmem:[%s23373_s1 + $0xe58] sm:$0xf0]  ;;  %v15600_v23 = vld [vmem:[%s23373_s1 + $0xe2c] sm:$0xf] }
  0xef   : > { %2711 = vmatpush.bf16.msra.mxu3 %v10570_v38  ;;  %2670 = vmatmul.bf16.vlgmr.msra.gmra.mxu0 %v16686_v47  ;;  %v11034_v47 = vor.u32 %v15616_v6, %v11031_v7  ;;  %v2461_v33 = vpop.f32.mrf.mxu1  ;;  %v10743_v38 = vld [vmem:[%s23373_s1 + $0xc78] sm:$0xf0] }
  0xf0   : > { %2718 = vmatpush.bf16.msrb.mxu0 %v10810_v39  ;;  %2684 = vmatmul.bf16.vlgmr.msra.gmra.mxu1 %v16693_v54  ;;  %v17890_v54 = vpop.f32.mrf.mxu2  ;;  %v15576_v39 = vld [vmem:[%s23373_s1 + $0xd6c] sm:$0xf]  ;;  %v10746_v53 = vor.u32 %v15544_v37, %v10743_v38  ;;  %v11111_v6 = vld [vmem:[%s23373_s1 + $0xf58] sm:$0xf0] }
  0xf1   : > { %2732 = vmatpush.bf16.msrb.mxu1 %v10938_v42  ;;  %2698 = vmatmul.bf16.vlgmr.msra.gmra.mxu2 %v16691_v52  ;;  %v15580_v52 = vld [vmem:[%s23373_s1 + $0xd8c] sm:$0xf]  ;;  %v2462_v42 = vadd.f32 %v2461_v33, %v2447_v31  ;;  %v10874_v55 = vor.u32 %v15576_v39, %v10871_v44  ;;  %v10711_v14 = vld [vmem:[%s23373_s1 + $0xc38] sm:$0xf0] }
  0xf2   : > { %2746 = vmatpush.bf16.msrb.mxu2 %v11066_v43  ;;  %2712 = vmatmul.bf16.vlgmr.msra.gmra.mxu3 %v16705_v59  ;;  %v11162_v59 = vor.u32 %v15648_v8, %v11159_v9  ;;  %v10890_v35 = vor.u32 %v15580_v52, %v10887_v19  ;;  %v11146_v43 = vor.u32 %v15644_v27, %v11143_v28  ;;  %v10839_v19 = vld [vmem:[%s23373_s1 + $0xd38] sm:$0xf0]  ;;  %v15632_v27 = vld [vmem:[%s23373_s1 + $0xf2c] sm:$0xf] }
  0xf3   : > { %2760 = vmatpush.bf16.msrb.mxu3 %v11194_v48  ;;  %v15640_v48 = vld [vmem:[%s23373_s1 + $0xf6c] sm:$0xf]  ;;  %v10967_v25 = vld [vmem:[%s23373_s1 + $0xe38] sm:$0xf0] }
  0xf4   : > { %2719 = vmatpush.bf16.msrb.mxu0 %v10794_v62  ;;  %v10727_v62 = vld [vmem:[%s23373_s1 + $0xc58] sm:$0xf0]  ;;  %v15532_v31 = vld [vmem:[%s23373_s1 + $0xc0c] sm:$0xf] }
  0xf5   : > { %2733 = vmatpush.bf16.msrb.mxu1 %v10922_v63  ;;  %v15572_v63 = vld [vmem:[%s23373_s1 + $0xd4c] sm:$0xf]  ;;  %v10730_v8 = vor.u32 %v15540_v57, %v10727_v62  ;;  %v2489_v9 = vpop.f32.mrf.mxu3  ;;  %v11095_v28 = vld [vmem:[%s23373_s1 + $0xf38] sm:$0xf0]  ;;  %v15241_v57 = vld [vmem:[%s23373_s1 + $0x2ec] sm:$0xf0] }
  0xf6   : > { %2747 = vmatpush.bf16.msrb.mxu2 %v11050_v0  ;;  %v11130_v0 = vor.u32 %v15640_v48, %v11127_v49  ;;  %v10695_v33 = vld [vmem:[%s23373_s1 + $0xc18] sm:$0xf0]  ;;  %v15564_v37 = vld [vmem:[%s23373_s1 + $0xd0c] sm:$0xf]  ;;  %v15177_v48 = vld [vmem:[%s23373_s1 + $0xec] sm:$0xf0] }
  0xf7   : > { %2761 = vmatpush.bf16.msrb.mxu3 %v11178_v4  ;;  %v10823_v38 = vld [vmem:[%s23373_s1 + $0xd18] sm:$0xf0]  ;;  %v15596_v39 = vld [vmem:[%s23373_s1 + $0xe0c] sm:$0xf]  ;;  %v11437_v49 = vld [vmem:[%s23373_s1 + $0x1e0] sm:$0xf] }
  0xf8   : > { %2720 = vmatpush.bf16.msrb.mxu0 %v10778_v10  ;;  %v2475_v4 = vpop.f32.mrf.mxu2  ;;  %v10858_v10 = vor.u32 %v15572_v63, %v10855_v1  ;;  %v15628_v44 = vld [vmem:[%s23373_s1 + $0xf0c] sm:$0xf]  ;;  %v11079_v45 = vld [vmem:[%s23373_s1 + $0xf18] sm:$0xf0]  ;;  %v10826_v62 = vor.u32 %v15564_v37, %v10823_v38  ;;  %v15273_v1 = vld [vmem:[%s23373_s1 + $0x3ec] sm:$0xf0] }
  0xf9   : > { %2734 = vmatpush.bf16.msrb.mxu1 %v10906_v12  ;;  %v2476_v7 = vadd.f32 %v2475_v4, %v2462_v42  ;;  %v10986_v12 = vor.u32 %v15604_v2, %v10983_v3  ;;  %v11098_v42 = vor.u32 %v15632_v27, %v11095_v28  ;;  %v11082_v2 = vor.u32 %v15628_v44, %v11079_v45  ;;  %v11277_v28 = vld [vmem:[%s23373_s1 + $0xa0] sm:$0xf]  ;;  %v15233_v37 = vld [vmem:[%s23373_s1 + $0x2ac] sm:$0xf0] }
  0xfa   : > { %2748 = vmatpush.bf16.msrb.mxu2 %v11034_v47  ;;  %v15536_v47 = vld [vmem:[%s23373_s1 + $0xc2c] sm:$0xf]  ;;  %v11310_v3 = vor.u32 %v15177_v48, %v11309_v46  ;;  %v15265_v38 = vld [vmem:[%s23373_s1 + $0x3ac] sm:$0xf0] }
  0xfb   : > { %2762 = vmatpush.bf16.msrb.mxu3 %v11162_v59  ;;  %v17966_v52 = vadd.f32 %v2489_v9, %v2476_v7  ;;  %v11114_v59 = vor.u32 %v15636_v5, %v11111_v6  ;;  %v18031_v6 = vpop.f32.mrf.mxu0  ;;  %v11293_v7 = vld [vmem:[%s23373_s1 + $0xc0] sm:$0xf]  ;;  %v15165_v44 = vld [vmem:[%s23373_s1 + $0x8c] sm:$0xf0] }
  0xfc   : > { %2721 = vmatpush.bf16.msrb.mxu0 %v10762_v30  ;;  %v10714_v30 = vor.u32 %v15536_v47, %v10711_v14  ;;  %v11421_v9 = vld [vmem:[%s23373_s1 + $0x1c0] sm:$0xf]  ;;  %v15237_v14 = vld [vmem:[%s23373_s1 + $0x2cc] sm:$0xf0] }
  0xfd   : > { %2735 = vmatpush.bf16.msrb.mxu1 %v10890_v35  ;;  %v10842_v35 = vor.u32 %v15568_v18, %v10839_v19  ;;  %v11549_v47 = vld [vmem:[%s23373_s1 + $0x2c0] sm:$0xf]  ;;  %v18057_v19 = vpop.f32.mrf.mxu1  ;;  %v18098_v46 = vpop.f32.mrf.mxu3  ;;  %v15197_v48 = vld [vmem:[%s23373_s1 + $0x18c] sm:$0xf0] }
  0xfe   : > { %2749 = vmatpush.bf16.msrb.mxu2 %v11018_v36  ;;  %v10970_v36 = vor.u32 %v15600_v23, %v10967_v25  ;;  %v11677_v18 = vld [vmem:[%s23373_s1 + $0x3c0] sm:$0xf]  ;;  %v11550_v27 = vor.u32 %v15237_v14, %v11549_v47  ;;  %v15257_v47 = vld [vmem:[%s23373_s1 + $0x36c] sm:$0xf0] }
  0xff   : > { %2763 = vmatpush.bf16.msrb.mxu3 %v11146_v43  ;;  %v10951_v43 = vld [vmem:[%s23373_s1 + $0xe18] sm:$0xf0] }
 0x100   : > { %2722 = vmatpush.bf16.msrb.mxu0 %v10746_v53  ;;  %v10698_v53 = vor.u32 %v15532_v31, %v10695_v33  ;;  %v10954_v63 = vor.u32 %v15596_v39, %v10951_v43  ;;  %v11405_v31 = vld [vmem:[%s23373_s1 + $0x1a0] sm:$0xf] }
 0x101   : > { %2736 = vmatpush.bf16.msrb.mxu1 %v10874_v55  ;;  %v15209_v55 = vld [vmem:[%s23373_s1 + $0x1ec] sm:$0xf0] }
 0x102   : > { %2750 = vmatpush.bf16.msrb.mxu2 %v11002_v56  ;;  %v11565_v56 = vld [vmem:[%s23373_s1 + $0x2e0] sm:$0xf]  ;;  %v11438_v4 = vor.u32 %v15209_v55, %v11437_v49 }
 0x103   : > { %2764 = vmatpush.bf16.msrb.mxu3 %v11130_v0  ;;  %v11693_v0 = vld [vmem:[%s23373_s1 + $0x3e0] sm:$0xf]  ;;  %v11566_v5 = vor.u32 %v15241_v57, %v11565_v56  ;;  %v15261_v57 = vld [vmem:[%s23373_s1 + $0x38c] sm:$0xf0] }
 0x104   : > { %2723 = vmatpush.bf16.msrb.mxu0 %v10730_v8  ;;  %v15173_v8 = vld [vmem:[%s23373_s1 + $0xcc] sm:$0xf0]  ;;  %v11517_v49 = vld [vmem:[%s23373_s1 + $0x280] sm:$0xf] }
 0x105   : > { %2737 = vmatpush.bf16.msrb.mxu1 %v10858_v10  ;;  %v11694_v10 = vor.u32 %v15273_v1, %v11693_v0  ;;  %v11294_v23 = vor.u32 %v15173_v8, %v11293_v7  ;;  %v11645_v56 = vld [vmem:[%s23373_s1 + $0x380] sm:$0xf]  ;;  %v15193_v8 = vld [vmem:[%s23373_s1 + $0x16c] sm:$0xf0] }
 0x106   : > { %2751 = vmatpush.bf16.msrb.mxu2 %v10986_v12  ;;  %v15205_v12 = vld [vmem:[%s23373_s1 + $0x1cc] sm:$0xf0] }
 0x107   : > { %2765 = vmatpush.bf16.msrb.mxu3 %v11114_v59  ;;  %v15269_v59 = vld [vmem:[%s23373_s1 + $0x3cc] sm:$0xf0]  ;;  %v11422_v25 = vor.u32 %v15205_v12, %v11421_v9  ;;  %v11501_v9 = vld [vmem:[%s23373_s1 + $0x260] sm:$0xf] }
 0x108   : > { %2724 = vmatpush.bf16.msrb.mxu0 %v10714_v30  ;;  %v15169_v30 = vld [vmem:[%s23373_s1 + $0xac] sm:$0xf0]  ;;  %v11678_v33 = vor.u32 %v15269_v59, %v11677_v18  ;;  %v11629_v12 = vld [vmem:[%s23373_s1 + $0x360] sm:$0xf] }
 0x109   : > { %2738 = vmatpush.bf16.msrb.mxu1 %v10842_v35  ;;  %v15201_v35 = vld [vmem:[%s23373_s1 + $0x1ac] sm:$0xf0]  ;;  %v11278_v39 = vor.u32 %v15169_v30, %v11277_v28  ;;  %v11630_v28 = vor.u32 %v15257_v47, %v11629_v12  ;;  %v11949_v47 = vld [vmem:[%s23373_s1 + $0x5e0] sm:$0xf] }
 0x10a   : > { %2752 = vmatpush.bf16.msrb.mxu2 %v10970_v36  ;;  %v11533_v36 = vld [vmem:[%s23373_s1 + $0x2a0] sm:$0xf]  ;;  %v11406_v43 = vor.u32 %v15201_v35, %v11405_v31  ;;  %v15189_v31 = vld [vmem:[%s23373_s1 + $0x14c] sm:$0xf0] }
 0x10b   : > { %2766 = vmatpush.bf16.msrb.mxu3 %v11098_v42  ;;  %v18087_v42 = vpop.f32.mrf.mxu2  ;;  %v15221_v35 = vld [vmem:[%s23373_s1 + $0x24c] sm:$0xf0] }
 0x10c   : > { %2725 = vmatpush.bf16.msrb.mxu0 %v10698_v53  ;;  %v15229_v53 = vld [vmem:[%s23373_s1 + $0x28c] sm:$0xf0]  ;;  %v2503_v55 = vpop.f32.mrf.mxu0 }
 0x10d   : > { %2739 = vmatpush.bf16.msrb.mxu1 %v10826_v62  ;;  %v2504_v62 = vadd.f32 %v2503_v55, %v17966_v52  ;;  %v11518_v1 = vor.u32 %v15229_v53, %v11517_v49  ;;  %v11646_v52 = vor.u32 %v15261_v57, %v11645_v56  ;;  %v15185_v49 = vld [vmem:[%s23373_s1 + $0x12c] sm:$0xf0]  ;;  %v11469_v53 = vld [vmem:[%s23373_s1 + $0x220] sm:$0xf] }
 0x10e   : > { %2753 = vmatpush.bf16.msrb.mxu2 %v10954_v63  ;;  %v15217_v55 = vld [vmem:[%s23373_s1 + $0x22c] sm:$0xf0]  ;;  %v11597_v56 = vld [vmem:[%s23373_s1 + $0x320] sm:$0xf] }
 0x10f   : > { %2767 = vmatpush.bf16.msrb.mxu3 %v11082_v2  ;;  %2726 = vmatmul.bf16.vlgmr.msrb.gmra.mxu0 %v16836_v11  ;;  %v11661_v11 = vld [vmem:[%s23373_s1 + $0x3a0] sm:$0xf]  ;;  %v2517_v2 = vpop.f32.mrf.mxu1  ;;  %v15249_v57 = vld [vmem:[%s23373_s1 + $0x32c] sm:$0xf0] }
 0x110   : > { %4062 = vmatpush.bf16.msra.mxu0 %v11310_v3  ;;  %2740 = vmatmul.bf16.vlgmr.msrb.gmra.mxu1 %v16849_v17  ;;  %v11261_v17 = vld [vmem:[%s23373_s1 + $0x80] sm:$0xf]  ;;  %v11662_v45 = vor.u32 %v15265_v38, %v11661_v11  ;;  %v2518_v7 = vadd.f32 %v2517_v2, %v2504_v62  ;;  %v15253_v11 = vld [vmem:[%s23373_s1 + $0x34c] sm:$0xf0]  ;;  %v11470_v2 = vor.u32 %v15217_v55, %v11469_v53 }
 0x111   : > { %4076 = vmatpush.bf16.msra.mxu1 %v11438_v4  ;;  %2754 = vmatmul.bf16.vlgmr.msrb.gmra.mxu2 %v16847_v16  ;;  %v11534_v16 = vor.u32 %v15233_v37, %v11533_v36  ;;  %v11262_v63 = vor.u32 %v15165_v44, %v11261_v17  ;;  %v11245_v3 = vld [vmem:[%s23373_s1 + $0x60] sm:$0xf]  ;;  %v15161_v4 = vld [vmem:[%s23373_s1 + $0x6c] sm:$0xf0] }
 0x112   : > { %4090 = vmatpush.bf16.msra.mxu2 %v11566_v5  ;;  %2768 = vmatmul.bf16.vlgmr.msrb.gmra.mxu3 %v16857_v20  ;;  %v11389_v20 = vld [vmem:[%s23373_s1 + $0x180] sm:$0xf]  ;;  %v11246_v14 = vor.u32 %v15161_v4, %v11245_v3  ;;  %v15181_v4 = vld [vmem:[%s23373_s1 + $0x10c] sm:$0xf0] }
 0x113   : > { %4104 = vmatpush.bf16.msra.mxu3 %v11694_v10  ;;  %v11390_v0 = vor.u32 %v15197_v48, %v11389_v20  ;;  %v11373_v5 = vld [vmem:[%s23373_s1 + $0x160] sm:$0xf]  ;;  %v15225_v10 = vld [vmem:[%s23373_s1 + $0x26c] sm:$0xf0] }
 0x114   : > { %4063 = vmatpush.bf16.msra.mxu0 %v11294_v23  ;;  %v11374_v18 = vor.u32 %v15193_v8, %v11373_v5  ;;  %v11502_v59 = vor.u32 %v15225_v10, %v11501_v9  ;;  %v11229_v23 = vld [vmem:[%s23373_s1 + $0x40] sm:$0xf]  ;;  %v2531_v30 = vpop.f32.mrf.mxu2  ;;  %v15153_v20 = vld [vmem:[%s23373_s1 + $0x2c] sm:$0xf0] }
 0x115   : > { %4077 = vmatpush.bf16.msra.mxu1 %v11422_v25  ;;  %v15157_v25 = vld [vmem:[%s23373_s1 + $0x4c] sm:$0xf0]  ;;  %v2532_v36 = vadd.f32 %v2531_v30, %v2518_v7  ;;  %v11613_v37 = vld [vmem:[%s23373_s1 + $0x340] sm:$0xf]  ;;  %v2545_v38 = vpop.f32.mrf.mxu3 }
 0x116   : > { %4091 = vmatpush.bf16.msra.mxu2 %v11550_v27  ;;  %v11357_v27 = vld [vmem:[%s23373_s1 + $0x140] sm:$0xf]  ;;  %v11614_v48 = vor.u32 %v15253_v11, %v11613_v37  ;;  %v15213_v7 = vld [vmem:[%s23373_s1 + $0x20c] sm:$0xf0] }
 0x117   : > { %4105 = vmatpush.bf16.msra.mxu3 %v11678_v33  ;;  %v11485_v33 = vld [vmem:[%s23373_s1 + $0x240] sm:$0xf]  ;;  %v15245_v9 = vld [vmem:[%s23373_s1 + $0x30c] sm:$0xf0] }
 0x118   : > { %4064 = vmatpush.bf16.msra.mxu0 %v11278_v39  ;;  %v11230_v39 = vor.u32 %v15157_v25, %v11229_v23  ;;  %v11486_v17 = vor.u32 %v15221_v35, %v11485_v33  ;;  %v11213_v44 = vld [vmem:[%s23373_s1 + $0x20] sm:$0xf]  ;;  %v15305_v12 = vld [vmem:[%s23373_s1 + $0x4ec] sm:$0xf0] }
 0x119   : > { %4078 = vmatpush.bf16.msra.mxu1 %v11406_v43  ;;  %v18164_v43 = vadd.f32 %v2545_v38, %v2532_v36  ;;  %v11214_v62 = vor.u32 %v15153_v20, %v11213_v44  ;;  %v11325_v3 = vld [vmem:[%s23373_s1 + $0x100] sm:$0xf]  ;;  %v15369_v23 = vld [vmem:[%s23373_s1 + $0x6ec] sm:$0xf0] }
 0x11a   : > { %4092 = vmatpush.bf16.msra.mxu2 %v11534_v16  ;;  %v11358_v16 = vor.u32 %v15189_v31, %v11357_v27  ;;  %v11453_v5 = vld [vmem:[%s23373_s1 + $0x200] sm:$0xf]  ;;  %v11326_v25 = vor.u32 %v15181_v4, %v11325_v3  ;;  %v15401_v30 = vld [vmem:[%s23373_s1 + $0x7ec] sm:$0xf0] }
 0x11b   : > { %4106 = vmatpush.bf16.msra.mxu3 %v11662_v45  ;;  %v11341_v45 = vld [vmem:[%s23373_s1 + $0x120] sm:$0xf]  ;;  %v11454_v27 = vor.u32 %v15213_v7, %v11453_v5  ;;  %v15301_v11 = vld [vmem:[%s23373_s1 + $0x4cc] sm:$0xf0] }
 0x11c   : > { %4065 = vmatpush.bf16.msra.mxu0 %v11262_v63  ;;  %v11197_v63 = vld [vmem:[%s23373_s1] sm:$0xf]  ;;  %v15365_v44 = vld [vmem:[%s23373_s1 + $0x6cc] sm:$0xf0] }
 0x11d   : > { %4079 = vmatpush.bf16.msra.mxu1 %v11390_v0  ;;  %v15149_v0 = vld [vmem:[%s23373_s1 + $0xc] sm:$0xf0]  ;;  %v11581_v8 = vld [vmem:[%s23373_s1 + $0x300] sm:$0xf] }
 0x11e   : > { %4093 = vmatpush.bf16.msra.mxu2 %v11518_v1  ;;  %v11342_v1 = vor.u32 %v15185_v49, %v11341_v45  ;;  %v11821_v10 = vld [vmem:[%s23373_s1 + $0x4e0] sm:$0xf]  ;;  %v11582_v31 = vor.u32 %v15245_v9, %v11581_v8  ;;  %v15397_v45 = vld [vmem:[%s23373_s1 + $0x7cc] sm:$0xf0]  ;;  %v18264_v49 = vpop.f32.mrf.mxu1 }
 0x11f   : > { %4107 = vmatpush.bf16.msra.mxu3 %v11646_v52  ;;  %v11598_v52 = vor.u32 %v15249_v57, %v11597_v56  ;;  %v11822_v33 = vor.u32 %v15305_v12, %v11821_v10  ;;  %v11805_v37 = vld [vmem:[%s23373_s1 + $0x4c0] sm:$0xf]  ;;  %v15361_v3 = vld [vmem:[%s23373_s1 + $0x6ac] sm:$0xf0] }
 0x120   : > { %4066 = vmatpush.bf16.msra.mxu0 %v11246_v14  ;;  %v11198_v14 = vor.u32 %v15149_v0, %v11197_v63  ;;  %v11933_v38 = vld [vmem:[%s23373_s1 + $0x5c0] sm:$0xf]  ;;  %v11806_v53 = vor.u32 %v15301_v11, %v11805_v37  ;;  %v15393_v5 = vld [vmem:[%s23373_s1 + $0x7ac] sm:$0xf0] }
 0x121   : > { %4080 = vmatpush.bf16.msra.mxu1 %v11374_v18  ;;  %v15337_v18 = vld [vmem:[%s23373_s1 + $0x5ec] sm:$0xf0]  ;;  %v12189_v20 = vld [vmem:[%s23373_s1 + $0x7c0] sm:$0xf] }
 0x122   : > { %4094 = vmatpush.bf16.msra.mxu2 %v11502_v59  ;;  %v12077_v59 = vld [vmem:[%s23373_s1 + $0x6e0] sm:$0xf]  ;;  %v11950_v35 = vor.u32 %v15337_v18, %v11949_v47  ;;  %v12190_v0 = vor.u32 %v15397_v45, %v12189_v20  ;;  %v15293_v10 = vld [vmem:[%s23373_s1 + $0x48c] sm:$0xf0]  ;;  %v18303_v47 = vpop.f32.mrf.mxu2 }
 0x123   : > { %4108 = vmatpush.bf16.msra.mxu3 %v11630_v28  ;;  %v12205_v28 = vld [vmem:[%s23373_s1 + $0x7e0] sm:$0xf]  ;;  %v12078_v36 = vor.u32 %v15369_v23, %v12077_v59  ;;  %v15325_v18 = vld [vmem:[%s23373_s1 + $0x58c] sm:$0xf0] }
 0x124   : > { %4067 = vmatpush.bf16.msra.mxu0 %v11230_v39  ;;  %v12206_v39 = vor.u32 %v15401_v30, %v12205_v28  ;;  %v11789_v57 = vld [vmem:[%s23373_s1 + $0x4a0] sm:$0xf]  ;;  %v15357_v23 = vld [vmem:[%s23373_s1 + $0x68c] sm:$0xf0] }
 0x125   : > { %4081 = vmatpush.bf16.msra.mxu1 %v11358_v16  ;;  %v15333_v16 = vld [vmem:[%s23373_s1 + $0x5cc] sm:$0xf0]  ;;  %v11917_v63 = vld [vmem:[%s23373_s1 + $0x5a0] sm:$0xf] }
 0x126   : > { %4095 = vmatpush.bf16.msra.mxu2 %v11486_v17  ;;  %v12061_v17 = vld [vmem:[%s23373_s1 + $0x6c0] sm:$0xf]  ;;  %v11934_v55 = vor.u32 %v15333_v16, %v11933_v38  ;;  %v15389_v28 = vld [vmem:[%s23373_s1 + $0x78c] sm:$0xf0] }
 0x127   : > { %4109 = vmatpush.bf16.msra.mxu3 %v11614_v48  ;;  %v18262_v48 = vpop.f32.mrf.mxu0  ;;  %v12062_v56 = vor.u32 %v15365_v44, %v12061_v17  ;;  %v12173_v4 = vld [vmem:[%s23373_s1 + $0x7a0] sm:$0xf]  ;;  %v15289_v11 = vld [vmem:[%s23373_s1 + $0x46c] sm:$0xf0] }
 0x128   : > { %4068 = vmatpush.bf16.msra.mxu0 %v11214_v62  ;;  %v15297_v62 = vld [vmem:[%s23373_s1 + $0x4ac] sm:$0xf0]  ;;  %v11773_v9 = vld [vmem:[%s23373_s1 + $0x480] sm:$0xf] }
 0x129   : > { %4082 = vmatpush.bf16.msra.mxu1 %v11342_v1  ;;  %v15329_v1 = vld [vmem:[%s23373_s1 + $0x5ac] sm:$0xf0]  ;;  %v11901_v12 = vld [vmem:[%s23373_s1 + $0x580] sm:$0xf]  ;;  %v11774_v30 = vor.u32 %v15293_v10, %v11773_v9 }
 0x12a   : > { %4096 = vmatpush.bf16.msra.mxu2 %v11470_v2  ;;  %v12045_v2 = vld [vmem:[%s23373_s1 + $0x6a0] sm:$0xf]  ;;  %v11918_v7 = vor.u32 %v15329_v1, %v11917_v63  ;;  %v15321_v17 = vld [vmem:[%s23373_s1 + $0x56c] sm:$0xf0] }
 0x12b   : > { %4110 = vmatpush.bf16.msra.mxu3 %v11598_v52  ;;  %v11790_v52 = vor.u32 %v15297_v62, %v11789_v57  ;;  %v12046_v8 = vor.u32 %v15361_v3, %v12045_v2  ;;  %v12029_v59 = vld [vmem:[%s23373_s1 + $0x680] sm:$0xf]  ;;  %v15353_v20 = vld [vmem:[%s23373_s1 + $0x66c] sm:$0xf0] }
 0x12c   : > { %4069 = vmatpush.bf16.msra.mxu0 %v11198_v14  ;;  %v12174_v14 = vor.u32 %v15393_v5, %v12173_v4  ;;  %v11757_v37 = vld [vmem:[%s23373_s1 + $0x460] sm:$0xf]  ;;  %v15285_v63 = vld [vmem:[%s23373_s1 + $0x44c] sm:$0xf0] }
 0x12d   : > { %4083 = vmatpush.bf16.msra.mxu1 %v11326_v25  ;;  %v18314_v25 = vpop.f32.mrf.mxu3  ;;  %v11885_v38 = vld [vmem:[%s23373_s1 + $0x560] sm:$0xf]  ;;  %v15317_v2 = vld [vmem:[%s23373_s1 + $0x54c] sm:$0xf0] }
 0x12e   : > { %4097 = vmatpush.bf16.msra.mxu2 %v11454_v27  ;;  %v12157_v27 = vld [vmem:[%s23373_s1 + $0x780] sm:$0xf]  ;;  %v15349_v4 = vld [vmem:[%s23373_s1 + $0x64c] sm:$0xf0] }
 0x12f   : > { %4111 = vmatpush.bf16.msra.mxu3 %v11582_v31  ;;  %4070 = vmatmul.bf16.vlgmr.msra.gmra.mxu0 %v16641_v15  ;;  %v2559_v31 = vpop.f32.mrf.mxu0  ;;  %v12158_v16 = vor.u32 %v15389_v28, %v12157_v27  ;;  %v12013_v44 = vld [vmem:[%s23373_s1 + $0x660] sm:$0xf] }
 0x130   : > { %4118 = vmatpush.bf16.msrb.mxu0 %v11822_v33  ;;  %4084 = vmatmul.bf16.vlgmr.msra.gmra.mxu1 %v16654_v24  ;;  %v2573_v33 = vpop.f32.mrf.mxu1  ;;  %v12141_v45 = vld [vmem:[%s23373_s1 + $0x760] sm:$0xf]  ;;  %v12014_v57 = vor.u32 %v15353_v20, %v12013_v44  ;;  %v15309_v44 = vld [vmem:[%s23373_s1 + $0x50c] sm:$0xf0] }
 0x131   : > { %4132 = vmatpush.bf16.msrb.mxu1 %v11950_v35  ;;  %4098 = vmatmul.bf16.vlgmr.msra.gmra.mxu2 %v16646_v21  ;;  %v11902_v35 = vor.u32 %v15325_v18, %v11901_v12  ;;  %v11741_v62 = vld [vmem:[%s23373_s1 + $0x440] sm:$0xf] }
 0x132   : > { %4146 = vmatpush.bf16.msrb.mxu2 %v12078_v36  ;;  %4112 = vmatmul.bf16.vlgmr.msra.gmra.mxu3 %v16666_v32  ;;  %v12030_v36 = vor.u32 %v15357_v23, %v12029_v59  ;;  %v11997_v3 = vld [vmem:[%s23373_s1 + $0x640] sm:$0xf]  ;;  %v11742_v9 = vor.u32 %v15285_v63, %v11741_v62  ;;  %v15281_v59 = vld [vmem:[%s23373_s1 + $0x42c] sm:$0xf0]  ;;  %v11311_v62 = vld [vmem:[%s23373_s1 + $0xf0] sm:$0xf0] }
 0x133   : > { %4160 = vmatpush.bf16.msrb.mxu3 %v12206_v39  ;;  %v2574_v39 = vadd.f32 %v2573_v33, %v2559_v31  ;;  %v11725_v18 = vld [vmem:[%s23373_s1 + $0x420] sm:$0xf]  ;;  %v15345_v33 = vld [vmem:[%s23373_s1 + $0x62c] sm:$0xf0]  ;;  %v15207_v63 = vld [vmem:[%s23373_s1 + $0x1e4] sm:$0xf] }
 0x134   : > { %4119 = vmatpush.bf16.msrb.mxu0 %v11806_v53  ;;  %v15385_v53 = vld [vmem:[%s23373_s1 + $0x76c] sm:$0xf0]  ;;  %v2587_v5 = vpop.f32.mrf.mxu2  ;;  %v11853_v23 = vld [vmem:[%s23373_s1 + $0x520] sm:$0xf] }
 0x135   : > { %4133 = vmatpush.bf16.msrb.mxu1 %v11934_v55  ;;  %v11758_v55 = vor.u32 %v15289_v11, %v11757_v37  ;;  %v12142_v1 = vor.u32 %v15385_v53, %v12141_v45  ;;  %v2601_v10 = vpop.f32.mrf.mxu3  ;;  %v11981_v31 = vld [vmem:[%s23373_s1 + $0x620] sm:$0xf]  ;;  %v11726_v37 = vor.u32 %v15281_v59, %v11725_v18  ;;  %v15341_v53 = vld [vmem:[%s23373_s1 + $0x60c] sm:$0xf0]  ;;  %v15171_v18 = vld [vmem:[%s23373_s1 + $0xc4] sm:$0xf] }
 0x136   : > { %4147 = vmatpush.bf16.msrb.mxu2 %v12062_v56  ;;  %v11886_v56 = vor.u32 %v15321_v17, %v11885_v38  ;;  %v11709_v11 = vld [vmem:[%s23373_s1 + $0x400] sm:$0xf]  ;;  %v15277_v38 = vld [vmem:[%s23373_s1 + $0x40c] sm:$0xf0]  ;;  %v11295_v59 = vld [vmem:[%s23373_s1 + $0xd0] sm:$0xf0] }
 0x137   : > { %4161 = vmatpush.bf16.msrb.mxu3 %v12190_v0  ;;  %v11869_v0 = vld [vmem:[%s23373_s1 + $0x540] sm:$0xf] }
 0x138   : > { %4120 = vmatpush.bf16.msrb.mxu0 %v11790_v52  ;;  %v12125_v52 = vld [vmem:[%s23373_s1 + $0x740] sm:$0xf]  ;;  %v11870_v12 = vor.u32 %v15317_v2, %v11869_v0  ;;  %v11710_v0 = vor.u32 %v15277_v38, %v11709_v11  ;;  %v15239_v2 = vld [vmem:[%s23373_s1 + $0x2e4] sm:$0xf]  ;;  %v11298_v11 = vor.u32 %v15171_v18, %v11295_v59  ;;  %v11647_v18 = vld [vmem:[%s23373_s1 + $0x390] sm:$0xf0] }
 0x139   : > { %4134 = vmatpush.bf16.msrb.mxu1 %v11918_v7  ;;  %v15381_v7 = vld [vmem:[%s23373_s1 + $0x74c] sm:$0xf0]  ;;  %v11837_v17 = vld [vmem:[%s23373_s1 + $0x500] sm:$0xf] }
 0x13a   : > { %4148 = vmatpush.bf16.msrb.mxu2 %v12046_v8  ;;  %v2588_v8 = vadd.f32 %v2587_v5, %v2574_v39  ;;  %v12126_v28 = vor.u32 %v15381_v7, %v12125_v52  ;;  %v11965_v20 = vld [vmem:[%s23373_s1 + $0x600] sm:$0xf]  ;;  %v15271_v52 = vld [vmem:[%s23373_s1 + $0x3e4] sm:$0xf]  ;;  %v11695_v7 = vld [vmem:[%s23373_s1 + $0x3f0] sm:$0xf0] }
 0x13b   : > { %4162 = vmatpush.bf16.msrb.mxu3 %v12174_v14  ;;  %v11998_v14 = vor.u32 %v15349_v4, %v11997_v3  ;;  %v11567_v3 = vld [vmem:[%s23373_s1 + $0x2f0] sm:$0xf0]  ;;  %v11838_v4 = vor.u32 %v15309_v44, %v11837_v17  ;;  %v11966_v5 = vor.u32 %v15341_v53, %v11965_v20  ;;  %v15199_v44 = vld [vmem:[%s23373_s1 + $0x1a4] sm:$0xf] }
 0x13c   : > { %4121 = vmatpush.bf16.msrb.mxu0 %v11774_v30  ;;  %v18379_v27 = vadd.f32 %v2601_v10, %v2588_v8  ;;  %v15313_v30 = vld [vmem:[%s23373_s1 + $0x52c] sm:$0xf0]  ;;  %v11279_v17 = vld [vmem:[%s23373_s1 + $0xb0] sm:$0xf0]  ;;  %v15231_v53 = vld [vmem:[%s23373_s1 + $0x2a4] sm:$0xf] }
 0x13d   : > { %4135 = vmatpush.bf16.msrb.mxu1 %v11902_v35  ;;  %v12109_v35 = vld [vmem:[%s23373_s1 + $0x720] sm:$0xf]  ;;  %v11854_v39 = vor.u32 %v15313_v30, %v11853_v23  ;;  %v15203_v23 = vld [vmem:[%s23373_s1 + $0x1c4] sm:$0xf]  ;;  %v11423_v30 = vld [vmem:[%s23373_s1 + $0x1d0] sm:$0xf0] }
 0x13e   : > { %4149 = vmatpush.bf16.msrb.mxu2 %v12030_v36  ;;  %v15377_v36 = vld [vmem:[%s23373_s1 + $0x72c] sm:$0xf0]  ;;  %v11426_v38 = vor.u32 %v15203_v23, %v11423_v30 }
 0x13f   : > { %4163 = vmatpush.bf16.msrb.mxu3 %v12158_v16  ;;  %v11982_v16 = vor.u32 %v15345_v33, %v11981_v31  ;;  %v12110_v45 = vor.u32 %v15377_v36, %v12109_v35  ;;  %v15235_v31 = vld [vmem:[%s23373_s1 + $0x2c4] sm:$0xf]  ;;  %v11551_v33 = vld [vmem:[%s23373_s1 + $0x2d0] sm:$0xf0] }
 0x140   : > { %4122 = vmatpush.bf16.msrb.mxu0 %v11758_v55  ;;  %v12093_v55 = vld [vmem:[%s23373_s1 + $0x700] sm:$0xf]  ;;  %v15267_v35 = vld [vmem:[%s23373_s1 + $0x3c4] sm:$0xf]  ;;  %v11679_v36 = vld [vmem:[%s23373_s1 + $0x3d0] sm:$0xf0] }
 0x141   : > { %4136 = vmatpush.bf16.msrb.mxu1 %v11886_v56  ;;  %v15373_v56 = vld [vmem:[%s23373_s1 + $0x70c] sm:$0xf0]  ;;  %v11682_v20 = vor.u32 %v15267_v35, %v11679_v36  ;;  %v11247_v35 = vld [vmem:[%s23373_s1 + $0x70] sm:$0xf0]  ;;  %v15191_v36 = vld [vmem:[%s23373_s1 + $0x164] sm:$0xf] }
 0x142   : > { %4150 = vmatpush.bf16.msrb.mxu2 %v12014_v57  ;;  %v15175_v57 = vld [vmem:[%s23373_s1 + $0xe4] sm:$0xf]  ;;  %v12094_v8 = vor.u32 %v15373_v56, %v12093_v55  ;;  %v11535_v55 = vld [vmem:[%s23373_s1 + $0x2b0] sm:$0xf0] }
 0x143   : > { %4164 = vmatpush.bf16.msrb.mxu3 %v12142_v1  ;;  %v11439_v1 = vld [vmem:[%s23373_s1 + $0x1f0] sm:$0xf0]  ;;  %v15263_v56 = vld [vmem:[%s23373_s1 + $0x3a4] sm:$0xf] }
 0x144   : > { %4123 = vmatpush.bf16.msrb.mxu0 %v11742_v9  ;;  %v11314_v9 = vor.u32 %v15175_v57, %v11311_v62  ;;  %v11442_v10 = vor.u32 %v15207_v63, %v11439_v1  ;;  %v11663_v57 = vld [vmem:[%s23373_s1 + $0x3b0] sm:$0xf0]  ;;  %v18500_v63 = vpop.f32.mrf.mxu2  ;;  %v11538_v1 = vor.u32 %v15231_v53, %v11535_v55  ;;  %v15155_v55 = vld [vmem:[%s23373_s1 + $0x44] sm:$0xf] }
 0x145   : > { %4137 = vmatpush.bf16.msrb.mxu1 %v11870_v12  ;;  %v11570_v12 = vor.u32 %v15239_v2, %v11567_v3  ;;  %v15163_v2 = vld [vmem:[%s23373_s1 + $0x84] sm:$0xf]  ;;  %v11263_v3 = vld [vmem:[%s23373_s1 + $0x90] sm:$0xf0] }
 0x146   : > { %4151 = vmatpush.bf16.msrb.mxu2 %v11998_v14  ;;  %v18444_v14 = vpop.f32.mrf.mxu0  ;;  %v11266_v23 = vor.u32 %v15163_v2, %v11263_v3  ;;  %v15219_v2 = vld [vmem:[%s23373_s1 + $0x244] sm:$0xf]  ;;  %v11487_v3 = vld [vmem:[%s23373_s1 + $0x250] sm:$0xf0] }
 0x147   : > { %4165 = vmatpush.bf16.msrb.mxu3 %v12126_v28  ;;  %v11698_v28 = vor.u32 %v15271_v52, %v11695_v7  ;;  %v18511_v52 = vpop.f32.mrf.mxu3  ;;  %v11391_v7 = vld [vmem:[%s23373_s1 + $0x190] sm:$0xf0] }
 0x148   : > { %4124 = vmatpush.bf16.msrb.mxu0 %v11726_v37  ;;  %v18470_v37 = vpop.f32.mrf.mxu1 }
 0x149   : > { %4138 = vmatpush.bf16.msrb.mxu1 %v11854_v39  ;;  %v11554_v39 = vor.u32 %v15235_v31, %v11551_v33  ;;  %v15159_v33 = vld [vmem:[%s23373_s1 + $0x64] sm:$0xf] }
 0x14a   : > { %4152 = vmatpush.bf16.msrb.mxu2 %v11982_v16  ;;  %v15167_v16 = vld [vmem:[%s23373_s1 + $0xa4] sm:$0xf] }
 0x14b   : > { %4166 = vmatpush.bf16.msrb.mxu3 %v12110_v45  ;;  %v11407_v45 = vld [vmem:[%s23373_s1 + $0x1b0] sm:$0xf0]  ;;  %v11282_v62 = vor.u32 %v15167_v16, %v11279_v17  ;;  %v15255_v17 = vld [vmem:[%s23373_s1 + $0x364] sm:$0xf] }
 0x14c   : > { %4125 = vmatpush.bf16.msrb.mxu0 %v11710_v0  ;;  %v11410_v0 = vor.u32 %v15199_v44, %v11407_v45  ;;  %v11503_v16 = vld [vmem:[%s23373_s1 + $0x270] sm:$0xf0] }
 0x14d   : > { %4139 = vmatpush.bf16.msrb.mxu1 %v11838_v4  ;;  %v15195_v4 = vld [vmem:[%s23373_s1 + $0x184] sm:$0xf]  ;;  %v11631_v44 = vld [vmem:[%s23373_s1 + $0x370] sm:$0xf0] }
 0x14e   : > { %4153 = vmatpush.bf16.msrb.mxu2 %v11966_v5  ;;  %v11666_v5 = vor.u32 %v15263_v56, %v11663_v57  ;;  %v11231_v56 = vld [vmem:[%s23373_s1 + $0x50] sm:$0xf0]  ;;  %v15187_v57 = vld [vmem:[%s23373_s1 + $0x144] sm:$0xf] }
 0x14f   : > { %4167 = vmatpush.bf16.msrb.mxu3 %v12094_v8  ;;  %4126 = vmatmul.bf16.vlgmr.msrb.gmra.mxu0 %v16772_v22  ;;  %v15227_v8 = vld [vmem:[%s23373_s1 + $0x284] sm:$0xf] }
 0x150   : > { %4174 = vmatpush.bf16.msra.mxu0 %v11314_v9  ;;  %4140 = vmatmul.bf16.vlgmr.msrb.gmra.mxu1 %v16795_v40  ;;  %v11519_v9 = vld [vmem:[%s23373_s1 + $0x290] sm:$0xf0]  ;;  %v2629_v31 = vpop.f32.mrf.mxu1 }
 0x151   : > { %4188 = vmatpush.bf16.msra.mxu1 %v11442_v10  ;;  %4154 = vmatmul.bf16.vlgmr.msrb.gmra.mxu2 %v16777_v29  ;;  %v2615_v10 = vpop.f32.mrf.mxu0  ;;  %v11522_v30 = vor.u32 %v15227_v8, %v11519_v9  ;;  %v11234_v9 = vor.u32 %v15155_v55, %v11231_v56  ;;  %v11455_v55 = vld [vmem:[%s23373_s1 + $0x210] sm:$0xf0]  ;;  %v15243_v56 = vld [vmem:[%s23373_s1 + $0x304] sm:$0xf] }
 0x152   : > { %4202 = vmatpush.bf16.msra.mxu2 %v11570_v12  ;;  %4168 = vmatmul.bf16.vlgmr.msrb.gmra.mxu3 %v16797_v41  ;;  %v15259_v12 = vld [vmem:[%s23373_s1 + $0x384] sm:$0xf]  ;;  %v2616_v59 = vadd.f32 %v2615_v10, %v18379_v27 }
 0x153   : > { %4216 = vmatpush.bf16.msra.mxu3 %v11698_v28  ;;  %v11394_v28 = vor.u32 %v15195_v4, %v11391_v7  ;;  %v11650_v27 = vor.u32 %v15259_v12, %v11647_v18  ;;  %v11615_v7 = vld [vmem:[%s23373_s1 + $0x350] sm:$0xf0]  ;;  %v11490_v18 = vor.u32 %v15219_v2, %v11487_v3 }
 0x154   : > { %4175 = vmatpush.bf16.msra.mxu0 %v11298_v11  ;;  %v2630_v11 = vadd.f32 %v2629_v31, %v2616_v59  ;;  %v15151_v59 = vld [vmem:[%s23373_s1 + $0x24] sm:$0xf]  ;;  %v11343_v31 = vld [vmem:[%s23373_s1 + $0x130] sm:$0xf0] }
 0x155   : > { %4189 = vmatpush.bf16.msra.mxu1 %v11426_v38  ;;  %v11375_v38 = vld [vmem:[%s23373_s1 + $0x170] sm:$0xf0]  ;;  %v2657_v8 = vpop.f32.mrf.mxu3 }
 0x156   : > { %4203 = vmatpush.bf16.msra.mxu2 %v11554_v39  ;;  %v15223_v39 = vld [vmem:[%s23373_s1 + $0x264] sm:$0xf]  ;;  %v11378_v45 = vor.u32 %v15191_v36, %v11375_v38  ;;  %v11951_v3 = vld [vmem:[%s23373_s1 + $0x5f0] sm:$0xf0] }
 0x157   : > { %4217 = vmatpush.bf16.msra.mxu3 %v11682_v20  ;;  %v11250_v20 = vor.u32 %v15159_v33, %v11247_v35  ;;  %v11506_v53 = vor.u32 %v15223_v39, %v11503_v16  ;;  %v15215_v33 = vld [vmem:[%s23373_s1 + $0x224] sm:$0xf]  ;;  %v11471_v35 = vld [vmem:[%s23373_s1 + $0x230] sm:$0xf0] }
 0x158   : > { %4176 = vmatpush.bf16.msra.mxu0 %v11282_v62  ;;  %v11634_v62 = vor.u32 %v15255_v17, %v11631_v44  ;;  %v15247_v36 = vld [vmem:[%s23373_s1 + $0x324] sm:$0xf]  ;;  %v11199_v39 = vld [vmem:[%s23373_s1 + $0x10] sm:$0xf0]  ;;  %v11474_v17 = vor.u32 %v15215_v33, %v11471_v35 }
 0x159   : > { %4190 = vmatpush.bf16.msra.mxu1 %v11410_v0  ;;  %v2643_v0 = vpop.f32.mrf.mxu2  ;;  %v15147_v38 = vld [vmem:[%s23373_s1 + $0x4] sm:$0xf] }
 0x15a   : > { %4204 = vmatpush.bf16.msra.mxu2 %v11538_v1  ;;  %v11359_v1 = vld [vmem:[%s23373_s1 + $0x150] sm:$0xf0]  ;;  %v2644_v4 = vadd.f32 %v2643_v0, %v2630_v11  ;;  %v15179_v44 = vld [vmem:[%s23373_s1 + $0x104] sm:$0xf]  ;;  %v11202_v2 = vor.u32 %v15147_v38, %v11199_v39 }
 0x15b   : > { %4218 = vmatpush.bf16.msra.mxu3 %v11666_v5  ;;  %v15251_v5 = vld [vmem:[%s23373_s1 + $0x344] sm:$0xf]  ;;  %v11362_v12 = vor.u32 %v15187_v57, %v11359_v1  ;;  %v11583_v57 = vld [vmem:[%s23373_s1 + $0x310] sm:$0xf0] }
 0x15c   : > { %4177 = vmatpush.bf16.msra.mxu0 %v11266_v23  ;;  %v18577_v10 = vadd.f32 %v2657_v8, %v2644_v4  ;;  %v11215_v23 = vld [vmem:[%s23373_s1 + $0x30] sm:$0xf0]  ;;  %v15335_v1 = vld [vmem:[%s23373_s1 + $0x5e4] sm:$0xf] }
 0x15d   : > { %4191 = vmatpush.bf16.msra.mxu1 %v11394_v28  ;;  %v15183_v28 = vld [vmem:[%s23373_s1 + $0x124] sm:$0xf]  ;;  %v11218_v11 = vor.u32 %v15151_v59, %v11215_v23  ;;  %v11823_v0 = vld [vmem:[%s23373_s1 + $0x4f0] sm:$0xf0]  ;;  %v11954_v23 = vor.u32 %v15335_v1, %v11951_v3 }
 0x15e   : > { %4205 = vmatpush.bf16.msra.mxu2 %v11522_v30  ;;  %v11618_v30 = vor.u32 %v15251_v5, %v11615_v7  ;;  %v11346_v16 = vor.u32 %v15183_v28, %v11343_v31  ;;  %v15367_v4 = vld [vmem:[%s23373_s1 + $0x6e4] sm:$0xf]  ;;  %v12079_v5 = vld [vmem:[%s23373_s1 + $0x6f0] sm:$0xf0] }
 0x15f   : > { %4219 = vmatpush.bf16.msra.mxu3 %v11650_v27  ;;  %v11599_v27 = vld [vmem:[%s23373_s1 + $0x330] sm:$0xf0]  ;;  %v12082_v28 = vor.u32 %v15367_v4, %v12079_v5  ;;  %v15331_v33 = vld [vmem:[%s23373_s1 + $0x5c4] sm:$0xf] }
 0x160   : > { %4178 = vmatpush.bf16.msra.mxu0 %v11250_v20  ;;  %v11327_v20 = vld [vmem:[%s23373_s1 + $0x110] sm:$0xf0]  ;;  %v15395_v38 = vld [vmem:[%s23373_s1 + $0x7c4] sm:$0xf] }
 0x161   : > { %4192 = vmatpush.bf16.msra.mxu1 %v11378_v45  ;;  %v15211_v45 = vld [vmem:[%s23373_s1 + $0x204] sm:$0xf]  ;;  %v11330_v7 = vor.u32 %v15179_v44, %v11327_v20  ;;  %v11807_v31 = vld [vmem:[%s23373_s1 + $0x4d0] sm:$0xf0] }
 0x162   : > { %4206 = vmatpush.bf16.msra.mxu2 %v11506_v53  ;;  %v11602_v53 = vor.u32 %v15247_v36, %v11599_v27  ;;  %v11458_v8 = vor.u32 %v15211_v45, %v11455_v55  ;;  %v11935_v36 = vld [vmem:[%s23373_s1 + $0x5d0] sm:$0xf0]  ;;  %v15363_v27 = vld [vmem:[%s23373_s1 + $0x6c4] sm:$0xf] }
 0x163   : > { %4220 = vmatpush.bf16.msra.mxu3 %v11634_v62  ;;  %v15303_v62 = vld [vmem:[%s23373_s1 + $0x4e4] sm:$0xf]  ;;  %v12191_v39 = vld [vmem:[%s23373_s1 + $0x7d0] sm:$0xf0]  ;;  %v11938_v20 = vor.u32 %v15331_v33, %v11935_v36 }
 0x164   : > { %4179 = vmatpush.bf16.msra.mxu0 %v11234_v9  ;;  %v15399_v9 = vld [vmem:[%s23373_s1 + $0x7e4] sm:$0xf]  ;;  %v11826_v59 = vor.u32 %v15303_v62, %v11823_v0  ;;  %v11791_v55 = vld [vmem:[%s23373_s1 + $0x4b0] sm:$0xf0] }
 0x165   : > { %4193 = vmatpush.bf16.msra.mxu1 %v11362_v12  ;;  %v12207_v12 = vld [vmem:[%s23373_s1 + $0x7f0] sm:$0xf0]  ;;  %v15359_v0 = vld [vmem:[%s23373_s1 + $0x6a4] sm:$0xf] }
 0x166   : > { %4207 = vmatpush.bf16.msra.mxu2 %v11490_v18  ;;  %v11586_v18 = vor.u32 %v15243_v56, %v11583_v57  ;;  %v12210_v35 = vor.u32 %v15399_v9, %v12207_v12  ;;  %v15327_v56 = vld [vmem:[%s23373_s1 + $0x5a4] sm:$0xf]  ;;  %v12194_v57 = vor.u32 %v15395_v38, %v12191_v39  ;;  %v11919_v62 = vld [vmem:[%s23373_s1 + $0x5b0] sm:$0xf0] }
 0x167   : > { %4221 = vmatpush.bf16.msra.mxu3 %v11618_v30  ;;  %v15299_v30 = vld [vmem:[%s23373_s1 + $0x4c4] sm:$0xf]  ;;  %v12047_v1 = vld [vmem:[%s23373_s1 + $0x6b0] sm:$0xf0]  ;;  %v11922_v5 = vor.u32 %v15327_v56, %v11919_v62 }
 0x168   : > { %4180 = vmatpush.bf16.msra.mxu0 %v11218_v11  ;;  %v12063_v11 = vld [vmem:[%s23373_s1 + $0x6d0] sm:$0xf0]  ;;  %v11810_v44 = vor.u32 %v15299_v30, %v11807_v31  ;;  %v15323_v12 = vld [vmem:[%s23373_s1 + $0x584] sm:$0xf]  ;;  %v18727_v31 = vpop.f32.mrf.mxu3 }
 0x169   : > { %4194 = vmatpush.bf16.msra.mxu1 %v11346_v16  ;;  %v18675_v16 = vpop.f32.mrf.mxu0  ;;  %v12066_v45 = vor.u32 %v15363_v27, %v12063_v11  ;;  %v12175_v3 = vld [vmem:[%s23373_s1 + $0x7b0] sm:$0xf0]  ;;  %v15387_v33 = vld [vmem:[%s23373_s1 + $0x784] sm:$0xf] }
 0x16a   : > { %4208 = vmatpush.bf16.msra.mxu2 %v11474_v17  ;;  %v18677_v17 = vpop.f32.mrf.mxu1  ;;  %v11775_v9 = vld [vmem:[%s23373_s1 + $0x490] sm:$0xf0] }
 0x16b   : > { %4222 = vmatpush.bf16.msra.mxu3 %v11602_v53  ;;  %v15295_v53 = vld [vmem:[%s23373_s1 + $0x4a4] sm:$0xf]  ;;  %v12031_v30 = vld [vmem:[%s23373_s1 + $0x690] sm:$0xf0] }
 0x16c   : > { %4181 = vmatpush.bf16.msra.mxu0 %v11202_v2  ;;  %v15391_v2 = vld [vmem:[%s23373_s1 + $0x7a4] sm:$0xf]  ;;  %v11794_v4 = vor.u32 %v15295_v53, %v11791_v55  ;;  %v11887_v56 = vld [vmem:[%s23373_s1 + $0x570] sm:$0xf0] }
 0x16d   : > { %4195 = vmatpush.bf16.msra.mxu1 %v11330_v7  ;;  %v12050_v7 = vor.u32 %v15359_v0, %v12047_v1  ;;  %v12015_v62 = vld [vmem:[%s23373_s1 + $0x670] sm:$0xf0]  ;;  %v15383_v0 = vld [vmem:[%s23373_s1 + $0x764] sm:$0xf] }
 0x16e   : > { %4209 = vmatpush.bf16.msra.mxu2 %v11458_v8  ;;  %v15291_v8 = vld [vmem:[%s23373_s1 + $0x484] sm:$0xf]  ;;  %v12143_v1 = vld [vmem:[%s23373_s1 + $0x770] sm:$0xf0] }
 0x16f   : > { %4223 = vmatpush.bf16.msra.mxu3 %v11586_v18  ;;  %4182 = vmatmul.bf16.vlgmr.msra.gmra.mxu0 %v16641_v15  ;;  %v18716_v18 = vpop.f32.mrf.mxu2  ;;  %v11778_v36 = vor.u32 %v15291_v8, %v11775_v9  ;;  %v15315_v8 = vld [vmem:[%s23373_s1 + $0x544] sm:$0xf]  ;;  %v12146_v9 = vor.u32 %v15383_v0, %v12143_v1  ;;  %v12111_v0 = vld [vmem:[%s23373_s1 + $0x730] sm:$0xf0] }
 0x170   : > { %4230 = vmatpush.bf16.msrb.mxu0 %v11826_v59  ;;  %4196 = vmatmul.bf16.vlgmr.msra.gmra.mxu1 %v16654_v24  ;;  %v12178_v59 = vor.u32 %v15391_v2, %v12175_v3 }
 0x171   : > { %4244 = vmatpush.bf16.msrb.mxu1 %v11954_v23  ;;  %4210 = vmatmul.bf16.vlgmr.msra.gmra.mxu2 %v16646_v21  ;;  %v11903_v23 = vld [vmem:[%s23373_s1 + $0x590] sm:$0xf0]  ;;  %v2671_v27 = vpop.f32.mrf.mxu0 }
 0x172   : > { %4258 = vmatpush.bf16.msrb.mxu2 %v12082_v28  ;;  %4224 = vmatmul.bf16.vlgmr.msra.gmra.mxu3 %v16666_v32  ;;  %v15355_v28 = vld [vmem:[%s23373_s1 + $0x684] sm:$0xf]  ;;  %v2685_v11 = vpop.f32.mrf.mxu1  ;;  %v11906_v38 = vor.u32 %v15323_v12, %v11903_v23  ;;  %v11871_v12 = vld [vmem:[%s23373_s1 + $0x550] sm:$0xf0] }
 0x173   : > { %4272 = vmatpush.bf16.msrb.mxu3 %v12210_v35  ;;  %v12159_v35 = vld [vmem:[%s23373_s1 + $0x790] sm:$0xf0]  ;;  %v12034_v39 = vor.u32 %v15355_v28, %v12031_v30  ;;  %v2686_v53 = vadd.f32 %v2685_v11, %v2671_v27  ;;  %v15379_v30 = vld [vmem:[%s23373_s1 + $0x744] sm:$0xf]  ;;  %v11874_v11 = vor.u32 %v15315_v8, %v11871_v12 }
 0x174   : > { %4231 = vmatpush.bf16.msrb.mxu0 %v11810_v44  ;;  %v15287_v44 = vld [vmem:[%s23373_s1 + $0x464] sm:$0xf]  ;;  %v12162_v55 = vor.u32 %v15387_v33, %v12159_v35  ;;  %v11999_v23 = vld [vmem:[%s23373_s1 + $0x650] sm:$0xf0] }
 0x175   : > { %4245 = vmatpush.bf16.msrb.mxu1 %v11938_v20  ;;  %v11759_v20 = vld [vmem:[%s23373_s1 + $0x470] sm:$0xf0]  ;;  %v2713_v27 = vpop.f32.mrf.mxu3 }
 0x176   : > { %4259 = vmatpush.bf16.msrb.mxu2 %v12066_v45  ;;  %v15319_v45 = vld [vmem:[%s23373_s1 + $0x564] sm:$0xf]  ;;  %v11762_v2 = vor.u32 %v15287_v44, %v11759_v20  ;;  %v12127_v33 = vld [vmem:[%s23373_s1 + $0x750] sm:$0xf0] }
 0x177   : > { %4273 = vmatpush.bf16.msrb.mxu3 %v12194_v57  ;;  %v15351_v57 = vld [vmem:[%s23373_s1 + $0x664] sm:$0xf]  ;;  %v11890_v3 = vor.u32 %v15319_v45, %v11887_v56  ;;  %v2699_v28 = vpop.f32.mrf.mxu2  ;;  %v11727_v44 = vld [vmem:[%s23373_s1 + $0x430] sm:$0xf0] }
 0x178   : > { %4232 = vmatpush.bf16.msrb.mxu0 %v11794_v4  ;;  %v12018_v4 = vor.u32 %v15351_v57, %v12015_v62  ;;  %v2700_v35 = vadd.f32 %v2699_v28, %v2686_v53  ;;  %v15311_v20 = vld [vmem:[%s23373_s1 + $0x524] sm:$0xf]  ;;  %v12130_v53 = vor.u32 %v15379_v30, %v12127_v33  ;;  %v11983_v57 = vld [vmem:[%s23373_s1 + $0x630] sm:$0xf0]  ;;  %v11317_v30 = vld [vmem:[%s23373_s1 + $0xe8] sm:$0xf] }
 0x179   : > { %4246 = vmatpush.bf16.msrb.mxu1 %v11922_v5  ;;  %v15283_v5 = vld [vmem:[%s23373_s1 + $0x444] sm:$0xf]  ;;  %v11839_v8 = vld [vmem:[%s23373_s1 + $0x510] sm:$0xf0]  ;;  %v15178_v33 = vld [vmem:[%s23373_s1 + $0xf4] sm:$0xf0] }
 0x17a   : > { %4260 = vmatpush.bf16.msrb.mxu2 %v12050_v7  ;;  %v11743_v7 = vld [vmem:[%s23373_s1 + $0x450] sm:$0xf0]  ;;  %v18792_v45 = vadd.f32 %v2713_v27, %v2700_v35  ;;  %v15343_v56 = vld [vmem:[%s23373_s1 + $0x624] sm:$0xf]  ;;  %v11445_v35 = vld [vmem:[%s23373_s1 + $0x1e8] sm:$0xf] }
 0x17b   : > { %4274 = vmatpush.bf16.msrb.mxu3 %v12178_v59  ;;  %v15347_v59 = vld [vmem:[%s23373_s1 + $0x644] sm:$0xf]  ;;  %v12095_v28 = vld [vmem:[%s23373_s1 + $0x710] sm:$0xf0]  ;;  %v15210_v27 = vld [vmem:[%s23373_s1 + $0x1f4] sm:$0xf0] }
 0x17c   : > { %4233 = vmatpush.bf16.msrb.mxu0 %v11778_v36  ;;  %v11746_v36 = vor.u32 %v15283_v5, %v11743_v7  ;;  %v15375_v62 = vld [vmem:[%s23373_s1 + $0x724] sm:$0xf]  ;;  %v11986_v5 = vor.u32 %v15343_v56, %v11983_v57  ;;  %v11318_v56 = vor.u32 %v15178_v33, %v11317_v30  ;;  %v11446_v57 = vor.u32 %v15210_v27, %v11445_v35  ;;  %v11285_v33 = vld [vmem:[%s23373_s1 + $0xa8] sm:$0xf]  ;;  %v15170_v35 = vld [vmem:[%s23373_s1 + $0xb4] sm:$0xf0] }
 0x17d   : > { %4247 = vmatpush.bf16.msrb.mxu1 %v11906_v38  ;;  %v12002_v38 = vor.u32 %v15347_v59, %v11999_v23  ;;  %v15307_v7 = vld [vmem:[%s23373_s1 + $0x504] sm:$0xf]  ;;  %v12114_v12 = vor.u32 %v15375_v62, %v12111_v0  ;;  %v11967_v59 = vld [vmem:[%s23373_s1 + $0x610] sm:$0xf0]  ;;  %v18857_v0 = vpop.f32.mrf.mxu0 }
 0x17e   : > { %4261 = vmatpush.bf16.msrb.mxu2 %v12034_v39  ;;  %v15279_v39 = vld [vmem:[%s23373_s1 + $0x424] sm:$0xf] }
 0x17f   : > { %4275 = vmatpush.bf16.msrb.mxu3 %v12162_v55  ;;  %v11855_v55 = vld [vmem:[%s23373_s1 + $0x530] sm:$0xf0]  ;;  %v11730_v1 = vor.u32 %v15279_v39, %v11727_v44  ;;  %v15371_v23 = vld [vmem:[%s23373_s1 + $0x704] sm:$0xf]  ;;  %v11842_v39 = vor.u32 %v15307_v7, %v11839_v8  ;;  %v11557_v7 = vld [vmem:[%s23373_s1 + $0x2c8] sm:$0xf] }
 0x180   : > { %4234 = vmatpush.bf16.msrb.mxu0 %v11762_v2  ;;  %v15275_v2 = vld [vmem:[%s23373_s1 + $0x404] sm:$0xf]  ;;  %v15238_v8 = vld [vmem:[%s23373_s1 + $0x2d4] sm:$0xf0] }
 0x181   : > { %4248 = vmatpush.bf16.msrb.mxu1 %v11890_v3  ;;  %v11711_v3 = vld [vmem:[%s23373_s1 + $0x410] sm:$0xf0]  ;;  %v11558_v30 = vor.u32 %v15238_v8, %v11557_v7  ;;  %v11525_v7 = vld [vmem:[%s23373_s1 + $0x288] sm:$0xf]  ;;  %v15230_v8 = vld [vmem:[%s23373_s1 + $0x294] sm:$0xf0] }
 0x182   : > { %4262 = vmatpush.bf16.msrb.mxu2 %v12018_v4  ;;  %v11858_v4 = vor.u32 %v15311_v20, %v11855_v55  ;;  %v11701_v20 = vld [vmem:[%s23373_s1 + $0x3e8] sm:$0xf]  ;;  %v12098_v55 = vor.u32 %v15371_v23, %v12095_v28 }
 0x183   : > { %4276 = vmatpush.bf16.msrb.mxu3 %v12146_v9  ;;  %v15339_v9 = vld [vmem:[%s23373_s1 + $0x604] sm:$0xf] }
 0x184   : > { %4235 = vmatpush.bf16.msrb.mxu0 %v11746_v36  ;;  %v11714_v36 = vor.u32 %v15275_v2, %v11711_v3  ;;  %v11970_v44 = vor.u32 %v15339_v9, %v11967_v59  ;;  %v15174_v2 = vld [vmem:[%s23373_s1 + $0xd4] sm:$0xf0]  ;;  %v11429_v3 = vld [vmem:[%s23373_s1 + $0x1c8] sm:$0xf]  ;;  %v18883_v59 = vpop.f32.mrf.mxu1 }
 0x185   : > { %4249 = vmatpush.bf16.msrb.mxu1 %v11874_v11  ;;  %v11573_v11 = vld [vmem:[%s23373_s1 + $0x2e8] sm:$0xf] }
 0x186   : > { %4263 = vmatpush.bf16.msrb.mxu2 %v12002_v38  ;;  %v15242_v38 = vld [vmem:[%s23373_s1 + $0x2f4] sm:$0xf0]  ;;  %v11685_v9 = vld [vmem:[%s23373_s1 + $0x3c8] sm:$0xf] }
 0x187   : > { %4277 = vmatpush.bf16.msrb.mxu3 %v12130_v53  ;;  %v15274_v53 = vld [vmem:[%s23373_s1 + $0x3f4] sm:$0xf0]  ;;  %v11574_v62 = vor.u32 %v15242_v38, %v11573_v11  ;;  %v11541_v38 = vld [vmem:[%s23373_s1 + $0x2a8] sm:$0xf] }
 0x188   : > { %4236 = vmatpush.bf16.msrb.mxu0 %v11730_v1  ;;  %v11301_v1 = vld [vmem:[%s23373_s1 + $0xc8] sm:$0xf]  ;;  %v15202_v11 = vld [vmem:[%s23373_s1 + $0x1b4] sm:$0xf0] }
 0x189   : > { %4250 = vmatpush.bf16.msrb.mxu1 %v11858_v4  ;;  %v11702_v4 = vor.u32 %v15274_v53, %v11701_v20  ;;  %v11302_v23 = vor.u32 %v15174_v2, %v11301_v1  ;;  %v15266_v20 = vld [vmem:[%s23373_s1 + $0x3b4] sm:$0xf0]  ;;  %v11286_v53 = vor.u32 %v15170_v35, %v11285_v33  ;;  %v11397_v2 = vld [vmem:[%s23373_s1 + $0x188] sm:$0xf]  ;;  %v11526_v35 = vor.u32 %v15230_v8, %v11525_v7 }
 0x18a   : > { %4264 = vmatpush.bf16.msrb.mxu2 %v11986_v5  ;;  %v15206_v5 = vld [vmem:[%s23373_s1 + $0x1d4] sm:$0xf0]  ;;  %v11365_v7 = vld [vmem:[%s23373_s1 + $0x148] sm:$0xf] }
 0x18b   : > { %4278 = vmatpush.bf16.msrb.mxu3 %v12114_v12  ;;  %v15270_v12 = vld [vmem:[%s23373_s1 + $0x3d4] sm:$0xf0]  ;;  %v11430_v28 = vor.u32 %v15206_v5, %v11429_v3 }
 0x18c   : > { %4237 = vmatpush.bf16.msrb.mxu0 %v11714_v36  ;;  %v11413_v36 = vld [vmem:[%s23373_s1 + $0x1a8] sm:$0xf]  ;;  %v11686_v27 = vor.u32 %v15270_v12, %v11685_v9  ;;  %v15166_v1 = vld [vmem:[%s23373_s1 + $0x94] sm:$0xf0]  ;;  %v2727_v9 = vpop.f32.mrf.mxu0 }
 0x18d   : > { %4251 = vmatpush.bf16.msrb.mxu1 %v11842_v39  ;;  %v15234_v39 = vld [vmem:[%s23373_s1 + $0x2b4] sm:$0xf0]  ;;  %v11653_v12 = vld [vmem:[%s23373_s1 + $0x388] sm:$0xf] }
 0x18e   : > { %4265 = vmatpush.bf16.msrb.mxu2 %v11970_v44  ;;  %v11669_v44 = vld [vmem:[%s23373_s1 + $0x3a8] sm:$0xf]  ;;  %v15198_v5 = vld [vmem:[%s23373_s1 + $0x194] sm:$0xf0] }
 0x18f   : > { %4279 = vmatpush.bf16.msrb.mxu3 %v12098_v55  ;;  %4238 = vmatmul.bf16.vlgmr.msrb.gmra.mxu0 %v16772_v22  ;;  %v18913_v55 = vpop.f32.mrf.mxu2  ;;  %v11670_v3 = vor.u32 %v15266_v20, %v11669_v44  ;;  %v11398_v33 = vor.u32 %v15198_v5, %v11397_v2  ;;  %v15194_v44 = vld [vmem:[%s23373_s1 + $0x174] sm:$0xf0]  ;;  %v11509_v20 = vld [vmem:[%s23373_s1 + $0x268] sm:$0xf] }
 0x190   : > { %4286 = vmatpush.bf16.msra.mxu0 %v11318_v56  ;;  %4252 = vmatmul.bf16.vlgmr.msrb.gmra.mxu1 %v16795_v40  ;;  %v11414_v56 = vor.u32 %v15202_v11, %v11413_v36  ;;  %v2741_v36 = vpop.f32.mrf.mxu1  ;;  %v15162_v11 = vld [vmem:[%s23373_s1 + $0x74] sm:$0xf0] }
 0x191   : > { %4300 = vmatpush.bf16.msra.mxu1 %v11446_v57  ;;  %4266 = vmatmul.bf16.vlgmr.msrb.gmra.mxu2 %v16777_v29  ;;  %v11542_v57 = vor.u32 %v15234_v39, %v11541_v38  ;;  %v11381_v38 = vld [vmem:[%s23373_s1 + $0x168] sm:$0xf]  ;;  %v15158_v5 = vld [vmem:[%s23373_s1 + $0x54] sm:$0xf0] }
 0x192   : > { %4314 = vmatpush.bf16.msra.mxu2 %v11574_v62  ;;  %4280 = vmatmul.bf16.vlgmr.msrb.gmra.mxu3 %v16797_v41  ;;  %v11269_v62 = vld [vmem:[%s23373_s1 + $0x88] sm:$0xf] }
 0x193   : > { %4328 = vmatpush.bf16.msra.mxu3 %v11702_v4  ;;  %v18924_v4 = vpop.f32.mrf.mxu3 }
 0x194   : > { %4287 = vmatpush.bf16.msra.mxu0 %v11302_v23  ;;  %23385 = vst [vmem:[#allocation2_spill] sm:$0xff] %v18924_v4  ;;  %v15262_v23 = vld [vmem:[%s23373_s1 + $0x394] sm:$0xf0] }
 0x195   : > { %4301 = vmatpush.bf16.msra.mxu1 %v11430_v28  ;;  %v2728_v28 = vadd.f32 %v2727_v9, %v18792_v45  ;;  %v11654_v45 = vor.u32 %v15262_v23, %v11653_v12  ;;  %v15190_v12 = vld [vmem:[%s23373_s1 + $0x154] sm:$0xf0]  ;;  %v11493_v23 = vld [vmem:[%s23373_s1 + $0x248] sm:$0xf] }
 0x196   : > { %4315 = vmatpush.bf16.msra.mxu2 %v11558_v30  ;;  %v11270_v30 = vor.u32 %v15166_v1, %v11269_v62  ;;  %v11382_v1 = vor.u32 %v15194_v44, %v11381_v38  ;;  %v11366_v38 = vor.u32 %v15190_v12, %v11365_v7  ;;  %v15154_v44 = vld [vmem:[%s23373_s1 + $0x34] sm:$0xf0]  ;;  %v11333_v12 = vld [vmem:[%s23373_s1 + $0x108] sm:$0xf] }
 0x197   : > { %4329 = vmatpush.bf16.msra.mxu3 %v11686_v27  ;;  %v11253_v27 = vld [vmem:[%s23373_s1 + $0x68] sm:$0xf]  ;;  %v2742_v39 = vadd.f32 %v2741_v36, %v2728_v28  ;;  %v2755_v9 = vpop.f32.mrf.mxu2  ;;  %v15222_v28 = vld [vmem:[%s23373_s1 + $0x254] sm:$0xf0] }
 0x198   : > { %4288 = vmatpush.bf16.msra.mxu0 %v11286_v53  ;;  %v15226_v53 = vld [vmem:[%s23373_s1 + $0x274] sm:$0xf0]  ;;  %v11254_v62 = vor.u32 %v15162_v11, %v11253_v27 }
 0x199   : > { %4302 = vmatpush.bf16.msra.mxu1 %v11414_v56  ;;  %v11637_v56 = vld [vmem:[%s23373_s1 + $0x368] sm:$0xf]  ;;  %v11510_v2 = vor.u32 %v15226_v53, %v11509_v20  ;;  %v15150_v7 = vld [vmem:[%s23373_s1 + $0x14] sm:$0xf0] }
 0x19a   : > { %4316 = vmatpush.bf16.msra.mxu2 %v11542_v57  ;;  %v15258_v57 = vld [vmem:[%s23373_s1 + $0x374] sm:$0xf0]  ;;  %v11349_v20 = vld [vmem:[%s23373_s1 + $0x128] sm:$0xf] }
 0x19b   : > { %4330 = vmatpush.bf16.msra.mxu3 %v11670_v3  ;;  %v11237_v3 = vld [vmem:[%s23373_s1 + $0x48] sm:$0xf]  ;;  %v11638_v8 = vor.u32 %v15258_v57, %v11637_v56  ;;  %v2769_v36 = vpop.f32.mrf.mxu3  ;;  %v15186_v56 = vld [vmem:[%s23373_s1 + $0x134] sm:$0xf0] }
 0x19c   : > { %4289 = vmatpush.bf16.msra.mxu0 %v11270_v30  ;;  %v2756_v30 = vadd.f32 %v2755_v9, %v2742_v39  ;;  %v11238_v27 = vor.u32 %v15158_v5, %v11237_v3  ;;  %v11221_v39 = vld [vmem:[%s23373_s1 + $0x28] sm:$0xf] }
 0x19d   : > { %4303 = vmatpush.bf16.msra.mxu1 %v11398_v33  ;;  %v11621_v33 = vld [vmem:[%s23373_s1 + $0x348] sm:$0xf]  ;;  %v11222_v3 = vor.u32 %v15154_v44, %v11221_v39  ;;  %v15338_v44 = vld [vmem:[%s23373_s1 + $0x5f4] sm:$0xf0] }
 0x19e   : > { %4317 = vmatpush.bf16.msra.mxu2 %v11526_v35  ;;  %v15254_v35 = vld [vmem:[%s23373_s1 + $0x354] sm:$0xf0]  ;;  %v18990_v11 = vadd.f32 %v2769_v36, %v2756_v30  ;;  %v11477_v57 = vld [vmem:[%s23373_s1 + $0x228] sm:$0xf] }
 0x19f   : > { %4331 = vmatpush.bf16.msra.mxu3 %v11654_v45  ;;  %v11494_v45 = vor.u32 %v15222_v28, %v11493_v23  ;;  %v11622_v53 = vor.u32 %v15254_v35, %v11621_v33  ;;  %v11205_v5 = vld [vmem:[%s23373_s1 + $0x8] sm:$0xf]  ;;  %v15182_v23 = vld [vmem:[%s23373_s1 + $0x114] sm:$0xf0] }
 0x1a0   : > { %4290 = vmatpush.bf16.msra.mxu0 %v11254_v62  ;;  %23386 = vst [vmem:[#allocation3_spill] sm:$0xff] %v18990_v11  ;;  %v15218_v62 = vld [vmem:[%s23373_s1 + $0x234] sm:$0xf0]  ;;  %v11461_v28 = vld [vmem:[%s23373_s1 + $0x208] sm:$0xf]  ;;  %v11206_v39 = vor.u32 %v15150_v7, %v11205_v5 }
 0x1a1   : > { %4304 = vmatpush.bf16.msra.mxu1 %v11382_v1  ;;  %v11605_v1 = vld [vmem:[%s23373_s1 + $0x328] sm:$0xf]  ;;  %v11478_v9 = vor.u32 %v15218_v62, %v11477_v57  ;;  %v15214_v33 = vld [vmem:[%s23373_s1 + $0x214] sm:$0xf0] }
 0x1a2   : > { %4318 = vmatpush.bf16.msra.mxu2 %v11510_v2  ;;  %v15250_v2 = vld [vmem:[%s23373_s1 + $0x334] sm:$0xf0]  ;;  %v11589_v35 = vld [vmem:[%s23373_s1 + $0x308] sm:$0xf]  ;;  %v11462_v57 = vor.u32 %v15214_v33, %v11461_v28 }
 0x1a3   : > { %4332 = vmatpush.bf16.msra.mxu3 %v11638_v8  ;;  %v11350_v8 = vor.u32 %v15186_v56, %v11349_v20  ;;  %v11606_v30 = vor.u32 %v15250_v2, %v11605_v1  ;;  %v15246_v36 = vld [vmem:[%s23373_s1 + $0x314] sm:$0xf0]  ;;  %v12085_v20 = vld [vmem:[%s23373_s1 + $0x6e8] sm:$0xf]  ;;  %v11334_v56 = vor.u32 %v15182_v23, %v11333_v12 }
 0x1a4   : > { %4291 = vmatpush.bf16.msra.mxu0 %v11238_v27  ;;  %v11829_v27 = vld [vmem:[%s23373_s1 + $0x4e8] sm:$0xf]  ;;  %v15402_v1 = vld [vmem:[%s23373_s1 + $0x7f4] sm:$0xf0]  ;;  %v11590_v2 = vor.u32 %v15246_v36, %v11589_v35 }
 0x1a5   : > { %4305 = vmatpush.bf16.msra.mxu1 %v11366_v38  ;;  %v15306_v38 = vld [vmem:[%s23373_s1 + $0x4f4] sm:$0xf0]  ;;  %v12213_v62 = vld [vmem:[%s23373_s1 + $0x7e8] sm:$0xf] }
 0x1a6   : > { %4319 = vmatpush.bf16.msra.mxu2 %v11494_v45  ;;  %v11957_v45 = vld [vmem:[%s23373_s1 + $0x5e8] sm:$0xf]  ;;  %v12214_v23 = vor.u32 %v15402_v1, %v12213_v62  ;;  %v15334_v28 = vld [vmem:[%s23373_s1 + $0x5d4] sm:$0xf0] }
 0x1a7   : > { %4333 = vmatpush.bf16.msra.mxu3 %v11622_v53  ;;  %v15370_v53 = vld [vmem:[%s23373_s1 + $0x6f4] sm:$0xf0]  ;;  %v11958_v5 = vor.u32 %v15338_v44, %v11957_v45  ;;  %v11941_v12 = vld [vmem:[%s23373_s1 + $0x5c8] sm:$0xf] }
 0x1a8   : > { %4292 = vmatpush.bf16.msra.mxu0 %v11222_v3  ;;  %v11830_v3 = vor.u32 %v15306_v38, %v11829_v27  ;;  %v12086_v7 = vor.u32 %v15370_v53, %v12085_v20  ;;  %v15366_v33 = vld [vmem:[%s23373_s1 + $0x6d4] sm:$0xf0]  ;;  %v12197_v35 = vld [vmem:[%s23373_s1 + $0x7c8] sm:$0xf]  ;;  %v11942_v38 = vor.u32 %v15334_v28, %v11941_v12 }
 0x1a9   : > { %4306 = vmatpush.bf16.msra.mxu1 %v11350_v8  ;;  %v11813_v8 = vld [vmem:[%s23373_s1 + $0x4c8] sm:$0xf]  ;;  %v15398_v36 = vld [vmem:[%s23373_s1 + $0x7d4] sm:$0xf0] }
 0x1aa   : > { %4320 = vmatpush.bf16.msra.mxu2 %v11478_v9  ;;  %v15302_v9 = vld [vmem:[%s23373_s1 + $0x4d4] sm:$0xf0]  ;;  %v11925_v20 = vld [vmem:[%s23373_s1 + $0x5a8] sm:$0xf]  ;;  %v12198_v53 = vor.u32 %v15398_v36, %v12197_v35 }
 0x1ab   : > { %4334 = vmatpush.bf16.msra.mxu3 %v11606_v30  ;;  %v12069_v30 = vld [vmem:[%s23373_s1 + $0x6c8] sm:$0xf]  ;;  %v11814_v27 = vor.u32 %v15302_v9, %v11813_v8  ;;  %v15298_v44 = vld [vmem:[%s23373_s1 + $0x4b4] sm:$0xf0] }
 0x1ac   : > { %4293 = vmatpush.bf16.msra.mxu0 %v11206_v39  ;;  %v12070_v45 = vor.u32 %v15366_v33, %v12069_v30  ;;  %v11797_v39 = vld [vmem:[%s23373_s1 + $0x4a8] sm:$0xf]  ;;  %v15362_v62 = vld [vmem:[%s23373_s1 + $0x6b4] sm:$0xf0] }
 0x1ad   : > { %4307 = vmatpush.bf16.msra.mxu1 %v11334_v56  ;;  %v15330_v56 = vld [vmem:[%s23373_s1 + $0x5b4] sm:$0xf0]  ;;  %v12181_v1 = vld [vmem:[%s23373_s1 + $0x7a8] sm:$0xf] }
 0x1ae   : > { %4321 = vmatpush.bf16.msra.mxu2 %v11462_v57  ;;  %v12053_v57 = vld [vmem:[%s23373_s1 + $0x6a8] sm:$0xf]  ;;  %v15294_v9 = vld [vmem:[%s23373_s1 + $0x494] sm:$0xf0] }
 0x1af   : > { %4335 = vmatpush.bf16.msra.mxu3 %v11590_v2  ;;  %4294 = vmatmul.bf16.vlgmr.msra.gmra.mxu0 %v16641_v15  ;;  %v15394_v2 = vld [vmem:[%s23373_s1 + $0x7b4] sm:$0xf0]  ;;  %v11781_v8 = vld [vmem:[%s23373_s1 + $0x488] sm:$0xf] }
 0x1b0   : > { %4342 = vmatpush.bf16.msrb.mxu0 %v11830_v3  ;;  %4308 = vmatmul.bf16.vlgmr.msra.gmra.mxu1 %v16654_v24  ;;  %v11798_v3 = vor.u32 %v15298_v44, %v11797_v39  ;;  %v11909_v12 = vld [vmem:[%s23373_s1 + $0x588] sm:$0xf]  ;;  %v15326_v28 = vld [vmem:[%s23373_s1 + $0x594] sm:$0xf0] }
 0x1b1   : > { %4356 = vmatpush.bf16.msrb.mxu1 %v11958_v5  ;;  %4322 = vmatmul.bf16.vlgmr.msra.gmra.mxu2 %v16646_v21  ;;  %v11926_v5 = vor.u32 %v15330_v56, %v11925_v20  ;;  %v12037_v30 = vld [vmem:[%s23373_s1 + $0x688] sm:$0xf]  ;;  %v15358_v33 = vld [vmem:[%s23373_s1 + $0x694] sm:$0xf0] }
 0x1b2   : > { %4370 = vmatpush.bf16.msrb.mxu2 %v12086_v7  ;;  %4336 = vmatmul.bf16.vlgmr.msra.gmra.mxu3 %v16666_v32  ;;  %v12054_v7 = vor.u32 %v15362_v62, %v12053_v57  ;;  %v12165_v35 = vld [vmem:[%s23373_s1 + $0x788] sm:$0xf]  ;;  %v15390_v36 = vld [vmem:[%s23373_s1 + $0x794] sm:$0xf0] }
 0x1b3   : > { %4384 = vmatpush.bf16.msrb.mxu3 %v12214_v23  ;;  %v12182_v23 = vor.u32 %v15394_v2, %v12181_v1  ;;  %v11765_v39 = vld [vmem:[%s23373_s1 + $0x468] sm:$0xf]  ;;  %v15290_v44 = vld [vmem:[%s23373_s1 + $0x474] sm:$0xf0] }
 0x1b4   : > { %4343 = vmatpush.bf16.msrb.mxu0 %v11814_v27  ;;  %v11782_v27 = vor.u32 %v15294_v9, %v11781_v8  ;;  %v11893_v20 = vld [vmem:[%s23373_s1 + $0x568] sm:$0xf]  ;;  %v15322_v56 = vld [vmem:[%s23373_s1 + $0x574] sm:$0xf0] }
 0x1b5   : > { %4357 = vmatpush.bf16.msrb.mxu1 %v11942_v38  ;;  %v11910_v38 = vor.u32 %v15326_v28, %v11909_v12  ;;  %v12021_v57 = vld [vmem:[%s23373_s1 + $0x668] sm:$0xf]  ;;  %v15354_v62 = vld [vmem:[%s23373_s1 + $0x674] sm:$0xf0] }
 0x1b6   : > { %4371 = vmatpush.bf16.msrb.mxu2 %v12070_v45  ;;  %v12038_v45 = vor.u32 %v15358_v33, %v12037_v30  ;;  %v12149_v1 = vld [vmem:[%s23373_s1 + $0x768] sm:$0xf]  ;;  %v15386_v2 = vld [vmem:[%s23373_s1 + $0x774] sm:$0xf0] }
 0x1b7   : > { %4385 = vmatpush.bf16.msrb.mxu3 %v12198_v53  ;;  %v12166_v53 = vor.u32 %v15390_v36, %v12165_v35  ;;  %v11749_v8 = vld [vmem:[%s23373_s1 + $0x448] sm:$0xf]  ;;  %v15286_v9 = vld [vmem:[%s23373_s1 + $0x454] sm:$0xf0] }
 0x1b8   : > { %4344 = vmatpush.bf16.msrb.mxu0 %v11798_v3  ;;  %v11766_v3 = vor.u32 %v15290_v44, %v11765_v39  ;;  %v11877_v12 = vld [vmem:[%s23373_s1 + $0x548] sm:$0xf]  ;;  %v15318_v28 = vld [vmem:[%s23373_s1 + $0x554] sm:$0xf0] }
 0x1b9   : > { %4358 = vmatpush.bf16.msrb.mxu1 %v11926_v5  ;;  %v11894_v5 = vor.u32 %v15322_v56, %v11893_v20  ;;  %v12005_v30 = vld [vmem:[%s23373_s1 + $0x648] sm:$0xf]  ;;  %v15350_v33 = vld [vmem:[%s23373_s1 + $0x654] sm:$0xf0] }
 0x1ba   : > { %4372 = vmatpush.bf16.msrb.mxu2 %v12054_v7  ;;  %v12022_v7 = vor.u32 %v15354_v62, %v12021_v57  ;;  %v12133_v35 = vld [vmem:[%s23373_s1 + $0x748] sm:$0xf]  ;;  %v15382_v36 = vld [vmem:[%s23373_s1 + $0x754] sm:$0xf0] }
 0x1bb   : > { %4386 = vmatpush.bf16.msrb.mxu3 %v12182_v23  ;;  %v12150_v23 = vor.u32 %v15386_v2, %v12149_v1  ;;  %v11733_v39 = vld [vmem:[%s23373_s1 + $0x428] sm:$0xf]  ;;  %v15282_v44 = vld [vmem:[%s23373_s1 + $0x434] sm:$0xf0] }
 0x1bc   : > { %4345 = vmatpush.bf16.msrb.mxu0 %v11782_v27  ;;  %v11750_v27 = vor.u32 %v15286_v9, %v11749_v8  ;;  %v11861_v20 = vld [vmem:[%s23373_s1 + $0x528] sm:$0xf]  ;;  %v15314_v56 = vld [vmem:[%s23373_s1 + $0x534] sm:$0xf0] }
 0x1bd   : > { %4359 = vmatpush.bf16.msrb.mxu1 %v11910_v38  ;;  %v11878_v38 = vor.u32 %v15318_v28, %v11877_v12  ;;  %v11989_v57 = vld [vmem:[%s23373_s1 + $0x628] sm:$0xf]  ;;  %v15346_v62 = vld [vmem:[%s23373_s1 + $0x634] sm:$0xf0]  ;;  %v11862_v8 = vor.u32 %v15314_v56, %v11861_v20  ;;  %v11447_v20 = vld [vmem:[%s23373_s1 + $0x1f8] sm:$0xf0] }
 0x1be   : > { %4373 = vmatpush.bf16.msrb.mxu2 %v12038_v45  ;;  %v12006_v45 = vor.u32 %v15350_v33, %v12005_v30  ;;  %v12117_v1 = vld [vmem:[%s23373_s1 + $0x728] sm:$0xf]  ;;  %v15378_v2 = vld [vmem:[%s23373_s1 + $0x734] sm:$0xf0]  ;;  %v11990_v9 = vor.u32 %v15346_v62, %v11989_v57  ;;  %v11575_v56 = vld [vmem:[%s23373_s1 + $0x2f8] sm:$0xf0] }
 0x1bf   : > { %4387 = vmatpush.bf16.msrb.mxu3 %v12166_v53  ;;  %v12134_v53 = vor.u32 %v15382_v36, %v12133_v35  ;;  %v11845_v12 = vld [vmem:[%s23373_s1 + $0x508] sm:$0xf]  ;;  %v12118_v30 = vor.u32 %v15378_v2, %v12117_v1  ;;  %v15342_v33 = vld [vmem:[%s23373_s1 + $0x614] sm:$0xf0]  ;;  %v15272_v1 = vld [vmem:[%s23373_s1 + $0x3ec] sm:$0xf] }
 0x1c0   : > { %4346 = vmatpush.bf16.msrb.mxu0 %v11766_v3  ;;  %v11734_v3 = vor.u32 %v15282_v44, %v11733_v39  ;;  %v11973_v28 = vld [vmem:[%s23373_s1 + $0x608] sm:$0xf]  ;;  %v15374_v36 = vld [vmem:[%s23373_s1 + $0x714] sm:$0xf0]  ;;  %v15208_v39 = vld [vmem:[%s23373_s1 + $0x1ec] sm:$0xf] }
 0x1c1   : > { %4360 = vmatpush.bf16.msrb.mxu1 %v11894_v5  ;;  %v11717_v5 = vld [vmem:[%s23373_s1 + $0x408] sm:$0xf]  ;;  %v11974_v62 = vor.u32 %v15342_v33, %v11973_v28  ;;  %v11703_v2 = vld [vmem:[%s23373_s1 + $0x3f8] sm:$0xf0]  ;;  %v11450_v11 = vor.u32 %v15208_v39, %v11447_v20  ;;  %v15236_v33 = vld [vmem:[%s23373_s1 + $0x2cc] sm:$0xf] }
 0x1c2   : > { %4374 = vmatpush.bf16.msrb.mxu2 %v12022_v7  ;;  %v15278_v7 = vld [vmem:[%s23373_s1 + $0x414] sm:$0xf0]  ;;  %v12101_v35 = vld [vmem:[%s23373_s1 + $0x708] sm:$0xf]  ;;  %v11706_v28 = vor.u32 %v15272_v1, %v11703_v2  ;;  %v15168_v20 = vld [vmem:[%s23373_s1 + $0xac] sm:$0xf]  ;;  %v19314_v2 = vpop.f32.mrf.mxu3 }
 0x1c3   : > { %4388 = vmatpush.bf16.msrb.mxu3 %v12150_v23  ;;  %v15310_v23 = vld [vmem:[%s23373_s1 + $0x514] sm:$0xf0]  ;;  %v11718_v44 = vor.u32 %v15278_v7, %v11717_v5  ;;  %v19262_v7 = vpop.f32.mrf.mxu1  ;;  %v11543_v1 = vld [vmem:[%s23373_s1 + $0x2b8] sm:$0xf0]  ;;  %23390 = vst [vmem:[#allocation7_spill] sm:$0xff] %v19314_v2 }
 0x1c4   : > { %4347 = vmatpush.bf16.msrb.mxu0 %v11750_v27  ;;  %v19236_v27 = vpop.f32.mrf.mxu0  ;;  %v11846_v57 = vor.u32 %v15310_v23, %v11845_v12  ;;  %23388 = vst [vmem:[#allocation5_spill] sm:$0xff] %v19262_v7  ;;  %v15204_v12 = vld [vmem:[%s23373_s1 + $0x1cc] sm:$0xf]  ;;  %v2352_v23 = vadd.f32 %v17645_v34, %v17619_v13  ;;  %v11687_v34 = vld [vmem:[%s23373_s1 + $0x3d8] sm:$0xf0] }
 0x1c5   : > { %4361 = vmatpush.bf16.msrb.mxu1 %v11878_v38  ;;  %23387 = vst [vmem:[#allocation4_spill] sm:$0xff] %v19236_v27  ;;  %v15176_v38 = vld [vmem:[%s23373_s1 + $0xec] sm:$0xf] }
 0x1c6   : > { %4375 = vmatpush.bf16.msrb.mxu2 %v12006_v45  ;;  %v11319_v45 = vld [vmem:[%s23373_s1 + $0xf8] sm:$0xf0]  ;;  %v15268_v13 = vld [vmem:[%s23373_s1 + $0x3cc] sm:$0xf] }
 0x1c7   : > { %4389 = vmatpush.bf16.msrb.mxu3 %v12134_v53  ;;  %v15240_v53 = vld [vmem:[%s23373_s1 + $0x2ec] sm:$0xf]  ;;  %v11322_v5 = vor.u32 %v15176_v38, %v11319_v45 }
 0x1c8   : > { %4348 = vmatpush.bf16.msrb.mxu0 %v11734_v3  ;;  %v12102_v3 = vor.u32 %v15374_v36, %v12101_v35  ;;  %v11578_v27 = vor.u32 %v15240_v53, %v11575_v56  ;;  %v11559_v35 = vld [vmem:[%s23373_s1 + $0x2d8] sm:$0xf0]  ;;  %v19284_v36 = vpop.f32.mrf.mxu2  ;;  %v15200_v56 = vld [vmem:[%s23373_s1 + $0x1ac] sm:$0xf] }
 0x1c9   : > { %4362 = vmatpush.bf16.msrb.mxu1 %v11862_v8  ;;  %v15172_v8 = vld [vmem:[%s23373_s1 + $0xcc] sm:$0xf]  ;;  %23389 = vst [vmem:[#allocation6_spill] sm:$0xff] %v19284_v36  ;;  %v11287_v53 = vld [vmem:[%s23373_s1 + $0xb8] sm:$0xf0] }
 0x1ca   : > { %4376 = vmatpush.bf16.msrb.mxu2 %v11990_v9  ;;  %v11303_v9 = vld [vmem:[%s23373_s1 + $0xd8] sm:$0xf0] }
 0x1cb   : > { %4390 = vmatpush.bf16.msrb.mxu3 %v12118_v30  ;;  %v11431_v30 = vld [vmem:[%s23373_s1 + $0x1d8] sm:$0xf0]  ;;  %v11306_v38 = vor.u32 %v15172_v8, %v11303_v9  ;;  %v19325_v8 = vpop.f32.mrf.mxu1 }
 0x1cc   : > { %4349 = vmatpush.bf16.msrb.mxu0 %v11718_v44  ;;  %v19292_v45 = vpop.f32.mrf.mxu0  ;;  %v11434_v39 = vor.u32 %v15204_v12, %v11431_v30  ;;  %v11562_v44 = vor.u32 %v15236_v33, %v11559_v35  ;;  %v15196_v30 = vld [vmem:[%s23373_s1 + $0x18c] sm:$0xf] }
 0x1cd   : > { %4363 = vmatpush.bf16.msrb.mxu1 %v11846_v57  ;;  %v2366_v57 = vadd.f32 %v17675_v51, %v2352_v23  ;;  %v15264_v51 = vld [vmem:[%s23373_s1 + $0x3ac] sm:$0xf] }
 0x1ce   : > { %4377 = vmatpush.bf16.msrb.mxu2 %v11974_v62  ;;  %v15232_v62 = vld [vmem:[%s23373_s1 + $0x2ac] sm:$0xf] }
 0x1cf   : > { %4391 = vmatpush.bf16.msrb.mxu3 %v12102_v3  ;;  %4350 = vmatmul.bf16.vlgmr.msrb.gmra.mxu0 %v16772_v22  ;;  %v11671_v3 = vld [vmem:[%s23373_s1 + $0x3b8] sm:$0xf0]  ;;  %v11546_v12 = vor.u32 %v15232_v62, %v11543_v1  ;;  %v15164_v23 = vld [vmem:[%s23373_s1 + $0x8c] sm:$0xf]  ;;  %v2380_v33 = vadd.f32 %v17686_v61, %v2366_v57 }
 0x1d0   : > { %4398 = vmatpush.bf16.msra.mxu0 %v11322_v5  ;;  %4364 = vmatmul.bf16.vlgmr.msrb.gmra.mxu1 %v16795_v40  ;;  %v11290_v5 = vor.u32 %v15168_v20, %v11287_v53  ;;  %v11674_v35 = vor.u32 %v15264_v51, %v11671_v3  ;;  %v15260_v61 = vld [vmem:[%s23373_s1 + $0x38c] sm:$0xf]  ;;  %v11383_v1 = vld [vmem:[%s23373_s1 + $0x178] sm:$0xf0] }
 0x1d1   : > { %4412 = vmatpush.bf16.msra.mxu1 %v11450_v11  ;;  %v11690_v11 = vor.u32 %v15268_v13, %v11687_v34  ;;  %4378 = vmatmul.bf16.vlgmr.msrb.gmra.mxu2 %v16777_v29  ;;  %v11399_v13 = vld [vmem:[%s23373_s1 + $0x198] sm:$0xf0]  ;;  %v15228_v34 = vld [vmem:[%s23373_s1 + $0x28c] sm:$0xf]  ;;  %v2394_v20 = vadd.f32 %v17849_v58, %v2380_v33 }
 0x1d2   : > { %4426 = vmatpush.bf16.msra.mxu2 %v11578_v27  ;;  %v11415_v27 = vld [vmem:[%s23373_s1 + $0x1b8] sm:$0xf0]  ;;  %4392 = vmatmul.bf16.vlgmr.msrb.gmra.mxu3 %v16797_v41  ;;  %v15192_v62 = vld [vmem:[%s23373_s1 + $0x16c] sm:$0xf] }
 0x1d3   : > { %4440 = vmatpush.bf16.msra.mxu3 %v11706_v28  ;;  %v11418_v9 = vor.u32 %v15200_v56, %v11415_v27  ;;  %v11271_v28 = vld [vmem:[%s23373_s1 + $0x98] sm:$0xf0]  ;;  %v11402_v56 = vor.u32 %v15196_v30, %v11399_v13  ;;  %v15224_v51 = vld [vmem:[%s23373_s1 + $0x26c] sm:$0xf]  ;;  %v11386_v33 = vor.u32 %v15192_v62, %v11383_v1 }
 0x1d4   : > { %4399 = vmatpush.bf16.msra.mxu0 %v11306_v38  ;;  %v11527_v38 = vld [vmem:[%s23373_s1 + $0x298] sm:$0xf0]  ;;  %v11274_v53 = vor.u32 %v15164_v23, %v11271_v28  ;;  %v2408_v28 = vadd.f32 %v17851_v60, %v2394_v20  ;;  %v15156_v13 = vld [vmem:[%s23373_s1 + $0x4c] sm:$0xf] }
 0x1d5   : > { %4413 = vmatpush.bf16.msra.mxu1 %v11434_v39  ;;  %v19346_v39 = vpop.f32.mrf.mxu2  ;;  %v11530_v57 = vor.u32 %v15228_v34, %v11527_v38  ;;  %v11255_v27 = vld [vmem:[%s23373_s1 + $0x78] sm:$0xf0]  ;;  %v15188_v38 = vld [vmem:[%s23373_s1 + $0x14c] sm:$0xf] }
 0x1d6   : > { %4427 = vmatpush.bf16.msra.mxu2 %v11562_v44  ;;  %v11655_v44 = vld [vmem:[%s23373_s1 + $0x398] sm:$0xf0]  ;;  %v2422_v60 = vadd.f32 %v17890_v54, %v2408_v28  ;;  %v15220_v20 = vld [vmem:[%s23373_s1 + $0x24c] sm:$0xf] }
 0x1d7   : > { %4441 = vmatpush.bf16.msra.mxu3 %v11690_v11  ;;  %v15160_v11 = vld [vmem:[%s23373_s1 + $0x6c] sm:$0xf]  ;;  %v11658_v58 = vor.u32 %v15260_v61, %v11655_v44  ;;  %v11511_v3 = vld [vmem:[%s23373_s1 + $0x278] sm:$0xf0] }
 0x1d8   : > { %4400 = vmatpush.bf16.msra.mxu0 %v11290_v5  ;;  %v4073_v5 = vpop.f32.mrf.mxu0  ;;  %v11639_v23 = vld [vmem:[%s23373_s1 + $0x378] sm:$0xf0]  ;;  %v11258_v30 = vor.u32 %v15160_v11, %v11255_v27  ;;  %v15152_v1 = vld [vmem:[%s23373_s1 + $0x2c] sm:$0xf] }
 0x1d9   : > { %4414 = vmatpush.bf16.msra.mxu1 %v11418_v9  ;;  %v19373_v9 = vpop.f32.mrf.mxu3  ;;  %v11239_v34 = vld [vmem:[%s23373_s1 + $0x58] sm:$0xf0] }
 0x1da   : > { %4428 = vmatpush.bf16.msra.mxu2 %v11546_v12  ;;  %v15256_v12 = vld [vmem:[%s23373_s1 + $0x36c] sm:$0xf]  ;;  %v11367_v44 = vld [vmem:[%s23373_s1 + $0x158] sm:$0xf0]  ;;  %v11242_v11 = vor.u32 %v15156_v13, %v11239_v34  ;;  %v4072_v34 = vadd.f32 %v19292_v45, %v17751_v50 }
 0x1db   : > { %4442 = vmatpush.bf16.msra.mxu3 %v11674_v35  ;;  %v11514_v35 = vor.u32 %v15224_v51, %v11511_v3  ;;  %v11642_v61 = vor.u32 %v15256_v12, %v11639_v23  ;;  %v11623_v54 = vld [vmem:[%s23373_s1 + $0x358] sm:$0xf0]  ;;  %v11370_v62 = vor.u32 %v15188_v38, %v11367_v44  ;;  %v15184_v3 = vld [vmem:[%s23373_s1 + $0x12c] sm:$0xf]  ;;  %v2436_v12 = vadd.f32 %v17901_v26, %v2422_v60 }
 0x1dc   : > { %4401 = vmatpush.bf16.msra.mxu0 %v11274_v53  ;;  %v11495_v53 = vld [vmem:[%s23373_s1 + $0x258] sm:$0xf0]  ;;  %v15248_v26 = vld [vmem:[%s23373_s1 + $0x32c] sm:$0xf] }
 0x1dd   : > { %4415 = vmatpush.bf16.msra.mxu1 %v11402_v56  ;;  %v4087_v56 = vpop.f32.mrf.mxu1  ;;  %v4101_v27 = vpop.f32.mrf.mxu2  ;;  %v11223_v51 = vld [vmem:[%s23373_s1 + $0x38] sm:$0xf0]  ;;  %v4074_v38 = vadd.f32 %v4073_v5, %v2436_v12  ;;  %v15180_v50 = vld [vmem:[%s23373_s1 + $0x10c] sm:$0xf] }
 0x1de   : > { %4429 = vmatpush.bf16.msra.mxu2 %v11530_v57  ;;  %v15252_v57 = vld [vmem:[%s23373_s1 + $0x34c] sm:$0xf]  ;;  %v11351_v28 = vld [vmem:[%s23373_s1 + $0x138] sm:$0xf0]  ;;  %v11226_v60 = vor.u32 %v15152_v1, %v11223_v51 }
 0x1df   : > { %4443 = vmatpush.bf16.msra.mxu3 %v11658_v58  ;;  %v11498_v58 = vor.u32 %v15220_v20, %v11495_v53  ;;  %v11626_v23 = vor.u32 %v15252_v57, %v11623_v54  ;;  %v11607_v13 = vld [vmem:[%s23373_s1 + $0x338] sm:$0xf0]  ;;  %v11354_v53 = vor.u32 %v15184_v3, %v11351_v28  ;;  %v15212_v5 = vld [vmem:[%s23373_s1 + $0x20c] sm:$0xf]  ;;  %v4088_v28 = vadd.f32 %v4087_v56, %v4074_v38 }
 0x1e0   : > { %4402 = vmatpush.bf16.msra.mxu0 %v11258_v30  ;;  %v15216_v30 = vld [vmem:[%s23373_s1 + $0x22c] sm:$0xf]  ;;  %v11207_v44 = vld [vmem:[%s23373_s1 + $0x18] sm:$0xf0]  ;;  %v11610_v54 = vor.u32 %v15248_v26, %v11607_v13 }
 0x1e1   : > { %4416 = vmatpush.bf16.msra.mxu1 %v11386_v33  ;;  %v11479_v33 = vld [vmem:[%s23373_s1 + $0x238] sm:$0xf0]  ;;  %v4115_v20 = vpop.f32.mrf.mxu3  ;;  %v15304_v51 = vld [vmem:[%s23373_s1 + $0x4ec] sm:$0xf] }
 0x1e2   : > { %4430 = vmatpush.bf16.msra.mxu2 %v11514_v35  ;;  %v19426_v35 = vpop.f32.mrf.mxu0  ;;  %v11482_v57 = vor.u32 %v15216_v30, %v11479_v33  ;;  %v11335_v45 = vld [vmem:[%s23373_s1 + $0x118] sm:$0xf0]  ;;  %v15336_v12 = vld [vmem:[%s23373_s1 + $0x5ec] sm:$0xf] }
 0x1e3   : > { %4444 = vmatpush.bf16.msra.mxu3 %v11642_v61  ;;  %v15148_v61 = vld [vmem:[%s23373_s1 + $0xc] sm:$0xf]  ;;  %v11831_v3 = vld [vmem:[%s23373_s1 + $0x4f8] sm:$0xf0] }
 0x1e4   : > { %4403 = vmatpush.bf16.msra.mxu0 %v11242_v11  ;;  %v11463_v11 = vld [vmem:[%s23373_s1 + $0x218] sm:$0xf0]  ;;  %v11210_v30 = vor.u32 %v15148_v61, %v11207_v44  ;;  %v15368_v26 = vld [vmem:[%s23373_s1 + $0x6ec] sm:$0xf]  ;;  %v4102_v61 = vadd.f32 %v4101_v27, %v4088_v28  ;;  %v11834_v36 = vor.u32 %v15304_v51, %v11831_v3 }
 0x1e5   : > { %4417 = vmatpush.bf16.msra.mxu1 %v11370_v62  ;;  %v15244_v62 = vld [vmem:[%s23373_s1 + $0x30c] sm:$0xf]  ;;  %v19460_v1 = vpop.f32.mrf.mxu1  ;;  %v11959_v33 = vld [vmem:[%s23373_s1 + $0x5f8] sm:$0xf0]  ;;  %v19481_v2 = vpop.f32.mrf.mxu2  ;;  %v11466_v56 = vor.u32 %v15212_v5, %v11463_v11 }
 0x1e6   : > { %4431 = vmatpush.bf16.msra.mxu2 %v11498_v58  ;;  %v11591_v58 = vld [vmem:[%s23373_s1 + $0x318] sm:$0xf0]  ;;  %v11962_v7 = vor.u32 %v15336_v12, %v11959_v33  ;;  %v4116_v3 = vadd.f32 %v4115_v20, %v4102_v61  ;;  %v15324_v61 = vld [vmem:[%s23373_s1 + $0x58c] sm:$0xf] }
 0x1e7   : > { %4445 = vmatpush.bf16.msra.mxu3 %v11626_v23  ;;  %v4086_v23 = vadd.f32 %v19325_v8, %v4072_v34  ;;  %v12087_v13 = vld [vmem:[%s23373_s1 + $0x6f8] sm:$0xf0]  ;;  %v11338_v8 = vor.u32 %v15180_v50, %v11335_v45  ;;  %v15400_v34 = vld [vmem:[%s23373_s1 + $0x7ec] sm:$0xf]  ;;  %v11594_v44 = vor.u32 %v15244_v62, %v11591_v58 }
 0x1e8   : > { %4404 = vmatpush.bf16.msra.mxu0 %v11226_v60  ;;  %v12215_v38 = vld [vmem:[%s23373_s1 + $0x7f8] sm:$0xf0]  ;;  %v12090_v4 = vor.u32 %v15368_v26, %v12087_v13  ;;  %v15332_v50 = vld [vmem:[%s23373_s1 + $0x5cc] sm:$0xf] }
 0x1e9   : > { %4418 = vmatpush.bf16.msra.mxu1 %v11354_v53  ;;  %v4100_v60 = vadd.f32 %v19346_v39, %v4086_v23  ;;  %v15300_v53 = vld [vmem:[%s23373_s1 + $0x4cc] sm:$0xf]  ;;  %v12218_v39 = vor.u32 %v15400_v34, %v12215_v38  ;;  %v11943_v27 = vld [vmem:[%s23373_s1 + $0x5d8] sm:$0xf0]  ;;  %v19508_v11 = vpop.f32.mrf.mxu3 }
 0x1ea   : > { %4432 = vmatpush.bf16.msra.mxu2 %v11482_v57  ;;  %v11815_v57 = vld [vmem:[%s23373_s1 + $0x4d8] sm:$0xf0]  ;;  %v15364_v45 = vld [vmem:[%s23373_s1 + $0x6cc] sm:$0xf]  ;;  %v11946_v23 = vor.u32 %v15332_v50, %v11943_v27 }
 0x1eb   : > { %4446 = vmatpush.bf16.msra.mxu3 %v11610_v54  ;;  %v12071_v5 = vld [vmem:[%s23373_s1 + $0x6d8] sm:$0xf0]  ;;  %v4129_v54 = vpop.f32.mrf.mxu0  ;;  %v15396_v62 = vld [vmem:[%s23373_s1 + $0x7cc] sm:$0xf]  ;;  %v4114_v51 = vadd.f32 %v19373_v9, %v4100_v60  ;;  %v11818_v12 = vor.u32 %v15300_v53, %v11815_v57 }
 0x1ec   : > { %4405 = vmatpush.bf16.msra.mxu0 %v11210_v30  ;;  %v12199_v58 = vld [vmem:[%s23373_s1 + $0x7d8] sm:$0xf0]  ;;  %v12074_v28 = vor.u32 %v15364_v45, %v12071_v5  ;;  %v15296_v30 = vld [vmem:[%s23373_s1 + $0x4ac] sm:$0xf]  ;;  %v19575_v5 = vld [vmem:[%s23374_s2] sm:$0xf] }
 0x1ed   : > { %4419 = vmatpush.bf16.msra.mxu1 %v11338_v8  ;;  %v11799_v33 = vld [vmem:[%s23373_s1 + $0x4b8] sm:$0xf0]  ;;  %v15328_v9 = vld [vmem:[%s23373_s1 + $0x5ac] sm:$0xf]  ;;  %v4128_v20 = vadd.f32 %v19426_v35, %v4114_v51  ;;  %v4143_v8 = vpop.f32.mrf.mxu1  ;;  %v4157_v34 = vpop.f32.mrf.mxu2 }
 0x1ee   : > { %4433 = vmatpush.bf16.msra.mxu2 %v11466_v56  ;;  %v15360_v26 = vld [vmem:[%s23373_s1 + $0x6ac] sm:$0xf]  ;;  %v12055_v13 = vld [vmem:[%s23373_s1 + $0x6b8] sm:$0xf0]  ;;  %v11802_v56 = vor.u32 %v15296_v30, %v11799_v33 }
 0x1ef   : > { %4447 = vmatpush.bf16.msra.mxu3 %v11594_v44  ;;  %4406 = vmatmul.bf16.vlgmr.msra.gmra.mxu0 %v16641_v15  ;;  %v15392_v15 = vld [vmem:[%s23373_s1 + $0x7ac] sm:$0xf]  ;;  %v12183_v35 = vld [vmem:[%s23373_s1 + $0x7b8] sm:$0xf0]  ;;  %v12058_v60 = vor.u32 %v15360_v26, %v12055_v13 }
 0x1f0   : > { %4454 = vmatpush.bf16.msrb.mxu0 %v11834_v36  ;;  %v4130_v36 = vadd.f32 %v4129_v54, %v4116_v3  ;;  %4420 = vmatmul.bf16.vlgmr.msra.gmra.mxu1 %v16654_v24  ;;  %v11783_v24 = vld [vmem:[%s23373_s1 + $0x498] sm:$0xf0]  ;;  %v12186_v53 = vor.u32 %v15392_v15, %v12183_v35  ;;  %v15356_v50 = vld [vmem:[%s23373_s1 + $0x68c] sm:$0xf] }
 0x1f1   : > { %4468 = vmatpush.bf16.msrb.mxu1 %v11962_v7  ;;  %v11927_v7 = vld [vmem:[%s23373_s1 + $0x5b8] sm:$0xf0]  ;;  %4434 = vmatmul.bf16.vlgmr.msra.gmra.mxu2 %v16646_v21  ;;  %v15292_v21 = vld [vmem:[%s23373_s1 + $0x48c] sm:$0xf] }
 0x1f2   : > { %4482 = vmatpush.bf16.msrb.mxu2 %v12090_v4  ;;  %v12202_v4 = vor.u32 %v15396_v62, %v12199_v58  ;;  %4448 = vmatmul.bf16.vlgmr.msra.gmra.mxu3 %v16666_v32  ;;  %v11930_v38 = vor.u32 %v15328_v9, %v11927_v7  ;;  %v4142_v32 = vadd.f32 %v19460_v1, %v4128_v20  ;;  %v11911_v57 = vld [vmem:[%s23373_s1 + $0x598] sm:$0xf0]  ;;  %v15388_v27 = vld [vmem:[%s23373_s1 + $0x78c] sm:$0xf]  ;;  %v4171_v58 = vpop.f32.mrf.mxu3  ;;  %v4512_v7 = vperm.slane %v19575_v5, 0 }
 0x1f3   : > { %4496 = vmatpush.bf16.msrb.mxu3 %v12218_v39  ;;  %v4144_v44 = vadd.f32 %v4143_v8, %v4130_v36  ;;  %v12039_v39 = vld [vmem:[%s23373_s1 + $0x698] sm:$0xf0]  ;;  %v11786_v62 = vor.u32 %v15292_v21, %v11783_v24  ;;  %v11914_v51 = vor.u32 %v15324_v61, %v11911_v57  ;;  %v15352_v33 = vld [vmem:[%s23373_s1 + $0x66c] sm:$0xf]  ;;  %v2464_v8 = vadd.f32 %v18057_v19, %v18031_v6 }
 0x1f4   : > { %4455 = vmatpush.bf16.msrb.mxu0 %v11818_v12  ;;  %v12167_v1 = vld [vmem:[%s23373_s1 + $0x798] sm:$0xf0]  ;;  %v4156_v45 = vadd.f32 %v19481_v2, %v4142_v32  ;;  %v12042_v3 = vor.u32 %v15356_v50, %v12039_v39  ;;  %v15288_v12 = vld [vmem:[%s23373_s1 + $0x46c] sm:$0xf] }
 0x1f5   : > { %4469 = vmatpush.bf16.msrb.mxu1 %v11946_v23  ;;  %v4158_v54 = vadd.f32 %v4157_v34, %v4144_v44  ;;  %v11767_v2 = vld [vmem:[%s23373_s1 + $0x478] sm:$0xf0]  ;;  %v15320_v23 = vld [vmem:[%s23373_s1 + $0x56c] sm:$0xf] }
 0x1f6   : > { %4483 = vmatpush.bf16.msrb.mxu2 %v12074_v28  ;;  %v12170_v28 = vor.u32 %v15388_v27, %v12167_v1  ;;  %v11895_v30 = vld [vmem:[%s23373_s1 + $0x578] sm:$0xf0]  ;;  %v15384_v20 = vld [vmem:[%s23373_s1 + $0x76c] sm:$0xf]  ;;  %v11770_v13 = vor.u32 %v15288_v12, %v11767_v2 }
 0x1f7   : > { %4497 = vmatpush.bf16.msrb.mxu3 %v12202_v4  ;;  %v12023_v9 = vld [vmem:[%s23373_s1 + $0x678] sm:$0xf0]  ;;  %v4170_v4 = vadd.f32 %v19508_v11, %v4156_v45  ;;  %v4172_v26 = vadd.f32 %v4171_v58, %v4158_v54  ;;  %v11898_v15 = vor.u32 %v15320_v23, %v11895_v30  ;;  %v15316_v34 = vld [vmem:[%s23373_s1 + $0x54c] sm:$0xf]  ;;  %v4183_v58 = vpop.f32.mrf.mxu0  ;;  %v4197_v23 = vpop.f32.mrf.mxu1  ;;  %v16263_v30 = vmov 65535  }
 0x1f8   : > { %4456 = vmatpush.bf16.msrb.mxu0 %v11802_v56  ;;  %v12151_v36 = vld [vmem:[%s23373_s1 + $0x778] sm:$0xf0]  ;;  %v12026_v35 = vor.u32 %v15352_v33, %v12023_v9  ;;  %v15284_v56 = vld [vmem:[%s23373_s1 + $0x44c] sm:$0xf]  ;;  %v4550_v33 = vsel %vm4548_vm0, 4294967295, %v16263_v30 }
 0x1f9   : > { %4470 = vmatpush.bf16.msrb.mxu1 %v11930_v38  ;;  %v11751_v11 = vld [vmem:[%s23373_s1 + $0x458] sm:$0xf0]  ;;  %v12154_v38 = vor.u32 %v15384_v20, %v12151_v36  ;;  %v15348_v19 = vld [vmem:[%s23373_s1 + $0x64c] sm:$0xf]  ;;  %v4520_v61 = vadd.f32 %v4512_v7, %v4170_v4  ;;  %v4524_v32 = vadd.f32 %v4512_v7, %v4172_v26 }
 0x1fa   : > { %4484 = vmatpush.bf16.msrb.mxu2 %v12058_v60  ;;  %v11879_v6 = vld [vmem:[%s23373_s1 + $0x558] sm:$0xf0]  ;;  %v15380_v21 = vld [vmem:[%s23373_s1 + $0x74c] sm:$0xf]  ;;  %v11754_v44 = vor.u32 %v15284_v56, %v11751_v11 }
 0x1fb   : > { %4498 = vmatpush.bf16.msrb.mxu3 %v12186_v53  ;;  %v12007_v60 = vld [vmem:[%s23373_s1 + $0x658] sm:$0xf0]  ;;  %v2478_v53 = vadd.f32 %v18087_v42, %v2464_v8  ;;  %v11882_v57 = vor.u32 %v15316_v34, %v11879_v6  ;;  %v15280_v39 = vld [vmem:[%s23373_s1 + $0x42c] sm:$0xf]  ;;  %v4528_v12 = vmax.f32 %v4520_v61, 0.0  ;;  %v4532_v2 = vmax.f32 %v4524_v32, 0.0  ;;  %v4225_v61 = vpop.f32.mrf.mxu3 }
 0x1fc   : > { %4457 = vmatpush.bf16.msrb.mxu0 %v11786_v62  ;;  %v12135_v24 = vld [vmem:[%s23373_s1 + $0x758] sm:$0xf0]  ;;  %v12010_v50 = vor.u32 %v15348_v19, %v12007_v60  ;;  %v15312_v1 = vld [vmem:[%s23373_s1 + $0x52c] sm:$0xf]  ;;  %v19682_v60 = vsel %vm4549_vm1, %v4550_v33, 0 }
 0x1fd   : > { %4471 = vmatpush.bf16.msrb.mxu1 %v11914_v51  ;;  %v11735_v27 = vld [vmem:[%s23373_s1 + $0x438] sm:$0xf0]  ;;  %v12138_v45 = vor.u32 %v15380_v21, %v12135_v24  ;;  %v15344_v54 = vld [vmem:[%s23373_s1 + $0x62c] sm:$0xf]  ;;  %v2492_v9 = vadd.f32 %v18098_v46, %v2478_v53  ;;  %v4536_v34 = vpack.c.bf16 %v4532_v2, %v4528_v12  ;;  %v4211_v21 = vpop.f32.mrf.mxu2  ;;  %v4184_v53 = vadd.f32 %v4183_v58, %v18164_v43 }
 0x1fe   : > { %4485 = vmatpush.bf16.msrb.mxu2 %v12042_v3  ;;  %v11863_v42 = vld [vmem:[%s23373_s1 + $0x538] sm:$0xf0]  ;;  %v15376_v51 = vld [vmem:[%s23373_s1 + $0x72c] sm:$0xf] }
 0x1ff   : > { %4499 = vmatpush.bf16.msrb.mxu3 %v12170_v28  ;;  %v11991_v62 = vld [vmem:[%s23373_s1 + $0x638] sm:$0xf0]  ;;  %v11738_v28 = vor.u32 %v15280_v39, %v11735_v27  ;;  %v11866_v20 = vor.u32 %v15312_v1, %v11863_v42  ;;  %v15276_v4 = vld [vmem:[%s23373_s1 + $0x40c] sm:$0xf]  ;;  %v19686_v32 = vand.u32 %v19682_v60, %v4536_v34  ;;  %v4198_v39 = vadd.f32 %v4197_v23, %v4184_v53 }
 0x200   : > { %4458 = vmatpush.bf16.msrb.mxu0 %v11770_v13  ;;  %v12119_v3 = vld [vmem:[%s23373_s1 + $0x738] sm:$0xf0]  ;;  %v11994_v36 = vor.u32 %v15344_v54, %v11991_v62  ;;  %v15308_v26 = vld [vmem:[%s23373_s1 + $0x50c] sm:$0xf] }
 0x201   : > { %4472 = vmatpush.bf16.msrb.mxu1 %v11898_v15  ;;  %v11719_v7 = vld [vmem:[%s23373_s1 + $0x418] sm:$0xf0]  ;;  %v12122_v13 = vor.u32 %v15376_v51, %v12119_v3  ;;  %v15340_v8 = vld [vmem:[%s23373_s1 + $0x60c] sm:$0xf]  ;;  %v4212_v43 = vadd.f32 %v4211_v21, %v4198_v39 }
 0x202   : > { %4486 = vmatpush.bf16.msrb.mxu2 %v12026_v35  ;;  %v11847_v46 = vld [vmem:[%s23373_s1 + $0x518] sm:$0xf0]  ;;  %v2506_v35 = vadd.f32 %v18262_v48, %v2492_v9  ;;  %v15372_v56 = vld [vmem:[%s23373_s1 + $0x70c] sm:$0xf] }
 0x203   : > { %4500 = vmatpush.bf16.msrb.mxu3 %v12154_v38  ;;  %v11975_v15 = vld [vmem:[%s23373_s1 + $0x618] sm:$0xf0]  ;;  %v11722_v38 = vor.u32 %v15276_v4, %v11719_v7  ;;  %v11850_v6 = vor.u32 %v15308_v26, %v11847_v46  ;;  %v4227_v1 = vpop.f32.mrf.mxu3  ;;  %v4226_v54 = vadd.f32 %v4225_v61, %v4212_v43 }
 0x204   : > { %4459 = vmatpush.bf16.msrb.mxu0 %v11754_v44  ;;  %v12103_v11 = vld [vmem:[%s23373_s1 + $0x718] sm:$0xf0]  ;;  %v11978_v19 = vor.u32 %v15340_v8, %v11975_v15  ;;  %v2520_v24 = vadd.f32 %v18264_v49, %v2506_v35 }
 0x205   : > { %4473 = vmatpush.bf16.msrb.mxu1 %v11882_v57  ;;  %v12106_v48 = vor.u32 %v15372_v56, %v12103_v11  ;;  %v4185_v57 = vpop.f32.mrf.mxu0  ;;  %v4213_v27 = vpop.f32.mrf.mxu2  ;;  %v16264_v56 = vmov 0.0  }
 0x206   : > { %4487 = vmatpush.bf16.msrb.mxu2 %v12010_v50  ;;  %v2534_v44 = vadd.f32 %v18303_v47, %v2520_v24  ;;  %v4199_v50 = vpop.f32.mrf.mxu1 }
 0x207   : > { %4501 = vmatpush.bf16.msrb.mxu3 %v12138_v45 }
 0x208   : > { %4460 = vmatpush.bf16.msrb.mxu0 %v11738_v28  ;;  %v2548_v49 = vadd.f32 %v18314_v25, %v2534_v44  ;;  %v4513_v28 = vperm.slane %v19575_v5, 1 }
 0x209   : > { %4474 = vmatpush.bf16.msrb.mxu1 %v11866_v20 }
 0x20a   : > { %4488 = vmatpush.bf16.msrb.mxu2 %v11994_v36  ;;  %v4186_v47 = vadd.f32 %v4185_v57, %v2548_v49  ;;  %v425_v36 = vlaneseq }
 0x20b   : > { %4502 = vmatpush.bf16.msrb.mxu3 %v12122_v13 }
 0x20c   : > { %4461 = vmatpush.bf16.msrb.mxu0 %v11722_v38  ;;  %v4200_v62 = vadd.f32 %v4199_v50, %v4186_v47  ;;  %v426_v26 = vshrl.u32 %v425_v36, 7  ;;  %v19698_v13 = vand.u32 127, %v425_v36 }
 0x20d   : > { %4475 = vmatpush.bf16.msrb.mxu1 %v11850_v6  ;;  %v4239_v45 = vpop.f32.mrf.mxu0 }
 0x20e   : > { %4489 = vmatpush.bf16.msrb.mxu2 %v11978_v19  ;;  %v4253_v42 = vpop.f32.mrf.mxu1  ;;  %v4240_v58 = vadd.f32 %v4239_v45, %v4226_v54  ;;  %v19700_v8 = vmul.u32 2, %v426_v26  ;;  %v2576_v19 = vadd.f32 %v18470_v37, %v18444_v14  ;;  %vm9814_vm8 = vcmp.eq.s32.totalorder %v19698_v13, 12 }
 0x20f   : > { %4503 = vmatpush.bf16.msrb.mxu3 %v12106_v48  ;;  %4462 = vmatmul.bf16.vlgmr.msrb.gmra.mxu0 %v16772_v22  ;;  %v4214_v22 = vadd.f32 %v4213_v27, %v4200_v62  ;;  %vm9813_vm9 = vcmp.lt.s32.totalorder %v19698_v13, 12  ;;  %vm9812_vm10 = vcmp.lt.s32.totalorder %v19698_v13, 8  ;;  %vm9811_vm11 = vcmp.lt.s32.totalorder %v19698_v13, 4 }
 0x210   : > { %4571 = vmatpush.bf16.msra.mxu0 %v19686_v32  ;;  %4476 = vmatmul.bf16.vlgmr.msrb.gmra.mxu1 %v16795_v40  ;;  %vm4541_vm2 = vcmp.eq.s32.totalorder %v19698_v13, %v19700_v8  ;;  %v2590_v21 = vadd.f32 %v18500_v63, %v2576_v19  ;;  %v4740_v48 = vadd.s32 1, %v19700_v8 }
 0x211   : > { %4490 = vmatmul.bf16.vlgmr.msrb.gmra.mxu2 %v16777_v29  ;;  %v4228_v51 = vadd.f32 %v4227_v1, %v4214_v22  ;;  %v4254_v29 = vadd.f32 %v4253_v42, %v4240_v58  ;;  %v4542_v11 = vsel %vm4541_vm2, 1.0, %v16264_v56 }
 0x212   : > { %4504 = vmatmul.bf16.vlgmr.msrb.gmra.mxu3 %v16797_v41  ;;  %v19705_v38 = vpack.c.bf16 %v4542_v11, %v4542_v11  ;;  %vm4741_vm4 = vcmp.eq.s32.totalorder %v19698_v13, %v4740_v48  ;;  %v2604_v53 = vadd.f32 %v18511_v52, %v2590_v21  ;;  %v23392_v48 = vld [vmem:[#allocation4_spill] sm:$0xff] }
 0x213   : > { %v4742_v44 = vsel %vm4741_vm4, 1.0, %v16264_v56 }
 0x214   : > { %4754 = vmatpush.bf16.msrb.mxu0 %v19686_v32  ;;  %v4267_v40 = vpop.f32.mrf.mxu2  ;;  %v19723_v57 = vpack.c.bf16 %v4742_v44, %v4742_v44  ;;  %v2618_v50 = vadd.f32 %v18675_v16, %v2604_v53  ;;  %v23393_v44 = vld [vmem:[#allocation5_spill] sm:$0xff] }
 0x215   : > { %v4241_v3 = vpop.f32.mrf.mxu0  ;;  %v4281_v25 = vpop.f32.mrf.mxu3  ;;  %v4268_v12 = vadd.f32 %v4267_v40, %v4254_v29 }
 0x216   : > { %v4242_v2 = vadd.f32 %v4241_v3, %v4228_v51  ;;  %v4255_v41 = vpop.f32.mrf.mxu1  ;;  %v2632_v37 = vadd.f32 %v18677_v17, %v2618_v50 }
 0x217   : > { %v4282_v23 = vadd.f32 %v4281_v25, %v4268_v12 }
 0x218   : > { %v4256_v30 = vadd.f32 %v4255_v41, %v4242_v2  ;;  %v2646_v49 = vadd.f32 %v18716_v18, %v2632_v37  ;;  %v4514_v41 = vperm.slane %v19575_v5, 2 }
 0x219   : > { %v4521_v4 = vadd.f32 %v4513_v28, %v4282_v23 }
 0x21a   : > { %v2660_v47 = vadd.f32 %v18727_v31, %v2646_v49 }
 0x21b   : > { %v4529_v15 = vmax.f32 %v4521_v4, 0.0 }
 0x21c   : > { %v4269_v33 = vpop.f32.mrf.mxu2 }
 0x21d   : > { %v4270_v9 = vadd.f32 %v4269_v33, %v4256_v30  ;;  %v4283_v20 = vpop.f32.mrf.mxu3 }
 0x21f   : > { %v4284_v7 = vadd.f32 %v4283_v20, %v4270_v9  ;;  %12219 = vmatmul.msk.bf16.vlgmr.msra.gmra.mxu0 %vm4544_vm3, %v19705_v38 }
 0x221   : > { %v4525_v46 = vadd.f32 %v4513_v28, %v4284_v7 }
 0x223   : > { %v4533_v35 = vmax.f32 %v4525_v46, 0.0 }
 0x225   : > { %v4537_v34 = vpack.c.bf16 %v4533_v35, %v4529_v15  ;;  %v2688_v15 = vadd.f32 %v18883_v59, %v18857_v0  ;;  %v12433_v59 = vld [vmem:[%s23375_s3 + $0x378] sm:$0xf] }
 0x227   : > { %v19708_v6 = vand.u32 %v19682_v60, %v4537_v34  ;;  %v2702_v35 = vadd.f32 %v18913_v55, %v2688_v15  ;;  %v23391_v34 = vld [vmem:[#allocation2_spill] sm:$0xff] }
 0x228   : > { %v15771_v55 = vld [vmem:[%s23375_s3 + $0x380] sm:$0xf0] }
 0x229   : > { %4584 = vmatpush.bf16.msra.mxu1 %v19708_v6  ;;  %v2716_v19 = vadd.f32 %v23391_v34, %v2702_v35  ;;  %v4515_v35 = vperm.slane %v19575_v5, 3  ;;  %v12373_v34 = vld [vmem:[%s23375_s3 + $0x300] sm:$0xf] }
 0x22c   : > { %12220 = vmatmul.msk.bf16.vlgmr.msra.gmra.mxu1 %vm4544_vm3, %v19705_v38  ;;  %v4295_v24 = vpop.f32.mrf.mxu0 }
 0x22d   : > { %4767 = vmatpush.bf16.msrb.mxu1 %v19708_v6  ;;  %v4309_v61 = vpop.f32.mrf.mxu1  ;;  %v4296_v39 = vadd.f32 %v4295_v24, %v18577_v10  ;;  %v2730_v24 = vadd.f32 %v23392_v48, %v2716_v19  ;;  %v15756_v19 = vld [vmem:[%s23375_s3 + $0x308] sm:$0xf0] }
 0x22e   : > { %v12374_v48 = vor.u32 %v15756_v19, %v12373_v34  ;;  %v12471_v19 = vld [vmem:[%s23375_s3 + $0x3cc] sm:$0xf0] }
 0x22f   : > { %12223 = vmatmul.msk.bf16.vlgmr.msrb.gmra.mxu0 %vm4544_vm3, %v19723_v57  ;;  %v4310_v27 = vadd.f32 %v4309_v61, %v4296_v39  ;;  %v2744_v53 = vadd.f32 %v23393_v44, %v2730_v24  ;;  %v12361_v24 = vld [vmem:[%s23375_s3 + $0x2e8] sm:$0xf] }
 0x234   : > { %v4323_v14 = vpop.f32.mrf.mxu2  ;;  %v4297_v43 = vpop.f32.mrf.mxu0 }
 0x235   : > { %v4337_v63 = vpop.f32.mrf.mxu3  ;;  %v4311_v52 = vpop.f32.mrf.mxu1  ;;  %v4324_v16 = vadd.f32 %v4323_v14, %v4310_v27  ;;  %v4298_v1 = vadd.f32 %v4297_v43, %v2660_v47  ;;  %v23394_v14 = vld [vmem:[#allocation6_spill] sm:$0xff]  ;;  %v12434_v43 = vor.u32 %v15771_v55, %v12433_v59  ;;  %v12529_v59 = vld [vmem:[%s23375_s3 + $0x438] sm:$0xf] }
 0x236   : > { %v2758_v37 = vadd.f32 %v23394_v14, %v2744_v53  ;;  %v15795_v55 = vld [vmem:[%s23375_s3 + $0x440] sm:$0xf0] }
 0x237   : > { %v4338_v22 = vadd.f32 %v4337_v63, %v4324_v16  ;;  %v4312_v58 = vadd.f32 %v4311_v52, %v4298_v1  ;;  %v23395_v63 = vld [vmem:[#allocation3_spill] sm:$0xff]  ;;  %5408 = vmatpush.bf16.msra.mxu0 %v12434_v43  ;;  %v12530_v43 = vor.u32 %v15795_v55, %v12529_v59 }
 0x238   : > { %v23396_v52 = vld [vmem:[#allocation7_spill] sm:$0xff] }
 0x239   : > { %v2772_v47 = vadd.f32 %v23396_v52, %v2758_v37  ;;  %v12349_v37 = vld [vmem:[%s23375_s3 + $0x2d0] sm:$0xf]  ;;  %v12517_v52 = vld [vmem:[%s23375_s3 + $0x420] sm:$0xf]  ;;  %5421 = vmatpush.bf16.msra.mxu1 %v12530_v43  ;;  %v12627_v59 = vld [vmem:[%s23375_s3 + $0x504] sm:$0xf0] }
 0x23a   : > { %v12601_v55 = vld [vmem:[%s23375_s3 + $0x4c8] sm:$0xf] }
 0x23c   : > { %12224 = vmatmul.msk.bf16.vlgmr.msrb.gmra.mxu1 %vm4544_vm3, %v19723_v57  ;;  %v4325_v45 = vpop.f32.mrf.mxu2 }
 0x23d   : > { %v4339_v42 = vpop.f32.mrf.mxu3  ;;  %v4326_v40 = vadd.f32 %v4325_v45, %v4312_v58  ;;  %v12421_v45 = vld [vmem:[%s23375_s3 + $0x360] sm:$0xf]  ;;  %v15765_v58 = vld [vmem:[%s23375_s3 + $0x350] sm:$0xf0] }
 0x23f   : > { %v4340_v29 = vadd.f32 %v4339_v42, %v4326_v40  ;;  %v15768_v42 = vld [vmem:[%s23375_s3 + $0x368] sm:$0xf0] }
 0x24c   : > { %v4351_v54 = vpop.f32.mrf.mxu0 }
 0x24d   : > { %v4365_v62 = vpop.f32.mrf.mxu1  ;;  %v4352_v17 = vadd.f32 %v4351_v54, %v4338_v22  ;;  %v12409_v22 = vld [vmem:[%s23375_s3 + $0x348] sm:$0xf] }
 0x24f   : > { %v4366_v18 = vadd.f32 %v4365_v62, %v4352_v17  ;;  %v12422_v62 = vor.u32 %v15768_v42, %v12421_v45  ;;  %v15791_v42 = vld [vmem:[%s23375_s3 + $0x424] sm:$0xf] }
 0x251   : > { %5409 = vmatpush.bf16.msra.mxu0 %v12422_v62  ;;  %v12519_v62 = vld [vmem:[%s23375_s3 + $0x42c] sm:$0xf0] }
 0x254   : > { %v4379_v51 = vpop.f32.mrf.mxu2  ;;  %v4353_v3 = vpop.f32.mrf.mxu0 }
 0x255   : > { %v4393_v10 = vpop.f32.mrf.mxu3  ;;  %v4380_v25 = vadd.f32 %v4379_v51, %v4366_v18  ;;  %v4354_v12 = vadd.f32 %v4353_v3, %v4340_v29  ;;  %v4367_v2 = vpop.f32.mrf.mxu1  ;;  %v12410_v51 = vor.u32 %v15765_v58, %v12409_v22  ;;  %v12397_v3 = vld [vmem:[%s23375_s3 + $0x330] sm:$0xf]  ;;  %v12505_v22 = vld [vmem:[%s23375_s3 + $0x408] sm:$0xf]  ;;  %v15789_v58 = vld [vmem:[%s23375_s3 + $0x410] sm:$0xf0] }
 0x257   : > { %v4394_v31 = vadd.f32 %v4393_v10, %v4380_v25  ;;  %v4368_v23 = vadd.f32 %v4367_v2, %v4354_v12  ;;  %v15762_v10 = vld [vmem:[%s23375_s3 + $0x338] sm:$0xf0]  ;;  %5410 = vmatpush.bf16.msra.mxu0 %v12410_v51  ;;  %v12522_v51 = vor.u32 %v15791_v42, %v12519_v62  ;;  %v15815_v42 = vld [vmem:[%s23375_s3 + $0x4e4] sm:$0xf] }
 0x258   : > { %v15810_v62 = vld [vmem:[%s23375_s3 + $0x4b8] sm:$0xf0] }
 0x259   : > { %v4522_v9 = vadd.f32 %v4514_v41, %v4394_v31  ;;  %v12398_v31 = vor.u32 %v15762_v10, %v12397_v3  ;;  %v12507_v3 = vld [vmem:[%s23375_s3 + $0x414] sm:$0xf0]  ;;  %v12493_v10 = vld [vmem:[%s23375_s3 + $0x3f0] sm:$0xf] }
 0x25b   : > { %v4530_v4 = vmax.f32 %v4522_v9, 0.0  ;;  %5411 = vmatpush.bf16.msra.mxu0 %v12398_v31  ;;  %v12495_v31 = vld [vmem:[%s23375_s3 + $0x3fc] sm:$0xf0] }
 0x25c   : > { %v4381_v28 = vpop.f32.mrf.mxu2 }
 0x25d   : > { %v4382_v30 = vadd.f32 %v4381_v28, %v4368_v23  ;;  %v4395_v33 = vpop.f32.mrf.mxu3  ;;  %v15759_v23 = vld [vmem:[%s23375_s3 + $0x320] sm:$0xf0] }
 0x25f   : > { %v4396_v20 = vadd.f32 %v4395_v33, %v4382_v30 }
 0x261   : > { %v4526_v36 = vadd.f32 %v4514_v41, %v4396_v20  ;;  %v12385_v41 = vld [vmem:[%s23375_s3 + $0x318] sm:$0xf] }
 0x263   : > { %v4534_v7 = vmax.f32 %v4526_v36, 0.0  ;;  %v12386_v36 = vor.u32 %v15759_v23, %v12385_v41  ;;  %v12481_v41 = vld [vmem:[%s23375_s3 + $0x3d8] sm:$0xf]  ;;  %v15783_v23 = vld [vmem:[%s23375_s3 + $0x3e0] sm:$0xf0] }
 0x265   : > { %v4538_v26 = vpack.c.bf16 %v4534_v7, %v4530_v4  ;;  %5412 = vmatpush.bf16.msra.mxu0 %v12386_v36  ;;  %v15780_v36 = vld [vmem:[%s23375_s3 + $0x3c8] sm:$0xf0] }
 0x267   : > { %v19736_v46 = vand.u32 %v19682_v60, %v4538_v26 }
 0x269   : > { %4597 = vmatpush.bf16.msra.mxu2 %v19736_v46  ;;  %5413 = vmatpush.bf16.msra.mxu0 %v12374_v48  ;;  %v15777_v48 = vld [vmem:[%s23375_s3 + $0x3b0] sm:$0xf0] }
 0x26c   : > { %12221 = vmatmul.msk.bf16.vlgmr.msra.gmra.mxu2 %vm4544_vm3, %v19705_v38  ;;  %v4407_v11 = vpop.f32.mrf.mxu0 }
 0x26d   : > { %4780 = vmatpush.bf16.msrb.mxu2 %v19736_v46  ;;  %v4421_v21 = vpop.f32.mrf.mxu1  ;;  %v4408_v49 = vadd.f32 %v4407_v11, %v23395_v63  ;;  %v15750_v63 = vld [vmem:[%s23375_s3 + $0x2d8] sm:$0xf0] }
 0x26f   : > { %v4422_v27 = vadd.f32 %v4421_v21, %v4408_v49  ;;  %v15794_v49 = vld [vmem:[%s23375_s3 + $0x43c] sm:$0xf] }
 0x274   : > { %v4435_v61 = vpop.f32.mrf.mxu2  ;;  %v4409_v0 = vpop.f32.mrf.mxu0 }
 0x275   : > { %v4449_v50 = vpop.f32.mrf.mxu3  ;;  %v4423_v39 = vpop.f32.mrf.mxu1  ;;  %v4436_v16 = vadd.f32 %v4435_v61, %v4422_v27  ;;  %v4410_v1 = vadd.f32 %v4409_v0, %v2772_v47  ;;  %v15753_v61 = vld [vmem:[%s23375_s3 + $0x2f0] sm:$0xf0]  ;;  %v12531_v0 = vld [vmem:[%s23375_s3 + $0x444] sm:$0xf0]  ;;  %v15792_v47 = vld [vmem:[%s23375_s3 + $0x428] sm:$0xf0]  ;;  %v12350_v27 = vor.u32 %v15750_v63, %v12349_v37 }
 0x276   : > { %v12362_v53 = vor.u32 %v15753_v61, %v12361_v24  ;;  %v12534_v45 = vor.u32 %v15794_v49, %v12531_v0  ;;  %v12613_v61 = vld [vmem:[%s23375_s3 + $0x4e0] sm:$0xf]  ;;  %v12445_v63 = vld [vmem:[%s23375_s3 + $0x390] sm:$0xf]  ;;  %v15774_v49 = vld [vmem:[%s23375_s3 + $0x398] sm:$0xf0] }
 0x277   : > { %v4450_v29 = vadd.f32 %v4449_v50, %v4436_v16  ;;  %v4424_v18 = vadd.f32 %v4423_v39, %v4410_v1  ;;  %v15818_v0 = vld [vmem:[%s23375_s3 + $0x4fc] sm:$0xf] }
 0x278   : > { %5414 = vmatpush.bf16.msra.mxu0 %v12362_v53 }
 0x27c   : > { %12225 = vmatmul.msk.bf16.vlgmr.msrb.gmra.mxu2 %vm4544_vm3, %v19723_v57  ;;  %v4437_v54 = vpop.f32.mrf.mxu2  ;;  %5415 = vmatpush.bf16.msra.mxu0 %v12350_v27  ;;  %v12446_v27 = vor.u32 %v15774_v49, %v12445_v63  ;;  %v12579_v49 = vld [vmem:[%s23375_s3 + $0x4a4] sm:$0xf0] }
 0x27d   : > { %v4451_v40 = vpop.f32.mrf.mxu3  ;;  %v4438_v12 = vadd.f32 %v4437_v54, %v4424_v18  ;;  %v12518_v54 = vor.u32 %v15792_v47, %v12517_v52  ;;  %v12506_v18 = vor.u32 %v15789_v58, %v12505_v22  ;;  %v12633_v22 = vld [vmem:[%s23375_s3 + $0x500] sm:$0xf]  ;;  %v15820_v58 = vld [vmem:[%s23375_s3 + $0x508] sm:$0xf0] }
 0x27f   : > { %v4452_v30 = vadd.f32 %v4451_v40, %v4438_v12  ;;  %5422 = vmatpush.bf16.msra.mxu1 %v12518_v54  ;;  %v15785_v12 = vld [vmem:[%s23375_s3 + $0x3f4] sm:$0xf]  ;;  %v12615_v54 = vld [vmem:[%s23375_s3 + $0x4ec] sm:$0xf0] }
 0x280   : > { %5473 = vmatpush.bf16.msrb.mxu0 %v12534_v45  ;;  %v12630_v45 = vor.u32 %v15818_v0, %v12627_v59  ;;  %v12565_v59 = vld [vmem:[%s23375_s3 + $0x480] sm:$0xf] }
 0x283   : > { %5423 = vmatpush.bf16.msra.mxu1 %v12506_v18 }
 0x284   : > { %5474 = vmatpush.bf16.msrb.mxu0 %v12522_v51 }
 0x28c   : > { %v4463_v17 = vpop.f32.mrf.mxu0 }
 0x28d   : > { %v4477_v25 = vpop.f32.mrf.mxu1  ;;  %v4464_v2 = vadd.f32 %v4463_v17, %v4450_v29  ;;  %v15788_v29 = vld [vmem:[%s23375_s3 + $0x40c] sm:$0xf] }
 0x28f   : > { %v4478_v33 = vadd.f32 %v4477_v25, %v4464_v2  ;;  %v12510_v25 = vor.u32 %v15788_v29, %v12507_v3  ;;  %v12618_v29 = vor.u32 %v15815_v42, %v12615_v54  ;;  %v12634_v3 = vor.u32 %v15820_v58, %v12633_v22  ;;  %v15747_v42 = vld [vmem:[%s23375_s3 + $0x2c0] sm:$0xf0]  ;;  %v12553_v54 = vld [vmem:[%s23375_s3 + $0x468] sm:$0xf]  ;;  %v13048_v58 = vld [vmem:[%s23375_s3 + $0x2a0] sm:$0xf] }
 0x291   : > { %5475 = vmatpush.bf16.msrb.mxu0 %v12510_v25 }
 0x294   : > { %v4491_v28 = vpop.f32.mrf.mxu2  ;;  %v4465_v20 = vpop.f32.mrf.mxu0 }
 0x295   : > { %v4505_v9 = vpop.f32.mrf.mxu3  ;;  %v4492_v4 = vadd.f32 %v4491_v28, %v4478_v33  ;;  %v4466_v7 = vadd.f32 %v4465_v20, %v4452_v30  ;;  %v4479_v26 = vpop.f32.mrf.mxu1  ;;  %v12498_v30 = vor.u32 %v15785_v12, %v12495_v31  ;;  %v12482_v33 = vor.u32 %v15783_v23, %v12481_v41  ;;  %v12469_v20 = vld [vmem:[%s23375_s3 + $0x3c0] sm:$0xf]  ;;  %v12621_v12 = vld [vmem:[%s23375_s3 + $0x4e8] sm:$0xf] }
 0x297   : > { %v4506_v15 = vadd.f32 %v4505_v9, %v4492_v4  ;;  %v4480_v11 = vadd.f32 %v4479_v26, %v4466_v7  ;;  %v12483_v9 = vld [vmem:[%s23375_s3 + $0x3e4] sm:$0xf0]  ;;  %v12625_v4 = vld [vmem:[%s23375_s3 + $0x4f8] sm:$0xf]  ;;  %v15819_v26 = vld [vmem:[%s23375_s3 + $0x500] sm:$0xf0]  ;;  %5476 = vmatpush.bf16.msrb.mxu0 %v12498_v30 }
 0x298   : > { %v12626_v34 = vor.u32 %v15819_v26, %v12625_v4 }
 0x299   : > { %v4523_v50 = vadd.f32 %v4515_v35, %v4506_v15 }
 0x29a   : > { %5434 = vmatpush.bf16.msra.mxu2 %v12626_v34 }
 0x29b   : > { %v4531_v16 = vmax.f32 %v4523_v50, 0.0  ;;  %v15776_v50 = vld [vmem:[%s23375_s3 + $0x3ac] sm:$0xf] }
 0x29c   : > { %v4493_v21 = vpop.f32.mrf.mxu2  ;;  %v19863_v28 = vpop.f32.mrf.mxu0 }
 0x29d   : > { %v4494_v5 = vadd.f32 %v4493_v21, %v4480_v11  ;;  %v4507_v44 = vpop.f32.mrf.mxu3  ;;  %v12470_v11 = vor.u32 %v15780_v36, %v12469_v20  ;;  %v12457_v21 = vld [vmem:[%s23375_s3 + $0x3a8] sm:$0xf]  ;;  %v15814_v20 = vld [vmem:[%s23375_s3 + $0x4d8] sm:$0xf0] }
 0x29e   : > { %v12458_v37 = vor.u32 %v15777_v48, %v12457_v21  ;;  %v15808_v21 = vld [vmem:[%s23375_s3 + $0x4a8] sm:$0xf0] }
 0x29f   : > { %v4508_v14 = vadd.f32 %v4507_v44, %v4494_v5  ;;  %v15816_v5 = vld [vmem:[%s23375_s3 + $0x4e8] sm:$0xf0] }
 0x2a0   : > { %v12614_v44 = vor.u32 %v15816_v5, %v12613_v61  ;;  %v15805_v61 = vld [vmem:[%s23375_s3 + $0x490] sm:$0xf0] }
 0x2a1   : > { %v4527_v39 = vadd.f32 %v4515_v35, %v4508_v14  ;;  %v15779_v35 = vld [vmem:[%s23375_s3 + $0x3c4] sm:$0xf]  ;;  %v12459_v14 = vld [vmem:[%s23375_s3 + $0x3b4] sm:$0xf0] }
 0x2a2   : > { %v12474_v53 = vor.u32 %v15779_v35, %v12471_v19  ;;  %5435 = vmatpush.bf16.msra.mxu2 %v12614_v44  ;;  %v12462_v47 = vor.u32 %v15776_v50, %v12459_v14  ;;  %v15811_v35 = vld [vmem:[%s23375_s3 + $0x4c0] sm:$0xf0]  ;;  %v12585_v19 = vld [vmem:[%s23375_s3 + $0x4a0] sm:$0xf]  ;;  %v12577_v44 = vld [vmem:[%s23375_s3 + $0x498] sm:$0xf] }
 0x2a3   : > { %v4535_v1 = vmax.f32 %v4527_v39, 0.0  ;;  %v15813_v39 = vld [vmem:[%s23375_s3 + $0x4d0] sm:$0xf0]  ;;  %v12586_v48 = vor.u32 %v15808_v21, %v12585_v19  ;;  %v15806_v50 = vld [vmem:[%s23375_s3 + $0x49c] sm:$0xf] }
 0x2a4   : > { %v4575_v24 = vpop.f32.mrf.mxu0  ;;  %v12602_v52 = vor.u32 %v15813_v39, %v12601_v55  ;;  %v12561_v14 = vld [vmem:[%s23375_s3 + $0x470] sm:$0xf]  ;;  %v12582_v0 = vor.u32 %v15806_v50, %v12579_v49  ;;  %v15804_v55 = vld [vmem:[%s23375_s3 + $0x488] sm:$0xf0]  ;;  %v15803_v39 = vld [vmem:[%s23375_s3 + $0x484] sm:$0xf] }
 0x2a5   : > { %v4539_v40 = vpack.c.bf16 %v4535_v1, %v4531_v16  ;;  %v15773_v16 = vld [vmem:[%s23375_s3 + $0x394] sm:$0xf]  ;;  %v12447_v1 = vld [vmem:[%s23375_s3 + $0x39c] sm:$0xf0]  ;;  %v12573_v24 = vld [vmem:[%s23375_s3 + $0x488] sm:$0xf] }
 0x2a6   : > { %5436 = vmatpush.bf16.msra.mxu2 %v12602_v52  ;;  %v12450_v51 = vor.u32 %v15773_v16, %v12447_v1  ;;  %v12574_v5 = vor.u32 %v15805_v61, %v12573_v24  ;;  %v12567_v52 = vld [vmem:[%s23375_s3 + $0x48c] sm:$0xf0]  ;;  %v12549_v16 = vld [vmem:[%s23375_s3 + $0x458] sm:$0xf]  ;;  %v15799_v1 = vld [vmem:[%s23375_s3 + $0x460] sm:$0xf0] }
 0x2a7   : > { %v19833_v17 = vand.u32 %v19682_v60, %v4539_v40  ;;  %v15786_v60 = vld [vmem:[%s23375_s3 + $0x3f8] sm:$0xf0]  ;;  %v12550_v22 = vor.u32 %v15799_v1, %v12549_v16  ;;  %v12685_v19 = vld [vmem:[%s23375_s3 + $0x570] sm:$0xf]  ;;  %v12673_v49 = vld [vmem:[%s23375_s3 + $0x558] sm:$0xf] }
 0x2a8   : > { %v12494_v2 = vor.u32 %v15786_v60, %v12493_v10  ;;  %v15812_v10 = vld [vmem:[%s23375_s3 + $0x4cc] sm:$0xf]  ;;  %v12603_v60 = vld [vmem:[%s23375_s3 + $0x4d4] sm:$0xf0]  ;;  %v15834_v21 = vld [vmem:[%s23375_s3 + $0x578] sm:$0xf0] }
 0x2a9   : > { %4610 = vmatpush.bf16.msra.mxu3 %v19833_v17  ;;  %v19880_v7 = vpop.f32.mrf.mxu1  ;;  %v12606_v23 = vor.u32 %v15812_v10, %v12603_v60  ;;  %v12541_v10 = vld [vmem:[%s23375_s3 + $0x450] sm:$0xf]  ;;  %v15798_v60 = vld [vmem:[%s23375_s3 + $0x458] sm:$0xf0]  ;;  %v12686_v61 = vor.u32 %v15834_v21, %v12685_v19  ;;  %v13012_v16 = vld [vmem:[%s23375_s3 + $0x258] sm:$0xf] }
 0x2aa   : > { %5424 = vmatpush.bf16.msra.mxu1 %v12494_v2  ;;  %v15817_v2 = vld [vmem:[%s23375_s3 + $0x4f0] sm:$0xf0]  ;;  %v13024_v50 = vld [vmem:[%s23375_s3 + $0x270] sm:$0xf]  ;;  %v15735_v1 = vld [vmem:[%s23375_s3 + $0x260] sm:$0xf0] }
 0x2ab   : > { %v12622_v30 = vor.u32 %v15817_v2, %v12621_v12  ;;  %v15797_v12 = vld [vmem:[%s23375_s3 + $0x454] sm:$0xf]  ;;  %v12543_v2 = vld [vmem:[%s23375_s3 + $0x45c] sm:$0xf0]  ;;  %v15823_v19 = vld [vmem:[%s23375_s3 + $0x520] sm:$0xf0] }
 0x2ac   : > { %12222 = vmatmul.msk.bf16.vlgmr.msra.gmra.mxu3 %vm4544_vm3, %v19705_v38  ;;  %v15782_v38 = vld [vmem:[%s23375_s3 + $0x3dc] sm:$0xf]  ;;  %v4756_v18 = vpop.f32.mrf.mxu0 }
 0x2ad   : > { %4793 = vmatpush.bf16.msrb.mxu3 %v19833_v17  ;;  %v12486_v15 = vor.u32 %v15782_v38, %v12483_v9  ;;  %v19959_v25 = vpack.c.bf16 %v4756_v18, %v4756_v18  ;;  %v15809_v38 = vld [vmem:[%s23375_s3 + $0x4b4] sm:$0xf]  ;;  %v12609_v9 = vld [vmem:[%s23375_s3 + $0x4d0] sm:$0xf] }
 0x2ae   : > { %5425 = vmatpush.bf16.msra.mxu1 %v12482_v33  ;;  %v12591_v33 = vld [vmem:[%s23375_s3 + $0x4bc] sm:$0xf0]  ;;  %v12610_v4 = vor.u32 %v15814_v20, %v12609_v9  ;;  %v12699_v9 = vld [vmem:[%s23375_s3 + $0x594] sm:$0xf0]  ;;  %v12705_v20 = vld [vmem:[%s23375_s3 + $0x590] sm:$0xf] }
 0x2af   : > { %5477 = vmatpush.bf16.msrb.mxu0 %v12486_v15  ;;  %v12594_v36 = vor.u32 %v15809_v38, %v12591_v33  ;;  %v12597_v15 = vld [vmem:[%s23375_s3 + $0x4b8] sm:$0xf]  ;;  %v15836_v33 = vld [vmem:[%s23375_s3 + $0x58c] sm:$0xf] }
 0x2b0   : > { %5416 = vmatmul.bf16.vlgmr.msra.gmra.mxu0 %v19959_v25  ;;  %v12598_v34 = vor.u32 %v15811_v35, %v12597_v15 }
 0x2b1   : > { %v4588_v43 = vpop.f32.mrf.mxu1 }
 0x2b2   : > { %5426 = vmatpush.bf16.msra.mxu1 %v12470_v11  ;;  %v12566_v43 = vor.u32 %v15804_v55, %v12565_v59  ;;  %v15830_v55 = vld [vmem:[%s23375_s3 + $0x55c] sm:$0xf] }
 0x2b3   : > { %5478 = vmatpush.bf16.msrb.mxu0 %v12474_v53  ;;  %v15807_v53 = vld [vmem:[%s23375_s3 + $0x4a0] sm:$0xf0] }
 0x2b4   : > { %v4758_v26 = vpop.f32.mrf.mxu0  ;;  %v12578_v63 = vor.u32 %v15807_v53, %v12577_v44  ;;  %v12693_v44 = vld [vmem:[%s23375_s3 + $0x578] sm:$0xf]  ;;  %v15835_v53 = vld [vmem:[%s23375_s3 + $0x580] sm:$0xf0] }
 0x2b5   : > { %v15838_v26 = vld [vmem:[%s23375_s3 + $0x598] sm:$0xf0] }
 0x2b6   : > { %5427 = vmatpush.bf16.msra.mxu1 %v12458_v37  ;;  %v15802_v37 = vld [vmem:[%s23375_s3 + $0x478] sm:$0xf0]  ;;  %v12706_v35 = vor.u32 %v15838_v26, %v12705_v20 }
 0x2b7   : > { %5479 = vmatpush.bf16.msrb.mxu0 %v12462_v47  ;;  %v12562_v47 = vor.u32 %v15802_v37, %v12561_v14  ;;  %v15738_v14 = vld [vmem:[%s23375_s3 + $0x278] sm:$0xf0] }
 0x2b8   : > { %v15822_v26 = vld [vmem:[%s23375_s3 + $0x518] sm:$0xf0] }
 0x2b9   : > { %v4769_v31 = vpop.f32.mrf.mxu1 }
 0x2ba   : > { %5428 = vmatpush.bf16.msra.mxu1 %v12446_v27  ;;  %v19967_v41 = vpack.c.bf16 %v4769_v31, %v4769_v31  ;;  %v12570_v27 = vor.u32 %v15803_v39, %v12567_v52  ;;  %v12697_v31 = vld [vmem:[%s23375_s3 + $0x588] sm:$0xf]  ;;  %v13025_v52 = vor.u32 %v15738_v14, %v13024_v50 }
 0x2bb   : > { %5480 = vmatpush.bf16.msrb.mxu0 %v12450_v51  ;;  %v12675_v39 = vld [vmem:[%s23375_s3 + $0x564] sm:$0xf0] }
 0x2bc   : > { %12226 = vmatmul.msk.bf16.vlgmr.msrb.gmra.mxu3 %vm4544_vm3, %v19723_v57  ;;  %v12589_v57 = vld [vmem:[%s23375_s3 + $0x4b0] sm:$0xf] }
 0x2bd   : > { %v12590_v40 = vor.u32 %v15810_v62, %v12589_v57  ;;  %5429 = vmatmul.bf16.vlgmr.msra.gmra.mxu1 %v19967_v41  ;;  %v15801_v57 = vld [vmem:[%s23375_s3 + $0x470] sm:$0xf0]  ;;  %v15800_v62 = vld [vmem:[%s23375_s3 + $0x46c] sm:$0xf] }
 0x2be   : > { %5486 = vmatpush.bf16.msrb.mxu1 %v12630_v45  ;;  %v13060_v45 = vld [vmem:[%s23375_s3 + $0x2b8] sm:$0xf]  ;;  %v12554_v51 = vor.u32 %v15801_v57, %v12553_v54  ;;  %v15828_v54 = vld [vmem:[%s23375_s3 + $0x548] sm:$0xf0]  ;;  %v15827_v57 = vld [vmem:[%s23375_s3 + $0x544] sm:$0xf] }
 0x2bf   : > { %5437 = vmatpush.bf16.msra.mxu2 %v12590_v40  ;;  %5538 = vmatpush.bf16.msra.mxu0 %v12634_v3  ;;  %v15744_v40 = vld [vmem:[%s23375_s3 + $0x2a8] sm:$0xf0]  ;;  %v13061_v18 = vor.u32 %v15747_v42, %v13060_v45  ;;  %v12661_v42 = vld [vmem:[%s23375_s3 + $0x540] sm:$0xf] }
 0x2c0   : > { %5481 = vmatmul.bf16.vlgmr.msrb.gmra.mxu0 %v19967_v41  ;;  %v13049_v15 = vor.u32 %v15744_v40, %v13048_v58  ;;  %v12669_v58 = vld [vmem:[%s23375_s3 + $0x548] sm:$0xf]  ;;  %v15829_v40 = vld [vmem:[%s23375_s3 + $0x550] sm:$0xf0] }
 0x2c1   : > { %v4771_v11 = vpop.f32.mrf.mxu1 }
 0x2c2   : > { %5487 = vmatpush.bf16.msrb.mxu1 %v12618_v29  ;;  %v12555_v29 = vld [vmem:[%s23375_s3 + $0x474] sm:$0xf0]  ;;  %v13036_v11 = vld [vmem:[%s23375_s3 + $0x288] sm:$0xf] }
 0x2c3   : > { %5539 = vmatpush.bf16.msra.mxu0 %v12622_v30  ;;  %5438 = vmatpush.bf16.msra.mxu2 %v12578_v63  ;;  %v12558_v3 = vor.u32 %v15800_v62, %v12555_v29  ;;  %v12542_v30 = vor.u32 %v15798_v60, %v12541_v10  ;;  %v12694_v63 = vor.u32 %v15835_v53, %v12693_v44  ;;  %v15732_v10 = vld [vmem:[%s23375_s3 + $0x248] sm:$0xf0]  ;;  %v12649_v60 = vld [vmem:[%s23375_s3 + $0x528] sm:$0xf]  ;;  %v15767_v44 = vld [vmem:[%s23375_s3 + $0x364] sm:$0xf] }
 0x2c4   : > { %v12662_v62 = vor.u32 %v15828_v54, %v12661_v42  ;;  %v12423_v53 = vld [vmem:[%s23375_s3 + $0x36c] sm:$0xf0] }
 0x2c5   : > { %v12426_v50 = vor.u32 %v15767_v44, %v12423_v53  ;;  %v12387_v44 = vld [vmem:[%s23375_s3 + $0x324] sm:$0xf0]  ;;  %v12393_v53 = vld [vmem:[%s23375_s3 + $0x320] sm:$0xf] }
 0x2c6   : > { %5488 = vmatpush.bf16.msrb.mxu1 %v12606_v23  ;;  %v15837_v23 = vld [vmem:[%s23375_s3 + $0x590] sm:$0xf0] }
 0x2c7   : > { %5540 = vmatpush.bf16.msra.mxu0 %v12610_v4  ;;  %5439 = vmatpush.bf16.msra.mxu2 %v12566_v43  ;;  %v12698_v38 = vor.u32 %v15837_v23, %v12697_v31  ;;  %v12702_v4 = vor.u32 %v15836_v33, %v12699_v9  ;;  %v12681_v43 = vld [vmem:[%s23375_s3 + $0x560] sm:$0xf]  ;;  %v12651_v23 = vld [vmem:[%s23375_s3 + $0x534] sm:$0xf0] }
 0x2c9   : > { %5449 = vmatpush.bf16.msra.mxu3 %v12698_v38  ;;  %v15826_v38 = vld [vmem:[%s23375_s3 + $0x538] sm:$0xf0] }
 0x2ca   : > { %5489 = vmatpush.bf16.msrb.mxu1 %v12594_v36  ;;  %v12546_v36 = vor.u32 %v15797_v12, %v12543_v2  ;;  %v15825_v12 = vld [vmem:[%s23375_s3 + $0x530] sm:$0xf0]  ;;  %v15824_v2 = vld [vmem:[%s23375_s3 + $0x52c] sm:$0xf] }
 0x2cb   : > { %5541 = vmatpush.bf16.msra.mxu0 %v12598_v34  ;;  %5440 = vmatpush.bf16.msra.mxu2 %v12554_v51  ;;  %v15741_v34 = vld [vmem:[%s23375_s3 + $0x290] sm:$0xf0]  ;;  %v13013_v51 = vor.u32 %v15735_v1, %v13012_v16  ;;  %v12650_v31 = vor.u32 %v15825_v12, %v12649_v60  ;;  %v12654_v9 = vor.u32 %v15824_v2, %v12651_v23  ;;  %v15766_v60 = vld [vmem:[%s23375_s3 + $0x358] sm:$0xf0]  ;;  %v12772_v12 = vld [vmem:[%s23375_s3 + $0x78] sm:$0xf] }
 0x2cc   : > { %v13037_v24 = vor.u32 %v15741_v34, %v13036_v11  ;;  %v12639_v11 = vld [vmem:[%s23375_s3 + $0x51c] sm:$0xf0]  ;;  %v12645_v34 = vld [vmem:[%s23375_s3 + $0x518] sm:$0xf]  ;;  %v15677_v1 = vld [vmem:[%s23375_s3 + $0x94] sm:$0xf] }
 0x2cd   : > { %5450 = vmatpush.bf16.msra.mxu3 %v12686_v61  ;;  %v12435_v61 = vld [vmem:[%s23375_s3 + $0x384] sm:$0xf0]  ;;  %v15675_v2 = vld [vmem:[%s23375_s3 + $0x80] sm:$0xf0] }
 0x2ce   : > { %5490 = vmatpush.bf16.msrb.mxu1 %v12582_v0  ;;  %v15831_v0 = vld [vmem:[%s23375_s3 + $0x560] sm:$0xf0] }
 0x2cf   : > { %5542 = vmatpush.bf16.msra.mxu0 %v12586_v48  ;;  %5441 = vmatpush.bf16.msra.mxu2 %v12542_v30  ;;  %v15833_v48 = vld [vmem:[%s23375_s3 + $0x574] sm:$0xf]  ;;  %v12674_v59 = vor.u32 %v15831_v0, %v12673_v49  ;;  %v12657_v30 = vld [vmem:[%s23375_s3 + $0x530] sm:$0xf]  ;;  %v15680_v0 = vld [vmem:[%s23375_s3 + $0xac] sm:$0xf] }
 0x2d0   : > { %v12658_v20 = vor.u32 %v15826_v38, %v12657_v30  ;;  %v15671_v30 = vld [vmem:[%s23375_s3 + $0x64] sm:$0xf]  ;;  %v12762_v38 = vld [vmem:[%s23375_s3 + $0x6c] sm:$0xf0] }
 0x2d1   : > { %5451 = vmatpush.bf16.msra.mxu3 %v12674_v59  ;;  %v12798_v59 = vld [vmem:[%s23375_s3 + $0xb4] sm:$0xf0] }
 0x2d2   : > { %5491 = vmatpush.bf16.msrb.mxu1 %v12570_v27  ;;  %v15832_v27 = vld [vmem:[%s23375_s3 + $0x568] sm:$0xf0] }
 0x2d3   : > { %5543 = vmatpush.bf16.msra.mxu0 %v12574_v5  ;;  %5501 = vmatpush.bf16.msrb.mxu2 %v12702_v4  ;;  %v12687_v5 = vld [vmem:[%s23375_s3 + $0x57c] sm:$0xf0]  ;;  %v12682_v45 = vor.u32 %v15832_v27, %v12681_v43  ;;  %v12637_v4 = vld [vmem:[%s23375_s3 + $0x510] sm:$0xf]  ;;  %v12796_v43 = vld [vmem:[%s23375_s3 + $0xa8] sm:$0xf]  ;;  %v12801_v27 = vor.u32 %v15680_v0, %v12798_v59 }
 0x2d4   : > { %v12690_v37 = vor.u32 %v15833_v48, %v12687_v5  ;;  %v12646_v48 = vor.u32 %v15823_v19, %v12645_v34  ;;  %v12760_v34 = vld [vmem:[%s23375_s3 + $0x60] sm:$0xf]  ;;  %v15672_v19 = vld [vmem:[%s23375_s3 + $0x68] sm:$0xf0]  ;;  %v15665_v0 = vld [vmem:[%s23375_s3 + $0x34] sm:$0xf] }
 0x2d5   : > { %5452 = vmatpush.bf16.msra.mxu3 %v12662_v62  ;;  %v15769_v62 = vld [vmem:[%s23375_s3 + $0x370] sm:$0xf0]  ;;  %v12738_v59 = vld [vmem:[%s23375_s3 + $0x3c] sm:$0xf0] }
 0x2d6   : > { %5492 = vmatpush.bf16.msrb.mxu1 %v12558_v3  ;;  %v13000_v3 = vld [vmem:[%s23375_s3 + $0x240] sm:$0xf] }
 0x2d7   : > { %5544 = vmatpush.bf16.msra.mxu0 %v12562_v47  ;;  %5502 = vmatpush.bf16.msrb.mxu2 %v12690_v37  ;;  %v12678_v47 = vor.u32 %v15830_v55, %v12675_v39  ;;  %v13001_v33 = vor.u32 %v15732_v10, %v13000_v3  ;;  %v15764_v37 = vld [vmem:[%s23375_s3 + $0x34c] sm:$0xf]  ;;  %v12441_v55 = vld [vmem:[%s23375_s3 + $0x380] sm:$0xf]  ;;  %v12417_v10 = vld [vmem:[%s23375_s3 + $0x350] sm:$0xf] }
 0x2d8   : > { %v15772_v39 = vld [vmem:[%s23375_s3 + $0x388] sm:$0xf0] }
 0x2d9   : > { %5453 = vmatpush.bf16.msra.mxu3 %v12650_v31  ;;  %v12442_v42 = vor.u32 %v15772_v39, %v12441_v55 }
 0x2da   : > { %5493 = vmatpush.bf16.msrb.mxu1 %v12546_v36 }
 0x2db   : > { %5545 = vmatpush.bf16.msra.mxu0 %v12550_v22  ;;  %5503 = vmatpush.bf16.msrb.mxu2 %v12678_v47  ;;  %v12663_v22 = vld [vmem:[%s23375_s3 + $0x54c] sm:$0xf0] }
 0x2dc   : > { %v12666_v29 = vor.u32 %v15827_v57, %v12663_v22  ;;  %v12429_v57 = vld [vmem:[%s23375_s3 + $0x368] sm:$0xf]  ;;  %v12784_v22 = vld [vmem:[%s23375_s3 + $0x90] sm:$0xf] }
 0x2de   : > { %5553 = vmatpush.bf16.msra.mxu1 %v12706_v35  ;;  %v12638_v35 = vor.u32 %v15822_v26, %v12637_v4  ;;  %v12399_v4 = vld [vmem:[%s23375_s3 + $0x33c] sm:$0xf0]  ;;  %v12405_v26 = vld [vmem:[%s23375_s3 + $0x338] sm:$0xf] }
 0x2df   : > { %6088 = vmatpush.bf16.msrb.mxu0 %v13061_v18  ;;  %v12670_v18 = vor.u32 %v15829_v40, %v12669_v58  ;;  %5504 = vmatpush.bf16.msrb.mxu2 %v12666_v29  ;;  %v15678_v58 = vld [vmem:[%s23375_s3 + $0x98] sm:$0xf0]  ;;  %v12774_v29 = vld [vmem:[%s23375_s3 + $0x84] sm:$0xf0] }
 0x2e0   : > { %5454 = vmatpush.bf16.msra.mxu3 %v12638_v35  ;;  %v12785_v3 = vor.u32 %v15678_v58, %v12784_v22  ;;  %v15752_v58 = vld [vmem:[%s23375_s3 + $0x2ec] sm:$0xf] }
 0x2e2   : > { %5554 = vmatpush.bf16.msra.mxu1 %v12694_v63  ;;  %v12411_v63 = vld [vmem:[%s23375_s3 + $0x354] sm:$0xf0] }
 0x2e3   : > { %6089 = vmatpush.bf16.msrb.mxu0 %v13049_v15  ;;  %v15821_v15 = vld [vmem:[%s23375_s3 + $0x514] sm:$0xf]  ;;  %5505 = vmatpush.bf16.msrb.mxu2 %v12654_v9  ;;  %v12414_v49 = vor.u32 %v15764_v37, %v12411_v63  ;;  %v12773_v9 = vor.u32 %v15675_v2, %v12772_v12  ;;  %v15760_v37 = vld [vmem:[%s23375_s3 + $0x328] sm:$0xf0]  ;;  %v12748_v63 = vld [vmem:[%s23375_s3 + $0x48] sm:$0xf] }
 0x2e4   : > { %v12642_v21 = vor.u32 %v15821_v15, %v12639_v11  ;;  %v12765_v15 = vor.u32 %v15671_v30, %v12762_v38  ;;  %v15763_v11 = vld [vmem:[%s23375_s3 + $0x340] sm:$0xf0]  ;;  %v12394_v55 = vor.u32 %v15760_v37, %v12393_v53  ;;  %v12714_v2 = vld [vmem:[%s23375_s3 + $0xc] sm:$0xf0]  ;;  %v15749_v30 = vld [vmem:[%s23375_s3 + $0x2d4] sm:$0xf] }
 0x2e5   : > { %v15659_v12 = vld [vmem:[%s23375_s3 + $0x4] sm:$0xf]  ;;  %v12351_v38 = vld [vmem:[%s23375_s3 + $0x2dc] sm:$0xf0] }
 0x2e6   : > { %5555 = vmatpush.bf16.msra.mxu1 %v12682_v45  ;;  %v12786_v45 = vld [vmem:[%s23375_s3 + $0x9c] sm:$0xf0] }
 0x2e7   : > { %6090 = vmatpush.bf16.msrb.mxu0 %v13037_v24  ;;  %v15770_v24 = vld [vmem:[%s23375_s3 + $0x37c] sm:$0xf]  ;;  %5506 = vmatpush.bf16.msrb.mxu2 %v12642_v21  ;;  %v12789_v40 = vor.u32 %v15677_v1, %v12786_v45  ;;  %v15668_v21 = vld [vmem:[%s23375_s3 + $0x4c] sm:$0xf]  ;;  %v15757_v1 = vld [vmem:[%s23375_s3 + $0x310] sm:$0xf0] }
 0x2e8   : > { %v12438_v5 = vor.u32 %v15770_v24, %v12435_v61  ;;  %v12406_v24 = vor.u32 %v15763_v11, %v12405_v26  ;;  %v12761_v61 = vor.u32 %v15672_v19, %v12760_v34  ;;  %v12736_v45 = vld [vmem:[%s23375_s3 + $0x30] sm:$0xf]  ;;  %v12712_v26 = vld [vmem:[%s23375_s3] sm:$0xf]  ;;  %v15706_v19 = vld [vmem:[%s23375_s3 + $0x178] sm:$0xf0] }
 0x2e9   : > { %v12900_v34 = vld [vmem:[%s23375_s3 + $0x170] sm:$0xf]  ;;  %v12876_v53 = vld [vmem:[%s23375_s3 + $0x140] sm:$0xf] }
 0x2ea   : > { %5556 = vmatpush.bf16.msra.mxu1 %v12670_v18  ;;  %5460 = vmatpush.bf16.msrb.mxu3 %v12438_v5  ;;  %v12430_v18 = vor.u32 %v15769_v62, %v12429_v57  ;;  %v15758_v5 = vld [vmem:[%s23375_s3 + $0x31c] sm:$0xf]  ;;  %v12726_v57 = vld [vmem:[%s23375_s3 + $0x24] sm:$0xf0] }
 0x2eb   : > { %6091 = vmatpush.bf16.msrb.mxu0 %v13025_v52  ;;  %v15681_v52 = vld [vmem:[%s23375_s3 + $0xb0] sm:$0xf0] }
 0x2ec   : > { %v12797_v54 = vor.u32 %v15681_v52, %v12796_v43  ;;  %v15755_v43 = vld [vmem:[%s23375_s3 + $0x304] sm:$0xf]  ;;  %v12375_v52 = vld [vmem:[%s23375_s3 + $0x30c] sm:$0xf0] }
 0x2ee   : > { %5557 = vmatpush.bf16.msra.mxu1 %v12658_v20  ;;  %5461 = vmatpush.bf16.msrb.mxu3 %v12426_v50  ;;  %v15761_v20 = vld [vmem:[%s23375_s3 + $0x334] sm:$0xf] }
 0x2ef   : > { %6092 = vmatpush.bf16.msrb.mxu0 %v13013_v51  ;;  %v20188_v36 = vpop.f32.mrf.mxu2  ;;  %v15674_v51 = vld [vmem:[%s23375_s3 + $0x7c] sm:$0xf]  ;;  %v12402_v35 = vor.u32 %v15761_v20, %v12399_v4  ;;  %v12354_v20 = vor.u32 %v15749_v30, %v12351_v38  ;;  %v15751_v4 = vld [vmem:[%s23375_s3 + $0x2e0] sm:$0xf0]  ;;  %v12868_v38 = vld [vmem:[%s23375_s3 + $0x138] sm:$0xf] }
 0x2f0   : > { %v12777_v31 = vor.u32 %v15674_v51, %v12774_v29  ;;  %v12369_v51 = vld [vmem:[%s23375_s3 + $0x2f0] sm:$0xf] }
 0x2f2   : > { %5558 = vmatpush.bf16.msra.mxu1 %v12646_v48  ;;  %5462 = vmatpush.bf16.msrb.mxu3 %v12414_v49  ;;  %v12750_v48 = vld [vmem:[%s23375_s3 + $0x54] sm:$0xf0]  ;;  %v15669_v49 = vld [vmem:[%s23375_s3 + $0x50] sm:$0xf0] }
 0x2f3   : > { %6093 = vmatpush.bf16.msrb.mxu0 %v13001_v33  ;;  %v12418_v33 = vor.u32 %v15766_v60, %v12417_v10  ;;  %v12753_v50 = vor.u32 %v15668_v21, %v12750_v48  ;;  %v12749_v39 = vor.u32 %v15669_v49, %v12748_v63  ;;  %v12724_v10 = vld [vmem:[%s23375_s3 + $0x18] sm:$0xf]  ;;  %v15663_v60 = vld [vmem:[%s23375_s3 + $0x20] sm:$0xf0]  ;;  %v12901_v48 = vor.u32 %v15706_v19, %v12900_v34  ;;  %v12864_v63 = vld [vmem:[%s23375_s3 + $0x128] sm:$0xf] }
 0x2f4   : > { %v15697_v49 = vld [vmem:[%s23375_s3 + $0x130] sm:$0xf0]  ;;  %v12501_v34 = vld [vmem:[%s23375_s3 + $0x3f8] sm:$0xf]  ;;  %v15787_v19 = vld [vmem:[%s23375_s3 + $0x400] sm:$0xf0] }
 0x2f6   : > { %5463 = vmatpush.bf16.msrb.mxu3 %v12402_v35 }
 0x2f7   : > { %v4601_v14 = vpop.f32.mrf.mxu2 }
 0x2f8   : > { %v12390_v14 = vor.u32 %v15758_v5, %v12387_v44  ;;  %v15703_v5 = vld [vmem:[%s23375_s3 + $0x160] sm:$0xf0] }
 0x2fa   : > { %5464 = vmatpush.bf16.msrb.mxu3 %v12390_v14 }
 0x2ff   : > { %v4782_v47 = vpop.f32.mrf.mxu2 }
 0x300   : > { %v4801_v16 = vpack.c.bf16 %v4782_v47, %v4782_v47  ;;  %v12381_v47 = vld [vmem:[%s23375_s3 + $0x308] sm:$0xf] }
 0x301   : > { %v12382_v62 = vor.u32 %v15757_v1, %v12381_v47  ;;  %v12894_v47 = vld [vmem:[%s23375_s3 + $0x174] sm:$0xf0] }
 0x302   : > { %5546 = vmatmul.bf16.vlgmr.msra.gmra.mxu0 %v4801_v16  ;;  %5442 = vmatmul.bf16.vlgmr.msra.gmra.mxu2 %v4801_v16 }
 0x303   : > { %6099 = vmatpush.bf16.msra.mxu0 %v12801_v27  ;;  %5494 = vmatmul.bf16.vlgmr.msrb.gmra.mxu1 %v4801_v16  ;;  %v12741_v27 = vor.u32 %v15665_v0, %v12738_v59  ;;  %v12378_v16 = vor.u32 %v15755_v43, %v12375_v52  ;;  %v12865_v0 = vor.u32 %v15697_v49, %v12864_v63  ;;  %v12537_v59 = vld [vmem:[%s23375_s3 + $0x440] sm:$0xf]  ;;  %v15705_v43 = vld [vmem:[%s23375_s3 + $0x170] sm:$0xf0]  ;;  %v15704_v52 = vld [vmem:[%s23375_s3 + $0x16c] sm:$0xf] }
 0x304   : > { %5512 = vmatpush.bf16.msra.mxu2 %v12442_v42  ;;  %6047 = vmatpush.bf16.msrb.mxu1 %v12797_v54  ;;  %v15666_v42 = vld [vmem:[%s23375_s3 + $0x38] sm:$0xf0]  ;;  %v12489_v49 = vld [vmem:[%s23375_s3 + $0x3e0] sm:$0xf] }
 0x305   : > { %v15662_v54 = vld [vmem:[%s23375_s3 + $0x1c] sm:$0xf]  ;;  %v12737_v22 = vor.u32 %v15666_v42, %v12736_v45  ;;  %5465 = vmatpush.bf16.msrb.mxu3 %v12378_v16  ;;  %v20454_v42 = vpack.c.bf16 %v19863_v28, %v19863_v28 }
 0x306   : > { %v12729_v29 = vor.u32 %v15662_v54, %v12726_v57  ;;  %v15694_v16 = vld [vmem:[%s23375_s3 + $0x118] sm:$0xf0] }
 0x307   : > { %6100 = vmatpush.bf16.msra.mxu0 %v12789_v40  ;;  %v4784_v23 = vpop.f32.mrf.mxu2  ;;  %v12363_v40 = vld [vmem:[%s23375_s3 + $0x2f4] sm:$0xf0]  ;;  %v15702_v28 = vld [vmem:[%s23375_s3 + $0x158] sm:$0xf0] }
 0x308   : > { %5513 = vmatpush.bf16.msra.mxu2 %v12430_v18  ;;  %6048 = vmatpush.bf16.msrb.mxu1 %v12785_v3  ;;  %v12366_v18 = vor.u32 %v15752_v58, %v12363_v40  ;;  %v15754_v3 = vld [vmem:[%s23375_s3 + $0x2f8] sm:$0xf0]  ;;  %v12725_v23 = vor.u32 %v15663_v60, %v12724_v10  ;;  %v12897_v58 = vor.u32 %v15704_v52, %v12894_v47  ;;  %v15691_v10 = vld [vmem:[%s23375_s3 + $0x100] sm:$0xf0]  ;;  %v15692_v52 = vld [vmem:[%s23375_s3 + $0x10c] sm:$0xf] }
 0x309   : > { %v12846_v47 = vld [vmem:[%s23375_s3 + $0x114] sm:$0xf0] }
 0x30a   : > { %5466 = vmatpush.bf16.msrb.mxu3 %v12366_v18  ;;  %v12882_v18 = vld [vmem:[%s23375_s3 + $0x15c] sm:$0xf0] }
 0x30b   : > { %6101 = vmatpush.bf16.msra.mxu0 %v12777_v31  ;;  %v12370_v31 = vor.u32 %v15754_v3, %v12369_v51  ;;  %v12880_v51 = vld [vmem:[%s23375_s3 + $0x150] sm:$0xf]  ;;  %v12840_v3 = vld [vmem:[%s23375_s3 + $0xf8] sm:$0xf] }
 0x30c   : > { %5514 = vmatpush.bf16.msra.mxu2 %v12418_v33  ;;  %6049 = vmatpush.bf16.msrb.mxu1 %v12773_v9  ;;  %v12357_v33 = vld [vmem:[%s23375_s3 + $0x2d8] sm:$0xf]  ;;  %v12717_v9 = vor.u32 %v15659_v12, %v12714_v2  ;;  %v12881_v12 = vor.u32 %v15702_v28, %v12880_v51  ;;  %v12513_v2 = vld [vmem:[%s23375_s3 + $0x410] sm:$0xf]  ;;  %v12841_v30 = vor.u32 %v15691_v10, %v12840_v3  ;;  %v15687_v3 = vld [vmem:[%s23375_s3 + $0xe0] sm:$0xf0] }
 0x30d   : > { %v12358_v35 = vor.u32 %v15751_v4, %v12357_v33  ;;  %v15699_v33 = vld [vmem:[%s23375_s3 + $0x140] sm:$0xf0]  ;;  %v12828_v4 = vld [vmem:[%s23375_s3 + $0xe0] sm:$0xf]  ;;  %v15686_v10 = vld [vmem:[%s23375_s3 + $0xdc] sm:$0xf] }
 0x30e   : > { %5467 = vmatpush.bf16.msrb.mxu3 %v12354_v20  ;;  %v12870_v20 = vld [vmem:[%s23375_s3 + $0x144] sm:$0xf0] }
 0x30f   : > { %6102 = vmatpush.bf16.msra.mxu0 %v12765_v15  ;;  %v15660_v15 = vld [vmem:[%s23375_s3 + $0x8] sm:$0xf0] }
 0x310   : > { %5515 = vmatpush.bf16.msra.mxu2 %v12406_v24  ;;  %6050 = vmatpush.bf16.msrb.mxu1 %v12761_v61  ;;  %v12713_v11 = vor.u32 %v15660_v15, %v12712_v26  ;;  %v12888_v61 = vld [vmem:[%s23375_s3 + $0x158] sm:$0xf]  ;;  %v15688_v26 = vld [vmem:[%s23375_s3 + $0xe8] sm:$0xf0] }
 0x311   : > { %v12889_v44 = vor.u32 %v15703_v5, %v12888_v61  ;;  %v12856_v61 = vld [vmem:[%s23375_s3 + $0x120] sm:$0xf]  ;;  %v15696_v5 = vld [vmem:[%s23375_s3 + $0x128] sm:$0xf0] }
 0x312   : > { %v12857_v63 = vor.u32 %v15696_v5, %v12856_v61 }
 0x313   : > { %6103 = vmatpush.bf16.msra.mxu0 %v12753_v50  ;;  %v15700_v50 = vld [vmem:[%s23375_s3 + $0x148] sm:$0xf0] }
 0x314   : > { %5516 = vmatpush.bf16.msra.mxu2 %v12394_v55  ;;  %6051 = vmatpush.bf16.msrb.mxu1 %v12749_v39  ;;  %v12877_v37 = vor.u32 %v15700_v50, %v12876_v53  ;;  %v15796_v55 = vld [vmem:[%s23375_s3 + $0x448] sm:$0xf0]  ;;  %v12892_v39 = vld [vmem:[%s23375_s3 + $0x168] sm:$0xf]  ;;  %v12858_v53 = vld [vmem:[%s23375_s3 + $0x12c] sm:$0xf0] }
 0x315   : > { %v12538_v45 = vor.u32 %v15796_v55, %v12537_v59  ;;  %v12893_v57 = vor.u32 %v15705_v43, %v12892_v39  ;;  %v12816_v50 = vld [vmem:[%s23375_s3 + $0xc8] sm:$0xf]  ;;  %v15693_v43 = vld [vmem:[%s23375_s3 + $0x110] sm:$0xf0] }
 0x316   : > { %v12844_v39 = vld [vmem:[%s23375_s3 + $0x108] sm:$0xf] }
 0x317   : > { %6104 = vmatpush.bf16.msra.mxu0 %v12741_v27  ;;  %v12852_v27 = vld [vmem:[%s23375_s3 + $0x110] sm:$0xf] }
 0x318   : > { %5517 = vmatpush.bf16.msra.mxu2 %v12382_v62  ;;  %6052 = vmatpush.bf16.msrb.mxu1 %v12737_v22  ;;  %v12525_v62 = vld [vmem:[%s23375_s3 + $0x428] sm:$0xf]  ;;  %v15793_v22 = vld [vmem:[%s23375_s3 + $0x430] sm:$0xf0]  ;;  %v12853_v40 = vor.u32 %v15694_v16, %v12852_v27  ;;  %v12845_v16 = vor.u32 %v15693_v43, %v12844_v39  ;;  %v12964_v43 = vld [vmem:[%s23375_s3 + $0x1f8] sm:$0xf] }
 0x319   : > { %v12526_v60 = vor.u32 %v15793_v22, %v12525_v62  ;;  %v15690_v62 = vld [vmem:[%s23375_s3 + $0xf8] sm:$0xf0]  ;;  %v15689_v22 = vld [vmem:[%s23375_s3 + $0xf4] sm:$0xf] }
 0x31b   : > { %6105 = vmatpush.bf16.msra.mxu0 %v12729_v29  ;;  %v15701_v29 = vld [vmem:[%s23375_s3 + $0x154] sm:$0xf] }
 0x31c   : > { %5518 = vmatpush.bf16.msra.mxu2 %v12370_v31  ;;  %6053 = vmatpush.bf16.msrb.mxu1 %v12725_v23  ;;  %v15790_v31 = vld [vmem:[%s23375_s3 + $0x418] sm:$0xf0]  ;;  %v12885_v23 = vor.u32 %v15701_v29, %v12882_v18  ;;  %v12465_v29 = vld [vmem:[%s23375_s3 + $0x3b0] sm:$0xf] }
 0x31d   : > { %v15778_v18 = vld [vmem:[%s23375_s3 + $0x3b8] sm:$0xf0] }
 0x31f   : > { %6106 = vmatpush.bf16.msra.mxu0 %v12717_v9  ;;  %v15698_v9 = vld [vmem:[%s23375_s3 + $0x13c] sm:$0xf] }
 0x320   : > { %5519 = vmatpush.bf16.msra.mxu2 %v12358_v35  ;;  %6054 = vmatpush.bf16.msrb.mxu1 %v12713_v11  ;;  %v12514_v35 = vor.u32 %v15790_v31, %v12513_v2  ;;  %v12869_v11 = vor.u32 %v15699_v33, %v12868_v38  ;;  %v12453_v2 = vld [vmem:[%s23375_s3 + $0x398] sm:$0xf]  ;;  %v6203_v31 = vadd.s32 2, %v19700_v8  ;;  %v12808_v38 = vld [vmem:[%s23375_s3 + $0xc0] sm:$0xf] }
 0x321   : > { %v15684_v33 = vld [vmem:[%s23375_s3 + $0xc8] sm:$0xf0] }
 0x322   : > { %vm6204_vm6 = vcmp.eq.s32.totalorder %v19698_v13, %v6203_v31  ;;  %v12942_v31 = vld [vmem:[%s23375_s3 + $0x1d4] sm:$0xf0] }
 0x32f   : > { %v4612_v21 = vpop.f32.mrf.mxu3 }
 0x330   : > { %v20406_v24 = vpack.c.bf16 %v4612_v21, %v4612_v21  ;;  %v12873_v21 = vor.u32 %v15698_v9, %v12870_v20  ;;  %v15683_v20 = vld [vmem:[%s23375_s3 + $0xc4] sm:$0xf] }
 0x332   : > { %13070 = vmatmul.msk.bf16.vlgmr.msrb.gmra.mxu0 %vm5404_vm5, %v20406_v24 }
 0x333   : > { %6164 = vmatpush.bf16.msrb.mxu0 %v12901_v48  ;;  %v12829_v48 = vor.u32 %v15688_v26, %v12828_v4  ;;  %v12988_v4 = vld [vmem:[%s23375_s3 + $0x228] sm:$0xf]  ;;  %v15729_v26 = vld [vmem:[%s23375_s3 + $0x230] sm:$0xf0] }
 0x334   : > { %v12989_v61 = vor.u32 %v15729_v26, %v12988_v4  ;;  %v15713_v26 = vld [vmem:[%s23375_s3 + $0x1b4] sm:$0xf] }
 0x337   : > { %6165 = vmatpush.bf16.msrb.mxu0 %v12889_v44  ;;  %v4614_v14 = vpop.f32.mrf.mxu3  ;;  %v15695_v44 = vld [vmem:[%s23375_s3 + $0x124] sm:$0xf] }
 0x338   : > { %v15685_v14 = vld [vmem:[%s23375_s3 + $0xd0] sm:$0xf0]  ;;  %v12861_v59 = vor.u32 %v15695_v44, %v12858_v53  ;;  %v12976_v53 = vld [vmem:[%s23375_s3 + $0x210] sm:$0xf] }
 0x339   : > { %v12817_v55 = vor.u32 %v15685_v14, %v12816_v50  ;;  %v15726_v50 = vld [vmem:[%s23375_s3 + $0x218] sm:$0xf0] }
 0x33b   : > { %6166 = vmatpush.bf16.msrb.mxu0 %v12877_v37  ;;  %v12502_v37 = vor.u32 %v15787_v19, %v12501_v34  ;;  %v12996_v19 = vld [vmem:[%s23375_s3 + $0x230] sm:$0xf] }
 0x33f   : > { %6167 = vmatpush.bf16.msrb.mxu0 %v12865_v0  ;;  %v4795_v1 = vpop.f32.mrf.mxu3  ;;  %v15784_v0 = vld [vmem:[%s23375_s3 + $0x3e8] sm:$0xf0] }
 0x340   : > { %v4802_v54 = vpack.c.bf16 %v4795_v1, %v4795_v1  ;;  %v12490_v27 = vor.u32 %v15784_v0, %v12489_v49  ;;  %v12477_v1 = vld [vmem:[%s23375_s3 + $0x3c8] sm:$0xf]  ;;  %v6205_v49 = vsel %vm6204_vm6, 1.0, %v16264_v56  ;;  %v12984_v0 = vld [vmem:[%s23375_s3 + $0x218] sm:$0xf] }
 0x342   : > { %12707 = vmatmul.msk.bf16.vlgmr.msra.gmra.mxu3 %vm5404_vm5, %v4802_v54  ;;  %12708 = vmatmul.msk.bf16.vlgmr.msrb.gmra.mxu2 %vm5404_vm5, %v4802_v54 }
 0x343   : > { %5525 = vmatpush.bf16.msra.mxu3 %v12538_v45  ;;  %12709 = vmatmul.msk.bf16.vlgmr.msra.gmra.mxu1 %vm5404_vm5, %v4802_v54  ;;  %v15781_v45 = vld [vmem:[%s23375_s3 + $0x3d0] sm:$0xf0]  ;;  %v12849_v54 = vor.u32 %v15692_v52, %v12846_v47  ;;  %v15723_v52 = vld [vmem:[%s23375_s3 + $0x200] sm:$0xf0]  ;;  %v20658_v47 = vpack.c.bf16 %v6205_v49, %v6205_v49 }
 0x344   : > { %6060 = vmatpush.bf16.msrb.mxu2 %v12893_v57  ;;  %6107 = vmatmul.bf16.vlgmr.msra.gmra.mxu0 %v20454_v42  ;;  %v12832_v57 = vld [vmem:[%s23375_s3 + $0xf0] sm:$0xf]  ;;  %v12478_v51 = vor.u32 %v15781_v45, %v12477_v1  ;;  %v15722_v1 = vld [vmem:[%s23375_s3 + $0x1fc] sm:$0xf]  ;;  %v12966_v45 = vld [vmem:[%s23375_s3 + $0x204] sm:$0xf0] }
 0x345   : > { %6112 = vmatpush.bf16.msra.mxu1 %v12897_v58  ;;  %6168 = vmatpush.bf16.msrb.mxu0 %v12853_v40  ;;  %v12834_v58 = vld [vmem:[%s23375_s3 + $0xfc] sm:$0xf0]  ;;  %v20572_v40 = vpack.c.bf16 %v19880_v7, %v19880_v7  ;;  %v12833_v28 = vor.u32 %v15690_v62, %v12832_v57  ;;  %v15724_v57 = vld [vmem:[%s23375_s3 + $0x208] sm:$0xf0]  ;;  %v12969_v62 = vor.u32 %v15722_v1, %v12966_v45  ;;  %v15709_v1 = vld [vmem:[%s23375_s3 + $0x190] sm:$0xf0] }
 0x346   : > { %v12837_v7 = vor.u32 %v15689_v22, %v12834_v58  ;;  %v12952_v22 = vld [vmem:[%s23375_s3 + $0x1e0] sm:$0xf]  ;;  %v15720_v58 = vld [vmem:[%s23375_s3 + $0x1e8] sm:$0xf0] }
 0x347   : > { %5526 = vmatpush.bf16.msra.mxu3 %v12526_v60  ;;  %v4797_v15 = vpop.f32.mrf.mxu3  ;;  %v12822_v60 = vld [vmem:[%s23375_s3 + $0xe4] sm:$0xf0]  ;;  %v13068_v45 = vld [vmem:[%s23375_s3 + $0x2c0] sm:$0xf] }
 0x348   : > { %6061 = vmatpush.bf16.msrb.mxu2 %v12881_v12  ;;  %v12466_v12 = vor.u32 %v15778_v18, %v12465_v29  ;;  %v12825_v9 = vor.u32 %v15686_v10, %v12822_v60  ;;  %v12810_v15 = vld [vmem:[%s23375_s3 + $0xcc] sm:$0xf0]  ;;  %v12960_v29 = vld [vmem:[%s23375_s3 + $0x1e8] sm:$0xf]  ;;  %v15721_v18 = vld [vmem:[%s23375_s3 + $0x1f0] sm:$0xf0] }
 0x349   : > { %6113 = vmatpush.bf16.msra.mxu1 %v12885_v23  ;;  %6169 = vmatpush.bf16.msrb.mxu0 %v12841_v30  ;;  %v15775_v30 = vld [vmem:[%s23375_s3 + $0x3a0] sm:$0xf0]  ;;  %v12813_v5 = vor.u32 %v15683_v20, %v12810_v15  ;;  %v15717_v10 = vld [vmem:[%s23375_s3 + $0x1d0] sm:$0xf0]  ;;  %v15714_v20 = vld [vmem:[%s23375_s3 + $0x1b8] sm:$0xf0] }
 0x34a   : > { %v12454_v34 = vor.u32 %v15775_v30, %v12453_v2  ;;  %v15716_v2 = vld [vmem:[%s23375_s3 + $0x1cc] sm:$0xf]  ;;  %v15718_v30 = vld [vmem:[%s23375_s3 + $0x1d8] sm:$0xf0]  ;;  %v12930_v15 = vld [vmem:[%s23375_s3 + $0x1bc] sm:$0xf0] }
 0x34b   : > { %5527 = vmatpush.bf16.msra.mxu3 %v12514_v35  ;;  %v15728_v35 = vld [vmem:[%s23375_s3 + $0x22c] sm:$0xf] }
 0x34c   : > { %6062 = vmatpush.bf16.msrb.mxu2 %v12869_v11  ;;  %v12990_v11 = vld [vmem:[%s23375_s3 + $0x234] sm:$0xf0] }
 0x34d   : > { %6114 = vmatpush.bf16.msra.mxu1 %v12873_v21  ;;  %6170 = vmatpush.bf16.msrb.mxu0 %v12829_v48  ;;  %v15730_v21 = vld [vmem:[%s23375_s3 + $0x238] sm:$0xf0]  ;;  %v12809_v48 = vor.u32 %v15684_v33, %v12808_v38  ;;  %v12993_v44 = vor.u32 %v15728_v35, %v12990_v11  ;;  %v12945_v33 = vor.u32 %v15716_v2, %v12942_v31  ;;  %v12936_v35 = vld [vmem:[%s23375_s3 + $0x1b8] sm:$0xf]  ;;  %v15715_v11 = vld [vmem:[%s23375_s3 + $0x1c0] sm:$0xf0] }
 0x34e   : > { %v12997_v14 = vor.u32 %v15730_v21, %v12996_v19  ;;  %v12933_v19 = vor.u32 %v15713_v26, %v12930_v15  ;;  %v12916_v21 = vld [vmem:[%s23375_s3 + $0x198] sm:$0xf]  ;;  %v15742_v2 = vld [vmem:[%s23375_s3 + $0x298] sm:$0xf0] }
 0x34f   : > { %5528 = vmatpush.bf16.msra.mxu3 %v12502_v37  ;;  %v15725_v37 = vld [vmem:[%s23375_s3 + $0x214] sm:$0xf]  ;;  %v15734_v15 = vld [vmem:[%s23375_s3 + $0x25c] sm:$0xf] }
 0x350   : > { %6063 = vmatpush.bf16.msrb.mxu2 %v12857_v63  ;;  %v12978_v63 = vld [vmem:[%s23375_s3 + $0x21c] sm:$0xf0] }
 0x351   : > { %6115 = vmatpush.bf16.msra.mxu1 %v12861_v59  ;;  %6171 = vmatpush.bf16.msrb.mxu0 %v12817_v55  ;;  %v15727_v59 = vld [vmem:[%s23375_s3 + $0x220] sm:$0xf0]  ;;  %v12977_v55 = vor.u32 %v15726_v50, %v12976_v53  ;;  %v12981_v39 = vor.u32 %v15725_v37, %v12978_v63  ;;  %v12918_v53 = vld [vmem:[%s23375_s3 + $0x1a4] sm:$0xf0]  ;;  %v12924_v50 = vld [vmem:[%s23375_s3 + $0x1a0] sm:$0xf] }
 0x352   : > { %5468 = vmatmul.bf16.vlgmr.msrb.gmra.mxu3 %v19959_v25  ;;  %5520 = vmatmul.bf16.vlgmr.msra.gmra.mxu2 %v19959_v25  ;;  %v12820_v25 = vld [vmem:[%s23375_s3 + $0xd8] sm:$0xf]  ;;  %v12904_v63 = vld [vmem:[%s23375_s3 + $0x180] sm:$0xf] }
 0x353   : > { %5529 = vmatpush.bf16.msra.mxu3 %v12490_v27  ;;  %6055 = vmatmul.bf16.vlgmr.msrb.gmra.mxu1 %v20454_v42  ;;  %v12821_v23 = vor.u32 %v15687_v3, %v12820_v25  ;;  %v20660_v27 = vpop.f32.mrf.mxu0  ;;  %v12940_v3 = vld [vmem:[%s23375_s3 + $0x1c8] sm:$0xf] }
 0x354   : > { %6064 = vmatpush.bf16.msrb.mxu2 %v12845_v16  ;;  %6172 = vmatmul.bf16.vlgmr.msrb.gmra.mxu0 %v20572_v40  ;;  %v12985_v16 = vor.u32 %v15727_v59, %v12984_v0  ;;  %v12941_v38 = vor.u32 %v15717_v10, %v12940_v3  ;;  %v15708_v0 = vld [vmem:[%s23375_s3 + $0x188] sm:$0xf0]  ;;  %v15707_v59 = vld [vmem:[%s23375_s3 + $0x184] sm:$0xf] }
 0x355   : > { %6243 = vmatpush.bf16.msra.mxu0 %v19736_v46  ;;  %6116 = vmatpush.bf16.msra.mxu1 %v12849_v54  ;;  %v12972_v54 = vld [vmem:[%s23375_s3 + $0x200] sm:$0xf]  ;;  %v15740_v10 = vld [vmem:[%s23375_s3 + $0x28c] sm:$0xf] }
 0x357   : > { %5530 = vmatpush.bf16.msra.mxu3 %v12478_v51  ;;  %v12973_v51 = vor.u32 %v15724_v57, %v12972_v54  ;;  %v15748_v54 = vld [vmem:[%s23375_s3 + $0x2c8] sm:$0xf0]  ;;  %v12905_v57 = vor.u32 %v15708_v0, %v12904_v63 }
 0x358   : > { %6065 = vmatpush.bf16.msrb.mxu2 %v12833_v28  ;;  %v12954_v28 = vld [vmem:[%s23375_s3 + $0x1ec] sm:$0xf0] }
 0x359   : > { %6117 = vmatpush.bf16.msra.mxu1 %v12837_v7  ;;  %v12953_v7 = vor.u32 %v15720_v58, %v12952_v22 }
 0x35b   : > { %5531 = vmatpush.bf16.msra.mxu3 %v12466_v12  ;;  %v5419_v60 = vpop.f32.mrf.mxu0  ;;  %v12961_v12 = vor.u32 %v15721_v18, %v12960_v29  ;;  %v13056_v29 = vld [vmem:[%s23375_s3 + $0x2a8] sm:$0xf]  ;;  %v15745_v18 = vld [vmem:[%s23375_s3 + $0x2b0] sm:$0xf0] }
 0x35c   : > { %6066 = vmatpush.bf16.msrb.mxu2 %v12821_v23  ;;  %v12948_v23 = vld [vmem:[%s23375_s3 + $0x1d0] sm:$0xf]  ;;  %v13057_v3 = vor.u32 %v15745_v18, %v13056_v29  ;;  %v13038_v60 = vld [vmem:[%s23375_s3 + $0x294] sm:$0xf0]  ;;  %v15667_v18 = vld [vmem:[%s23375_s3 + $0x40] sm:$0xf0] }
 0x35d   : > { %6118 = vmatpush.bf16.msra.mxu1 %v12825_v9  ;;  %v12928_v9 = vld [vmem:[%s23375_s3 + $0x1b0] sm:$0xf]  ;;  %v12949_v4 = vor.u32 %v15718_v30, %v12948_v23  ;;  %v13041_v23 = vor.u32 %v15740_v10, %v13038_v60  ;;  %v12744_v29 = vld [vmem:[%s23375_s3 + $0x38] sm:$0xf]  ;;  %v15906_v60 = vld [vmem:[%s23375_s3 + $0x7b8] sm:$0xf0] }
 0x35e   : > { %v13463_v10 = vld [vmem:[%s23375_s3 + $0x7b0] sm:$0xf] }
 0x35f   : > { %5532 = vmatpush.bf16.msra.mxu3 %v12454_v34  ;;  %v12929_v34 = vor.u32 %v15714_v20, %v12928_v9  ;;  %v13032_v9 = vld [vmem:[%s23375_s3 + $0x278] sm:$0xf] }
 0x360   : > { %6067 = vmatpush.bf16.msrb.mxu2 %v12809_v48  ;;  %v15711_v48 = vld [vmem:[%s23375_s3 + $0x1a0] sm:$0xf0] }
 0x361   : > { %6119 = vmatpush.bf16.msra.mxu1 %v12813_v5  ;;  %v12937_v5 = vor.u32 %v15715_v11, %v12936_v35  ;;  %v12917_v37 = vor.u32 %v15711_v48, %v12916_v21  ;;  %v13014_v35 = vld [vmem:[%s23375_s3 + $0x264] sm:$0xf0] }
 0x362   : > { %5533 = vmatmul.bf16.vlgmr.msra.gmra.mxu3 %v19967_v41  ;;  %v12965_v41 = vor.u32 %v15723_v52, %v12964_v43  ;;  %v12912_v43 = vld [vmem:[%s23375_s3 + $0x188] sm:$0xf]  ;;  %v15746_v52 = vld [vmem:[%s23375_s3 + $0x2bc] sm:$0xf]  ;;  %v13017_v21 = vor.u32 %v15734_v15, %v13014_v35 }
 0x363   : > { %6073 = vmatpush.bf16.msrb.mxu3 %v12989_v61  ;;  %6068 = vmatmul.bf16.vlgmr.msrb.gmra.mxu2 %v20572_v40  ;;  %v20739_v61 = vpop.f32.mrf.mxu0  ;;  %v12913_v58 = vor.u32 %v15709_v1, %v12912_v43 }
 0x364   : > { %6125 = vmatpush.bf16.msra.mxu2 %v12993_v44  ;;  %6120 = vmatmul.bf16.vlgmr.msra.gmra.mxu1 %v20572_v40  ;;  %v15719_v40 = vld [vmem:[%s23375_s3 + $0x1e4] sm:$0xf]  ;;  %v15710_v44 = vld [vmem:[%s23375_s3 + $0x19c] sm:$0xf] }
 0x365   : > { %6177 = vmatpush.bf16.msrb.mxu1 %v12997_v14  ;;  %13075 = vmatmul.msk.bf16.vlgmr.msra.gmra.mxu0 %vm4544_vm3, %v20658_v47  ;;  %v12957_v25 = vor.u32 %v15719_v40, %v12954_v28  ;;  %v15712_v14 = vld [vmem:[%s23375_s3 + $0x1a8] sm:$0xf0]  ;;  %v12921_v49 = vor.u32 %v15710_v44, %v12918_v53  ;;  %v15743_v40 = vld [vmem:[%s23375_s3 + $0x2a4] sm:$0xf]  ;;  %v13050_v28 = vld [vmem:[%s23375_s3 + $0x2ac] sm:$0xf0] }
 0x366   : > { %v13002_v44 = vld [vmem:[%s23375_s3 + $0x24c] sm:$0xf0]  ;;  %v13008_v53 = vld [vmem:[%s23375_s3 + $0x248] sm:$0xf] }
 0x367   : > { %6074 = vmatpush.bf16.msrb.mxu3 %v12977_v55  ;;  %v12906_v55 = vld [vmem:[%s23375_s3 + $0x18c] sm:$0xf0] }
 0x368   : > { %6126 = vmatpush.bf16.msra.mxu2 %v12981_v39  ;;  %v12925_v39 = vor.u32 %v15712_v14, %v12924_v50  ;;  %v15733_v50 = vld [vmem:[%s23375_s3 + $0x250] sm:$0xf0]  ;;  %v12804_v14 = vld [vmem:[%s23375_s3 + $0xb0] sm:$0xf] }
 0x369   : > { %6178 = vmatpush.bf16.msrb.mxu1 %v12985_v16  ;;  %v13062_v16 = vld [vmem:[%s23375_s3 + $0x2c4] sm:$0xf0]  ;;  %v13009_v0 = vor.u32 %v15733_v50, %v13008_v53  ;;  %v13403_v50 = vld [vmem:[%s23375_s3 + $0x738] sm:$0xf] }
 0x36b   : > { %6075 = vmatpush.bf16.msrb.mxu3 %v12965_v41  ;;  %v12909_v41 = vor.u32 %v15707_v59, %v12906_v55  ;;  %v5484_v22 = vpop.f32.mrf.mxu0  ;;  %v12792_v55 = vld [vmem:[%s23375_s3 + $0x98] sm:$0xf] }
 0x36c   : > { %6127 = vmatpush.bf16.msra.mxu2 %v12969_v62  ;;  %v13065_v62 = vor.u32 %v15746_v52, %v13062_v16 }
 0x36d   : > { %6179 = vmatpush.bf16.msrb.mxu1 %v12973_v51  ;;  %v13069_v51 = vor.u32 %v15748_v54, %v13068_v45  ;;  %v12780_v45 = vld [vmem:[%s23375_s3 + $0x80] sm:$0xf]  ;;  %v15676_v54 = vld [vmem:[%s23375_s3 + $0x88] sm:$0xf0] }
 0x36f   : > { %6076 = vmatpush.bf16.msrb.mxu3 %v12953_v7  ;;  %v4618_v7 = vpack.c.bf16 %v20188_v36, %v20188_v36  ;;  %v13044_v36 = vld [vmem:[%s23375_s3 + $0x290] sm:$0xf] }
 0x370   : > { %6128 = vmatpush.bf16.msra.mxu2 %v12957_v25  ;;  %v13053_v25 = vor.u32 %v15743_v40, %v13050_v28  ;;  %v13045_v30 = vor.u32 %v15742_v2, %v13044_v36  ;;  %v12756_v40 = vld [vmem:[%s23375_s3 + $0x50] sm:$0xf]  ;;  %v13464_v36 = vor.u32 %v15906_v60, %v13463_v10  ;;  %v12732_v2 = vld [vmem:[%s23375_s3 + $0x20] sm:$0xf] }
 0x371   : > { %6180 = vmatpush.bf16.msrb.mxu1 %v12961_v12  ;;  %v5430_v12 = vpop.f32.mrf.mxu1  ;;  %v13511_v60 = vld [vmem:[%s23375_s3 + $0x810] sm:$0xf] }
 0x372   : > { %v5431_v31 = vadd.f32 %v5430_v12, %v20660_v27  ;;  %v15739_v27 = vld [vmem:[%s23375_s3 + $0x280] sm:$0xf0]  ;;  %v12745_v12 = vor.u32 %v15667_v18, %v12744_v29  ;;  %v13525_v29 = vld [vmem:[%s23375_s3 + $0x834] sm:$0xf0] }
 0x373   : > { %6077 = vmatpush.bf16.msrb.mxu3 %v12941_v38  ;;  %v15737_v38 = vld [vmem:[%s23375_s3 + $0x274] sm:$0xf]  ;;  %v13033_v26 = vor.u32 %v15739_v27, %v13032_v9  ;;  %v15903_v9 = vld [vmem:[%s23375_s3 + $0x7a0] sm:$0xf0] }
 0x374   : > { %6129 = vmatpush.bf16.msra.mxu2 %v12945_v33  ;;  %v13026_v33 = vld [vmem:[%s23375_s3 + $0x27c] sm:$0xf0] }
 0x375   : > { %6181 = vmatpush.bf16.msrb.mxu1 %v12949_v4  ;;  %v13029_v4 = vor.u32 %v15737_v38, %v13026_v33  ;;  %v15661_v38 = vld [vmem:[%s23375_s3 + $0x10] sm:$0xf0]  ;;  %v13451_v33 = vld [vmem:[%s23375_s3 + $0x798] sm:$0xf] }
 0x376   : > { %v13452_v27 = vor.u32 %v15903_v9, %v13451_v33  ;;  %v15914_v33 = vld [vmem:[%s23375_s3 + $0x7fc] sm:$0xf]  ;;  %v13501_v9 = vld [vmem:[%s23375_s3 + $0x804] sm:$0xf0] }
 0x377   : > { %6078 = vmatpush.bf16.msrb.mxu3 %v12929_v34  ;;  %v13020_v34 = vld [vmem:[%s23375_s3 + $0x260] sm:$0xf] }
 0x378   : > { %6130 = vmatpush.bf16.msra.mxu2 %v12933_v19  ;;  %v15736_v19 = vld [vmem:[%s23375_s3 + $0x268] sm:$0xf0] }
 0x379   : > { %6182 = vmatpush.bf16.msrb.mxu1 %v12937_v5  ;;  %v5432_v11 = vpop.f32.mrf.mxu1  ;;  %v13021_v48 = vor.u32 %v15736_v19, %v13020_v34  ;;  %v15731_v5 = vld [vmem:[%s23375_s3 + $0x244] sm:$0xf]  ;;  %v13427_v34 = vld [vmem:[%s23375_s3 + $0x768] sm:$0xf]  ;;  %v15897_v19 = vld [vmem:[%s23375_s3 + $0x770] sm:$0xf0] }
 0x37b   : > { %6079 = vmatpush.bf16.msrb.mxu3 %v12917_v37  ;;  %v15682_v37 = vld [vmem:[%s23375_s3 + $0xb8] sm:$0xf0] }
 0x37c   : > { %6131 = vmatpush.bf16.msra.mxu2 %v12921_v49  ;;  %v13005_v49 = vor.u32 %v15731_v5, %v13002_v44  ;;  %v12805_v59 = vor.u32 %v15682_v37, %v12804_v14  ;;  %v15894_v5 = vld [vmem:[%s23375_s3 + $0x758] sm:$0xf0]  ;;  %v13391_v37 = vld [vmem:[%s23375_s3 + $0x720] sm:$0xf] }
 0x37d   : > { %6183 = vmatpush.bf16.msrb.mxu1 %v12925_v39  ;;  %v15679_v39 = vld [vmem:[%s23375_s3 + $0xa0] sm:$0xf0] }
 0x37e   : > { %v12793_v16 = vor.u32 %v15679_v39, %v12792_v55  ;;  %v15926_v55 = vld [vmem:[%s23375_s3 + $0x85c] sm:$0xf]  ;;  %v13549_v39 = vld [vmem:[%s23375_s3 + $0x864] sm:$0xf0] }
 0x37f   : > { %6080 = vmatpush.bf16.msrb.mxu3 %v12905_v57  ;;  %v20823_v20 = vpop.f32.mrf.mxu0  ;;  %v12781_v57 = vor.u32 %v15676_v54, %v12780_v45  ;;  %v13535_v54 = vld [vmem:[%s23375_s3 + $0x840] sm:$0xf] }
 0x380   : > { %6132 = vmatpush.bf16.msra.mxu2 %v12909_v41  ;;  %v12768_v41 = vld [vmem:[%s23375_s3 + $0x68] sm:$0xf] }
 0x381   : > { %6184 = vmatpush.bf16.msrb.mxu1 %v12913_v58  ;;  %v20861_v43 = vpop.f32.mrf.mxu1 }
 0x382   : > { %6081 = vmatmul.bf16.vlgmr.msrb.gmra.mxu3 %v4618_v7 }
 0x383   : > { %6140 = vmatpush.bf16.msra.mxu3 %v13065_v62  ;;  %6133 = vmatmul.bf16.vlgmr.msra.gmra.mxu2 %v4618_v7  ;;  %v15673_v62 = vld [vmem:[%s23375_s3 + $0x70] sm:$0xf0] }
 0x384   : > { %6192 = vmatpush.bf16.msrb.mxu2 %v13069_v51  ;;  %6185 = vmatmul.bf16.vlgmr.msrb.gmra.mxu1 %v4618_v7  ;;  %v12769_v51 = vor.u32 %v15673_v62, %v12768_v41  ;;  %v13475_v7 = vld [vmem:[%s23375_s3 + $0x7c8] sm:$0xf]  ;;  %v15923_v41 = vld [vmem:[%s23375_s3 + $0x844] sm:$0xf] }
 0x385   : > { %6256 = vmatpush.bf16.msra.mxu1 %v19833_v17  ;;  %v5443_v52 = vpop.f32.mrf.mxu2 }
 0x386   : > { %v20865_v1 = vadd.f32 %v5443_v52, %v5431_v31  ;;  %v15664_v31 = vld [vmem:[%s23375_s3 + $0x28] sm:$0xf0] }
 0x387   : > { %6141 = vmatpush.bf16.msra.mxu3 %v13053_v25  ;;  %v5549_v63 = vpop.f32.mrf.mxu0  ;;  %v15909_v25 = vld [vmem:[%s23375_s3 + $0x7d0] sm:$0xf0] }
 0x388   : > { %6193 = vmatpush.bf16.msrb.mxu2 %v13057_v3  ;;  %v13476_v3 = vor.u32 %v15909_v25, %v13475_v7  ;;  %v15888_v63 = vld [vmem:[%s23375_s3 + $0x728] sm:$0xf0] }
 0x389   : > { %v5497_v22 = vpop.f32.mrf.mxu1 }
 0x38a   : > { %6896 = vmatpush.bf16.msrb.mxu0 %v13476_v3 }
 0x38b   : > { %6142 = vmatpush.bf16.msra.mxu3 %v13041_v23  ;;  %v12733_v23 = vor.u32 %v15664_v31, %v12732_v2 }
 0x38c   : > { %6194 = vmatpush.bf16.msrb.mxu2 %v13045_v30  ;;  %v12720_v30 = vld [vmem:[%s23375_s3 + $0x8] sm:$0xf] }
 0x38d   : > { %v5445_v58 = vpop.f32.mrf.mxu2  ;;  %v12721_v15 = vor.u32 %v15661_v38, %v12720_v30  ;;  %v15915_v30 = vld [vmem:[%s23375_s3 + $0x800] sm:$0xf0] }
 0x38e   : > { %6897 = vmatpush.bf16.msrb.mxu0 %v13464_v36  ;;  %v13537_v58 = vld [vmem:[%s23375_s3 + $0x84c] sm:$0xf0]  ;;  %v15917_v36 = vld [vmem:[%s23375_s3 + $0x814] sm:$0xf] }
 0x38f   : > { %6143 = vmatpush.bf16.msra.mxu3 %v13029_v4  ;;  %v13439_v4 = vld [vmem:[%s23375_s3 + $0x780] sm:$0xf] }
 0x390   : > { %6195 = vmatpush.bf16.msrb.mxu2 %v13033_v26  ;;  %v15900_v26 = vld [vmem:[%s23375_s3 + $0x788] sm:$0xf0] }
 0x391   : > { %v13440_v35 = vor.u32 %v15900_v26, %v13439_v4  ;;  %v13504_v4 = vor.u32 %v15914_v33, %v13501_v9  ;;  %v15848_v9 = vld [vmem:[%s23375_s3 + $0x5ec] sm:$0xf] }
 0x392   : > { %6898 = vmatpush.bf16.msrb.mxu0 %v13452_v27 }
 0x393   : > { %6144 = vmatpush.bf16.msra.mxu3 %v13017_v21  ;;  %v13428_v21 = vor.u32 %v15897_v19, %v13427_v34  ;;  %v15861_v34 = vld [vmem:[%s23375_s3 + $0x650] sm:$0xf0]  ;;  %v13487_v19 = vld [vmem:[%s23375_s3 + $0x7e0] sm:$0xf] }
 0x394   : > { %6196 = vmatpush.bf16.msrb.mxu2 %v13021_v48  ;;  %13076 = vmatmul.msk.bf16.vlgmr.msra.gmra.mxu1 %vm4544_vm3, %v20658_v47  ;;  %v13415_v48 = vld [vmem:[%s23375_s3 + $0x750] sm:$0xf] }
 0x395   : > { %v13416_v44 = vor.u32 %v15894_v5, %v13415_v48  ;;  %v15912_v48 = vld [vmem:[%s23375_s3 + $0x7e8] sm:$0xf0]  ;;  %v15911_v5 = vld [vmem:[%s23375_s3 + $0x7e4] sm:$0xf] }
 0x396   : > { %6899 = vmatpush.bf16.msrb.mxu0 %v13440_v35  ;;  %v13283_v35 = vld [vmem:[%s23375_s3 + $0x648] sm:$0xf] }
 0x397   : > { %6145 = vmatpush.bf16.msra.mxu3 %v13005_v49  ;;  %v13547_v49 = vld [vmem:[%s23375_s3 + $0x858] sm:$0xf] }
 0x398   : > { %6197 = vmatpush.bf16.msrb.mxu2 %v13009_v0  ;;  %v13392_v0 = vor.u32 %v15888_v63, %v13391_v37 }
 0x39a   : > { %13071 = vmatmul.msk.bf16.vlgmr.msra.gmra.mxu3 %vm5404_vm5, %v20406_v24  ;;  %6900 = vmatpush.bf16.msrb.mxu0 %v13428_v21  ;;  %v13284_v21 = vor.u32 %v15861_v34, %v13283_v35  ;;  %v13279_v35 = vld [vmem:[%s23375_s3 + $0x638] sm:$0xf] }
 0x39b   : > { %6151 = vmatpush.bf16.msrb.mxu3 %v12805_v59  ;;  %13072 = vmatmul.msk.bf16.vlgmr.msrb.gmra.mxu2 %vm5404_vm5, %v20406_v24  ;;  %v15670_v24 = vld [vmem:[%s23375_s3 + $0x58] sm:$0xf0]  ;;  %v15927_v59 = vld [vmem:[%s23375_s3 + $0x860] sm:$0xf0] }
 0x39c   : > { %6217 = vmatpush.bf16.msra.mxu2 %v19686_v32  ;;  %v12757_v28 = vor.u32 %v15670_v24, %v12756_v40  ;;  %v13548_v52 = vor.u32 %v15927_v59, %v13547_v49  ;;  %v13523_v40 = vld [vmem:[%s23375_s3 + $0x828] sm:$0xf]  ;;  %v15921_v24 = vld [vmem:[%s23375_s3 + $0x830] sm:$0xf0]  ;;  %v13271_v49 = vld [vmem:[%s23375_s3 + $0x630] sm:$0xf] }
 0x39e   : > { %6901 = vmatpush.bf16.msrb.mxu0 %v13416_v44  ;;  %6911 = vmatpush.bf16.msrb.mxu1 %v13548_v52  ;;  %v13489_v44 = vld [vmem:[%s23375_s3 + $0x7ec] sm:$0xf0]  ;;  %v15857_v52 = vld [vmem:[%s23375_s3 + $0x634] sm:$0xf] }
 0x39f   : > { %6152 = vmatpush.bf16.msrb.mxu3 %v12793_v16  ;;  %v13552_v16 = vor.u32 %v15926_v55, %v13549_v39 }
 0x3a0   : > { %6870 = vmatpush.bf16.msrb.mxu2 %v13284_v21  ;;  %v15859_v21 = vld [vmem:[%s23375_s3 + $0x640] sm:$0xf0] }
 0x3a3   : > { %6153 = vmatpush.bf16.msrb.mxu3 %v12781_v57  ;;  %v15924_v57 = vld [vmem:[%s23375_s3 + $0x848] sm:$0xf0] }
 0x3a4   : > { %v13536_v22 = vor.u32 %v15924_v57, %v13535_v54  ;;  %v13259_v54 = vld [vmem:[%s23375_s3 + $0x618] sm:$0xf]  ;;  %v15855_v57 = vld [vmem:[%s23375_s3 + $0x620] sm:$0xf0] }
 0x3a6   : > { %6912 = vmatpush.bf16.msrb.mxu1 %v13536_v22 }
 0x3a7   : > { %6154 = vmatpush.bf16.msrb.mxu3 %v12769_v51  ;;  %v13540_v51 = vor.u32 %v15923_v41, %v13537_v58  ;;  %v13260_v58 = vor.u32 %v15855_v57, %v13259_v54  ;;  %v15856_v54 = vld [vmem:[%s23375_s3 + $0x628] sm:$0xf0] }
 0x3ab   : > { %6155 = vmatpush.bf16.msrb.mxu3 %v12757_v28  ;;  %13073 = vmatmul.msk.bf16.vlgmr.msra.gmra.mxu2 %vm4544_vm3, %v20658_v47  ;;  %v15920_v28 = vld [vmem:[%s23375_s3 + $0x82c] sm:$0xf] }
 0x3ac   : > { %v13528_v18 = vor.u32 %v15920_v28, %v13525_v29 }
 0x3af   : > { %6156 = vmatpush.bf16.msrb.mxu3 %v12745_v12  ;;  %v20935_v11 = vpop.f32.mrf.mxu0  ;;  %v15918_v12 = vld [vmem:[%s23375_s3 + $0x818] sm:$0xf0] }
 0x3b0   : > { %v13512_v31 = vor.u32 %v15918_v12, %v13511_v60  ;;  %v15852_v60 = vld [vmem:[%s23375_s3 + $0x608] sm:$0xf0] }
 0x3b3   : > { %6157 = vmatpush.bf16.msrb.mxu3 %v12733_v23  ;;  %v13499_v23 = vld [vmem:[%s23375_s3 + $0x7f8] sm:$0xf] }
 0x3b4   : > { %v13500_v27 = vor.u32 %v15915_v30, %v13499_v23  ;;  %v13291_v23 = vld [vmem:[%s23375_s3 + $0x650] sm:$0xf]  ;;  %v15862_v30 = vld [vmem:[%s23375_s3 + $0x658] sm:$0xf0] }
 0x3b7   : > { %6158 = vmatpush.bf16.msrb.mxu3 %v12721_v15  ;;  %v6097_v53 = vpop.f32.mrf.mxu0 }
 0x3b8   : > { %v13488_v53 = vor.u32 %v15912_v48, %v13487_v19  ;;  %v13223_v48 = vld [vmem:[%s23375_s3 + $0x5d0] sm:$0xf] }
 0x3ba   : > { %6159 = vmatmul.bf16.vlgmr.msrb.gmra.mxu3 %v20454_v42  ;;  %v15891_v42 = vld [vmem:[%s23375_s3 + $0x740] sm:$0xf0] }
 0x3bb   : > { %6230 = vmatpush.bf16.msra.mxu3 %v19708_v6  ;;  %v13404_v14 = vor.u32 %v15891_v42, %v13403_v50  ;;  %v13492_v50 = vor.u32 %v15911_v5, %v13489_v44  ;;  %v15860_v42 = vld [vmem:[%s23375_s3 + $0x64c] sm:$0xf]  ;;  %v15846_v5 = vld [vmem:[%s23375_s3 + $0x5d8] sm:$0xf0] }
 0x3bc   : > { %v13224_v44 = vor.u32 %v15846_v5, %v13223_v48  ;;  %v15879_v48 = vld [vmem:[%s23375_s3 + $0x6e0] sm:$0xf0]  ;;  %v15878_v5 = vld [vmem:[%s23375_s3 + $0x6dc] sm:$0xf] }
 0x3bd   : > { %6902 = vmatpush.bf16.msrb.mxu0 %v13404_v14  ;;  %v13285_v14 = vld [vmem:[%s23375_s3 + $0x654] sm:$0xf0] }
 0x3be   : > { %v13288_v63 = vor.u32 %v15860_v42, %v13285_v14  ;;  %v13225_v42 = vld [vmem:[%s23375_s3 + $0x5dc] sm:$0xf0] }
 0x3c0   : > { %v20974_v45 = vpop.f32.mrf.mxu1 }
 0x3c1   : > { %6903 = vmatpush.bf16.msrb.mxu0 %v13392_v0  ;;  %v20985_v62 = vpop.f32.mrf.mxu0  ;;  %v15858_v0 = vld [vmem:[%s23375_s3 + $0x638] sm:$0xf0] }
 0x3c2   : > { %v13272_v39 = vor.u32 %v15858_v0, %v13271_v49  ;;  %v13211_v0 = vld [vmem:[%s23375_s3 + $0x5b8] sm:$0xf] }
 0x3c4   : > { %6871 = vmatpush.bf16.msrb.mxu2 %v13272_v39  ;;  %v15843_v39 = vld [vmem:[%s23375_s3 + $0x5c0] sm:$0xf0] }
 0x3c5   : > { %6963 = vmatpush.bf16.msra.mxu0 %v13552_v16  ;;  %v5456_v7 = vpop.f32.mrf.mxu3  ;;  %v21004_v25 = vpop.f32.mrf.mxu2  ;;  %v13273_v16 = vld [vmem:[%s23375_s3 + $0x63c] sm:$0xf0]  ;;  %v13212_v57 = vor.u32 %v15843_v39, %v13211_v0  ;;  %v15875_v0 = vld [vmem:[%s23375_s3 + $0x6c4] sm:$0xf] }
 0x3c6   : > { %v5457_v3 = vadd.f32 %v5456_v7, %v20865_v1  ;;  %v13513_v1 = vld [vmem:[%s23375_s3 + $0x81c] sm:$0xf0]  ;;  %v13276_v41 = vor.u32 %v15857_v52, %v13273_v16 }
 0x3c7   : > { %v13516_v38 = vor.u32 %v15917_v36, %v13513_v1  ;;  %v15851_v36 = vld [vmem:[%s23375_s3 + $0x604] sm:$0xf]  ;;  %v13235_v1 = vld [vmem:[%s23375_s3 + $0x5e8] sm:$0xf]  ;;  %v13267_v16 = vld [vmem:[%s23375_s3 + $0x620] sm:$0xf] }
 0x3c8   : > { %v5562_v10 = vpop.f32.mrf.mxu1  ;;  %6872 = vmatpush.bf16.msrb.mxu2 %v13260_v58  ;;  %v15842_v58 = vld [vmem:[%s23375_s3 + $0x5bc] sm:$0xf] }
 0x3c9   : > { %6964 = vmatpush.bf16.msra.mxu0 %v13540_v51  ;;  %v6110_v2 = vpop.f32.mrf.mxu0  ;;  %v15854_v51 = vld [vmem:[%s23375_s3 + $0x61c] sm:$0xf]  ;;  %v13247_v10 = vld [vmem:[%s23375_s3 + $0x600] sm:$0xf] }
 0x3ca   : > { %13074 = vmatmul.msk.bf16.vlgmr.msra.gmra.mxu3 %vm4544_vm3, %v20658_v47  ;;  %v13524_v47 = vor.u32 %v15921_v24, %v13523_v40  ;;  %v13261_v40 = vld [vmem:[%s23375_s3 + $0x624] sm:$0xf0]  ;;  %v13248_v12 = vor.u32 %v15852_v60, %v13247_v10  ;;  %v15884_v10 = vld [vmem:[%s23375_s3 + $0x70c] sm:$0xf] }
 0x3cb   : > { %v13264_v29 = vor.u32 %v15854_v51, %v13261_v40  ;;  %v13268_v51 = vor.u32 %v15856_v54, %v13267_v16  ;;  %v13255_v40 = vld [vmem:[%s23375_s3 + $0x608] sm:$0xf]  ;;  %v13345_v54 = vld [vmem:[%s23375_s3 + $0x6cc] sm:$0xf0] }
 0x3cc   : > { %6913 = vmatpush.bf16.msrb.mxu1 %v13524_v47  ;;  %6873 = vmatpush.bf16.msrb.mxu2 %v13248_v12  ;;  %v13381_v12 = vld [vmem:[%s23375_s3 + $0x714] sm:$0xf0] }
 0x3cd   : > { %6965 = vmatpush.bf16.msra.mxu0 %v13528_v18  ;;  %v5458_v26 = vpop.f32.mrf.mxu3  ;;  %v5510_v15 = vpop.f32.mrf.mxu2 }
 0x3ce   : > { %v13292_v15 = vor.u32 %v15862_v30, %v13291_v23  ;;  %v15850_v23 = vld [vmem:[%s23375_s3 + $0x5f8] sm:$0xf0]  ;;  %v13367_v30 = vld [vmem:[%s23375_s3 + $0x6f0] sm:$0xf] }
 0x3d0   : > { %6914 = vmatpush.bf16.msrb.mxu1 %v13512_v31  ;;  %v6056_v37 = vpop.f32.mrf.mxu1 }
 0x3d1   : > { %6966 = vmatpush.bf16.msra.mxu0 %v13516_v38  ;;  %v21061_v59 = vadd.f32 %v6056_v37, %v5457_v3  ;;  %v21063_v55 = vpop.f32.mrf.mxu0 }
 0x3d4   : > { %6915 = vmatpush.bf16.msrb.mxu1 %v13500_v27  ;;  %v13237_v27 = vld [vmem:[%s23375_s3 + $0x5f4] sm:$0xf0] }
 0x3d5   : > { %6967 = vmatpush.bf16.msra.mxu0 %v13504_v4  ;;  %v5469_v22 = vpop.f32.mrf.mxu3  ;;  %v5521_v28 = vpop.f32.mrf.mxu2  ;;  %v13240_v34 = vor.u32 %v15848_v9, %v13237_v27 }
 0x3d6   : > { %v5483_v24 = vadd.f32 %v20739_v61, %v5469_v22 }
 0x3d8   : > { %6916 = vmatpush.bf16.msrb.mxu1 %v13488_v53  ;;  %v5496_v47 = vadd.f32 %v20861_v43, %v5483_v24  ;;  %v6058_v18 = vpop.f32.mrf.mxu1 }
 0x3d9   : > { %6968 = vmatpush.bf16.msra.mxu0 %v13492_v50  ;;  %v6175_v7 = vpop.f32.mrf.mxu0  ;;  %v15845_v50 = vld [vmem:[%s23375_s3 + $0x5d4] sm:$0xf]  ;;  %v15840_v18 = vld [vmem:[%s23375_s3 + $0x5a8] sm:$0xf0] }
 0x3da   : > { %v5509_v3 = vadd.f32 %v21004_v25, %v5496_v47  ;;  %v13249_v25 = vld [vmem:[%s23375_s3 + $0x60c] sm:$0xf0]  ;;  %v13228_v49 = vor.u32 %v15845_v50, %v13225_v42  ;;  %v15853_v47 = vld [vmem:[%s23375_s3 + $0x610] sm:$0xf0]  ;;  %v13357_v50 = vld [vmem:[%s23375_s3 + $0x6e4] sm:$0xf0] }
 0x3db   : > { %v13252_v31 = vor.u32 %v15851_v36, %v13249_v25  ;;  %v13201_v36 = vld [vmem:[%s23375_s3 + $0x5ac] sm:$0xf0]  ;;  %v13219_v42 = vld [vmem:[%s23375_s3 + $0x5c0] sm:$0xf] }
 0x3dc   : > { %6922 = vmatpush.bf16.msra.mxu1 %v13288_v63  ;;  %v6109_v61 = vadd.f32 %v20985_v62, %v5509_v3  ;;  %v15849_v62 = vld [vmem:[%s23375_s3 + $0x5f0] sm:$0xf0]  ;;  %v13280_v63 = vor.u32 %v15859_v21, %v13279_v35  ;;  %v15847_v35 = vld [vmem:[%s23375_s3 + $0x5e0] sm:$0xf0]  ;;  %v13355_v21 = vld [vmem:[%s23375_s3 + $0x6d8] sm:$0xf] }
 0x3dd   : > { %v5471_v43 = vpop.f32.mrf.mxu3  ;;  %v5523_v2 = vpop.f32.mrf.mxu2  ;;  %v13236_v38 = vor.u32 %v15849_v62, %v13235_v1  ;;  %v15885_v3 = vld [vmem:[%s23375_s3 + $0x710] sm:$0xf0]  ;;  %v13243_v62 = vld [vmem:[%s23375_s3 + $0x5f0] sm:$0xf] }
 0x3de   : > { %v15839_v43 = vld [vmem:[%s23375_s3 + $0x5a4] sm:$0xf]  ;;  %v13256_v2 = vor.u32 %v15853_v47, %v13255_v40  ;;  %v13244_v9 = vor.u32 %v15850_v23, %v13243_v62  ;;  %v13333_v47 = vld [vmem:[%s23375_s3 + $0x6b4] sm:$0xf0]  ;;  %v13295_v23 = vld [vmem:[%s23375_s3 + $0x660] sm:$0xf] }
 0x3df   : > { %6874 = vmatpush.bf16.msrb.mxu2 %v13236_v38  ;;  %v13204_v1 = vor.u32 %v15839_v43, %v13201_v36  ;;  %v15882_v38 = vld [vmem:[%s23375_s3 + $0x6f8] sm:$0xf0] }
 0x3e0   : > { %6923 = vmatpush.bf16.msra.mxu1 %v13276_v41  ;;  %v13368_v27 = vor.u32 %v15882_v38, %v13367_v30  ;;  %v15864_v30 = vld [vmem:[%s23375_s3 + $0x668] sm:$0xf0]  ;;  %v15863_v38 = vld [vmem:[%s23375_s3 + $0x664] sm:$0xf] }
 0x3e1   : > { %v6121_v33 = vpop.f32.mrf.mxu1 }
 0x3e2   : > { %v21117_v4 = vadd.f32 %v6121_v33, %v6109_v61  ;;  %v6245_v26 = vpop.f32.mrf.mxu0  ;;  %v15881_v33 = vld [vmem:[%s23375_s3 + $0x6f4] sm:$0xf] }
 0x3e3   : > { %v21122_v19 = vpack.c.bf16 %v6245_v26, %v6245_v26  ;;  %6875 = vmatpush.bf16.msrb.mxu2 %v13224_v44  ;;  %v13369_v26 = vld [vmem:[%s23375_s3 + $0x6fc] sm:$0xf0] }
 0x3e4   : > { %6924 = vmatpush.bf16.msra.mxu1 %v13264_v29  ;;  %v13199_v29 = vld [vmem:[%s23375_s3 + $0x5a0] sm:$0xf] }
 0x3e5   : > { %v5534_v53 = vpop.f32.mrf.mxu3  ;;  %6904 = vmatmul.bf16.vlgmr.msrb.gmra.mxu0 %v21122_v19  ;;  %v13200_v7 = vor.u32 %v15840_v18, %v13199_v29  ;;  %v13319_v18 = vld [vmem:[%s23375_s3 + $0x690] sm:$0xf] }
 0x3e6   : > { %v5535_v14 = vadd.f32 %v5534_v53, %v5521_v28  ;;  %v6069_v37 = vpop.f32.mrf.mxu2  ;;  %6974 = vmatpush.bf16.msrb.mxu0 %v13292_v15  ;;  %v13231_v15 = vld [vmem:[%s23375_s3 + $0x5d8] sm:$0xf]  ;;  %v13356_v53 = vor.u32 %v15879_v48, %v13355_v21  ;;  %v15886_v21 = vld [vmem:[%s23375_s3 + $0x718] sm:$0xf0] }
 0x3e7   : > { %v21147_v52 = vadd.f32 %v6069_v37, %v21061_v59  ;;  %v13213_v59 = vld [vmem:[%s23375_s3 + $0x5c4] sm:$0xf0]  ;;  %6876 = vmatpush.bf16.msrb.mxu2 %v13212_v57  ;;  %v13232_v44 = vor.u32 %v15847_v35, %v13231_v15  ;;  %v13360_v37 = vor.u32 %v15878_v5, %v13357_v50  ;;  %v13477_v15 = vld [vmem:[%s23375_s3 + $0x7d4] sm:$0xf0]  ;;  %v15905_v50 = vld [vmem:[%s23375_s3 + $0x7b4] sm:$0xf] }
 0x3e8   : > { %6925 = vmatpush.bf16.msra.mxu1 %v13252_v31  ;;  %v5548_v41 = vadd.f32 %v20823_v20, %v5535_v14  ;;  %v13216_v24 = vor.u32 %v15842_v58, %v13213_v59  ;;  %v13384_v31 = vor.u32 %v15884_v10, %v13381_v12  ;;  %v15844_v14 = vld [vmem:[%s23375_s3 + $0x5c8] sm:$0xf0]  ;;  %v13207_v57 = vld [vmem:[%s23375_s3 + $0x5a8] sm:$0xf]  ;;  %v15873_v59 = vld [vmem:[%s23375_s3 + $0x6b0] sm:$0xf0] }
 0x3e9   : > { %v6123_v22 = vpop.f32.mrf.mxu1  ;;  %v13220_v39 = vor.u32 %v15844_v14, %v13219_v42  ;;  %v13331_v58 = vld [vmem:[%s23375_s3 + $0x6a8] sm:$0xf]  ;;  %v13465_v42 = vld [vmem:[%s23375_s3 + $0x7bc] sm:$0xf0] }
 0x3ea   : > { %6975 = vmatpush.bf16.msrb.mxu0 %v13280_v63  ;;  %v21166_v20 = vadd.f32 %v20974_v45, %v5548_v41  ;;  %v6247_v28 = vpop.f32.mrf.mxu0  ;;  %v13379_v45 = vld [vmem:[%s23375_s3 + $0x708] sm:$0xf]  ;;  %v13343_v63 = vld [vmem:[%s23375_s3 + $0x6c0] sm:$0xf]  ;;  %v15841_v41 = vld [vmem:[%s23375_s3 + $0x5b0] sm:$0xf0]  ;;  %v13348_v22 = vor.u32 %v15875_v0, %v13345_v54 }
 0x3eb   : > { %v13380_v61 = vor.u32 %v15885_v3, %v13379_v45  ;;  %6877 = vmatpush.bf16.msrb.mxu2 %v13200_v7  ;;  %v13332_v28 = vor.u32 %v15873_v59, %v13331_v58  ;;  %v15870_v7 = vld [vmem:[%s23375_s3 + $0x698] sm:$0xf0]  ;;  %v15869_v45 = vld [vmem:[%s23375_s3 + $0x694] sm:$0xf]  ;;  %v13363_v54 = vld [vmem:[%s23375_s3 + $0x6e0] sm:$0xf] }
 0x3ec   : > { %6926 = vmatpush.bf16.msra.mxu1 %v13240_v34  ;;  %v13372_v34 = vor.u32 %v15881_v33, %v13369_v26  ;;  %v13320_v10 = vor.u32 %v15870_v7, %v13319_v18  ;;  %v15908_v26 = vld [vmem:[%s23375_s3 + $0x7cc] sm:$0xf]  ;;  %v15902_v0 = vld [vmem:[%s23375_s3 + $0x79c] sm:$0xf]  ;;  %v15899_v58 = vld [vmem:[%s23375_s3 + $0x784] sm:$0xf] }
 0x3ed   : > { %v5536_v60 = vpop.f32.mrf.mxu3  ;;  %6883 = vmatpush.bf16.msrb.mxu3 %v13380_v61  ;;  %v13480_v5 = vor.u32 %v15908_v26, %v13477_v15  ;;  %v15896_v7 = vld [vmem:[%s23375_s3 + $0x76c] sm:$0xf]  ;;  %v15910_v26 = vld [vmem:[%s23375_s3 + $0x7d8] sm:$0xf0] }
 0x3ee   : > { %v6071_v25 = vpop.f32.mrf.mxu2  ;;  %6976 = vmatpush.bf16.msrb.mxu0 %v13268_v51  ;;  %v15872_v51 = vld [vmem:[%s23375_s3 + $0x6ac] sm:$0xf]  ;;  %v13321_v60 = vld [vmem:[%s23375_s3 + $0x69c] sm:$0xf0] }
 0x3ef   : > { %6935 = vmatpush.bf16.msra.mxu2 %v13384_v31  ;;  %v13336_v29 = vor.u32 %v15872_v51, %v13333_v47  ;;  %v13324_v43 = vor.u32 %v15869_v45, %v13321_v60  ;;  %v13307_v25 = vld [vmem:[%s23375_s3 + $0x678] sm:$0xf]  ;;  %v15866_v31 = vld [vmem:[%s23375_s3 + $0x67c] sm:$0xf] }
 0x3f0   : > { %6927 = vmatpush.bf16.msra.mxu1 %v13228_v49  ;;  %v15876_v49 = vld [vmem:[%s23375_s3 + $0x6c8] sm:$0xf0]  ;;  %v13429_v45 = vld [vmem:[%s23375_s3 + $0x774] sm:$0xf0]  ;;  %v15874_v60 = vld [vmem:[%s23375_s3 + $0x6b8] sm:$0xf0] }
 0x3f1   : > { %6884 = vmatpush.bf16.msrb.mxu3 %v13368_v27  ;;  %v13344_v16 = vor.u32 %v15876_v49, %v13343_v63  ;;  %v13297_v27 = vld [vmem:[%s23375_s3 + $0x66c] sm:$0xf0]  ;;  %v15883_v63 = vld [vmem:[%s23375_s3 + $0x700] sm:$0xf0]  ;;  %v13468_v49 = vor.u32 %v15905_v50, %v13465_v42  ;;  %v13471_v50 = vld [vmem:[%s23375_s3 + $0x7b8] sm:$0xf] }
 0x3f2   : > { %6977 = vmatpush.bf16.msrb.mxu0 %v13256_v2  ;;  %v15867_v2 = vld [vmem:[%s23375_s3 + $0x680] sm:$0xf0]  ;;  %v13300_v48 = vor.u32 %v15863_v38, %v13297_v27  ;;  %v13315_v38 = vld [vmem:[%s23375_s3 + $0x680] sm:$0xf]  ;;  %v13483_v27 = vld [vmem:[%s23375_s3 + $0x7d0] sm:$0xf] }
 0x3f3   : > { %6936 = vmatpush.bf16.msra.mxu2 %v13372_v34  ;;  %v13387_v34 = vld [vmem:[%s23375_s3 + $0x710] sm:$0xf]  ;;  %v15907_v42 = vld [vmem:[%s23375_s3 + $0x7c0] sm:$0xf0] }
 0x3f4   : > { %6928 = vmatpush.bf16.msra.mxu1 %v13216_v24  ;;  %v13208_v24 = vor.u32 %v15841_v41, %v13207_v57  ;;  %v15880_v57 = vld [vmem:[%s23375_s3 + $0x6e8] sm:$0xf0] }
 0x3f5   : > { %6885 = vmatpush.bf16.msrb.mxu3 %v13356_v53  ;;  %v13388_v53 = vor.u32 %v15886_v21, %v13387_v34  ;;  %v13393_v34 = vld [vmem:[%s23375_s3 + $0x72c] sm:$0xf0]  ;;  %v13303_v21 = vld [vmem:[%s23375_s3 + $0x668] sm:$0xf] }
 0x3f6   : > { %6978 = vmatpush.bf16.msrb.mxu0 %v13244_v9  ;;  %v13296_v9 = vor.u32 %v15864_v30, %v13295_v23  ;;  %v13405_v23 = vld [vmem:[%s23375_s3 + $0x744] sm:$0xf0] }
 0x3f7   : > { %6937 = vmatpush.bf16.msra.mxu2 %v13360_v37  ;;  %v13375_v37 = vld [vmem:[%s23375_s3 + $0x6f8] sm:$0xf] }
 0x3f8   : > { %6929 = vmatpush.bf16.msra.mxu1 %v13204_v1  ;;  %v13308_v1 = vor.u32 %v15867_v2, %v13307_v25 }
 0x3f9   : > { %6886 = vmatpush.bf16.msrb.mxu3 %v13344_v16  ;;  %v13376_v16 = vor.u32 %v15883_v63, %v13375_v37 }
 0x3fa   : > { %6979 = vmatpush.bf16.msrb.mxu0 %v13232_v44 }
 0x3fb   : > { %6938 = vmatpush.bf16.msra.mxu2 %v13348_v22  ;;  %v13364_v22 = vor.u32 %v15880_v57, %v13363_v54  ;;  %v13447_v57 = vld [vmem:[%s23375_s3 + $0x788] sm:$0xf] }
 0x3fd   : > { %6887 = vmatpush.bf16.msrb.mxu3 %v13332_v28  ;;  %v15877_v28 = vld [vmem:[%s23375_s3 + $0x6d0] sm:$0xf0] }
 0x3fe   : > { %6980 = vmatpush.bf16.msrb.mxu0 %v13220_v39  ;;  %v13453_v39 = vld [vmem:[%s23375_s3 + $0x7a4] sm:$0xf0] }
 0x3ff   : > { %6939 = vmatpush.bf16.msra.mxu2 %v13336_v29  ;;  %v13456_v41 = vor.u32 %v15902_v0, %v13453_v39  ;;  %v13459_v0 = vld [vmem:[%s23375_s3 + $0x7a0] sm:$0xf]  ;;  %v15904_v39 = vld [vmem:[%s23375_s3 + $0x7a8] sm:$0xf0] }
 0x401   : > { %v21264_v40 = vpop.f32.mrf.mxu1  ;;  %6888 = vmatpush.bf16.msrb.mxu3 %v13320_v10  ;;  %v13339_v10 = vld [vmem:[%s23375_s3 + $0x6b0] sm:$0xf] }
 0x402   : > { %6981 = vmatpush.bf16.msrb.mxu0 %v13208_v24  ;;  %v13351_v24 = vld [vmem:[%s23375_s3 + $0x6c8] sm:$0xf]  ;;  %v13340_v25 = vor.u32 %v15874_v60, %v13339_v10  ;;  %v15892_v10 = vld [vmem:[%s23375_s3 + $0x748] sm:$0xf0] }
 0x403   : > { %6940 = vmatpush.bf16.msra.mxu2 %v13324_v43  ;;  %v15893_v43 = vld [vmem:[%s23375_s3 + $0x754] sm:$0xf] }
 0x405   : > { %v6082_v3 = vpop.f32.mrf.mxu3  ;;  %6889 = vmatpush.bf16.msrb.mxu3 %v13308_v1 }
 0x406   : > { %v21282_v61 = vadd.f32 %v6082_v3, %v21147_v52  ;;  %v6134_v12 = vpop.f32.mrf.mxu2  ;;  %v13352_v3 = vor.u32 %v15877_v28, %v13351_v24 }
 0x407   : > { %v6135_v36 = vadd.f32 %v6134_v12, %v21117_v4  ;;  %v13309_v4 = vld [vmem:[%s23375_s3 + $0x684] sm:$0xf0]  ;;  %v13432_v12 = vor.u32 %v15896_v7, %v13429_v45  ;;  %v15895_v45 = vld [vmem:[%s23375_s3 + $0x760] sm:$0xf0] }
 0x408   : > { %v13312_v62 = vor.u32 %v15866_v31, %v13309_v4  ;;  %v13327_v31 = vld [vmem:[%s23375_s3 + $0x698] sm:$0xf] }
 0x409   : > { %v6188_v52 = vpop.f32.mrf.mxu1  ;;  %6890 = vmatpush.bf16.msrb.mxu3 %v13296_v9 }
 0x40a   : > { %6941 = vmatpush.bf16.msra.mxu2 %v13312_v62  ;;  %v15871_v52 = vld [vmem:[%s23375_s3 + $0x6a0] sm:$0xf0]  ;;  %v15890_v62 = vld [vmem:[%s23375_s3 + $0x73c] sm:$0xf] }
 0x40b   : > { %v13328_v30 = vor.u32 %v15871_v52, %v13327_v31  ;;  %v13408_v9 = vor.u32 %v15890_v62, %v13405_v23  ;;  %v13531_v23 = vld [vmem:[%s23375_s3 + $0x830] sm:$0xf] }
 0x40d   : > { %v6084_v33 = vpop.f32.mrf.mxu3  ;;  %6948 = vmatpush.bf16.msra.mxu3 %v13480_v5 }
 0x40e   : > { %v6136_v35 = vpop.f32.mrf.mxu2  ;;  %6942 = vmatpush.bf16.msra.mxu2 %v13300_v48  ;;  %v15868_v33 = vld [vmem:[%s23375_s3 + $0x688] sm:$0xf0]  ;;  %v15865_v48 = vld [vmem:[%s23375_s3 + $0x670] sm:$0xf0] }
 0x40f   : > { %v13316_v15 = vor.u32 %v15868_v33, %v13315_v38  ;;  %v15887_v35 = vld [vmem:[%s23375_s3 + $0x724] sm:$0xf]  ;;  %v13304_v63 = vor.u32 %v15865_v48, %v13303_v21  ;;  %v15913_v21 = vld [vmem:[%s23375_s3 + $0x7f0] sm:$0xf0] }
 0x410   : > { %v13396_v37 = vor.u32 %v15887_v35, %v13393_v34  ;;  %v13495_v34 = vld [vmem:[%s23375_s3 + $0x7e8] sm:$0xf] }
 0x411   : > { %v6258_v44 = vpop.f32.mrf.mxu1  ;;  %6949 = vmatpush.bf16.msra.mxu3 %v13468_v49  ;;  %v13472_v49 = vor.u32 %v15907_v42, %v13471_v50  ;;  %v13496_v48 = vor.u32 %v15913_v21, %v13495_v34  ;;  %v13770_v21 = vld [vmem:[%s23375_s3 + $0x918] sm:$0xf] }
 0x412   : > { %v21327_v14 = vpack.c.bf16 %v6258_v44, %v6258_v44  ;;  %v13484_v44 = vor.u32 %v15910_v26, %v13483_v27  ;;  %v13507_v26 = vld [vmem:[%s23375_s3 + $0x800] sm:$0xf] }
 0x414   : > { %13557 = vmatmul.msk.bf16.vlgmr.msrb.gmra.mxu1 %vm5404_vm5, %v21327_v14  ;;  %13558 = vmatmul.msk.bf16.vlgmr.msra.gmra.mxu0 %vm5404_vm5, %v21327_v14 }
 0x415   : > { %6987 = vmatpush.bf16.msrb.mxu1 %v13388_v53  ;;  %7056 = vmatpush.bf16.msra.mxu0 %v19708_v6  ;;  %v13441_v6 = vld [vmem:[%s23375_s3 + $0x78c] sm:$0xf0] }
 0x416   : > { %6950 = vmatpush.bf16.msra.mxu3 %v13456_v41  ;;  %v13444_v47 = vor.u32 %v15899_v58, %v13441_v6  ;;  %v15901_v41 = vld [vmem:[%s23375_s3 + $0x790] sm:$0xf0] }
 0x417   : > { %v13448_v6 = vor.u32 %v15901_v41, %v13447_v57  ;;  %v13950_v41 = vld [vmem:[%s23375_s3 + $0xa80] sm:$0xf] }
 0x419   : > { %6988 = vmatpush.bf16.msrb.mxu1 %v13376_v16  ;;  %v6260_v59 = vpop.f32.mrf.mxu1  ;;  %v13460_v16 = vor.u32 %v15904_v39, %v13459_v0  ;;  %v15999_v39 = vld [vmem:[%s23375_s3 + $0xaa0] sm:$0xf0] }
 0x41a   : > { %6951 = vmatpush.bf16.msra.mxu3 %v13444_v47  ;;  %v13435_v59 = vld [vmem:[%s23375_s3 + $0x770] sm:$0xf] }
 0x41d   : > { %v6147_v51 = vpop.f32.mrf.mxu3  ;;  %6989 = vmatpush.bf16.msrb.mxu1 %v13364_v22  ;;  %v7029_v22 = vadd.s32 3, %v19700_v8 }
 0x41e   : > { %v21364_v29 = vadd.f32 %v6147_v51, %v6135_v36  ;;  %v21366_v18 = vpop.f32.mrf.mxu2  ;;  %v13417_v36 = vld [vmem:[%s23375_s3 + $0x75c] sm:$0xf0]  ;;  %6952 = vmatpush.bf16.msra.mxu3 %v13432_v12  ;;  %v15898_v51 = vld [vmem:[%s23375_s3 + $0x778] sm:$0xf0]  ;;  %v15889_v12 = vld [vmem:[%s23375_s3 + $0x730] sm:$0xf0] }
 0x41f   : > { %v13420_v1 = vor.u32 %v15893_v43, %v13417_v36  ;;  %vm7030_vm7 = vcmp.eq.s32.totalorder %v19698_v13, %v7029_v22  ;;  %v13436_v8 = vor.u32 %v15898_v51, %v13435_v59  ;;  %v13555_v43 = vld [vmem:[%s23375_s3 + $0x860] sm:$0xf]  ;;  %v15928_v36 = vld [vmem:[%s23375_s3 + $0x868] sm:$0xf0]  ;;  %v15963_v59 = vld [vmem:[%s23375_s3 + $0x980] sm:$0xf0] }
 0x420   : > { %v7031_v24 = vsel %vm7030_vm7, 1.0, %v16264_v56  ;;  %v13556_v52 = vor.u32 %v15928_v36, %v13555_v43  ;;  %v15996_v22 = vld [vmem:[%s23375_s3 + $0xa88] sm:$0xf0]  ;;  %v13938_v51 = vld [vmem:[%s23375_s3 + $0xa68] sm:$0xf] }
 0x421   : > { %6990 = vmatpush.bf16.msrb.mxu1 %v13352_v3  ;;  %v21452_v47 = vpack.c.bf16 %v7031_v24, %v7031_v24  ;;  %v15987_v36 = vld [vmem:[%s23375_s3 + $0xa40] sm:$0xf0] }
 0x422   : > { %6953 = vmatpush.bf16.msra.mxu3 %v13420_v1  ;;  %v13543_v1 = vld [vmem:[%s23375_s3 + $0x848] sm:$0xf] }
 0x425   : > { %v6149_v2 = vpop.f32.mrf.mxu3  ;;  %6991 = vmatpush.bf16.msrb.mxu1 %v13340_v25 }
 0x426   : > { %v6201_v4 = vpop.f32.mrf.mxu2  ;;  %6954 = vmatpush.bf16.msra.mxu3 %v13408_v9  ;;  %v13519_v9 = vld [vmem:[%s23375_s3 + $0x818] sm:$0xf] }
 0x427   : > { %v15925_v4 = vld [vmem:[%s23375_s3 + $0x850] sm:$0xf0] }
 0x428   : > { %v13544_v62 = vor.u32 %v15925_v4, %v13543_v1  ;;  %v13782_v1 = vld [vmem:[%s23375_s3 + $0x930] sm:$0xf]  ;;  %v15954_v4 = vld [vmem:[%s23375_s3 + $0x938] sm:$0xf0] }
 0x429   : > { %6992 = vmatpush.bf16.msrb.mxu1 %v13328_v30  ;;  %v15922_v30 = vld [vmem:[%s23375_s3 + $0x838] sm:$0xf0] }
 0x42a   : > { %6955 = vmatpush.bf16.msra.mxu3 %v13396_v37  ;;  %v13532_v33 = vor.u32 %v15922_v30, %v13531_v23  ;;  %v13842_v37 = vld [vmem:[%s23375_s3 + $0x9a8] sm:$0xf]  ;;  %v13783_v23 = vor.u32 %v15954_v4, %v13782_v1  ;;  %v15984_v30 = vld [vmem:[%s23375_s3 + $0xa28] sm:$0xf0]  ;;  %v13734_v4 = vld [vmem:[%s23375_s3 + $0x8d0] sm:$0xf] }
 0x42d   : > { %6993 = vmatpush.bf16.msrb.mxu1 %v13316_v15  ;;  %v15916_v15 = vld [vmem:[%s23375_s3 + $0x808] sm:$0xf0] }
 0x42e   : > { %v6219_v5 = vpop.f32.mrf.mxu2  ;;  %v13508_v35 = vor.u32 %v15916_v15, %v13507_v26  ;;  %v13964_v26 = vld [vmem:[%s23375_s3 + $0xaa4] sm:$0xf0] }
 0x42f   : > { %v6262_v53 = vpack.c.bf16 %v6219_v5, %v6219_v5 }
 0x431   : > { %6878 = vmatmul.bf16.vlgmr.msrb.gmra.mxu2 %v6262_v53  ;;  %6930 = vmatmul.bf16.vlgmr.msra.gmra.mxu1 %v6262_v53 }
 0x432   : > { %7000 = vmatpush.bf16.msrb.mxu2 %v13484_v44  ;;  %6982 = vmatmul.bf16.vlgmr.msrb.gmra.mxu0 %v6262_v53  ;;  %v15975_v53 = vld [vmem:[%s23375_s3 + $0x9e0] sm:$0xf0] }
 0x433   : > { %6994 = vmatpush.bf16.msrb.mxu1 %v13304_v63  ;;  %v15969_v63 = vld [vmem:[%s23375_s3 + $0x9b0] sm:$0xf0] }
 0x434   : > { %v13843_v0 = vor.u32 %v15969_v63, %v13842_v37  ;;  %v15995_v37 = vld [vmem:[%s23375_s3 + $0xa84] sm:$0xf]  ;;  %v13952_v63 = vld [vmem:[%s23375_s3 + $0xa8c] sm:$0xf0] }
 0x436   : > { %7001 = vmatpush.bf16.msrb.mxu2 %v13472_v49  ;;  %v6221_v54 = vpop.f32.mrf.mxu2  ;;  %v13962_v49 = vld [vmem:[%s23375_s3 + $0xa98] sm:$0xf] }
 0x437   : > { %7069 = vmatpush.bf16.msra.mxu1 %v19736_v46  ;;  %v15966_v54 = vld [vmem:[%s23375_s3 + $0x998] sm:$0xf0]  ;;  %v13963_v57 = vor.u32 %v15999_v39, %v13962_v49  ;;  %v13758_v49 = vld [vmem:[%s23375_s3 + $0x900] sm:$0xf]  ;;  %v15948_v39 = vld [vmem:[%s23375_s3 + $0x908] sm:$0xf0] }
 0x43a   : > { %7002 = vmatpush.bf16.msrb.mxu2 %v13460_v16  ;;  %v13830_v16 = vld [vmem:[%s23375_s3 + $0x990] sm:$0xf] }
 0x43d   : > { %v6160_v58 = vpop.f32.mrf.mxu3 }
 0x43e   : > { %v6161_v46 = vadd.f32 %v6160_v58, %v21166_v20  ;;  %7003 = vmatpush.bf16.msrb.mxu2 %v13448_v6  ;;  %v13423_v20 = vld [vmem:[%s23375_s3 + $0x758] sm:$0xf]  ;;  %v13831_v58 = vor.u32 %v15966_v54, %v13830_v16  ;;  %v13951_v6 = vor.u32 %v15996_v22, %v13950_v41  ;;  %v13878_v16 = vld [vmem:[%s23375_s3 + $0x9f0] sm:$0xf]  ;;  %v15978_v54 = vld [vmem:[%s23375_s3 + $0x9f8] sm:$0xf0]  ;;  %v13759_v41 = vor.u32 %v15948_v39, %v13758_v49 }
 0x43f   : > { %v13879_v22 = vor.u32 %v15978_v54, %v13878_v16  ;;  %v16007_v49 = vld [vmem:[%s23375_s3 + $0xae4] sm:$0xf] }
 0x440   : > { %v6174_v28 = vadd.f32 %v21063_v55, %v6161_v46  ;;  %v13424_v55 = vor.u32 %v15895_v45, %v13423_v20  ;;  %v13818_v46 = vld [vmem:[%s23375_s3 + $0x978] sm:$0xf]  ;;  %v13926_v20 = vld [vmem:[%s23375_s3 + $0xa50] sm:$0xf]  ;;  %v15990_v45 = vld [vmem:[%s23375_s3 + $0xa58] sm:$0xf0] }
 0x441   : > { %v13819_v24 = vor.u32 %v15963_v59, %v13818_v46  ;;  %v15992_v46 = vld [vmem:[%s23375_s3 + $0xa6c] sm:$0xf] }
 0x442   : > { %v6187_v7 = vadd.f32 %v21264_v40, %v6174_v28  ;;  %7004 = vmatpush.bf16.msrb.mxu2 %v13436_v8  ;;  %13561 = vmatmul.msk.bf16.vlgmr.msra.gmra.mxu0 %vm4544_vm3, %v21452_v47  ;;  %v13411_v40 = vld [vmem:[%s23375_s3 + $0x740] sm:$0xf]  ;;  %v15993_v28 = vld [vmem:[%s23375_s3 + $0xa70] sm:$0xf0] }
 0x443   : > { %v13412_v60 = vor.u32 %v15892_v10, %v13411_v40  ;;  %v13806_v8 = vld [vmem:[%s23375_s3 + $0x960] sm:$0xf] }
 0x444   : > { %v21462_v3 = vadd.f32 %v21366_v18, %v6187_v7  ;;  %v13399_v18 = vld [vmem:[%s23375_s3 + $0x728] sm:$0xf]  ;;  %v13939_v7 = vor.u32 %v15993_v28, %v13938_v51  ;;  %v16016_v28 = vld [vmem:[%s23375_s3 + $0xb2c] sm:$0xf] }
 0x445   : > { %v6162_v56 = vpop.f32.mrf.mxu3  ;;  %v13400_v2 = vor.u32 %v15889_v12, %v13399_v18  ;;  %v15957_v18 = vld [vmem:[%s23375_s3 + $0x950] sm:$0xf0]  ;;  %v13914_v12 = vld [vmem:[%s23375_s3 + $0xa38] sm:$0xf] }
 0x446   : > { %7005 = vmatpush.bf16.msrb.mxu2 %v13424_v55  ;;  %v13927_v55 = vor.u32 %v15990_v45, %v13926_v20  ;;  %v13746_v20 = vld [vmem:[%s23375_s3 + $0x8e8] sm:$0xf]  ;;  %v15945_v45 = vld [vmem:[%s23375_s3 + $0x8f0] sm:$0xf0] }
 0x44a   : > { %7006 = vmatpush.bf16.msrb.mxu2 %v13412_v60  ;;  %v13794_v60 = vld [vmem:[%s23375_s3 + $0x948] sm:$0xf] }
 0x44b   : > { %v13795_v43 = vor.u32 %v15957_v18, %v13794_v60  ;;  %v16005_v60 = vld [vmem:[%s23375_s3 + $0xad0] sm:$0xf0] }
 0x44c   : > { %v15989_v18 = vld [vmem:[%s23375_s3 + $0xa54] sm:$0xf] }
 0x44d   : > { %v6232_v25 = vpop.f32.mrf.mxu3 }
 0x44e   : > { %v6263_v31 = vpack.c.bf16 %v6232_v25, %v6232_v25  ;;  %7007 = vmatpush.bf16.msrb.mxu2 %v13400_v2  ;;  %v14034_v25 = vld [vmem:[%s23375_s3 + $0xb28] sm:$0xf]  ;;  %v16017_v2 = vld [vmem:[%s23375_s3 + $0xb30] sm:$0xf0] }
 0x450   : > { %6891 = vmatmul.bf16.vlgmr.msrb.gmra.mxu3 %v6263_v31  ;;  %6943 = vmatmul.bf16.vlgmr.msra.gmra.mxu2 %v6263_v31 }
 0x451   : > { %6995 = vmatmul.bf16.vlgmr.msrb.gmra.mxu1 %v6263_v31  ;;  %7015 = vmatpush.bf16.msrb.mxu3 %v13556_v52  ;;  %v13915_v31 = vor.u32 %v15987_v36, %v13914_v12  ;;  %v14035_v52 = vor.u32 %v16017_v2, %v14034_v25  ;;  %v13928_v12 = vld [vmem:[%s23375_s3 + $0xa5c] sm:$0xf0]  ;;  %v16013_v2 = vld [vmem:[%s23375_s3 + $0xb14] sm:$0xf] }
 0x452   : > { %7082 = vmatpush.bf16.msra.mxu2 %v19833_v17  ;;  %v15919_v17 = vld [vmem:[%s23375_s3 + $0x820] sm:$0xf0]  ;;  %7722 = vmatpush.bf16.msrb.mxu1 %v13963_v57  ;;  %v13931_v25 = vor.u32 %v15989_v18, %v13928_v12  ;;  %v15941_v12 = vld [vmem:[%s23375_s3 + $0x8d4] sm:$0xf] }
 0x453   : > { %v13520_v27 = vor.u32 %v15919_v17, %v13519_v9 }
 0x455   : > { %v6234_v38 = vpop.f32.mrf.mxu3  ;;  %7016 = vmatpush.bf16.msrb.mxu3 %v13544_v62  ;;  %v13902_v62 = vld [vmem:[%s23375_s3 + $0xa20] sm:$0xf] }
 0x456   : > { %7723 = vmatpush.bf16.msrb.mxu1 %v13951_v6  ;;  %v14022_v38 = vld [vmem:[%s23375_s3 + $0xb10] sm:$0xf]  ;;  %v13903_v9 = vor.u32 %v15984_v30, %v13902_v62  ;;  %v16008_v6 = vld [vmem:[%s23375_s3 + $0xae8] sm:$0xf0]  ;;  %v15942_v62 = vld [vmem:[%s23375_s3 + $0x8d8] sm:$0xf0] }
 0x459   : > { %7017 = vmatpush.bf16.msrb.mxu3 %v13532_v33  ;;  %v16014_v33 = vld [vmem:[%s23375_s3 + $0xb18] sm:$0xf0] }
 0x45a   : > { %7724 = vmatpush.bf16.msrb.mxu1 %v13939_v7  ;;  %v14023_v17 = vor.u32 %v16014_v33, %v14022_v38  ;;  %v13735_v38 = vor.u32 %v15942_v62, %v13734_v4  ;;  %v16002_v33 = vld [vmem:[%s23375_s3 + $0xab8] sm:$0xf0] }
 0x45d   : > { %7018 = vmatpush.bf16.msrb.mxu3 %v13520_v27  ;;  %v15998_v27 = vld [vmem:[%s23375_s3 + $0xa9c] sm:$0xf] }
 0x45e   : > { %7725 = vmatpush.bf16.msrb.mxu1 %v13927_v55  ;;  %v13967_v15 = vor.u32 %v15998_v27, %v13964_v26  ;;  %v13747_v55 = vor.u32 %v15945_v45, %v13746_v20 }
 0x460   : > { %6956 = vmatmul.bf16.vlgmr.msra.gmra.mxu3 %v21122_v19  ;;  %7008 = vmatmul.bf16.vlgmr.msrb.gmra.mxu2 %v21122_v19  ;;  %v13866_v19 = vld [vmem:[%s23375_s3 + $0x9d8] sm:$0xf] }
 0x461   : > { %13562 = vmatmul.msk.bf16.vlgmr.msra.gmra.mxu1 %vm4544_vm3, %v21452_v47  ;;  %7019 = vmatpush.bf16.msrb.mxu3 %v13508_v35  ;;  %v13867_v50 = vor.u32 %v15975_v53, %v13866_v19  ;;  %v15981_v53 = vld [vmem:[%s23375_s3 + $0xa10] sm:$0xf0] }
 0x462   : > { %v21520_v5 = vpop.f32.mrf.mxu0  ;;  %7726 = vmatpush.bf16.msrb.mxu1 %v13915_v31  ;;  %7737 = vmatpush.bf16.msrb.mxu2 %v14035_v52  ;;  %v14024_v31 = vld [vmem:[%s23375_s3 + $0xb1c] sm:$0xf0] }
 0x463   : > { %7709 = vmatpush.bf16.msrb.mxu0 %v13867_v50  ;;  %v16011_v50 = vld [vmem:[%s23375_s3 + $0xb00] sm:$0xf0]  ;;  %v14027_v52 = vor.u32 %v16013_v2, %v14024_v31  ;;  %v13880_v31 = vld [vmem:[%s23375_s3 + $0x9fc] sm:$0xf0] }
 0x465   : > { %7020 = vmatpush.bf16.msrb.mxu3 %v13496_v48  ;;  %v15951_v48 = vld [vmem:[%s23375_s3 + $0x920] sm:$0xf0] }
 0x466   : > { %7727 = vmatpush.bf16.msrb.mxu1 %v13903_v9  ;;  %7738 = vmatpush.bf16.msrb.mxu2 %v14023_v17  ;;  %v13771_v19 = vor.u32 %v15951_v48, %v13770_v21  ;;  %v15950_v9 = vld [vmem:[%s23375_s3 + $0x91c] sm:$0xf]  ;;  %v13772_v17 = vld [vmem:[%s23375_s3 + $0x924] sm:$0xf0] }
 0x467   : > { %v13775_v26 = vor.u32 %v15950_v9, %v13772_v17  ;;  %v14012_v48 = vld [vmem:[%s23375_s3 + $0xb04] sm:$0xf0] }
 0x469   : > { %7043 = vmatpush.bf16.msra.mxu3 %v19686_v32  ;;  %v13854_v32 = vld [vmem:[%s23375_s3 + $0x9c0] sm:$0xf] }
 0x46a   : > { %v6907_v44 = vpop.f32.mrf.mxu0 }
 0x46b   : > { %v13890_v44 = vld [vmem:[%s23375_s3 + $0xa08] sm:$0xf] }
 0x470   : > { %13559 = vmatmul.msk.bf16.vlgmr.msrb.gmra.mxu3 %vm5404_vm5, %v21327_v14  ;;  %13563 = vmatmul.msk.bf16.vlgmr.msra.gmra.mxu2 %vm4544_vm3, %v21452_v47  ;;  %v15972_v14 = vld [vmem:[%s23375_s3 + $0x9c8] sm:$0xf0] }
 0x471   : > { %v13855_v42 = vor.u32 %v15972_v14, %v13854_v32  ;;  %v14010_v32 = vld [vmem:[%s23375_s3 + $0xaf8] sm:$0xf]  ;;  %v13891_v14 = vor.u32 %v15981_v53, %v13890_v44  ;;  %7696 = vmatpush.bf16.msrb.mxu3 %v13771_v19  ;;  %v15939_v19 = vld [vmem:[%s23375_s3 + $0x8c0] sm:$0xf0] }
 0x472   : > { %v13722_v44 = vld [vmem:[%s23375_s3 + $0x8b8] sm:$0xf] }
 0x473   : > { %7710 = vmatpush.bf16.msrb.mxu0 %v13855_v42  ;;  %v14011_v42 = vor.u32 %v16011_v50, %v14010_v32  ;;  %7728 = vmatpush.bf16.msrb.mxu1 %v13891_v14  ;;  %v13723_v32 = vor.u32 %v15939_v19, %v13722_v44  ;;  %v15947_v50 = vld [vmem:[%s23375_s3 + $0x904] sm:$0xf]  ;;  %v13760_v14 = vld [vmem:[%s23375_s3 + $0x90c] sm:$0xf0]  ;;  %v14030_v44 = vld [vmem:[%s23375_s3 + $0xb18] sm:$0xf] }
 0x474   : > { %v16015_v19 = vld [vmem:[%s23375_s3 + $0xb20] sm:$0xf0] }
 0x475   : > { %7739 = vmatpush.bf16.msrb.mxu2 %v14011_v42  ;;  %7697 = vmatpush.bf16.msrb.mxu3 %v13759_v41  ;;  %v15983_v42 = vld [vmem:[%s23375_s3 + $0xa24] sm:$0xf]  ;;  %v13710_v41 = vld [vmem:[%s23375_s3 + $0x8a0] sm:$0xf] }
 0x477   : > { %7711 = vmatpush.bf16.msrb.mxu0 %v13843_v0  ;;  %v13955_v0 = vor.u32 %v15995_v37, %v13952_v63  ;;  %7729 = vmatpush.bf16.msrb.mxu1 %v13879_v22  ;;  %v13763_v37 = vor.u32 %v15947_v50, %v13760_v14  ;;  %v13904_v63 = vld [vmem:[%s23375_s3 + $0xa2c] sm:$0xf0]  ;;  %v15936_v22 = vld [vmem:[%s23375_s3 + $0x8a8] sm:$0xf0]  ;;  %v15971_v14 = vld [vmem:[%s23375_s3 + $0x9c4] sm:$0xf] }
 0x478   : > { %v13907_v16 = vor.u32 %v15983_v42, %v13904_v63  ;;  %v13712_v50 = vld [vmem:[%s23375_s3 + $0x8ac] sm:$0xf0] }
 0x479   : > { %7698 = vmatpush.bf16.msrb.mxu3 %v13747_v55  ;;  %v13698_v55 = vld [vmem:[%s23375_s3 + $0x888] sm:$0xf]  ;;  %v13856_v42 = vld [vmem:[%s23375_s3 + $0x9cc] sm:$0xf0] }
 0x47b   : > { %7712 = vmatpush.bf16.msrb.mxu0 %v13831_v58  ;;  %v13998_v58 = vld [vmem:[%s23375_s3 + $0xae0] sm:$0xf] }
 0x47c   : > { %v13999_v51 = vor.u32 %v16008_v6, %v13998_v58  ;;  %v15944_v58 = vld [vmem:[%s23375_s3 + $0x8ec] sm:$0xf]  ;;  %v13711_v6 = vor.u32 %v15936_v22, %v13710_v41  ;;  %v13700_v41 = vld [vmem:[%s23375_s3 + $0x894] sm:$0xf0] }
 0x47d   : > { %7699 = vmatpush.bf16.msrb.mxu3 %v13735_v38  ;;  %v13686_v38 = vld [vmem:[%s23375_s3 + $0x870] sm:$0xf] }
 0x47e   : > { %7740 = vmatpush.bf16.msrb.mxu2 %v13999_v51  ;;  %v15980_v51 = vld [vmem:[%s23375_s3 + $0xa0c] sm:$0xf] }
 0x47f   : > { %7713 = vmatpush.bf16.msrb.mxu0 %v13819_v24  ;;  %v13940_v24 = vld [vmem:[%s23375_s3 + $0xa74] sm:$0xf0] }
 0x480   : > { %13560 = vmatmul.msk.bf16.vlgmr.msra.gmra.mxu3 %vm4544_vm3, %v21452_v47  ;;  %v15960_v47 = vld [vmem:[%s23375_s3 + $0x968] sm:$0xf0] }
 0x481   : > { %v13807_v56 = vor.u32 %v15960_v47, %v13806_v8  ;;  %v14036_v8 = vld [vmem:[%s23375_s3 + $0xb34] sm:$0xf0]  ;;  %v13943_v47 = vor.u32 %v15992_v46, %v13940_v24  ;;  %7700 = vmatpush.bf16.msrb.mxu3 %v13723_v32  ;;  %v14031_v32 = vor.u32 %v16015_v19, %v14030_v44  ;;  %v15956_v44 = vld [vmem:[%s23375_s3 + $0x94c] sm:$0xf] }
 0x482   : > { %v14039_v7 = vor.u32 %v16016_v28, %v14036_v8  ;;  %v13748_v46 = vld [vmem:[%s23375_s3 + $0x8f4] sm:$0xf0]  ;;  %v16004_v28 = vld [vmem:[%s23375_s3 + $0xacc] sm:$0xf] }
 0x483   : > { %7714 = vmatpush.bf16.msrb.mxu0 %v13807_v56  ;;  %v13986_v56 = vld [vmem:[%s23375_s3 + $0xac8] sm:$0xf]  ;;  %v13892_v24 = vld [vmem:[%s23375_s3 + $0xa14] sm:$0xf0] }
 0x484   : > { %7789 = vmatpush.bf16.msra.mxu1 %v14039_v7  ;;  %v13987_v36 = vor.u32 %v16005_v60, %v13986_v56  ;;  %v13988_v8 = vld [vmem:[%s23375_s3 + $0xad4] sm:$0xf0]  ;;  %v13751_v7 = vor.u32 %v15944_v58, %v13748_v46  ;;  %v13895_v20 = vor.u32 %v15980_v51, %v13892_v24  ;;  %v15933_v60 = vld [vmem:[%s23375_s3 + $0x890] sm:$0xf0]  ;;  %v15968_v58 = vld [vmem:[%s23375_s3 + $0x9ac] sm:$0xf] }
 0x485   : > { %v13991_v56 = vor.u32 %v16004_v28, %v13988_v8  ;;  %7701 = vmatpush.bf16.msrb.mxu3 %v13711_v6  ;;  %v13699_v18 = vor.u32 %v15933_v60, %v13698_v55  ;;  %v14006_v28 = vld [vmem:[%s23375_s3 + $0xae8] sm:$0xf]  ;;  %v15929_v60 = vld [vmem:[%s23375_s3 + $0x874] sm:$0xf]  ;;  %v13796_v19 = vld [vmem:[%s23375_s3 + $0x954] sm:$0xf0] }
 0x486   : > { %7741 = vmatpush.bf16.msrb.mxu2 %v13987_v36  ;;  %v13736_v36 = vld [vmem:[%s23375_s3 + $0x8dc] sm:$0xf0] }
 0x487   : > { %7715 = vmatpush.bf16.msrb.mxu0 %v13795_v43  ;;  %v13739_v2 = vor.u32 %v15941_v12, %v13736_v36  ;;  %v6096_v12 = vadd.f32 %v20935_v11, %v21282_v61  ;;  %v13820_v11 = vld [vmem:[%s23375_s3 + $0x984] sm:$0xf0] }
 0x488   : > { %7790 = vmatpush.bf16.msra.mxu1 %v14027_v52  ;;  %v16001_v52 = vld [vmem:[%s23375_s3 + $0xab4] sm:$0xf] }
 0x489   : > { %7702 = vmatpush.bf16.msrb.mxu3 %v13699_v18 }
 0x48b   : > { %7716 = vmatpush.bf16.msrb.mxu0 %v13783_v23  ;;  %v13974_v23 = vld [vmem:[%s23375_s3 + $0xab0] sm:$0xf] }
 0x48c   : > { %v13975_v27 = vor.u32 %v16002_v33, %v13974_v23  ;;  %v14042_v23 = vld [vmem:[%s23375_s3 + $0xb30] sm:$0xf]  ;;  %v15930_v33 = vld [vmem:[%s23375_s3 + $0x878] sm:$0xf0] }
 0x48d   : > { %v13687_v17 = vor.u32 %v15930_v33, %v13686_v38  ;;  %v13982_v38 = vld [vmem:[%s23375_s3 + $0xab8] sm:$0xf]  ;;  %v16003_v33 = vld [vmem:[%s23375_s3 + $0xac0] sm:$0xf0] }
 0x48e   : > { %7742 = vmatpush.bf16.msrb.mxu2 %v13975_v27  ;;  %v15938_v27 = vld [vmem:[%s23375_s3 + $0x8bc] sm:$0xf] }
 0x48f   : > { %7774 = vmatpush.bf16.msra.mxu0 %v13967_v15  ;;  %v15986_v15 = vld [vmem:[%s23375_s3 + $0xa3c] sm:$0xf]  ;;  %7703 = vmatpush.bf16.msrb.mxu3 %v13687_v17  ;;  %v15959_v17 = vld [vmem:[%s23375_s3 + $0x964] sm:$0xf] }
 0x491   : > { %v21588_v40 = vpop.f32.mrf.mxu1  ;;  %v21590_v10 = vpop.f32.mrf.mxu0 }
 0x492   : > { %7748 = vmatpush.bf16.msra.mxu2 %v13775_v26  ;;  %v13724_v26 = vld [vmem:[%s23375_s3 + $0x8c4] sm:$0xf0] }
 0x493   : > { %7775 = vmatpush.bf16.msra.mxu0 %v13955_v0  ;;  %v14000_v0 = vld [vmem:[%s23375_s3 + $0xaec] sm:$0xf0] }
 0x494   : > { %v14003_v54 = vor.u32 %v16007_v49, %v14000_v0  ;;  %v13859_v49 = vor.u32 %v15971_v14, %v13856_v42  ;;  %v14018_v0 = vld [vmem:[%s23375_s3 + $0xb00] sm:$0xf]  ;;  %v13754_v42 = vld [vmem:[%s23375_s3 + $0x8f0] sm:$0xf] }
 0x496   : > { %7749 = vmatpush.bf16.msra.mxu2 %v13763_v37 }
 0x497   : > { %7776 = vmatpush.bf16.msra.mxu0 %v13943_v47 }
 0x499   : > { %v6920_v35 = vpop.f32.mrf.mxu1  ;;  %v6972_v34 = vpop.f32.mrf.mxu0 }
 0x49a   : > { %v13916_v35 = vld [vmem:[%s23375_s3 + $0xa44] sm:$0xf0]  ;;  %v16010_v34 = vld [vmem:[%s23375_s3 + $0xafc] sm:$0xf]  ;;  %7750 = vmatpush.bf16.msra.mxu2 %v13751_v7  ;;  %v16009_v7 = vld [vmem:[%s23375_s3 + $0xaf0] sm:$0xf0] }
 0x49b   : > { %7777 = vmatpush.bf16.msra.mxu0 %v13931_v25  ;;  %v13919_v21 = vor.u32 %v15986_v15, %v13916_v35  ;;  %v14015_v53 = vor.u32 %v16010_v34, %v14012_v48  ;;  %v15977_v25 = vld [vmem:[%s23375_s3 + $0x9f4] sm:$0xf]  ;;  %v15974_v15 = vld [vmem:[%s23375_s3 + $0x9dc] sm:$0xf]  ;;  %v13727_v34 = vor.u32 %v15938_v27, %v13724_v26  ;;  %v13808_v27 = vld [vmem:[%s23375_s3 + $0x96c] sm:$0xf0] }
 0x49c   : > { %v13883_v4 = vor.u32 %v15977_v25, %v13880_v31  ;;  %v16006_v31 = vld [vmem:[%s23375_s3 + $0xad8] sm:$0xf0] }
 0x49d   : > { %7791 = vmatpush.bf16.msra.mxu1 %v14015_v53  ;;  %v15935_v53 = vld [vmem:[%s23375_s3 + $0x8a4] sm:$0xf] }
 0x49e   : > { %7751 = vmatpush.bf16.msra.mxu2 %v13739_v2  ;;  %v13715_v63 = vor.u32 %v15935_v53, %v13712_v50  ;;  %v13994_v2 = vld [vmem:[%s23375_s3 + $0xad0] sm:$0xf] }
 0x49f   : > { %7778 = vmatpush.bf16.msra.mxu0 %v13919_v21  ;;  %v13868_v21 = vld [vmem:[%s23375_s3 + $0x9e4] sm:$0xf0] }
 0x4a0   : > { %v13871_v48 = vor.u32 %v15974_v15, %v13868_v21 }
 0x4a1   : > { %7792 = vmatpush.bf16.msra.mxu1 %v14003_v54  ;;  %v15932_v54 = vld [vmem:[%s23375_s3 + $0x88c] sm:$0xf] }
 0x4a2   : > { %7752 = vmatpush.bf16.msra.mxu2 %v13727_v34  ;;  %7761 = vmatpush.bf16.msra.mxu3 %v13871_v48  ;;  %v13703_v6 = vor.u32 %v15932_v54, %v13700_v41  ;;  %v13811_v34 = vor.u32 %v15959_v17, %v13808_v27  ;;  %v15949_v48 = vld [vmem:[%s23375_s3 + $0x910] sm:$0xf0]  ;;  %v13784_v41 = vld [vmem:[%s23375_s3 + $0x93c] sm:$0xf0]  ;;  %v15964_v27 = vld [vmem:[%s23375_s3 + $0x988] sm:$0xf0] }
 0x4a3   : > { %7779 = vmatpush.bf16.msra.mxu0 %v13907_v16  ;;  %v16012_v16 = vld [vmem:[%s23375_s3 + $0xb08] sm:$0xf0]  ;;  %v15953_v54 = vld [vmem:[%s23375_s3 + $0x934] sm:$0xf]  ;;  %v13826_v17 = vld [vmem:[%s23375_s3 + $0x980] sm:$0xf] }
 0x4a4   : > { %v14019_v22 = vor.u32 %v16012_v16, %v14018_v0 }
 0x4a5   : > { %7793 = vmatpush.bf16.msra.mxu1 %v13991_v56 }
 0x4a6   : > { %7753 = vmatpush.bf16.msra.mxu2 %v13715_v63  ;;  %7762 = vmatpush.bf16.msra.mxu3 %v13859_v49 }
 0x4a7   : > { %7780 = vmatpush.bf16.msra.mxu0 %v13895_v20  ;;  %v14007_v20 = vor.u32 %v16009_v7, %v14006_v28  ;;  %v15940_v28 = vld [vmem:[%s23375_s3 + $0x8c8] sm:$0xf0]  ;;  %v13718_v7 = vld [vmem:[%s23375_s3 + $0x8a8] sm:$0xf] }
 0x4aa   : > { %7754 = vmatpush.bf16.msra.mxu2 %v13703_v6 }
 0x4ab   : > { %7781 = vmatpush.bf16.msra.mxu0 %v13883_v4 }
 0x4ae   : > { %v21670_v57 = vpop.f32.mrf.mxu1 }
 0x4af   : > { %v21681_v59 = vpop.f32.mrf.mxu0 }
 0x4b4   : > { %v21710_v43 = vpop.f32.mrf.mxu2 }
 0x4b6   : > { %v6933_v1 = vpop.f32.mrf.mxu1 }
 0x4b7   : > { %v6985_v30 = vpop.f32.mrf.mxu0  ;;  %v13976_v1 = vld [vmem:[%s23375_s3 + $0xabc] sm:$0xf0] }
 0x4b8   : > { %v13979_v62 = vor.u32 %v16001_v52, %v13976_v1  ;;  %v16018_v30 = vld [vmem:[%s23375_s3 + $0xb38] sm:$0xf0] }
 0x4b9   : > { %v14043_v9 = vor.u32 %v16018_v30, %v14042_v23  ;;  %v15962_v52 = vld [vmem:[%s23375_s3 + $0x97c] sm:$0xf]  ;;  %v13778_v23 = vld [vmem:[%s23375_s3 + $0x920] sm:$0xf]  ;;  %v15952_v30 = vld [vmem:[%s23375_s3 + $0x928] sm:$0xf0] }
 0x4ba   : > { %7794 = vmatpush.bf16.msra.mxu1 %v13979_v62  ;;  %v13823_v1 = vor.u32 %v15962_v52, %v13820_v11  ;;  %v13779_v15 = vor.u32 %v15952_v30, %v13778_v23  ;;  %v13850_v11 = vld [vmem:[%s23375_s3 + $0x9b0] sm:$0xf] }
 0x4bc   : > { %v6881_v39 = vpop.f32.mrf.mxu2 }
 0x4bf   : > { %v7058_v47 = vpop.f32.mrf.mxu0 }
 0x4c0   : > { %v21796_v45 = vpack.c.bf16 %v7058_v47, %v7058_v47 }
 0x4c2   : > { %7717 = vmatmul.bf16.vlgmr.msrb.gmra.mxu0 %v21796_v45 }
 0x4c3   : > { %7841 = vmatpush.bf16.msrb.mxu0 %v14043_v9  ;;  %v13983_v9 = vor.u32 %v16003_v33, %v13982_v38  ;;  %v13838_v38 = vld [vmem:[%s23375_s3 + $0x998] sm:$0xf]  ;;  %v15967_v33 = vld [vmem:[%s23375_s3 + $0x9a0] sm:$0xf0] }
 0x4c7   : > { %v7060_v35 = vpop.f32.mrf.mxu0  ;;  %7842 = vmatpush.bf16.msrb.mxu0 %v14031_v32  ;;  %v13799_v32 = vor.u32 %v15956_v44, %v13796_v19  ;;  %v13814_v19 = vld [vmem:[%s23375_s3 + $0x968] sm:$0xf] }
 0x4c8   : > { %v13766_v35 = vld [vmem:[%s23375_s3 + $0x908] sm:$0xf] }
 0x4c9   : > { %v13767_v53 = vor.u32 %v15949_v48, %v13766_v35 }
 0x4cb   : > { %7843 = vmatpush.bf16.msrb.mxu0 %v14019_v22 }
 0x4ce   : > { %v6996_v37 = vpop.f32.mrf.mxu1 }
 0x4cf   : > { %v21869_v39 = vadd.f32 %v6996_v37, %v21681_v59  ;;  %v13844_v59 = vld [vmem:[%s23375_s3 + $0x9b4] sm:$0xf0]  ;;  %7844 = vmatpush.bf16.msrb.mxu0 %v14007_v20  ;;  %v15946_v37 = vld [vmem:[%s23375_s3 + $0x8f8] sm:$0xf0]  ;;  %v15937_v20 = vld [vmem:[%s23375_s3 + $0x8b0] sm:$0xf0] }
 0x4d0   : > { %v13847_v46 = vor.u32 %v15968_v58, %v13844_v59  ;;  %v13755_v16 = vor.u32 %v15946_v37, %v13754_v42  ;;  %v13742_v58 = vld [vmem:[%s23375_s3 + $0x8d8] sm:$0xf]  ;;  %v13802_v37 = vld [vmem:[%s23375_s3 + $0x950] sm:$0xf] }
 0x4d2   : > { %7763 = vmatpush.bf16.msra.mxu3 %v13847_v46 }
 0x4d3   : > { %v6892_v51 = vpop.f32.mrf.mxu3  ;;  %v6944_v24 = vpop.f32.mrf.mxu2 }
 0x4d4   : > { %v6893_v8 = vadd.f32 %v6892_v51, %v21710_v43  ;;  %v6945_v47 = vadd.f32 %v6944_v24, %v21670_v57  ;;  %v13688_v43 = vld [vmem:[%s23375_s3 + $0x87c] sm:$0xf0]  ;;  %v15965_v57 = vld [vmem:[%s23375_s3 + $0x994] sm:$0xf] }
 0x4d5   : > { %v13691_v18 = vor.u32 %v15929_v60, %v13688_v43  ;;  %v13730_v24 = vld [vmem:[%s23375_s3 + $0x8c0] sm:$0xf]  ;;  %v13719_v43 = vor.u32 %v15937_v20, %v13718_v7  ;;  %v13898_v7 = vld [vmem:[%s23375_s3 + $0xa10] sm:$0xf]  ;;  %v15982_v20 = vld [vmem:[%s23375_s3 + $0xa18] sm:$0xf0] }
 0x4d6   : > { %v6906_v56 = vadd.f32 %v21520_v5, %v6893_v8  ;;  %v6998_v55 = vpop.f32.mrf.mxu1  ;;  %v13832_v5 = vld [vmem:[%s23375_s3 + $0x99c] sm:$0xf0]  ;;  %v13731_v8 = vor.u32 %v15940_v28, %v13730_v24  ;;  %v15988_v24 = vld [vmem:[%s23375_s3 + $0xa48] sm:$0xf0] }
 0x4d7   : > { %v13835_v25 = vor.u32 %v15965_v57, %v13832_v5  ;;  %7755 = vmatpush.bf16.msra.mxu2 %v13691_v18  ;;  %v13862_v57 = vld [vmem:[%s23375_s3 + $0x9c8] sm:$0xf] }
 0x4d8   : > { %v6919_v36 = vadd.f32 %v21588_v40, %v6906_v56  ;;  %v13995_v40 = vor.u32 %v16006_v31, %v13994_v2 }
 0x4d9   : > { %7764 = vmatpush.bf16.msra.mxu3 %v13835_v25  ;;  %v15934_v25 = vld [vmem:[%s23375_s3 + $0x898] sm:$0xf0] }
 0x4da   : > { %v21922_v61 = vadd.f32 %v6919_v36, %v6096_v12  ;;  %7845 = vmatpush.bf16.msrb.mxu0 %v13995_v40  ;;  %v15973_v12 = vld [vmem:[%s23375_s3 + $0x9d0] sm:$0xf0]  ;;  %v13706_v36 = vld [vmem:[%s23375_s3 + $0x890] sm:$0xf]  ;;  %v15970_v40 = vld [vmem:[%s23375_s3 + $0x9b8] sm:$0xf0] }
 0x4db   : > { %v6894_v4 = vpop.f32.mrf.mxu3  ;;  %v6946_v62 = vpop.f32.mrf.mxu2  ;;  %v13863_v31 = vor.u32 %v15973_v12, %v13862_v57  ;;  %v13707_v52 = vor.u32 %v15934_v25, %v13706_v36  ;;  %v14217_v12 = vld [vmem:[%s23377_s5 + $0x270] sm:$0xf]  ;;  %v16081_v25 = vld [vmem:[%s23377_s5 + $0x1f4] sm:$0xf] }
 0x4dc   : > { %v13851_v62 = vor.u32 %v15970_v40, %v13850_v11  ;;  %v14145_v40 = vld [vmem:[%s23377_s5 + $0x1e0] sm:$0xf] }
 0x4dd   : > { %7765 = vmatpush.bf16.msra.mxu3 %v13823_v1  ;;  %v15931_v1 = vld [vmem:[%s23375_s3 + $0x880] sm:$0xf0] }
 0x4de   : > { %v7071_v26 = vpop.f32.mrf.mxu1  ;;  %7846 = vmatpush.bf16.msrb.mxu0 %v13983_v9  ;;  %v13839_v9 = vor.u32 %v15967_v33, %v13838_v38 }
 0x4df   : > { %v21945_v21 = vpack.c.bf16 %v7071_v26, %v7071_v26  ;;  %v13970_v26 = vld [vmem:[%s23375_s3 + $0xaa0] sm:$0xf] }
 0x4e1   : > { %7730 = vmatmul.bf16.vlgmr.msrb.gmra.mxu1 %v21945_v21  ;;  %7782 = vmatmul.bf16.vlgmr.msra.gmra.mxu0 %v21945_v21 }
 0x4e2   : > { %7800 = vmatpush.bf16.msrb.mxu1 %v13779_v15  ;;  %7766 = vmatpush.bf16.msra.mxu3 %v13811_v34  ;;  %v16000_v15 = vld [vmem:[%s23375_s3 + $0xaa8] sm:$0xf0]  ;;  %v13827_v34 = vor.u32 %v15964_v27, %v13826_v17  ;;  %v16078_v17 = vld [vmem:[%s23377_s5 + $0x1d4] sm:$0xf0]  ;;  %v14201_v27 = vld [vmem:[%s23377_s5 + $0x250] sm:$0xf] }
 0x4e3   : > { %v6957_v50 = vpop.f32.mrf.mxu3  ;;  %v7009_v14 = vpop.f32.mrf.mxu2  ;;  %v13971_v44 = vor.u32 %v16000_v15, %v13970_v26 }
 0x4e4   : > { %v6958_v63 = vadd.f32 %v6957_v50, %v6945_v47  ;;  %v7010_v49 = vadd.f32 %v7009_v14, %v21869_v39  ;;  %v13787_v39 = vor.u32 %v15953_v54, %v13784_v41  ;;  %v15976_v47 = vld [vmem:[%s23375_s3 + $0x9e8] sm:$0xf0]  ;;  %v15997_v50 = vld [vmem:[%s23375_s3 + $0xa90] sm:$0xf0] }
 0x4e6   : > { %v6971_v0 = vadd.f32 %v21590_v10, %v6958_v63  ;;  %7801 = vmatpush.bf16.msrb.mxu1 %v13767_v53  ;;  %7767 = vmatpush.bf16.msra.mxu3 %v13799_v32  ;;  %v7073_v22 = vpop.f32.mrf.mxu1  ;;  %v15943_v10 = vld [vmem:[%s23375_s3 + $0x8e0] sm:$0xf0]  ;;  %v15961_v53 = vld [vmem:[%s23375_s3 + $0x970] sm:$0xf0]  ;;  %v13958_v32 = vld [vmem:[%s23375_s3 + $0xa88] sm:$0xf] }
 0x4e7   : > { %v13743_v6 = vor.u32 %v15943_v10, %v13742_v58  ;;  %v13815_v14 = vor.u32 %v15961_v53, %v13814_v19  ;;  %v13959_v42 = vor.u32 %v15997_v50, %v13958_v32  ;;  %v15958_v63 = vld [vmem:[%s23375_s3 + $0x958] sm:$0xf0]  ;;  %v13790_v22 = vld [vmem:[%s23375_s3 + $0x938] sm:$0xf]  ;;  %v15955_v58 = vld [vmem:[%s23375_s3 + $0x940] sm:$0xf0] }
 0x4e8   : > { %v21979_v59 = vadd.f32 %v6971_v0, %v21364_v29  ;;  %v13874_v29 = vld [vmem:[%s23375_s3 + $0x9e0] sm:$0xf]  ;;  %v15994_v0 = vld [vmem:[%s23375_s3 + $0xa78] sm:$0xf0]  ;;  %v13803_v54 = vor.u32 %v15958_v63, %v13802_v37  ;;  %v13934_v10 = vld [vmem:[%s23375_s3 + $0xa58] sm:$0xf] }
 0x4e9   : > { %v13875_v60 = vor.u32 %v15976_v47, %v13874_v29  ;;  %v15985_v29 = vld [vmem:[%s23375_s3 + $0xa30] sm:$0xf0]  ;;  %v14129_v32 = vld [vmem:[%s23377_s5 + $0x1c0] sm:$0xf]  ;;  %v16076_v50 = vld [vmem:[%s23377_s5 + $0x1c4] sm:$0xf0] }
 0x4ea   : > { %7802 = vmatpush.bf16.msrb.mxu1 %v13755_v16  ;;  %7768 = vmatpush.bf16.msra.mxu3 %v13787_v39  ;;  %v15991_v39 = vld [vmem:[%s23375_s3 + $0xa60] sm:$0xf0]  ;;  %v16092_v37 = vld [vmem:[%s23377_s5 + $0x244] sm:$0xf0] }
 0x4eb   : > { %v6959_v46 = vpop.f32.mrf.mxu3  ;;  %v7011_v51 = vpop.f32.mrf.mxu2  ;;  %v16075_v63 = vld [vmem:[%s23377_s5 + $0x1c4] sm:$0xf] }
 0x4ec   : > { %v13935_v46 = vor.u32 %v15991_v39, %v13934_v10  ;;  %v13922_v51 = vld [vmem:[%s23375_s3 + $0xa40] sm:$0xf]  ;;  %v14121_v10 = vld [vmem:[%s23377_s5 + $0x1b0] sm:$0xf] }
 0x4ed   : > { %v13923_v28 = vor.u32 %v15988_v24, %v13922_v51  ;;  %v16090_v51 = vld [vmem:[%s23377_s5 + $0x234] sm:$0xf0] }
 0x4ee   : > { %7803 = vmatpush.bf16.msrb.mxu1 %v13743_v6  ;;  %v13791_v6 = vor.u32 %v15955_v58, %v13790_v22  ;;  %v14281_v22 = vld [vmem:[%s23377_s5 + $0x2f0] sm:$0xf]  ;;  %v16114_v58 = vld [vmem:[%s23377_s5 + $0x2f4] sm:$0xf0] }
 0x4ef   : > { %v14282_v39 = vor.u32 %v16114_v58, %v14281_v22 }
 0x4f2   : > { %7804 = vmatpush.bf16.msrb.mxu1 %v13731_v8  ;;  %v13910_v8 = vld [vmem:[%s23375_s3 + $0xa28] sm:$0xf] }
 0x4f3   : > { %v7022_v56 = vpop.f32.mrf.mxu3  ;;  %v7084_v55 = vpop.f32.mrf.mxu2  ;;  %v13911_v47 = vor.u32 %v15985_v29, %v13910_v8  ;;  %v16073_v8 = vld [vmem:[%s23377_s5 + $0x1b4] sm:$0xf]  ;;  %v14123_v29 = vld [vmem:[%s23377_s5 + $0x1b8] sm:$0xf0] }
 0x4f4   : > { %v7023_v18 = vadd.f32 %v7022_v56, %v7010_v49  ;;  %v7091_v5 = vpack.c.bf16 %v7084_v55, %v7084_v55  ;;  %v13946_v49 = vld [vmem:[%s23375_s3 + $0xa70] sm:$0xf]  ;;  %v13899_v56 = vor.u32 %v15982_v20, %v13898_v7  ;;  %v13886_v55 = vld [vmem:[%s23375_s3 + $0x9f8] sm:$0xf]  ;;  %v14273_v7 = vld [vmem:[%s23377_s5 + $0x2e0] sm:$0xf] }
 0x4f5   : > { %v13947_v41 = vor.u32 %v15994_v0, %v13946_v49  ;;  %v14131_v49 = vld [vmem:[%s23377_s5 + $0x1c8] sm:$0xf0]  ;;  %v16112_v20 = vld [vmem:[%s23377_s5 + $0x2e4] sm:$0xf0] }
 0x4f6   : > { %v22012_v2 = vadd.f32 %v7023_v18, %v21462_v3  ;;  %14044 = vmatmul.msk.bf16.vlgmr.msrb.gmra.mxu2 %vm5404_vm5, %v7091_v5  ;;  %14045 = vmatmul.msk.bf16.vlgmr.msra.gmra.mxu1 %vm5404_vm5, %v7091_v5  ;;  %v13694_v3 = vld [vmem:[%s23375_s3 + $0x878] sm:$0xf]  ;;  %v14153_v18 = vld [vmem:[%s23377_s5 + $0x1f0] sm:$0xf] }
 0x4f7   : > { %7813 = vmatpush.bf16.msrb.mxu2 %v13875_v60  ;;  %7805 = vmatpush.bf16.msrb.mxu1 %v13719_v43  ;;  %v13695_v30 = vor.u32 %v15931_v1, %v13694_v3  ;;  %v16080_v3 = vld [vmem:[%s23377_s5 + $0x1e4] sm:$0xf0]  ;;  %v14209_v1 = vld [vmem:[%s23377_s5 + $0x260] sm:$0xf] }
 0x4f8   : > { %14046 = vmatmul.msk.bf16.vlgmr.msrb.gmra.mxu0 %vm5404_vm5, %v7091_v5  ;;  %v16082_v5 = vld [vmem:[%s23377_s5 + $0x1f4] sm:$0xf0] }
 0x4f9   : > { %v14154_v36 = vor.u32 %v16082_v5, %v14153_v18  ;;  %v16088_v18 = vld [vmem:[%s23377_s5 + $0x224] sm:$0xf0]  ;;  %v16071_v5 = vld [vmem:[%s23377_s5 + $0x1a4] sm:$0xf] }
 0x4fb   : > { %v7024_v4 = vpop.f32.mrf.mxu3  ;;  %7814 = vmatpush.bf16.msrb.mxu2 %v13863_v31  ;;  %7806 = vmatpush.bf16.msrb.mxu1 %v13707_v52  ;;  %v7086_v23 = vpop.f32.mrf.mxu2  ;;  %v14155_v31 = vld [vmem:[%s23377_s5 + $0x1f8] sm:$0xf0] }
 0x4fc   : > { %v14158_v11 = vor.u32 %v16081_v25, %v14155_v31  ;;  %8240 = vmatpush.bf16.msra.mxu0 %v14154_v36  ;;  %v14146_v4 = vor.u32 %v16080_v3, %v14145_v40  ;;  %v16079_v23 = vld [vmem:[%s23377_s5 + $0x1e4] sm:$0xf]  ;;  %v14265_v25 = vld [vmem:[%s23377_s5 + $0x2d0] sm:$0xf]  ;;  %v16110_v31 = vld [vmem:[%s23377_s5 + $0x2d4] sm:$0xf0] }
 0x4fd   : > { %v16070_v40 = vld [vmem:[%s23377_s5 + $0x194] sm:$0xf0] }
 0x4ff   : > { %7815 = vmatpush.bf16.msrb.mxu2 %v13851_v62  ;;  %7807 = vmatpush.bf16.msrb.mxu1 %v13695_v30  ;;  %v16096_v62 = vld [vmem:[%s23377_s5 + $0x264] sm:$0xf0]  ;;  %v14147_v30 = vld [vmem:[%s23377_s5 + $0x1e8] sm:$0xf0] }
 0x500   : > { %v14210_v38 = vor.u32 %v16096_v62, %v14209_v1  ;;  %v14150_v33 = vor.u32 %v16079_v23, %v14147_v30  ;;  %8241 = vmatpush.bf16.msra.mxu0 %v14146_v4  ;;  %v14169_v1 = vld [vmem:[%s23377_s5 + $0x210] sm:$0xf]  ;;  %v16086_v4 = vld [vmem:[%s23377_s5 + $0x214] sm:$0xf0]  ;;  %v16069_v23 = vld [vmem:[%s23377_s5 + $0x194] sm:$0xf] }
 0x501   : > { %v14170_v62 = vor.u32 %v16086_v4, %v14169_v1  ;;  %v14107_v30 = vld [vmem:[%s23377_s5 + $0x198] sm:$0xf0]  ;;  %v16102_v1 = vld [vmem:[%s23377_s5 + $0x294] sm:$0xf0] }
 0x503   : > { %v7045_v35 = vpop.f32.mrf.mxu3  ;;  %7816 = vmatpush.bf16.msrb.mxu2 %v13839_v9  ;;  %v14137_v9 = vld [vmem:[%s23377_s5 + $0x1d0] sm:$0xf] }
 0x504   : > { %v7088_v48 = vpack.c.bf16 %v7045_v35, %v7045_v35  ;;  %v14138_v35 = vor.u32 %v16078_v17, %v14137_v9  ;;  %v14110_v9 = vor.u32 %v16069_v23, %v14107_v30  ;;  %v16108_v17 = vld [vmem:[%s23377_s5 + $0x2c4] sm:$0xf0]  ;;  %v16091_v23 = vld [vmem:[%s23377_s5 + $0x244] sm:$0xf]  ;;  %v14195_v30 = vld [vmem:[%s23377_s5 + $0x248] sm:$0xf0] }
 0x506   : > { %7704 = vmatmul.bf16.vlgmr.msrb.gmra.mxu3 %v7088_v48  ;;  %7756 = vmatmul.bf16.vlgmr.msra.gmra.mxu2 %v7088_v48 }
 0x507   : > { %7808 = vmatmul.bf16.vlgmr.msrb.gmra.mxu1 %v7088_v48  ;;  %7817 = vmatpush.bf16.msrb.mxu2 %v13827_v34  ;;  %v16094_v34 = vld [vmem:[%s23377_s5 + $0x254] sm:$0xf0]  ;;  %v16077_v48 = vld [vmem:[%s23377_s5 + $0x1d4] sm:$0xf] }
 0x508   : > { %7826 = vmatpush.bf16.msrb.mxu3 %v13971_v44  ;;  %v14139_v44 = vld [vmem:[%s23377_s5 + $0x1d8] sm:$0xf0]  ;;  %v14202_v19 = vor.u32 %v16094_v34, %v14201_v27  ;;  %8242 = vmatpush.bf16.msra.mxu0 %v14138_v35  ;;  %v14097_v35 = vld [vmem:[%s23377_s5 + $0x180] sm:$0xf]  ;;  %v16068_v34 = vld [vmem:[%s23377_s5 + $0x184] sm:$0xf0] }
 0x509   : > { %v14142_v53 = vor.u32 %v16077_v48, %v14139_v44  ;;  %v14161_v48 = vld [vmem:[%s23377_s5 + $0x200] sm:$0xf] }
 0x50b   : > { %v7047_v16 = vpop.f32.mrf.mxu3  ;;  %7818 = vmatpush.bf16.msrb.mxu2 %v13815_v14  ;;  %v14193_v14 = vld [vmem:[%s23377_s5 + $0x240] sm:$0xf] }
 0x50c   : > { %7827 = vmatpush.bf16.msrb.mxu3 %v13959_v42  ;;  %v14130_v42 = vor.u32 %v16076_v50, %v14129_v32  ;;  %v16067_v32 = vld [vmem:[%s23377_s5 + $0x184] sm:$0xf]  ;;  %v14099_v50 = vld [vmem:[%s23377_s5 + $0x188] sm:$0xf0] }
 0x50e   : > { %8243 = vmatpush.bf16.msra.mxu0 %v14130_v42  ;;  %v14102_v42 = vor.u32 %v16067_v32, %v14099_v50  ;;  %v14345_v32 = vld [vmem:[%s23377_s5 + $0x70] sm:$0xf] }
 0x50f   : > { %7819 = vmatpush.bf16.msrb.mxu2 %v13803_v54  ;;  %v14194_v54 = vor.u32 %v16092_v37, %v14193_v14  ;;  %v16097_v37 = vld [vmem:[%s23377_s5 + $0x274] sm:$0xf] }
 0x510   : > { %7828 = vmatpush.bf16.msrb.mxu3 %v13947_v41  ;;  %v14134_v41 = vor.u32 %v16075_v63, %v14131_v49  ;;  %v14219_v63 = vld [vmem:[%s23377_s5 + $0x278] sm:$0xf0]  ;;  %v16113_v49 = vld [vmem:[%s23377_s5 + $0x2f4] sm:$0xf] }
 0x513   : > { %7820 = vmatpush.bf16.msrb.mxu2 %v13791_v6  ;;  %v16074_v6 = vld [vmem:[%s23377_s5 + $0x1b4] sm:$0xf0] }
 0x514   : > { %7829 = vmatpush.bf16.msrb.mxu3 %v13935_v46  ;;  %v14185_v46 = vld [vmem:[%s23377_s5 + $0x230] sm:$0xf]  ;;  %v14122_v24 = vor.u32 %v16074_v6, %v14121_v10 }
 0x515   : > { %v14249_v10 = vld [vmem:[%s23377_s5 + $0x2b0] sm:$0xf] }
 0x516   : > { %7769 = vmatmul.bf16.vlgmr.msra.gmra.mxu3 %v21796_v45  ;;  %7821 = vmatmul.bf16.vlgmr.msrb.gmra.mxu2 %v21796_v45  ;;  %v15979_v45 = vld [vmem:[%s23375_s3 + $0xa00] sm:$0xf0] }
 0x517   : > { %v13887_v60 = vor.u32 %v15979_v45, %v13886_v55  ;;  %8266 = vmatpush.bf16.msra.mxu2 %v14282_v39  ;;  %8244 = vmatpush.bf16.msra.mxu0 %v14122_v24  ;;  %v14113_v55 = vld [vmem:[%s23377_s5 + $0x1a0] sm:$0xf]  ;;  %v16072_v45 = vld [vmem:[%s23377_s5 + $0x1a4] sm:$0xf0]  ;;  %v16106_v39 = vld [vmem:[%s23377_s5 + $0x2b4] sm:$0xf0] }
 0x518   : > { %7830 = vmatpush.bf16.msrb.mxu3 %v13923_v28  ;;  %v14186_v28 = vor.u32 %v16090_v51, %v14185_v46  ;;  %v14250_v46 = vor.u32 %v16106_v39, %v14249_v10  ;;  %v16095_v51 = vld [vmem:[%s23377_s5 + $0x264] sm:$0xf]  ;;  %v14211_v24 = vld [vmem:[%s23377_s5 + $0x268] sm:$0xf0]  ;;  %v14337_v39 = vld [vmem:[%s23377_s5 + $0x60] sm:$0xf] }
 0x51c   : > { %7831 = vmatpush.bf16.msrb.mxu3 %v13911_v47  ;;  %v14126_v47 = vor.u32 %v16073_v8, %v14123_v29  ;;  %v14214_v8 = vor.u32 %v16095_v51, %v14211_v24  ;;  %v14275_v29 = vld [vmem:[%s23377_s5 + $0x2e8] sm:$0xf0] }
 0x520   : > { %7832 = vmatpush.bf16.msrb.mxu3 %v13899_v56  ;;  %v14274_v56 = vor.u32 %v16112_v20, %v14273_v7  ;;  %v16048_v7 = vld [vmem:[%s23377_s5 + $0xe4] sm:$0xf0] }
 0x522   : > { %8267 = vmatpush.bf16.msra.mxu2 %v14274_v56 }
 0x524   : > { %7833 = vmatpush.bf16.msrb.mxu3 %v13887_v60  ;;  %v14177_v60 = vld [vmem:[%s23377_s5 + $0x220] sm:$0xf] }
 0x525   : > { %v14178_v36 = vor.u32 %v16088_v18, %v14177_v60  ;;  %v16104_v60 = vld [vmem:[%s23377_s5 + $0x2a4] sm:$0xf0] }
 0x527   : > { %7834 = vmatmul.bf16.vlgmr.msrb.gmra.mxu3 %v21945_v21  ;;  %v16098_v21 = vld [vmem:[%s23377_s5 + $0x274] sm:$0xf0] }
 0x528   : > { %v14218_v52 = vor.u32 %v16098_v21, %v14217_v12  ;;  %8279 = vmatpush.bf16.msra.mxu3 %v14158_v11  ;;  %v14115_v12 = vld [vmem:[%s23377_s5 + $0x1a8] sm:$0xf0]  ;;  %v14105_v11 = vld [vmem:[%s23377_s5 + $0x190] sm:$0xf] }
 0x529   : > { %v14118_v21 = vor.u32 %v16071_v5, %v14115_v12  ;;  %v14106_v3 = vor.u32 %v16070_v40, %v14105_v11  ;;  %v16093_v5 = vld [vmem:[%s23377_s5 + $0x254] sm:$0xf]  ;;  %v14203_v12 = vld [vmem:[%s23377_s5 + $0x258] sm:$0xf0] }
 0x52a   : > { %8253 = vmatpush.bf16.msra.mxu1 %v14218_v52  ;;  %v14266_v52 = vor.u32 %v16110_v31, %v14265_v25  ;;  %v14267_v25 = vld [vmem:[%s23377_s5 + $0x2d8] sm:$0xf0]  ;;  %v14393_v31 = vld [vmem:[%s23377_s5 + $0xd0] sm:$0xf] }
 0x52c   : > { %8280 = vmatpush.bf16.msra.mxu3 %v14150_v33  ;;  %8268 = vmatpush.bf16.msra.mxu2 %v14266_v52  ;;  %v16046_v52 = vld [vmem:[%s23377_s5 + $0xd4] sm:$0xf0] }
 0x52d   : > { %v14394_v40 = vor.u32 %v16046_v52, %v14393_v31  ;;  %v16101_v31 = vld [vmem:[%s23377_s5 + $0x294] sm:$0xf] }
 0x52e   : > { %8254 = vmatpush.bf16.msra.mxu1 %v14210_v38  ;;  %v14257_v38 = vld [vmem:[%s23377_s5 + $0x2c0] sm:$0xf] }
 0x52f   : > { %v14258_v27 = vor.u32 %v16108_v17, %v14257_v38  ;;  %v16107_v38 = vld [vmem:[%s23377_s5 + $0x2c4] sm:$0xf]  ;;  %v14259_v17 = vld [vmem:[%s23377_s5 + $0x2c8] sm:$0xf0] }
 0x530   : > { %8281 = vmatpush.bf16.msra.mxu3 %v14142_v53  ;;  %v16084_v53 = vld [vmem:[%s23377_s5 + $0x204] sm:$0xf0] }
 0x531   : > { %8269 = vmatpush.bf16.msra.mxu2 %v14258_v27  ;;  %v14162_v14 = vor.u32 %v16084_v53, %v14161_v48  ;;  %v14385_v27 = vld [vmem:[%s23377_s5 + $0xc0] sm:$0xf]  ;;  %v16100_v53 = vld [vmem:[%s23377_s5 + $0x284] sm:$0xf0] }
 0x532   : > { %8255 = vmatpush.bf16.msra.mxu1 %v14202_v19  ;;  %v14098_v19 = vor.u32 %v16068_v34, %v14097_v35  ;;  %v16044_v35 = vld [vmem:[%s23377_s5 + $0xc4] sm:$0xf0]  ;;  %v14262_v34 = vor.u32 %v16107_v38, %v14259_v17  ;;  %v16083_v17 = vld [vmem:[%s23377_s5 + $0x204] sm:$0xf] }
 0x533   : > { %v14386_v48 = vor.u32 %v16044_v35, %v14385_v27  ;;  %v14163_v27 = vld [vmem:[%s23377_s5 + $0x208] sm:$0xf0]  ;;  %v16099_v35 = vld [vmem:[%s23377_s5 + $0x284] sm:$0xf] }
 0x534   : > { %8282 = vmatpush.bf16.msra.mxu3 %v14134_v41  ;;  %v16050_v41 = vld [vmem:[%s23377_s5 + $0xf4] sm:$0xf0] }
 0x535   : > { %8270 = vmatpush.bf16.msra.mxu2 %v14250_v46  ;;  %v16032_v46 = vld [vmem:[%s23377_s5 + $0x64] sm:$0xf0] }
 0x536   : > { %8256 = vmatpush.bf16.msra.mxu1 %v14194_v54  ;;  %v14409_v54 = vld [vmem:[%s23377_s5 + $0xf0] sm:$0xf]  ;;  %v14338_v51 = vor.u32 %v16032_v46, %v14337_v39 }
 0x537   : > { %v14410_v58 = vor.u32 %v16050_v41, %v14409_v54  ;;  %v14251_v54 = vld [vmem:[%s23377_s5 + $0x2b8] sm:$0xf0]  ;;  %v14377_v41 = vld [vmem:[%s23377_s5 + $0xb0] sm:$0xf] }
 0x538   : > { %8283 = vmatpush.bf16.msra.mxu3 %v14126_v47  ;;  %v14401_v47 = vld [vmem:[%s23377_s5 + $0xe0] sm:$0xf] }
 0x53a   : > { %8257 = vmatpush.bf16.msra.mxu1 %v14186_v28  ;;  %v16111_v28 = vld [vmem:[%s23377_s5 + $0x2e4] sm:$0xf] }
 0x53b   : > { %v14278_v56 = vor.u32 %v16111_v28, %v14275_v29  ;;  %v14179_v29 = vld [vmem:[%s23377_s5 + $0x228] sm:$0xf0] }
 0x53c   : > { %8284 = vmatpush.bf16.msra.mxu3 %v14118_v21  ;;  %v14206_v21 = vor.u32 %v16093_v5, %v14203_v12 }
 0x53e   : > { %8258 = vmatpush.bf16.msra.mxu1 %v14178_v36  ;;  %v16109_v36 = vld [vmem:[%s23377_s5 + $0x2d4] sm:$0xf] }
 0x53f   : > { %v22110_v43 = vpop.f32.mrf.mxu0  ;;  %v14270_v11 = vor.u32 %v16109_v36, %v14267_v25  ;;  %v14171_v25 = vld [vmem:[%s23377_s5 + $0x218] sm:$0xf0] }
 0x540   : > { %8285 = vmatpush.bf16.msra.mxu3 %v14110_v9  ;;  %v14198_v9 = vor.u32 %v16091_v23, %v14195_v30 }
 0x542   : > { %8259 = vmatpush.bf16.msra.mxu1 %v14170_v62 }
 0x544   : > { %8286 = vmatpush.bf16.msra.mxu3 %v14102_v42  ;;  %v16034_v42 = vld [vmem:[%s23377_s5 + $0x74] sm:$0xf0] }
 0x546   : > { %8260 = vmatpush.bf16.msra.mxu1 %v14162_v14 }
 0x547   : > { %v7720_v57 = vpop.f32.mrf.mxu0 }
 0x548   : > { %v14114_v57 = vor.u32 %v16072_v45, %v14113_v55  ;;  %8574 = vmatpush.bf16.msrb.mxu3 %v14410_v58  ;;  %v14402_v55 = vor.u32 %v16048_v7, %v14401_v47  ;;  %v14241_v45 = vld [vmem:[%s23377_s5 + $0x2a0] sm:$0xf]  ;;  %v16103_v47 = vld [vmem:[%s23377_s5 + $0x2a4] sm:$0xf] }
 0x54a   : > { %8245 = vmatpush.bf16.msra.mxu0 %v14114_v57  ;;  %v14242_v57 = vor.u32 %v16104_v60, %v14241_v45  ;;  %v16040_v45 = vld [vmem:[%s23377_s5 + $0xa4] sm:$0xf0] }
 0x54c   : > { %8575 = vmatpush.bf16.msrb.mxu3 %v14402_v55  ;;  %8271 = vmatpush.bf16.msra.mxu2 %v14242_v57  ;;  %v14369_v55 = vld [vmem:[%s23377_s5 + $0xa0] sm:$0xf] }
 0x54d   : > { %v14370_v57 = vor.u32 %v16040_v45, %v14369_v55 }
 0x54e   : > { %8246 = vmatpush.bf16.msra.mxu0 %v14106_v3  ;;  %v14233_v3 = vld [vmem:[%s23377_s5 + $0x290] sm:$0xf] }
 0x54f   : > { %v14234_v4 = vor.u32 %v16102_v1, %v14233_v3  ;;  %v16038_v3 = vld [vmem:[%s23377_s5 + $0x94] sm:$0xf0] }
 0x550   : > { %8576 = vmatpush.bf16.msrb.mxu3 %v14394_v40  ;;  %v14361_v40 = vld [vmem:[%s23377_s5 + $0x90] sm:$0xf] }
 0x551   : > { %8272 = vmatpush.bf16.msra.mxu2 %v14234_v4  ;;  %v14362_v4 = vor.u32 %v16038_v3, %v14361_v40  ;;  %v14347_v40 = vld [vmem:[%s23377_s5 + $0x78] sm:$0xf0]  ;;  %v16065_v3 = vld [vmem:[%s23377_s5 + $0x174] sm:$0xf] }
 0x552   : > { %8247 = vmatpush.bf16.msra.mxu0 %v14098_v19  ;;  %v14225_v19 = vld [vmem:[%s23377_s5 + $0x280] sm:$0xf] }
 0x553   : > { %v14226_v14 = vor.u32 %v16100_v53, %v14225_v19  ;;  %v16036_v19 = vld [vmem:[%s23377_s5 + $0x84] sm:$0xf0] }
 0x554   : > { %8577 = vmatpush.bf16.msrb.mxu3 %v14386_v48  ;;  %v14353_v48 = vld [vmem:[%s23377_s5 + $0x80] sm:$0xf] }
 0x555   : > { %8273 = vmatpush.bf16.msra.mxu2 %v14226_v14  ;;  %v14313_v14 = vld [vmem:[%s23377_s5 + $0x30] sm:$0xf] }
 0x55e   : > { %v22157_v26 = vpop.f32.mrf.mxu1  ;;  %v22159_v15 = vpop.f32.mrf.mxu0 }
 0x566   : > { %v7733_v0 = vpop.f32.mrf.mxu1  ;;  %v7785_v16 = vpop.f32.mrf.mxu0 }
 0x567   : > { %v14222_v0 = vor.u32 %v16097_v37, %v14219_v63  ;;  %v14283_v16 = vld [vmem:[%s23377_s5 + $0x2f8] sm:$0xf0]  ;;  %v14346_v37 = vor.u32 %v16034_v42, %v14345_v32  ;;  %v16089_v63 = vld [vmem:[%s23377_s5 + $0x234] sm:$0xf]  ;;  %v14354_v32 = vor.u32 %v16036_v19, %v14353_v48  ;;  %v16026_v42 = vld [vmem:[%s23377_s5 + $0x34] sm:$0xf0] }
 0x568   : > { %v14286_v22 = vor.u32 %v16113_v49, %v14283_v16  ;;  %v14187_v49 = vld [vmem:[%s23377_s5 + $0x238] sm:$0xf0]  ;;  %v16063_v19 = vld [vmem:[%s23377_s5 + $0x164] sm:$0xf] }
 0x569   : > { %8292 = vmatpush.bf16.msrb.mxu0 %v14222_v0  ;;  %v16105_v0 = vld [vmem:[%s23377_s5 + $0x2b4] sm:$0xf]  ;;  %v14190_v16 = vor.u32 %v16089_v63, %v14187_v49  ;;  %8561 = vmatpush.bf16.msrb.mxu2 %v14346_v37  ;;  %v14314_v37 = vor.u32 %v16026_v42, %v14313_v14  ;;  %v14305_v63 = vld [vmem:[%s23377_s5 + $0x20] sm:$0xf]  ;;  %v16024_v49 = vld [vmem:[%s23377_s5 + $0x24] sm:$0xf0] }
 0x56a   : > { %8305 = vmatpush.bf16.msrb.mxu1 %v14286_v22  ;;  %v16042_v22 = vld [vmem:[%s23377_s5 + $0xb4] sm:$0xf0]  ;;  %v14254_v58 = vor.u32 %v16105_v0, %v14251_v54  ;;  %v7855_v0 = vld [vmem:[%s23376_s4] sm:$0x7] }
 0x56b   : > { %v14378_v10 = vor.u32 %v16042_v22, %v14377_v41  ;;  %v14306_v41 = vor.u32 %v16024_v49, %v14305_v63  ;;  %v7857_v39 = vperm.slane %v7855_v0, 0  ;;  %v14457_v49 = vld [vmem:[%s23377_s5 + $0x150] sm:$0xf] }
 0x56d   : > { %8293 = vmatpush.bf16.msrb.mxu0 %v14214_v8  ;;  %v16087_v8 = vld [vmem:[%s23377_s5 + $0x224] sm:$0xf]  ;;  %8578 = vmatpush.bf16.msrb.mxu3 %v14378_v10  ;;  %v16022_v10 = vld [vmem:[%s23377_s5 + $0x14] sm:$0xf0] }
 0x56e   : > { %8306 = vmatpush.bf16.msrb.mxu1 %v14278_v56  ;;  %v14243_v56 = vld [vmem:[%s23377_s5 + $0x2a8] sm:$0xf0]  ;;  %8562 = vmatpush.bf16.msrb.mxu2 %v14338_v51 }
 0x56f   : > { %v14246_v60 = vor.u32 %v16103_v47, %v14243_v56 }
 0x571   : > { %8294 = vmatpush.bf16.msrb.mxu0 %v14206_v21  ;;  %v16085_v21 = vld [vmem:[%s23377_s5 + $0x214] sm:$0xf]  ;;  %8579 = vmatpush.bf16.msrb.mxu3 %v14370_v57 }
 0x572   : > { %8307 = vmatpush.bf16.msrb.mxu1 %v14270_v11  ;;  %v14235_v11 = vld [vmem:[%s23377_s5 + $0x298] sm:$0xf0] }
 0x573   : > { %v22263_v33 = vpop.f32.mrf.mxu1  ;;  %v14238_v1 = vor.u32 %v16101_v31, %v14235_v11 }
 0x575   : > { %v22277_v44 = vpop.f32.mrf.mxu0  ;;  %8295 = vmatpush.bf16.msrb.mxu0 %v14198_v9  ;;  %8580 = vmatpush.bf16.msrb.mxu3 %v14362_v4 }
 0x576   : > { %8308 = vmatpush.bf16.msrb.mxu1 %v14262_v34  ;;  %v14227_v34 = vld [vmem:[%s23377_s5 + $0x288] sm:$0xf0] }
 0x577   : > { %v14230_v53 = vor.u32 %v16099_v35, %v14227_v34  ;;  %v14465_v35 = vld [vmem:[%s23377_s5 + $0x160] sm:$0xf]  ;;  %v16031_v34 = vld [vmem:[%s23377_s5 + $0x64] sm:$0xf] }
 0x579   : > { %v22312_v6 = vpop.f32.mrf.mxu2  ;;  %8296 = vmatpush.bf16.msrb.mxu0 %v14190_v16  ;;  %8581 = vmatpush.bf16.msrb.mxu3 %v14354_v32 }
 0x57a   : > { %8309 = vmatpush.bf16.msrb.mxu1 %v14254_v58  ;;  %v14297_v58 = vld [vmem:[%s23377_s5 + $0x10] sm:$0xf] }
 0x57b   : > { %v7798_v20 = vpop.f32.mrf.mxu1  ;;  %v14298_v51 = vor.u32 %v16022_v10, %v14297_v58  ;;  %v14459_v58 = vld [vmem:[%s23377_s5 + $0x158] sm:$0xf0] }
 0x57c   : > { %v14182_v20 = vor.u32 %v16087_v8, %v14179_v29  ;;  %v7858_v8 = vperm.slane %v7855_v0, 1  ;;  %v16020_v29 = vld [vmem:[%s23377_s5 + $0x4] sm:$0xf0] }
 0x57d   : > { %v7850_v18 = vpop.f32.mrf.mxu0 }
 0x57e   : > { %v16030_v18 = vld [vmem:[%s23377_s5 + $0x54] sm:$0xf0]  ;;  %8297 = vmatpush.bf16.msrb.mxu0 %v14182_v20  ;;  %8310 = vmatpush.bf16.msrb.mxu1 %v14246_v60 }
 0x581   : > { %v7746_v62 = vpop.f32.mrf.mxu2 }
 0x582   : > { %v16028_v62 = vld [vmem:[%s23377_s5 + $0x44] sm:$0xf0]  ;;  %8311 = vmatpush.bf16.msrb.mxu1 %v14238_v1  ;;  %v14475_v1 = vld [vmem:[%s23377_s5 + $0x178] sm:$0xf0] }
 0x584   : > { %v22389_v50 = vpop.f32.mrf.mxu1 }
 0x586   : > { %8312 = vmatpush.bf16.msrb.mxu1 %v14230_v53  ;;  %v14467_v53 = vld [vmem:[%s23377_s5 + $0x168] sm:$0xf0] }
 0x587   : > { %v14470_v63 = vor.u32 %v16063_v19, %v14467_v53  ;;  %v14299_v19 = vld [vmem:[%s23377_s5 + $0x18] sm:$0xf0] }
 0x589   : > { %v7705_v24 = vpop.f32.mrf.mxu3  ;;  %v22418_v28 = vpop.f32.mrf.mxu2 }
 0x58a   : > { %v7719_v7 = vadd.f32 %v22110_v43, %v7705_v24  ;;  %v14329_v43 = vld [vmem:[%s23377_s5 + $0x50] sm:$0xf] }
 0x58b   : > { %v14330_v36 = vor.u32 %v16030_v18, %v14329_v43 }
 0x58c   : > { %v7732_v5 = vadd.f32 %v22157_v26, %v7719_v7  ;;  %v7811_v12 = vpop.f32.mrf.mxu1  ;;  %v14174_v26 = vor.u32 %v16085_v21, %v14171_v25  ;;  %v14473_v25 = vld [vmem:[%s23377_s5 + $0x170] sm:$0xf] }
 0x58d   : > { %8563 = vmatpush.bf16.msrb.mxu2 %v14330_v36 }
 0x58e   : > { %v7745_v52 = vadd.f32 %v22312_v6, %v7732_v5  ;;  %v14321_v6 = vld [vmem:[%s23377_s5 + $0x40] sm:$0xf]  ;;  %8298 = vmatpush.bf16.msrb.mxu0 %v14174_v26  ;;  %v16066_v26 = vld [vmem:[%s23377_s5 + $0x174] sm:$0xf0] }
 0x58f   : > { %v14322_v30 = vor.u32 %v16028_v62, %v14321_v6 }
 0x590   : > { %v7852_v23 = vadd.f32 %v7745_v52, %v21922_v61  ;;  %v14166_v61 = vor.u32 %v16083_v17, %v14163_v27  ;;  %v14478_v27 = vor.u32 %v16065_v3, %v14475_v1  ;;  %v14433_v1 = vld [vmem:[%s23377_s5 + $0x120] sm:$0xf] }
 0x591   : > { %v7707_v38 = vpop.f32.mrf.mxu3  ;;  %v7759_v9 = vpop.f32.mrf.mxu2  ;;  %8564 = vmatpush.bf16.msrb.mxu2 %v14322_v30  ;;  %v14474_v30 = vor.u32 %v16066_v26, %v14473_v25 }
 0x592   : > { %8299 = vmatpush.bf16.msrb.mxu0 %v14166_v61  ;;  %v7863_v47 = vadd.f32 %v7857_v39, %v7852_v23  ;;  %v16064_v61 = vld [vmem:[%s23377_s5 + $0x164] sm:$0xf0] }
 0x593   : > { %v14466_v42 = vor.u32 %v16064_v61, %v14465_v35  ;;  %v14425_v61 = vld [vmem:[%s23377_s5 + $0x110] sm:$0xf] }
 0x594   : > { %v7866_v45 = vmax.f32 %v7863_v47, 0.0  ;;  %v14323_v47 = vld [vmem:[%s23377_s5 + $0x48] sm:$0xf0] }
 0x595   : > { %8565 = vmatpush.bf16.msrb.mxu2 %v14314_v37 }
 0x599   : > { %v7770_v16 = vpop.f32.mrf.mxu3  ;;  %v7822_v54 = vpop.f32.mrf.mxu2  ;;  %8566 = vmatpush.bf16.msrb.mxu2 %v14306_v41  ;;  %v14331_v41 = vld [vmem:[%s23377_s5 + $0x58] sm:$0xf0] }
 0x59a   : > { %v7771_v22 = vadd.f32 %v7770_v16, %v22418_v28  ;;  %v14289_v28 = vld [vmem:[%s23377_s5] sm:$0xf]  ;;  %v7823_v18 = vadd.f32 %v7822_v54, %v22389_v50  ;;  %v16033_v50 = vld [vmem:[%s23377_s5 + $0x74] sm:$0xf] }
 0x59b   : > { %v14290_v20 = vor.u32 %v16020_v29, %v14289_v28  ;;  %v14350_v17 = vor.u32 %v16033_v50, %v14347_v40  ;;  %v16029_v16 = vld [vmem:[%s23377_s5 + $0x54] sm:$0xf]  ;;  %v16027_v28 = vld [vmem:[%s23377_s5 + $0x44] sm:$0xf] }
 0x59c   : > { %v7784_v46 = vadd.f32 %v22159_v15, %v7771_v22  ;;  %v16061_v22 = vld [vmem:[%s23377_s5 + $0x154] sm:$0xf]  ;;  %v16047_v50 = vld [vmem:[%s23377_s5 + $0xe4] sm:$0xf] }
 0x59d   : > { %8567 = vmatpush.bf16.msrb.mxu2 %v14298_v51  ;;  %v14462_v51 = vor.u32 %v16061_v22, %v14459_v58  ;;  %v14291_v22 = vld [vmem:[%s23377_s5 + $0x8] sm:$0xf0]  ;;  %v16051_v58 = vld [vmem:[%s23377_s5 + $0x104] sm:$0xf] }
 0x59e   : > { %v7797_v24 = vadd.f32 %v22263_v33, %v7784_v46  ;;  %v14334_v46 = vor.u32 %v16029_v16, %v14331_v41  ;;  %v16052_v16 = vld [vmem:[%s23377_s5 + $0x104] sm:$0xf0] }
 0x5a0   : > { %v7853_v7 = vadd.f32 %v7797_v24, %v21979_v59  ;;  %v7859_v59 = vperm.slane %v7855_v0, 2  ;;  %v16062_v0 = vld [vmem:[%s23377_s5 + $0x154] sm:$0xf0]  ;;  %v14449_v24 = vld [vmem:[%s23377_s5 + $0x140] sm:$0xf] }
 0x5a1   : > { %v7772_v56 = vpop.f32.mrf.mxu3  ;;  %v7824_v15 = vpop.f32.mrf.mxu2  ;;  %8568 = vmatpush.bf16.msrb.mxu2 %v14290_v20  ;;  %v14458_v39 = vor.u32 %v16062_v0, %v14457_v49  ;;  %v14451_v20 = vld [vmem:[%s23377_s5 + $0x148] sm:$0xf0]  ;;  %v14417_v0 = vld [vmem:[%s23377_s5 + $0x100] sm:$0xf] }
 0x5a2   : > { %v7864_v55 = vadd.f32 %v7858_v8, %v7853_v7  ;;  %v16060_v8 = vld [vmem:[%s23377_s5 + $0x144] sm:$0xf0]  ;;  %v16059_v7 = vld [vmem:[%s23377_s5 + $0x144] sm:$0xf] }
 0x5a3   : > { %v14450_v56 = vor.u32 %v16060_v8, %v14449_v24  ;;  %v14649_v24 = vld [vmem:[%s23377_s5 + $0x3f0] sm:$0xf]  ;;  %v16146_v8 = vld [vmem:[%s23377_s5 + $0x3f4] sm:$0xf0] }
 0x5a4   : > { %v7867_v60 = vmax.f32 %v7864_v55, 0.0  ;;  %v16049_v55 = vld [vmem:[%s23377_s5 + $0xf4] sm:$0xf] }
 0x5a6   : > { %v7869_v33 = vpack.c.bf16 %v7867_v60, %v7866_v45  ;;  %v14411_v45 = vld [vmem:[%s23377_s5 + $0xf8] sm:$0xf0]  ;;  %v14326_v60 = vor.u32 %v16027_v28, %v14323_v47  ;;  %v16129_v28 = vld [vmem:[%s23377_s5 + $0x374] sm:$0xf] }
 0x5a7   : > { %v14414_v25 = vor.u32 %v16049_v55, %v14411_v45  ;;  %v14587_v47 = vld [vmem:[%s23377_s5 + $0x378] sm:$0xf0]  ;;  %v16041_v55 = vld [vmem:[%s23377_s5 + $0xb4] sm:$0xf] }
 0x5a8   : > { %v7970_v57 = vunpack.c.l.b16 %v7869_v33  ;;  %v7971_v43 = vunpack.c.h.b16 %v7869_v33  ;;  %v14454_v33 = vor.u32 %v16059_v7, %v14451_v20  ;;  %v14418_v7 = vor.u32 %v16052_v16, %v14417_v0  ;;  %v14379_v45 = vld [vmem:[%s23377_s5 + $0xb8] sm:$0xf0]  ;;  %v14553_v0 = vld [vmem:[%s23377_s5 + $0x330] sm:$0xf]  ;;  %v16122_v16 = vld [vmem:[%s23377_s5 + $0x334] sm:$0xf0] }
 0x5aa   : > { %v22522_v5 = vpack.c.b16 %v7970_v57, %v7970_v57  ;;  %v22524_v12 = vpack.c.b16 %v7971_v43, %v7971_v43  ;;  %v7835_v36 = vpop.f32.mrf.mxu3  ;;  %v14441_v57 = vld [vmem:[%s23377_s5 + $0x130] sm:$0xf]  ;;  %v16058_v43 = vld [vmem:[%s23377_s5 + $0x134] sm:$0xf0] }
 0x5ab   : > { %v7836_v21 = vadd.f32 %v7835_v36, %v7823_v18  ;;  %v14442_v40 = vor.u32 %v16058_v43, %v14441_v57  ;;  %v14577_v57 = vld [vmem:[%s23377_s5 + $0x360] sm:$0xf]  ;;  %v16128_v43 = vld [vmem:[%s23377_s5 + $0x364] sm:$0xf0] }
 0x5ac   : > { %v7979_v31 = vshll.u32 %v22522_v5, 16  ;;  %v7986_v52 = vshll.u32 %v22524_v12, 16  ;;  %v7977_v4 = vshrl.u32 %v22522_v5, 16  ;;  %v7984_v62 = vshrl.u32 %v22524_v12, 16 }
 0x5ad   : > { %v7849_v11 = vadd.f32 %v22277_v44, %v7836_v21  ;;  %v16025_v21 = vld [vmem:[%s23377_s5 + $0x34] sm:$0xf] }
 0x5ae   : > { %v7981_v6 = vrot.slane %v7979_v31, 1  ;;  %v7988_v23 = vrot.slane %v7986_v52, 1  ;;  %v16057_v31 = vld [vmem:[%s23377_s5 + $0x134] sm:$0xf]  ;;  %v14443_v52 = vld [vmem:[%s23377_s5 + $0x138] sm:$0xf0] }
 0x5af   : > { %v7854_v44 = vadd.f32 %v7849_v11, %v22012_v2  ;;  %v14339_v2 = vld [vmem:[%s23377_s5 + $0x68] sm:$0xf0] }
 0x5b0   : > { %v7982_v38 = vor.u32 %v7981_v6, %v7977_v4  ;;  %v22550_v9 = vor.u32 %v7988_v23, %v7984_v62  ;;  %v14342_v37 = vor.u32 %v16031_v34, %v14339_v2  ;;  %v14403_v11 = vld [vmem:[%s23377_s5 + $0xe8] sm:$0xf0]  ;;  %v14446_v4 = vor.u32 %v16057_v31, %v14443_v52  ;;  %v16056_v6 = vld [vmem:[%s23377_s5 + $0x124] sm:$0xf0]  ;;  %v16023_v62 = vld [vmem:[%s23377_s5 + $0x24] sm:$0xf] }
 0x5b1   : > { %v7865_v48 = vadd.f32 %v7859_v59, %v7854_v44  ;;  %v14315_v59 = vld [vmem:[%s23377_s5 + $0x38] sm:$0xf0]  ;;  %v14307_v23 = vld [vmem:[%s23377_s5 + $0x28] sm:$0xf0]  ;;  %v14406_v44 = vor.u32 %v16047_v50, %v14403_v11  ;;  %v16021_v2 = vld [vmem:[%s23377_s5 + $0x14] sm:$0xf]  ;;  %v14578_v31 = vor.u32 %v16128_v43, %v14577_v57 }
 0x5b2   : > { %v7837_v32 = vpop.f32.mrf.mxu3  ;;  %8248 = vmatmul.bf16.vlgmr.msra.gmra.mxu0 %v7982_v38  ;;  %8261 = vmatmul.bf16.vlgmr.msra.gmra.mxu1 %v22550_v9  ;;  %v14318_v3 = vor.u32 %v16025_v21, %v14315_v59  ;;  %v14310_v35 = vor.u32 %v16023_v62, %v14307_v23  ;;  %v14302_v49 = vor.u32 %v16021_v2, %v14299_v19  ;;  %v16127_v21 = vld [vmem:[%s23377_s5 + $0x364] sm:$0xf]  ;;  %v14579_v59 = vld [vmem:[%s23377_s5 + $0x368] sm:$0xf0]  ;;  %v14571_v62 = vld [vmem:[%s23377_s5 + $0x358] sm:$0xf0] }
 0x5b3   : > { %v7868_v14 = vmax.f32 %v7865_v48, 0.0  ;;  %8287 = vmatmul.bf16.vlgmr.msra.gmra.mxu3 %v7982_v38  ;;  %8587 = vmatpush.bf16.msra.mxu0 %v14474_v30  ;;  %v16055_v30 = vld [vmem:[%s23377_s5 + $0x124] sm:$0xf]  ;;  %v14435_v38 = vld [vmem:[%s23377_s5 + $0x128] sm:$0xf0]  ;;  %v14582_v11 = vor.u32 %v16127_v21, %v14579_v59 }
 0x5b4   : > { %8600 = vmatpush.bf16.msra.mxu1 %v14350_v17  ;;  %8626 = vmatpush.bf16.msra.mxu3 %v14478_v27  ;;  %v16045_v17 = vld [vmem:[%s23377_s5 + $0xd4] sm:$0xf]  ;;  %v14434_v27 = vor.u32 %v16056_v6, %v14433_v1  ;;  %v14438_v34 = vor.u32 %v16055_v30, %v14435_v38  ;;  %v16054_v48 = vld [vmem:[%s23377_s5 + $0x114] sm:$0xf0]  ;;  %v16039_v52 = vld [vmem:[%s23377_s5 + $0xa4] sm:$0xf] }
 0x5b5   : > { %v7870_v54 = vpack.c.bf16 %v7868_v14, %v7868_v14  ;;  %v16053_v32 = vld [vmem:[%s23377_s5 + $0x114] sm:$0xf]  ;;  %v14427_v14 = vld [vmem:[%s23377_s5 + $0x118] sm:$0xf0]  ;;  %v14633_v1 = vld [vmem:[%s23377_s5 + $0x3d0] sm:$0xf] }
 0x5b6   : > { %v14430_v41 = vor.u32 %v16053_v32, %v14427_v14  ;;  %v16125_v6 = vld [vmem:[%s23377_s5 + $0x354] sm:$0xf]  ;;  %v14363_v38 = vld [vmem:[%s23377_s5 + $0x98] sm:$0xf0]  ;;  %v14563_v2 = vld [vmem:[%s23377_s5 + $0x348] sm:$0xf0] }
 0x5b7   : > { %v7972_v10 = vunpack.c.l.b16 %v7870_v54  ;;  %8588 = vmatpush.bf16.msra.mxu0 %v14466_v42  ;;  %v16043_v42 = vld [vmem:[%s23377_s5 + $0xc4] sm:$0xf]  ;;  %v16037_v30 = vld [vmem:[%s23377_s5 + $0x94] sm:$0xf]  ;;  %v14355_v14 = vld [vmem:[%s23377_s5 + $0x88] sm:$0xf0] }
 0x5b8   : > { %8601 = vmatpush.bf16.msra.mxu1 %v14342_v37  ;;  %8627 = vmatpush.bf16.msra.mxu3 %v14470_v63  ;;  %v14387_v37 = vld [vmem:[%s23377_s5 + $0xc8] sm:$0xf0]  ;;  %v14426_v63 = vor.u32 %v16054_v48, %v14425_v61  ;;  %v16019_v54 = vld [vmem:[%s23377_s5 + $0x4] sm:$0xf]  ;;  %v14625_v61 = vld [vmem:[%s23377_s5 + $0x3c0] sm:$0xf]  ;;  %v14366_v19 = vor.u32 %v16037_v30, %v14363_v38 }
 0x5b9   : > { %v22598_v29 = vpack.c.b16 %v7972_v10, %v7972_v10  ;;  %v14419_v10 = vld [vmem:[%s23377_s5 + $0x108] sm:$0xf0]  ;;  %v14294_v20 = vor.u32 %v16019_v54, %v14291_v22  ;;  %v16123_v48 = vld [vmem:[%s23377_s5 + $0x344] sm:$0xf]  ;;  %v14617_v54 = vld [vmem:[%s23377_s5 + $0x3b0] sm:$0xf] }
 0x5ba   : > { %v16121_v22 = vld [vmem:[%s23377_s5 + $0x334] sm:$0xf]  ;;  %v16158_v57 = vld [vmem:[%s23377_s5 + $0x454] sm:$0xf0]  ;;  %v14601_v59 = vld [vmem:[%s23377_s5 + $0x390] sm:$0xf] }
 0x5bb   : > { %8589 = vmatpush.bf16.msra.mxu0 %v14458_v39  ;;  %v7993_v15 = vshll.u32 %v22598_v29, 16  ;;  %v7991_v18 = vshrl.u32 %v22598_v29, 16  ;;  %v14390_v39 = vor.u32 %v16043_v42, %v14387_v37  ;;  %v14713_v42 = vld [vmem:[%s23377_s5 + $0x470] sm:$0xf]  ;;  %v16162_v37 = vld [vmem:[%s23377_s5 + $0x474] sm:$0xf0] }
 0x5bc   : > { %8602 = vmatpush.bf16.msra.mxu1 %v14334_v46  ;;  %8628 = vmatpush.bf16.msra.mxu3 %v14462_v51  ;;  %v14585_v46 = vld [vmem:[%s23377_s5 + $0x370] sm:$0xf]  ;;  %v16130_v51 = vld [vmem:[%s23377_s5 + $0x374] sm:$0xf0]  ;;  %v14531_v30 = vld [vmem:[%s23377_s5 + $0x308] sm:$0xf0] }
 0x5bd   : > { %v7995_v36 = vrot.slane %v7993_v15, 1  ;;  %v14586_v15 = vor.u32 %v16130_v51, %v14585_v46  ;;  %v14554_v46 = vor.u32 %v16122_v16, %v14553_v0  ;;  %v14705_v51 = vld [vmem:[%s23377_s5 + $0x460] sm:$0xf]  ;;  %v16118_v21 = vld [vmem:[%s23377_s5 + $0x314] sm:$0xf0]  ;;  %v8688_v0 = vrot.slane %v22522_v5, 1 }
 0x5be   : > { %v16145_v38 = vld [vmem:[%s23377_s5 + $0x3f4] sm:$0xf]  ;;  %v14673_v16 = vld [vmem:[%s23377_s5 + $0x420] sm:$0xf] }
 0x5bf   : > { %8590 = vmatpush.bf16.msra.mxu0 %v14450_v56  ;;  %v7996_v26 = vor.u32 %v7995_v36, %v7991_v18  ;;  %v14422_v56 = vor.u32 %v16051_v58, %v14419_v10  ;;  %v14641_v18 = vld [vmem:[%s23377_s5 + $0x3e0] sm:$0xf]  ;;  %v16144_v36 = vld [vmem:[%s23377_s5 + $0x3e4] sm:$0xf0]  ;;  %v14555_v58 = vld [vmem:[%s23377_s5 + $0x338] sm:$0xf0] }
 0x5c0   : > { %8603 = vmatpush.bf16.msra.mxu1 %v14326_v60  ;;  %8629 = vmatpush.bf16.msra.mxu3 %v14454_v33  ;;  %v14650_v60 = vor.u32 %v16146_v8, %v14649_v24  ;;  %v14590_v33 = vor.u32 %v16129_v28, %v14587_v47  ;;  %v14642_v50 = vor.u32 %v16144_v36, %v14641_v18  ;;  %v16160_v24 = vld [vmem:[%s23377_s5 + $0x464] sm:$0xf0]  ;;  %v14545_v47 = vld [vmem:[%s23377_s5 + $0x320] sm:$0xf]  ;;  %v14537_v36 = vld [vmem:[%s23377_s5 + $0x310] sm:$0xf] }
 0x5c1   : > { %8274 = vmatmul.bf16.vlgmr.msra.gmra.mxu2 %v7996_v26  ;;  %v14558_v28 = vor.u32 %v16121_v22, %v14555_v58 }
 0x5c2   : > { %8613 = vmatpush.bf16.msra.mxu2 %v14414_v25  ;;  %8300 = vmatmul.bf16.vlgmr.msrb.gmra.mxu0 %v22550_v9  ;;  %v14395_v9 = vld [vmem:[%s23377_s5 + $0xd8] sm:$0xf0]  ;;  %v14382_v25 = vor.u32 %v16041_v55, %v14379_v45  ;;  %v14547_v55 = vld [vmem:[%s23377_s5 + $0x328] sm:$0xf0]  ;;  %v14706_v45 = vor.u32 %v16160_v24, %v14705_v51  ;;  %v14665_v24 = vld [vmem:[%s23377_s5 + $0x410] sm:$0xf] }
 0x5c3   : > { %8313 = vmatmul.bf16.vlgmr.msrb.gmra.mxu1 %v7996_v26  ;;  %8582 = vmatmul.bf16.vlgmr.msrb.gmra.mxu3 %v22524_v12  ;;  %v14398_v53 = vor.u32 %v16045_v17, %v14395_v9  ;;  %v14371_v26 = vld [vmem:[%s23377_s5 + $0xa8] sm:$0xf0]  ;;  %v14574_v9 = vor.u32 %v16125_v6, %v14571_v62  ;;  %v16116_v6 = vld [vmem:[%s23377_s5 + $0x304] sm:$0xf0]  ;;  %v14593_v62 = vld [vmem:[%s23377_s5 + $0x380] sm:$0xf] }
 0x5c4   : > { %8591 = vmatpush.bf16.msra.mxu0 %v14442_v40  ;;  %8604 = vmatpush.bf16.msra.mxu1 %v14318_v3  ;;  %v14569_v40 = vld [vmem:[%s23377_s5 + $0x350] sm:$0xf]  ;;  %v16126_v3 = vld [vmem:[%s23377_s5 + $0x354] sm:$0xf0]  ;;  %v14374_v23 = vor.u32 %v16039_v52, %v14371_v26  ;;  %v14539_v52 = vld [vmem:[%s23377_s5 + $0x318] sm:$0xf0] }
 0x5c5   : > { %8630 = vmatpush.bf16.msra.mxu3 %v14446_v4  ;;  %v16142_v4 = vld [vmem:[%s23377_s5 + $0x3d4] sm:$0xf0] }
 0x5c6   : > { %8614 = vmatpush.bf16.msra.mxu2 %v14406_v44  ;;  %v14570_v44 = vor.u32 %v16126_v3, %v14569_v40  ;;  %v14634_v17 = vor.u32 %v16142_v4, %v14633_v1  ;;  %v16156_v40 = vld [vmem:[%s23377_s5 + $0x444] sm:$0xf0]  ;;  %v14529_v3 = vld [vmem:[%s23377_s5 + $0x300] sm:$0xf] }
 0x5c8   : > { %8592 = vmatpush.bf16.msra.mxu0 %v14434_v27  ;;  %8605 = vmatpush.bf16.msra.mxu1 %v14310_v35  ;;  %v14561_v27 = vld [vmem:[%s23377_s5 + $0x340] sm:$0xf]  ;;  %v16124_v35 = vld [vmem:[%s23377_s5 + $0x344] sm:$0xf0] }
 0x5c9   : > { %8631 = vmatpush.bf16.msra.mxu3 %v14438_v34  ;;  %v16140_v34 = vld [vmem:[%s23377_s5 + $0x3c4] sm:$0xf0]  ;;  %v14562_v32 = vor.u32 %v16124_v35, %v14561_v27  ;;  %v14715_v27 = vld [vmem:[%s23377_s5 + $0x478] sm:$0xf0] }
 0x5ca   : > { %8615 = vmatpush.bf16.msra.mxu2 %v14398_v53  ;;  %v16035_v53 = vld [vmem:[%s23377_s5 + $0x84] sm:$0xf] }
 0x5cb   : > { %v14358_v10 = vor.u32 %v16035_v53, %v14355_v14  ;;  %v16143_v14 = vld [vmem:[%s23377_s5 + $0x3e4] sm:$0xf] }
 0x5cc   : > { %8593 = vmatpush.bf16.msra.mxu0 %v14426_v63  ;;  %8606 = vmatpush.bf16.msra.mxu1 %v14302_v49  ;;  %v14626_v63 = vor.u32 %v16140_v34, %v14625_v61  ;;  %v14566_v49 = vor.u32 %v16123_v48, %v14563_v2  ;;  %v14530_v61 = vor.u32 %v16116_v6, %v14529_v3  ;;  %v14681_v2 = vld [vmem:[%s23377_s5 + $0x430] sm:$0xf]  ;;  %v14603_v6 = vld [vmem:[%s23377_s5 + $0x398] sm:$0xf0] }
 0x5cd   : > { %8632 = vmatpush.bf16.msra.mxu3 %v14430_v41  ;;  %v16138_v41 = vld [vmem:[%s23377_s5 + $0x3b4] sm:$0xf0] }
 0x5ce   : > { %8616 = vmatpush.bf16.msra.mxu2 %v14390_v39  ;;  %v14714_v39 = vor.u32 %v16162_v37, %v14713_v42  ;;  %v14618_v8 = vor.u32 %v16138_v41, %v14617_v54  ;;  %v14643_v42 = vld [vmem:[%s23377_s5 + $0x3e8] sm:$0xf0]  ;;  %v16159_v37 = vld [vmem:[%s23377_s5 + $0x464] sm:$0xf]  ;;  %v16152_v54 = vld [vmem:[%s23377_s5 + $0x424] sm:$0xf0] }
 0x5cf   : > { %v8689_v41 = vrot.slane %v22524_v12, 1  ;;  %v14646_v22 = vor.u32 %v16143_v14, %v14643_v42  ;;  %v14674_v51 = vor.u32 %v16152_v54, %v14673_v16 }
 0x5d0   : > { %8594 = vmatpush.bf16.msra.mxu0 %v14418_v7  ;;  %8607 = vmatpush.bf16.msra.mxu1 %v14294_v20  ;;  %v16120_v7 = vld [vmem:[%s23377_s5 + $0x324] sm:$0xf0]  ;;  %v14609_v20 = vld [vmem:[%s23377_s5 + $0x3a0] sm:$0xf] }
 0x5d1   : > { %8633 = vmatpush.bf16.msra.mxu3 %v14422_v56  ;;  %8569 = vmatmul.bf16.vlgmr.msrb.gmra.mxu2 %v22522_v5  ;;  %v16136_v56 = vld [vmem:[%s23377_s5 + $0x3a4] sm:$0xf0] }
 0x5d2   : > { %8617 = vmatpush.bf16.msra.mxu2 %v14382_v25  ;;  %v14610_v43 = vor.u32 %v16136_v56, %v14609_v20  ;;  %v16134_v25 = vld [vmem:[%s23377_s5 + $0x394] sm:$0xf0]  ;;  %v14627_v20 = vld [vmem:[%s23377_s5 + $0x3c8] sm:$0xf0]  ;;  %v16155_v56 = vld [vmem:[%s23377_s5 + $0x444] sm:$0xf] }
 0x5d3   : > { %8595 = vmatmul.bf16.vlgmr.msra.gmra.mxu0 %v22598_v29  ;;  %8608 = vmatmul.bf16.vlgmr.msra.gmra.mxu1 %v22522_v5  ;;  %v14602_v1 = vor.u32 %v16134_v25, %v14601_v59  ;;  %v14635_v5 = vld [vmem:[%s23377_s5 + $0x3d8] sm:$0xf0] }
 0x5d4   : > { %8934 = vmatpush.bf16.msrb.mxu0 %v14586_v15  ;;  %8947 = vmatpush.bf16.msrb.mxu1 %v14650_v60  ;;  %v16119_v15 = vld [vmem:[%s23377_s5 + $0x324] sm:$0xf]  ;;  %v14546_v60 = vor.u32 %v16120_v7, %v14545_v47 }
 0x5d5   : > { %8973 = vmatpush.bf16.msrb.mxu3 %v14590_v33  ;;  %v14697_v33 = vld [vmem:[%s23377_s5 + $0x450] sm:$0xf]  ;;  %v14550_v18 = vor.u32 %v16119_v15, %v14547_v55  ;;  %v16139_v7 = vld [vmem:[%s23377_s5 + $0x3c4] sm:$0xf]  ;;  %v14691_v15 = vld [vmem:[%s23377_s5 + $0x448] sm:$0xf0] }
 0x5d6   : > { %8634 = vmatmul.bf16.vlgmr.msra.gmra.mxu3 %v22598_v29  ;;  %8618 = vmatpush.bf16.msra.mxu2 %v14374_v23  ;;  %v14698_v26 = vor.u32 %v16158_v57, %v14697_v33  ;;  %v16132_v23 = vld [vmem:[%s23377_s5 + $0x384] sm:$0xf0]  ;;  %v14630_v33 = vor.u32 %v16139_v7, %v14627_v20  ;;  %v14694_v57 = vor.u32 %v16155_v56, %v14691_v15  ;;  %v16193_v7 = vld [vmem:[%s23379_s7 + $0xf0] sm:$0xff] }
 0x5d7   : > { %v14594_v34 = vor.u32 %v16132_v23, %v14593_v62  ;;  %v16149_v62 = vld [vmem:[%s23377_s5 + $0x414] sm:$0xf]  ;;  %v16168_v56 = vld [vmem:[%s23379_s7 + $0x28] sm:$0xff] }
 0x5d8   : > { %8935 = vmatpush.bf16.msrb.mxu0 %v14578_v31  ;;  %8948 = vmatpush.bf16.msrb.mxu1 %v14642_v50  ;;  %v16117_v31 = vld [vmem:[%s23377_s5 + $0x314] sm:$0xf]  ;;  %v14538_v50 = vor.u32 %v16118_v21, %v14537_v36  ;;  %v14683_v21 = vld [vmem:[%s23377_s5 + $0x438] sm:$0xf0]  ;;  %v16176_v15 = vld [vmem:[%s23379_s7 + $0x68] sm:$0xff] }
 0x5d9   : > { %8974 = vmatpush.bf16.msrb.mxu3 %v14582_v11  ;;  %v14689_v11 = vld [vmem:[%s23377_s5 + $0x440] sm:$0xf]  ;;  %v14542_v4 = vor.u32 %v16117_v31, %v14539_v52  ;;  %v16153_v36 = vld [vmem:[%s23377_s5 + $0x434] sm:$0xf]  ;;  %v16135_v52 = vld [vmem:[%s23377_s5 + $0x3a4] sm:$0xf] }
 0x5da   : > { %8619 = vmatpush.bf16.msra.mxu2 %v14366_v19  ;;  %v14690_v35 = vor.u32 %v16156_v40, %v14689_v11  ;;  %v16154_v19 = vld [vmem:[%s23377_s5 + $0x434] sm:$0xf0]  ;;  %v14686_v31 = vor.u32 %v16153_v36, %v14683_v21  ;;  %v14675_v11 = vld [vmem:[%s23377_s5 + $0x428] sm:$0xf0]  ;;  %v8690_v40 = vrot.slane %v22598_v29, 1  ;;  %v16175_v36 = vld [vmem:[%s23379_s7 + $0x60] sm:$0xff] }
 0x5db   : > { %v14667_v29 = vld [vmem:[%s23377_s5 + $0x418] sm:$0xf0]  ;;  %v16183_v21 = vld [vmem:[%s23379_s7 + $0xa0] sm:$0xff] }
 0x5dc   : > { %8936 = vmatpush.bf16.msrb.mxu0 %v14570_v44  ;;  %8949 = vmatpush.bf16.msrb.mxu1 %v14634_v17  ;;  %v16115_v44 = vld [vmem:[%s23377_s5 + $0x304] sm:$0xf]  ;;  %v14651_v17 = vld [vmem:[%s23377_s5 + $0x3f8] sm:$0xf0] }
 0x5dd   : > { %8975 = vmatpush.bf16.msrb.mxu3 %v14574_v9  ;;  %v16161_v9 = vld [vmem:[%s23377_s5 + $0x474] sm:$0xf]  ;;  %v14534_v48 = vor.u32 %v16115_v44, %v14531_v30  ;;  %v14654_v53 = vor.u32 %v16145_v38, %v14651_v17  ;;  %v14670_v44 = vor.u32 %v16149_v62, %v14667_v29  ;;  %v16131_v30 = vld [vmem:[%s23377_s5 + $0x384] sm:$0xf]  ;;  %v14595_v38 = vld [vmem:[%s23377_s5 + $0x388] sm:$0xf0] }
 0x5de   : > { %8620 = vmatpush.bf16.msra.mxu2 %v14358_v10  ;;  %v16141_v10 = vld [vmem:[%s23377_s5 + $0x3d4] sm:$0xf]  ;;  %v16147_v17 = vld [vmem:[%s23377_s5 + $0x404] sm:$0xf]  ;;  %v16164_v62 = vld [vmem:[%s23379_s7 + $0x8] sm:$0xff] }
 0x5df   : > { %v16172_v29 = vld [vmem:[%s23379_s7 + $0x48] sm:$0xff] }
 0x5e0   : > { %8937 = vmatpush.bf16.msrb.mxu0 %v14562_v32  ;;  %8950 = vmatpush.bf16.msrb.mxu1 %v14626_v63  ;;  %v14718_v32 = vor.u32 %v16161_v9, %v14715_v27  ;;  %v14707_v63 = vld [vmem:[%s23377_s5 + $0x468] sm:$0xf0]  ;;  %v14598_v27 = vor.u32 %v16131_v30, %v14595_v38 }
 0x5e1   : > { %8976 = vmatpush.bf16.msrb.mxu3 %v14566_v49  ;;  %8621 = vmatmul.bf16.vlgmr.msra.gmra.mxu2 %v22524_v12  ;;  %v14682_v49 = vor.u32 %v16154_v19, %v14681_v2  ;;  %v14710_v58 = vor.u32 %v16159_v37, %v14707_v63  ;;  %v14659_v9 = vld [vmem:[%s23377_s5 + $0x408] sm:$0xf0] }
 0x5e2   : > { %8960 = vmatpush.bf16.msrb.mxu2 %v14714_v39  ;;  %v16157_v39 = vld [vmem:[%s23377_s5 + $0x454] sm:$0xf] }
 0x5e4   : > { %8938 = vmatpush.bf16.msrb.mxu0 %v14554_v46  ;;  %8951 = vmatpush.bf16.msrb.mxu1 %v14618_v8  ;;  %v14699_v46 = vld [vmem:[%s23377_s5 + $0x458] sm:$0xf0]  ;;  %v16150_v8 = vld [vmem:[%s23377_s5 + $0x414] sm:$0xf0] }
 0x5e5   : > { %8977 = vmatpush.bf16.msrb.mxu3 %v14558_v28  ;;  %v14638_v28 = vor.u32 %v16141_v10, %v14635_v5  ;;  %v14702_v47 = vor.u32 %v16157_v39, %v14699_v46  ;;  %v14666_v55 = vor.u32 %v16150_v8, %v14665_v24  ;;  %v16178_v10 = vld [vmem:[%s23379_s7 + $0x78] sm:$0xff]  ;;  %v16169_v24 = vld [vmem:[%s23379_s7 + $0x30] sm:$0xff] }
 0x5e6   : > { %8961 = vmatpush.bf16.msrb.mxu2 %v14706_v45  ;;  %v14657_v45 = vld [vmem:[%s23377_s5 + $0x400] sm:$0xf]  ;;  %v16186_v5 = vld [vmem:[%s23379_s7 + $0xb8] sm:$0xff]  ;;  %v16177_v8 = vld [vmem:[%s23379_s7 + $0x70] sm:$0xff] }
 0x5e7   : > { %v16194_v46 = vld [vmem:[%s23379_s7 + $0xf8] sm:$0xff] }
 0x5e8   : > { %8939 = vmatpush.bf16.msrb.mxu0 %v14546_v60  ;;  %8952 = vmatpush.bf16.msrb.mxu1 %v14610_v43  ;;  %v16148_v60 = vld [vmem:[%s23377_s5 + $0x404] sm:$0xf0]  ;;  %v16137_v43 = vld [vmem:[%s23377_s5 + $0x3b4] sm:$0xf] }
 0x5e9   : > { %8978 = vmatpush.bf16.msrb.mxu3 %v14550_v18  ;;  %v14619_v18 = vld [vmem:[%s23377_s5 + $0x3b8] sm:$0xf0]  ;;  %v14658_v59 = vor.u32 %v16148_v60, %v14657_v45  ;;  %v16184_v60 = vld [vmem:[%s23379_s7 + $0xa8] sm:$0xff] }
 0x5ea   : > { %8962 = vmatpush.bf16.msrb.mxu2 %v14698_v26  ;;  %v14622_v25 = vor.u32 %v16137_v43, %v14619_v18  ;;  %v14611_v26 = vld [vmem:[%s23377_s5 + $0x3a8] sm:$0xf0]  ;;  %v16167_v18 = vld [vmem:[%s23379_s7 + $0x20] sm:$0xff] }
 0x5eb   : > { %v14614_v3 = vor.u32 %v16135_v52, %v14611_v26  ;;  %v16174_v52 = vld [vmem:[%s23379_s7 + $0x58] sm:$0xff] }
 0x5ec   : > { %8940 = vmatpush.bf16.msrb.mxu0 %v14538_v50  ;;  %8953 = vmatpush.bf16.msrb.mxu1 %v14602_v1  ;;  %v16151_v50 = vld [vmem:[%s23377_s5 + $0x424] sm:$0xf] }
 0x5ed   : > { %8979 = vmatpush.bf16.msrb.mxu3 %v14542_v4  ;;  %v14678_v1 = vor.u32 %v16151_v50, %v14675_v11  ;;  %v16133_v4 = vld [vmem:[%s23377_s5 + $0x394] sm:$0xf]  ;;  %v16182_v50 = vld [vmem:[%s23379_s7 + $0x98] sm:$0xff] }
 0x5ee   : > { %8963 = vmatpush.bf16.msrb.mxu2 %v14690_v35  ;;  %v14606_v23 = vor.u32 %v16133_v4, %v14603_v6  ;;  %v14662_v35 = vor.u32 %v16147_v17, %v14659_v9  ;;  %v16190_v11 = vld [vmem:[%s23379_s7 + $0xd8] sm:$0xff]  ;;  %v16181_v4 = vld [vmem:[%s23379_s7 + $0x90] sm:$0xff]  ;;  %v16163_v9 = vld [vmem:[%s23379_s7] sm:$0xff] }
 0x5ef   : > { %v16189_v6 = vld [vmem:[%s23379_s7 + $0xd0] sm:$0xff] }
 0x5f0   : > { %8941 = vmatpush.bf16.msrb.mxu0 %v14530_v61  ;;  %8954 = vmatpush.bf16.msrb.mxu1 %v14594_v34 }
 0x5f1   : > { %8980 = vmatpush.bf16.msrb.mxu3 %v14534_v48 }
 0x5f2   : > { %8964 = vmatpush.bf16.msrb.mxu2 %v14682_v49 }
 0x5f3   : > { %8942 = vmatmul.bf16.vlgmr.msrb.gmra.mxu0 %v8688_v0  ;;  %8955 = vmatmul.bf16.vlgmr.msrb.gmra.mxu1 %v8689_v41 }
 0x5f4   : > { %8986 = vmatpush.bf16.msra.mxu0 %v14654_v53  ;;  %8999 = vmatpush.bf16.msra.mxu1 %v14718_v32 }
 0x5f5   : > { %8981 = vmatmul.bf16.vlgmr.msrb.gmra.mxu3 %v8688_v0 }
 0x5f6   : > { %8965 = vmatpush.bf16.msrb.mxu2 %v14674_v51  ;;  %9212 = vmatpush.bf16.msra.mxu3 %v16194_v46 }
 0x5f8   : > { %8987 = vmatpush.bf16.msra.mxu0 %v14646_v22  ;;  %9000 = vmatpush.bf16.msra.mxu1 %v14710_v58  ;;  %v16170_v58 = vld [vmem:[%s23379_s7 + $0x38] sm:$0xff] }
 0x5fa   : > { %8966 = vmatpush.bf16.msrb.mxu2 %v14666_v55  ;;  %9213 = vmatpush.bf16.msra.mxu3 %v16193_v7  ;;  %v16213_v7 = vld [vmem:[%s23379_s7 + $0x190] sm:$0xff] }
 0x5fc   : > { %8988 = vmatpush.bf16.msra.mxu0 %v14638_v28  ;;  %9001 = vmatpush.bf16.msra.mxu1 %v14702_v47  ;;  %v16185_v47 = vld [vmem:[%s23379_s7 + $0xb0] sm:$0xff] }
 0x5fe   : > { %8967 = vmatpush.bf16.msrb.mxu2 %v14658_v59 }
 0x600   : > { %8989 = vmatpush.bf16.msra.mxu0 %v14630_v33  ;;  %9002 = vmatpush.bf16.msra.mxu1 %v14694_v57  ;;  %v16192_v33 = vld [vmem:[%s23379_s7 + $0xe8] sm:$0xff] }
 0x601   : > { %8968 = vmatmul.bf16.vlgmr.msrb.gmra.mxu2 %v8690_v40  ;;  %9214 = vmatpush.bf16.msra.mxu3 %v16192_v33  ;;  %v16220_v33 = vld [vmem:[%s23379_s7 + $0x1c8] sm:$0xff] }
 0x602   : > { %9199 = vmatpush.bf16.msra.mxu2 %v16186_v5  ;;  %v16207_v5 = vld [vmem:[%s23379_s7 + $0x160] sm:$0xff] }
 0x604   : > { %8990 = vmatpush.bf16.msra.mxu0 %v14622_v25  ;;  %9003 = vmatpush.bf16.msra.mxu1 %v14686_v31  ;;  %v16191_v25 = vld [vmem:[%s23379_s7 + $0xe0] sm:$0xff]  ;;  %v16166_v31 = vld [vmem:[%s23379_s7 + $0x18] sm:$0xff] }
 0x605   : > { %9215 = vmatpush.bf16.msra.mxu3 %v16191_v25  ;;  %v9014_v25 = vld [vmem:[%s23378_s6] sm:$0x3] }
 0x606   : > { %9200 = vmatpush.bf16.msra.mxu2 %v16185_v47  ;;  %v16206_v47 = vld [vmem:[%s23379_s7 + $0x158] sm:$0xff] }
 0x608   : > { %8991 = vmatpush.bf16.msra.mxu0 %v14614_v3  ;;  %9004 = vmatpush.bf16.msra.mxu1 %v14678_v1  ;;  %v16165_v3 = vld [vmem:[%s23379_s7 + $0x10] sm:$0xff] }
 0x609   : > { %9216 = vmatpush.bf16.msra.mxu3 %v16190_v11  ;;  %v16173_v1 = vld [vmem:[%s23379_s7 + $0x50] sm:$0xff]  ;;  %v16195_v11 = vld [vmem:[%s23379_s7 + $0x100] sm:$0xff] }
 0x60a   : > { %9201 = vmatpush.bf16.msra.mxu2 %v16184_v60  ;;  %v16212_v60 = vld [vmem:[%s23379_s7 + $0x188] sm:$0xff] }
 0x60c   : > { %8992 = vmatpush.bf16.msra.mxu0 %v14606_v23  ;;  %9005 = vmatpush.bf16.msra.mxu1 %v14670_v44  ;;  %v16180_v23 = vld [vmem:[%s23379_s7 + $0x88] sm:$0xff] }
 0x60d   : > { %9217 = vmatpush.bf16.msra.mxu3 %v16189_v6  ;;  %v16188_v44 = vld [vmem:[%s23379_s7 + $0xc8] sm:$0xff] }
 0x60e   : > { %9202 = vmatpush.bf16.msra.mxu2 %v16183_v21 }
 0x610   : > { %8993 = vmatpush.bf16.msra.mxu0 %v14598_v27  ;;  %9006 = vmatpush.bf16.msra.mxu1 %v14662_v35  ;;  %v16171_v27 = vld [vmem:[%s23379_s7 + $0x40] sm:$0xff]  ;;  %v16218_v35 = vld [vmem:[%s23379_s7 + $0x1b8] sm:$0xff] }
 0x611   : > { %9218 = vmatpush.bf16.msra.mxu3 %v16188_v44 }
 0x612   : > { %9203 = vmatpush.bf16.msra.mxu2 %v16182_v50 }
 0x613   : > { %8994 = vmatmul.bf16.vlgmr.msra.gmra.mxu0 %v8689_v41  ;;  %9007 = vmatmul.bf16.vlgmr.msra.gmra.mxu1 %v8690_v40 }
 0x614   : > { %9323 = vmatpush.bf16.msrb.mxu0 %v16170_v58  ;;  %9336 = vmatpush.bf16.msrb.mxu1 %v16178_v10  ;;  %v16223_v58 = vld [vmem:[%s23379_s7 + $0x1e0] sm:$0xff] }
 0x615   : > { %v16199_v10 = vld [vmem:[%s23379_s7 + $0x120] sm:$0xff] }
 0x616   : > { %9204 = vmatpush.bf16.msra.mxu2 %v16181_v4  ;;  %v9016_v4 = vperm.slane %v9014_v25, 0 }
 0x618   : > { %9324 = vmatpush.bf16.msrb.mxu0 %v16169_v24  ;;  %9337 = vmatpush.bf16.msrb.mxu1 %v16177_v8  ;;  %v16214_v24 = vld [vmem:[%s23379_s7 + $0x198] sm:$0xff] }
 0x619   : > { %v16222_v8 = vld [vmem:[%s23379_s7 + $0x1d8] sm:$0xff] }
 0x61a   : > { %9205 = vmatpush.bf16.msra.mxu2 %v16180_v23 }
 0x61c   : > { %9325 = vmatpush.bf16.msrb.mxu0 %v16168_v56  ;;  %9338 = vmatpush.bf16.msrb.mxu1 %v16176_v15  ;;  %v16197_v15 = vld [vmem:[%s23379_s7 + $0x110] sm:$0xff] }
 0x620   : > { %9326 = vmatpush.bf16.msrb.mxu0 %v16167_v18  ;;  %9339 = vmatpush.bf16.msrb.mxu1 %v16175_v36  ;;  %v16196_v18 = vld [vmem:[%s23379_s7 + $0x108] sm:$0xff] }
 0x621   : > { %v16204_v36 = vld [vmem:[%s23379_s7 + $0x148] sm:$0xff] }
 0x624   : > { %9327 = vmatpush.bf16.msrb.mxu0 %v16166_v31  ;;  %9340 = vmatpush.bf16.msrb.mxu1 %v16174_v52  ;;  %v16211_v31 = vld [vmem:[%s23379_s7 + $0x180] sm:$0xff] }
 0x625   : > { %v16219_v52 = vld [vmem:[%s23379_s7 + $0x1c0] sm:$0xff] }
 0x628   : > { %9328 = vmatpush.bf16.msrb.mxu0 %v16165_v3  ;;  %9341 = vmatpush.bf16.msrb.mxu1 %v16173_v1  ;;  %v16203_v3 = vld [vmem:[%s23379_s7 + $0x140] sm:$0xff] }
 0x62c   : > { %9329 = vmatpush.bf16.msrb.mxu0 %v16164_v62  ;;  %9342 = vmatpush.bf16.msrb.mxu1 %v16172_v29  ;;  %v9017_v62 = vperm.slane %v9014_v25, 1 }
 0x62f   : > { %v8249_v61 = vpop.f32.mrf.mxu0  ;;  %v8262_v34 = vpop.f32.mrf.mxu1 }
 0x630   : > { %v8263_v48 = vadd.f32 %v8262_v34, %v8249_v61  ;;  %v16226_v61 = vld [vmem:[%s23379_s7 + $0x1f8] sm:$0xff]  ;;  %9330 = vmatpush.bf16.msrb.mxu0 %v16163_v9  ;;  %9343 = vmatpush.bf16.msrb.mxu1 %v16171_v27  ;;  %v16179_v34 = vld [vmem:[%s23379_s7 + $0x80] sm:$0xff] }
 0x631   : > { %9206 = vmatpush.bf16.msra.mxu2 %v16179_v34 }
 0x634   : > { %9642 = vmatpush.bf16.msra.mxu0 %v16218_v35  ;;  %9655 = vmatpush.bf16.msra.mxu1 %v16226_v61 }
 0x636   : > { %v8288_v2 = vpop.f32.mrf.mxu3 }
 0x637   : > { %v8251_v19 = vpop.f32.mrf.mxu0  ;;  %v8264_v53 = vpop.f32.mrf.mxu1 }
 0x638   : > { %v16210_v19 = vld [vmem:[%s23379_s7 + $0x178] sm:$0xff]  ;;  %v16217_v53 = vld [vmem:[%s23379_s7 + $0x1b0] sm:$0xff] }
 0x639   : > { %9643 = vmatpush.bf16.msra.mxu0 %v16217_v53 }
 0x63e   : > { %v8290_v32 = vpop.f32.mrf.mxu3 }
 0x63f   : > { %v8301_v14 = vpop.f32.mrf.mxu0  ;;  %v16225_v32 = vld [vmem:[%s23379_s7 + $0x1f0] sm:$0xff] }
 0x640   : > { %v8302_v42 = vadd.f32 %v8301_v14, %v8288_v2  ;;  %v8314_v37 = vpop.f32.mrf.mxu1  ;;  %v16202_v2 = vld [vmem:[%s23379_s7 + $0x138] sm:$0xff]  ;;  %9656 = vmatpush.bf16.msra.mxu1 %v16225_v32 }
 0x641   : > { %9482 = vmatpush.bf16.msrb.mxu2 %v16202_v2 }
 0x642   : > { %v23033_v63 = vadd.f32 %v8314_v37, %v8302_v42  ;;  %v16201_v37 = vld [vmem:[%s23379_s7 + $0x130] sm:$0xff] }
 0x644   : > { %v8275_v49 = vpop.f32.mrf.mxu2 }
 0x645   : > { %v8276_v0 = vadd.f32 %v8275_v49, %v8263_v48  ;;  %v16187_v48 = vld [vmem:[%s23379_s7 + $0xc0] sm:$0xff]  ;;  %v16209_v49 = vld [vmem:[%s23379_s7 + $0x170] sm:$0xff]  ;;  %9483 = vmatpush.bf16.msrb.mxu2 %v16201_v37  ;;  %v16242_v37 = vld [vmem:[%s23381_s9 + $0x74] sm:$0xf0] }
 0x646   : > { %v8583_v16 = vpop.f32.mrf.mxu3  ;;  %9219 = vmatpush.bf16.msra.mxu3 %v16187_v48 }
 0x647   : > { %v8303_v54 = vpop.f32.mrf.mxu0 }
 0x648   : > { %v8316_v22 = vpop.f32.mrf.mxu1  ;;  %v16224_v54 = vld [vmem:[%s23379_s7 + $0x1e8] sm:$0xff] }
 0x649   : > { %9657 = vmatpush.bf16.msra.mxu1 %v16224_v54  ;;  %v16200_v22 = vld [vmem:[%s23379_s7 + $0x128] sm:$0xff] }
 0x64a   : > { %9495 = vmatpush.bf16.msrb.mxu3 %v16210_v19  ;;  %9484 = vmatpush.bf16.msrb.mxu2 %v16200_v22  ;;  %v15121_v22 = vld [vmem:[%s23381_s9 + $0x60] sm:$0xf] }
 0x64c   : > { %v8277_v12 = vpop.f32.mrf.mxu2 }
 0x64d   : > { %v16208_v12 = vld [vmem:[%s23379_s7 + $0x168] sm:$0xff]  ;;  %9658 = vmatpush.bf16.msra.mxu1 %v16223_v58 }
 0x64e   : > { %v8585_v41 = vpop.f32.mrf.mxu3  ;;  %9496 = vmatpush.bf16.msrb.mxu3 %v16209_v49  ;;  %9485 = vmatpush.bf16.msrb.mxu2 %v16199_v10  ;;  %v16241_v49 = vld [vmem:[%s23381_s9 + $0x74] sm:$0xf]  ;;  %v15123_v10 = vld [vmem:[%s23381_s9 + $0x68] sm:$0xf0] }
 0x64f   : > { %v16215_v41 = vld [vmem:[%s23379_s7 + $0x1a0] sm:$0xff] }
 0x650   : > { %v23044_v39 = vpop.f32.mrf.mxu0  ;;  %v23049_v51 = vpop.f32.mrf.mxu1 }
 0x651   : > { %9659 = vmatpush.bf16.msra.mxu1 %v16222_v8  ;;  %v8610_v21 = vadd.f32 %v23049_v51, %v23033_v63  ;;  %v16237_v8 = vld [vmem:[%s23381_s9 + $0x54] sm:$0xf] }
 0x652   : > { %9497 = vmatpush.bf16.msrb.mxu3 %v16208_v12  ;;  %v16240_v12 = vld [vmem:[%s23381_s9 + $0x64] sm:$0xf0] }
 0x653   : > { %v15122_v58 = vor.u32 %v16240_v12, %v15121_v22 }
 0x654   : > { %v8570_v28 = vpop.f32.mrf.mxu2 }
 0x655   : > { %v8571_v20 = vadd.f32 %v8570_v28, %v8276_v0  ;;  %v16198_v28 = vld [vmem:[%s23379_s7 + $0x118] sm:$0xff] }
 0x656   : > { %9498 = vmatpush.bf16.msrb.mxu3 %v16207_v5  ;;  %9486 = vmatpush.bf16.msrb.mxu2 %v16198_v28  ;;  %v15113_v5 = vld [vmem:[%s23381_s9 + $0x50] sm:$0xf]  ;;  %v15115_v28 = vld [vmem:[%s23381_s9 + $0x58] sm:$0xf0] }
 0x657   : > { %v23077_v57 = vadd.f32 %v8583_v16, %v8571_v20  ;;  %v16216_v16 = vld [vmem:[%s23379_s7 + $0x1a8] sm:$0xff]  ;;  %v16221_v20 = vld [vmem:[%s23379_s7 + $0x1d0] sm:$0xff] }
 0x658   : > { %v8598_v45 = vpop.f32.mrf.mxu0  ;;  %v8611_v43 = vpop.f32.mrf.mxu1  ;;  %9644 = vmatpush.bf16.msra.mxu0 %v16216_v16  ;;  %9660 = vmatpush.bf16.msra.mxu1 %v16221_v20  ;;  %v15131_v16 = vld [vmem:[%s23381_s9 + $0x78] sm:$0xf0]  ;;  %v15105_v20 = vld [vmem:[%s23381_s9 + $0x40] sm:$0xf] }
 0x659   : > { %v23069_v55 = vpop.f32.mrf.mxu3  ;;  %v16205_v45 = vld [vmem:[%s23379_s7 + $0x150] sm:$0xff]  ;;  %v8597_v63 = vadd.f32 %v23044_v39, %v23077_v57  ;;  %v15134_v54 = vor.u32 %v16241_v49, %v15131_v16 }
 0x65a   : > { %9499 = vmatpush.bf16.msrb.mxu3 %v16206_v47  ;;  %9487 = vmatpush.bf16.msrb.mxu2 %v16197_v15  ;;  %v16235_v15 = vld [vmem:[%s23381_s9 + $0x44] sm:$0xf] }
 0x65c   : > { %v8572_v59 = vpop.f32.mrf.mxu2  ;;  %9645 = vmatpush.bf16.msra.mxu0 %v16215_v41  ;;  %9661 = vmatpush.bf16.msra.mxu1 %v16220_v33  ;;  %v16239_v41 = vld [vmem:[%s23381_s9 + $0x64] sm:$0xf]  ;;  %v15097_v33 = vld [vmem:[%s23381_s9 + $0x30] sm:$0xf] }
 0x65e   : > { %9500 = vmatpush.bf16.msrb.mxu3 %v16205_v45  ;;  %9488 = vmatpush.bf16.msrb.mxu2 %v16196_v18 }
 0x660   : > { %9646 = vmatpush.bf16.msra.mxu0 %v16214_v24  ;;  %9662 = vmatpush.bf16.msra.mxu1 %v16219_v52  ;;  %v15126_v24 = vor.u32 %v16239_v41, %v15123_v10  ;;  %v16232_v52 = vld [vmem:[%s23381_s9 + $0x24] sm:$0xf0] }
 0x661   : > { %v8637_v26 = vpop.f32.mrf.mxu3 }
 0x662   : > { %9501 = vmatpush.bf16.msrb.mxu3 %v16204_v36  ;;  %9489 = vmatpush.bf16.msrb.mxu2 %v16195_v11  ;;  %v16233_v36 = vld [vmem:[%s23381_s9 + $0x34] sm:$0xf]  ;;  %v15081_v11 = vld [vmem:[%s23381_s9 + $0x10] sm:$0xf] }
 0x664   : > { %v23103_v40 = vpop.f32.mrf.mxu2  ;;  %9647 = vmatpush.bf16.msra.mxu0 %v16213_v7  ;;  %v15118_v7 = vor.u32 %v16237_v8, %v15115_v28 }
 0x665   : > { %v8623_v26 = vadd.f32 %v23103_v40, %v8610_v21  ;;  %v15099_v21 = vld [vmem:[%s23381_s9 + $0x38] sm:$0xf0] }
 0x666   : > { %9502 = vmatpush.bf16.msrb.mxu3 %v16203_v3  ;;  %v15102_v25 = vor.u32 %v16233_v36, %v15099_v21  ;;  %v16230_v3 = vld [vmem:[%s23381_s9 + $0x14] sm:$0xf0] }
 0x667   : > { %v8636_v39 = vadd.f32 %v23069_v55, %v8623_v26  ;;  %v16231_v26 = vld [vmem:[%s23381_s9 + $0x24] sm:$0xf] }
 0x668   : > { %9648 = vmatpush.bf16.msra.mxu0 %v16212_v60  ;;  %v15107_v60 = vld [vmem:[%s23381_s9 + $0x48] sm:$0xf0] }
 0x669   : > { %v15110_v18 = vor.u32 %v16235_v15, %v15107_v60 }
 0x66c   : > { %v8624_v38 = vpop.f32.mrf.mxu2  ;;  %9649 = vmatpush.bf16.msra.mxu0 %v16211_v31  ;;  %v15089_v31 = vld [vmem:[%s23381_s9 + $0x20] sm:$0xf] }
 0x670   : > { %v23129_v30 = vpop.f32.mrf.mxu0  ;;  %v23131_v17 = vpop.f32.mrf.mxu1 }
 0x671   : > { %v8957_v43 = vadd.f32 %v23131_v17, %v23129_v30 }
 0x678   : > { %v23163_v14 = vpop.f32.mrf.mxu3  ;;  %v8945_v42 = vpop.f32.mrf.mxu0 }
 0x679   : > { %v8958_v0 = vpop.f32.mrf.mxu1  ;;  %v15129_v42 = vld [vmem:[%s23381_s9 + $0x70] sm:$0xf] }
 0x67a   : > { %v15130_v0 = vor.u32 %v16242_v37, %v15129_v42 }
 0x680   : > { %v8984_v46 = vpop.f32.mrf.mxu3 }
 0x681   : > { %v16238_v46 = vld [vmem:[%s23381_s9 + $0x54] sm:$0xf0] }
 0x682   : > { %v15114_v47 = vor.u32 %v16238_v46, %v15113_v5  ;;  %v9689_v46 = vld [vmem:[%s23382_s10] sm:$0x3] }
 0x683   : > { %v9772_v8 = vperm.slane %v9689_v46, 1  ;;  %v9771_v28 = vperm.slane %v9689_v46, 0 }
 0x684   : > { %v8969_v56 = vpop.f32.mrf.mxu2 }
 0x685   : > { %v8970_v59 = vadd.f32 %v8969_v56, %v8957_v43  ;;  %v16236_v56 = vld [vmem:[%s23381_s9 + $0x44] sm:$0xf0]  ;;  %v16234_v43 = vld [vmem:[%s23381_s9 + $0x34] sm:$0xf0] }
 0x686   : > { %v15106_v45 = vor.u32 %v16236_v56, %v15105_v20 }
 0x687   : > { %v9012_v1 = vadd.f32 %v8970_v59, %v8597_v63  ;;  %v15098_v59 = vor.u32 %v16234_v43, %v15097_v33  ;;  %v15090_v63 = vor.u32 %v16232_v52, %v15089_v31 }
 0x689   : > { %v9020_v29 = vadd.f32 %v9016_v4, %v9012_v1  ;;  %v16229_v1 = vld [vmem:[%s23381_s9 + $0x14] sm:$0xf] }
 0x68b   : > { %v9022_v38 = vmax.f32 %v9020_v29, 0.0  ;;  %v16228_v29 = vld [vmem:[%s23381_s9 + $0x4] sm:$0xf0] }
 0x68c   : > { %v8971_v51 = vpop.f32.mrf.mxu2 }
 0x68d   : > { %v15091_v51 = vld [vmem:[%s23381_s9 + $0x28] sm:$0xf0] }
 0x690   : > { %v8995_v50 = vpop.f32.mrf.mxu0  ;;  %v9008_v40 = vpop.f32.mrf.mxu1 }
 0x691   : > { %v8996_v6 = vadd.f32 %v8995_v50, %v23163_v14  ;;  %v15094_v50 = vor.u32 %v16231_v26, %v15091_v51 }
 0x693   : > { %v9009_v57 = vadd.f32 %v9008_v40, %v8996_v6  ;;  %v15082_v40 = vor.u32 %v16230_v3, %v15081_v11 }
 0x695   : > { %v9013_v23 = vadd.f32 %v9009_v57, %v8636_v39  ;;  %v15083_v39 = vld [vmem:[%s23381_s9 + $0x18] sm:$0xf0] }
 0x696   : > { %v15086_v57 = vor.u32 %v16229_v1, %v15083_v39 }
 0x697   : > { %v9021_v44 = vadd.f32 %v9017_v62, %v9013_v23  ;;  %v15073_v62 = vld [vmem:[%s23381_s9] sm:$0xf]  ;;  %v16227_v23 = vld [vmem:[%s23381_s9 + $0x4] sm:$0xf] }
 0x698   : > { %v8997_v30 = vpop.f32.mrf.mxu0  ;;  %v9010_v9 = vpop.f32.mrf.mxu1 }
 0x699   : > { %v9023_v17 = vmax.f32 %v9021_v44, 0.0  ;;  %v15074_v44 = vor.u32 %v16228_v29, %v15073_v62  ;;  %v15075_v30 = vld [vmem:[%s23381_s9 + $0x8] sm:$0xf0] }
 0x69b   : > { %v9024_v27 = vpack.c.bf16 %v9023_v17, %v9022_v38  ;;  %v15078_v38 = vor.u32 %v16227_v23, %v15075_v30 }
 0x69d   : > { %v9091_v35 = vunpack.c.l.b16 %v9024_v27  ;;  %v9092_v61 = vunpack.c.h.b16 %v9024_v27 }
 0x69f   : > { %v9093_v34 = vpack.c.b16 %v9091_v35, %v9091_v35  ;;  %v9094_v48 = vpack.c.b16 %v9092_v61, %v9092_v61 }
 0x6a1   : > { %9331 = vmatmul.bf16.vlgmr.msrb.gmra.mxu0 %v9093_v34  ;;  %9344 = vmatmul.bf16.vlgmr.msrb.gmra.mxu1 %v9094_v48  ;;  %v9096_v2 = vshrl.u32 %v9093_v34, 16  ;;  %v9099_v55 = vshrl.u32 %v9094_v48, 16  ;;  %v9382_v32 = vrot.slane %v9093_v34, 1  ;;  %v9383_v14 = vrot.slane %v9094_v48, 1 }
 0x6a3   : > { %9207 = vmatmul.bf16.vlgmr.msra.gmra.mxu2 %v9096_v2  ;;  %9220 = vmatmul.bf16.vlgmr.msra.gmra.mxu3 %v9099_v55  ;;  %v9542_v19 = vrot.slane %v9096_v2, 1  ;;  %v9543_v53 = vrot.slane %v9099_v55, 1 }
 0x6a4   : > { %9775 = vmatpush.bf16.msra.mxu2 %v15130_v0  ;;  %9788 = vmatpush.bf16.msra.mxu3 %v15134_v54  ;;  %v9669_v54 = vld [vmem:[%s23380_s8] sm:$0x1] }
 0x6a8   : > { %9776 = vmatpush.bf16.msra.mxu2 %v15122_v58  ;;  %9789 = vmatpush.bf16.msra.mxu3 %v15126_v24  ;;  %v9801_v24 = vld [vmem:[%s420_s25] sm:$0x1] }
 0x6ac   : > { %9777 = vmatpush.bf16.msra.mxu2 %v15114_v47  ;;  %9790 = vmatpush.bf16.msra.mxu3 %v15118_v7  ;;  %v9806_v47 = vmul.f32 -0.5, %v9801_v24 }
 0x6b0   : > { %9778 = vmatpush.bf16.msra.mxu2 %v15106_v45  ;;  %9791 = vmatpush.bf16.msra.mxu3 %v15110_v18  ;;  %v9807_v45 = vmul.f32 %v9806_v47, %v9801_v24 }
 0x6b1   : > { %9650 = vmatmul.bf16.vlgmr.msra.gmra.mxu0 %v9542_v19  ;;  %9663 = vmatmul.bf16.vlgmr.msra.gmra.mxu1 %v9543_v53 }
 0x6b3   : > { %9490 = vmatmul.bf16.vlgmr.msrb.gmra.mxu2 %v9382_v32  ;;  %9503 = vmatmul.bf16.vlgmr.msrb.gmra.mxu3 %v9383_v14 }
 0x6b4   : > { %9779 = vmatpush.bf16.msra.mxu2 %v15098_v59  ;;  %9792 = vmatpush.bf16.msra.mxu3 %v15102_v25 }
 0x6b8   : > { %9780 = vmatpush.bf16.msra.mxu2 %v15090_v63  ;;  %9793 = vmatpush.bf16.msra.mxu3 %v15094_v50 }
 0x6bc   : > { %9781 = vmatpush.bf16.msra.mxu2 %v15082_v40  ;;  %9794 = vmatpush.bf16.msra.mxu3 %v15086_v57 }
 0x6c0   : > { %9782 = vmatpush.bf16.msra.mxu2 %v15074_v44  ;;  %9795 = vmatpush.bf16.msra.mxu3 %v15078_v38 }
 0x71e   : > { %v9332_v4 = vpop.f32.mrf.mxu0  ;;  %v9345_v6 = vpop.f32.mrf.mxu1 }
 0x726   : > { %v9208_v17 = vpop.f32.mrf.mxu2  ;;  %v9221_v9 = vpop.f32.mrf.mxu3 }
 0x727   : > { %v9334_v27 = vpop.f32.mrf.mxu0  ;;  %v9347_v35 = vpop.f32.mrf.mxu1  ;;  %v9222_v48 = vadd.f32 %v9221_v9, %v9208_v17 }
 0x729   : > { %v9333_v19 = vadd.f32 %v9332_v4, %v9222_v48 }
 0x72b   : > { %v9346_v14 = vadd.f32 %v9345_v6, %v9333_v19 }
 0x72e   : > { %v9210_v61 = vpop.f32.mrf.mxu2  ;;  %v9223_v34 = vpop.f32.mrf.mxu3 }
 0x72f   : > { %v9651_v2 = vpop.f32.mrf.mxu0  ;;  %v9664_v55 = vpop.f32.mrf.mxu1 }
 0x730   : > { %v9665_v0 = vadd.f32 %v9664_v55, %v9651_v2 }
 0x736   : > { %v9491_v53 = vpop.f32.mrf.mxu2  ;;  %v9504_v32 = vpop.f32.mrf.mxu3 }
 0x737   : > { %v9505_v42 = vadd.f32 %v9504_v32, %v9491_v53  ;;  %v9653_v37 = vpop.f32.mrf.mxu0  ;;  %v9666_v49 = vpop.f32.mrf.mxu1 }
 0x739   : > { %v9508_v16 = vadd.f32 %v9505_v42, %v9346_v14 }
 0x73b   : > { %v9668_v22 = vadd.f32 %v9665_v0, %v9508_v16 }
 0x73d   : > { %v9670_v12 = vadd.f32 %v9669_v54, %v9668_v22 }
 0x73e   : > { %v9493_v41 = vpop.f32.mrf.mxu2  ;;  %v9506_v58 = vpop.f32.mrf.mxu3 }
 0x73f   : > { %v9671_v10 = vmax.f32 %v9670_v12, 0.0 }
 0x741   : > { %v9672_v5 = vpack.c.bf16 %v9671_v10, %v9671_v10 }
 0x743   : > { %9783 = vmatmul.bf16.vlgmr.msra.gmra.mxu2 %v9672_v5  ;;  %9796 = vmatmul.bf16.vlgmr.msra.gmra.mxu3 %v9672_v5 }
 0x7c6   : > { %v9784_v7 = vpop.f32.mrf.mxu2  ;;  %v9797_v20 = vpop.f32.mrf.mxu3 }
 0x7c7   : > { %v9798_v56 = vadd.f32 %v9797_v20, %v9772_v8  ;;  %v9785_v15 = vadd.f32 %v9784_v7, %v9771_v28 }
 0x7c9   : > { %v9802_v60 = vmul.f32 1.442695, %v9798_v56  ;;  %v9808_v33 = vsub.f32 %v9807_v45, %v9785_v15  ;;  %v9810_v43 = vadd.f32 1.4189385, %v9785_v15  ;;  %v9815_v21 = vsel %vm9814_vm8, %v9785_v15, 0.0 }
 0x7cb   : > { %16253 = vpow2.f32 %v9802_v60  ;;  %v15135_v25 = vadd.f32 -0.9189385, %v9808_v33  ;;  %v9816_v31 = vsel %vm9813_vm9, %v9810_v43, %v9815_v21 }
 0x7cd   : > { %v9817_v63 = vsel %vm9812_vm10, %v15135_v25, %v9816_v31 }
 0x7ce   : > { %v9786_v18 = vpop.f32.mrf.mxu2  ;;  %v9799_v36 = vpop.f32.mrf.mxu3 }
 0x7d1   : > { %v16254_v59 = vpop.eup %16253 }
 0x7d2   : > { %v9804_v52 = vmul.f32 %v16254_v59, %v9801_v24 }
 0x7d4   : > { %v9805_v26 = vadd.f32 %v9804_v52, %v9785_v15 }
 0x7d6   : > { %v9818_v51 = vsel %vm9811_vm11, %v9805_v26, %v9817_v63 }
 0x7d7   : > { %9819 = vst [vmem:[%s423_s30] sm:$0x1] %v9818_v51 }
 0x7d8 PF: > { %s22_s21 = sadd.s32 1, %s16261_s21  }
 0x7d9   : > { %p19_p4 = scmp.ge.s32.totalorder %s22_s21, 4  }
 0x7db   :  { %21 = sbr.rel (!%p19_p4) target bundleno = 1 (0x1), region = 110 }

</bundles_post_ra>
